<compile_context>
chip_gen: v7x
topology: tpu7x:2x2x1
jax: 0.10.0
libtpu: 0.0.40
codegen_flags: <defaults>
</compile_context>

<pallas_src>
import jax
import jax.numpy as jnp
from jax.experimental import pallas as pl
from jax.experimental.pallas import tpu as pltpu

_EPS = 1e-5
_LANE = 128


def _round_up(x, m):
    return (x + m - 1) // m * m


def _pick_tile_rows(nh, target=32):
    """Largest divisor of nh that is <= target while keeping the grid >= 2."""
    best = nh
    for d in range(min(nh, target), 0, -1):
        if nh % d == 0 and nh // d >= 2:
            best = d
            break
    return best


def _compiler_params():
    return pltpu.CompilerParams(
        dimension_semantics=("parallel",),          # shard the row-tile grid across TCs
        vmem_limit_bytes=32 * 1024 * 1024)          # explicit, v7x-safe budget


# ----------------------------- wrapper-side views -----------------------------
def _make_input_views(x_nhwc, tb):
    """Zero-pad spatially, cast bf16, build 3 dy-shifted flattened views + width mask."""
    N, H, W, C = x_nhwc.shape
    nt = (N * H) // tb
    r = tb * (W + 2)
    xp = jnp.pad(x_nhwc.astype(jnp.bfloat16), ((0, 0), (1, 1), (1, 1), (0, 0)))
    views = [xp[:, dy:dy + H, :, :].reshape(nt, r, C) for dy in range(3)]
    wmask = ((jnp.arange(r) % (W + 2)) < W).astype(jnp.float32).reshape(r, 1)
    return views, wmask, nt, r


def _make_act_views(y_stage, N, H, W, cp, tb):
    """dy views of the *raw* (pre-BN) staging output + validity masks.

    The masks mark real (non spatial-padding) positions so the consuming kernel can
    apply relu(x*scale+shift)*mask and recover exact zero padding.
    """
    nt = (N * H) // tb
    r = tb * (W + 2)
    a = y_stage.reshape(N, H, W + 2, cp)[:, :, :W, :]            # drop garbage columns
    ap = jnp.pad(a, ((0, 0), (1, 1), (1, 1), (0, 0)))            # bf16 zero pad
    views = [ap[:, dy:dy + H, :, :].reshape(nt, r, cp) for dy in range(3)]
    ones = jnp.pad(jnp.ones((N, H, W, 1), jnp.float32),
                   ((0, 0), (1, 1), (1, 1), (0, 0)))
    masks = [ones[:, dy:dy + H, :, :].reshape(nt, r, 1) for dy in range(3)]
    return views, masks


def _prep_weight(w_hwio, cin_pad, cout_pad):
    kh, kw, cin, cout = w_hwio.shape
    w = jnp.pad(w_hwio, ((0, 0), (0, 0), (0, cin_pad - cin), (0, cout_pad - cout)))
    return w.reshape(kh * kw, cin_pad, cout_pad).astype(jnp.bfloat16)


def _bn_scale_shift(stats, gamma, beta, count, cp):
    """Combine per-tile partial sums -> per-channel BN scale/shift (f32)."""
    tot = jnp.sum(stats, axis=0)                                  # (2, cp)
    mean = tot[0] / count
    var = jnp.maximum(tot[1] / count - mean * mean, 0.0)
    g = jnp.pad(gamma.astype(jnp.float32), (0, cp - gamma.shape[0]))
    b = jnp.pad(beta.astype(jnp.float32), (0, cp - beta.shape[0]))
    scale = g * jax.lax.rsqrt(var + _EPS)
    shift = b - mean * scale
    return scale.reshape(1, cp), shift.reshape(1, cp)


# ----------------------------- kernels ---------------------------------------
def _accumulate_conv(xs, w_ref, r, cp):
    """3x3 conv as 9 bf16 MXU matmuls: 3 dy views x 3 in-kernel dx shifts."""
    acc = jnp.zeros((r, cp), jnp.float32)
    for dy in range(3):
        x = xs[dy]                                                # (r, Cin) bf16
        for dx in range(3):
            p = jnp.dot(x, w_ref[3 * dy + dx],
                        preferred_element_type=jnp.float32)       # (r, cp) f32
            if dx:
                # out[row] needs in[row + dx]; rows shifted past the end only land
                # in the (discarded) width-padding columns.
                p = jnp.concatenate(
                    [p[dx:, :], jnp.zeros((dx, cp), jnp.float32)], axis=0)
            acc = acc + p
    return acc


def _stats(acc, wmask):
    ym = acc * wmask                                              # exclude garbage cols
    return jnp.concatenate(
        [jnp.sum(ym, axis=0, keepdims=True),                      # sum y
         jnp.sum(ym * acc, axis=0, keepdims=True)],               # sum y^2
        axis=0)


def _bn_relu_inputs(x_refs, m_refs, scale, shift):
    """relu(x*scale+shift)*mask for each dy view, cast to bf16 for the MXU."""
    xs = []
    for x_ref, m_ref in zip(x_refs, m_refs):
        v = x_ref[0].astype(jnp.float32) * scale + shift
        v = jnp.maximum(v, 0.0) * m_ref[0]
        xs.append(v.astype(jnp.bfloat16))
    return xs


def _conv_stats_kernel(x0_ref, x1_ref, x2_ref, w_ref, wm_ref, y_ref, s_ref):
    """Stage 1: conv (bias-free) + per-tile partial BN statistics."""
    r, cp = y_ref.shape[1], y_ref.shape[2]
    acc = _accumulate_conv((x0_ref[0], x1_ref[0], x2_ref[0]), w_ref, r, cp)
    y_ref[0] = acc.astype(y_ref.dtype)                            # bf16 staging
    s_ref[0] = _stats(acc, wm_ref[...])


def _bnrelu_conv_stats_kernel(x0_ref, x1_ref, x2_ref, m0_ref, m1_ref, m2_ref,
                              sc_ref, sh_ref, w_ref, wm_ref, y_ref, s_ref):
    """Stage 2: previous BN+ReLU applied in-kernel, then conv + partial stats."""
    r, cp = y_ref.shape[1], y_ref.shape[2]
    xs = _bn_relu_inputs((x0_ref, x1_ref, x2_ref), (m0_ref, m1_ref, m2_ref),
                         sc_ref[...], sh_ref[...])
    acc = _accumulate_conv(xs, w_ref, r, cp)
    y_ref[0] = acc.astype(y_ref.dtype)
    s_ref[0] = _stats(acc, wm_ref[...])


def _bnrelu_conv_bias_sigmoid_kernel(x0_ref, x1_ref, x2_ref,
                                     m0_ref, m1_ref, m2_ref,
                                     sc_ref, sh_ref, w_ref, b_ref, o_ref):
    """Stage 3: previous BN+ReLU in-kernel, final conv (bias kept) + sigmoid."""
    r, cp = o_ref.shape[1], o_ref.shape[2]
    xs = _bn_relu_inputs((x0_ref, x1_ref, x2_ref), (m0_ref, m1_ref, m2_ref),
                         sc_ref[...], sh_ref[...])
    acc = _accumulate_conv(xs, w_ref, r, cp) + b_ref[...]
    sig = pl.reciprocal(1.0 + jnp.exp(-acc), approx=True)         # EUP exp + rcp
    o_ref[0] = sig.astype(o_ref.dtype)


# --------------------------- pallas_call wrappers ------------------------------
def _run_conv_stats(views, wmask, w9, nt, r, cin, cout_p):
    x_spec = pl.BlockSpec((1, r, cin), lambda i: (i, 0, 0))
    return pl.pallas_call(
        _conv_stats_kernel,
        grid=(nt,),
        in_specs=[x_spec, x_spec, x_spec,
                  pl.BlockSpec((9, cin, cout_p), lambda i: (0, 0, 0)),
                  pl.BlockSpec((r, 1), lambda i: (0, 0))],
        out_specs=[pl.BlockSpec((1, r, cout_p), lambda i: (i, 0, 0)),
                   pl.BlockSpec((1, 2, cout_p), lambda i: (i, 0, 0))],
        out_shape=[jax.ShapeDtypeStruct((nt, r, cout_p), jnp.bfloat16),
                   jax.ShapeDtypeStruct((nt, 2, cout_p), jnp.float32)],
        compiler_params=_compiler_params(),
    )(views[0], views[1], views[2], w9, wmask)


def _run_bnrelu_conv_stats(views, masks, scale, shift, w9, wmask, nt, r, cin, cout_p):
    x_spec = pl.BlockSpec((1, r, cin), lambda i: (i, 0, 0))
    m_spec = pl.BlockSpec((1, r, 1), lambda i: (i, 0, 0))
    v_spec = pl.BlockSpec((1, cin), lambda i: (0, 0))
    return pl.pallas_call(
        _bnrelu_conv_stats_kernel,
        grid=(nt,),
        in_specs=[x_spec, x_spec, x_spec, m_spec, m_spec, m_spec,
                  v_spec, v_spec,
                  pl.BlockSpec((9, cin, cout_p), lambda i: (0, 0, 0)),
                  pl.BlockSpec((r, 1), lambda i: (0, 0))],
        out_specs=[pl.BlockSpec((1, r, cout_p), lambda i: (i, 0, 0)),
                   pl.BlockSpec((1, 2, cout_p), lambda i: (i, 0, 0))],
        out_shape=[jax.ShapeDtypeStruct((nt, r, cout_p), jnp.bfloat16),
                   jax.ShapeDtypeStruct((nt, 2, cout_p), jnp.float32)],
        compiler_params=_compiler_params(),
    )(views[0], views[1], views[2], masks[0], masks[1], masks[2],
      scale, shift, w9, wmask)


def _run_bnrelu_conv_sigmoid(views, masks, scale, shift, w9, bias, nt, r, cin, cout_p):
    x_spec = pl.BlockSpec((1, r, cin), lambda i: (i, 0, 0))
    m_spec = pl.BlockSpec((1, r, 1), lambda i: (i, 0, 0))
    v_spec = pl.BlockSpec((1, cin), lambda i: (0, 0))
    return pl.pallas_call(
        _bnrelu_conv_bias_sigmoid_kernel,
        grid=(nt,),
        in_specs=[x_spec, x_spec, x_spec, m_spec, m_spec, m_spec,
                  v_spec, v_spec,
                  pl.BlockSpec((9, cin, cout_p), lambda i: (0, 0, 0)),
                  pl.BlockSpec((1, cout_p), lambda i: (0, 0))],
        out_specs=pl.BlockSpec((1, r, cout_p), lambda i: (i, 0, 0)),
        out_shape=jax.ShapeDtypeStruct((nt, r, cout_p), jnp.float32),
        compiler_params=_compiler_params(),
    )(views[0], views[1], views[2], masks[0], masks[1], masks[2],
      scale, shift, w9, bias)


# ------------------------------- forward --------------------------------------
def cnn_part_forward(x_nchw, params):
    """cnn_part.forward: conv_block(in,32,mid=64) -> Conv2d(32,out) -> Sigmoid.

    Conv biases b1/b2 are accepted but unused: a bias feeding a train-mode
    BatchNorm is exactly cancelled by the mean subtraction.
    """
    # TODO(synk): BatchNorm2d running_mean/running_var buffer updates (a training-time
    # side effect) are not modeled; only the forward output is produced.
    x = jnp.transpose(x_nchw, (0, 2, 3, 1)).astype(jnp.float32)    # NCHW -> NHWC
    N, H, W, Cin = x.shape
    c1 = params["w1"].shape[-1]
    c2 = params["w2"].shape[-1]
    c3 = params["w3"].shape[-1]
    cp1, cp2, cp3 = (_round_up(c, _LANE) for c in (c1, c2, c3))    # lane-dense outputs
    count = float(N * H * W)

    tb = _pick_tile_rows(N * H)

    # Stage 1: conv1 (bias dropped) + partial BN stats.
    views1, wmask, nt, r = _make_input_views(x, tb)
    w1 = _prep_weight(params["w1"], Cin, cp1)
    y1, st1 = _run_conv_stats(views1, wmask, w1, nt, r, Cin, cp1)
    scale1, shift1 = _bn_scale_shift(st1, params["g1"], params["be1"], count, cp1)

    # Stage 2: bn1+relu fused in-kernel, conv2 + partial BN stats.
    views2, masks2 = _make_act_views(y1, N, H, W, cp1, tb)
    w2 = _prep_weight(params["w2"], cp1, cp2)
    y2, st2 = _run_bnrelu_conv_stats(views2, masks2, scale1, shift1, w2, wmask,
                                     nt, r, cp1, cp2)
    scale2, shift2 = _bn_scale_shift(st2, params["g2"], params["be2"], count, cp2)

    # Stage 3: bn2+relu fused in-kernel, final conv (bias kept) + sigmoid.
    views3, masks3 = _make_act_views(y2, N, H, W, cp2, tb)
    w3 = _prep_weight(params["w3"], cp2, cp3)
    b3 = jnp.pad(params["b3"].astype(jnp.float32), (0, cp3 - c3)).reshape(1, cp3)
    out = _run_bnrelu_conv_sigmoid(views3, masks3, scale2, shift2, w3, b3,
                                   nt, r, cp2, cp3)

    y = out.reshape(N, H, W + 2, cp3)[:, :, :W, :c3]
    return jnp.transpose(y, (0, 3, 1, 2))                          # NHWC -> NCHW


# --------------------- pure-JAX reference (correctness) -----------------------
def _ref_conv(x_nhwc, w_hwio):
    # bf16 operands (matching the MXU path), f32 accumulation.
    return jax.lax.conv_general_dilated(
        x_nhwc.astype(jnp.bfloat16), w_hwio.astype(jnp.bfloat16),
        (1, 1), "SAME", dimension_numbers=("NHWC", "HWIO", "NHWC"),
        preferred_element_type=jnp.float32)


def _ref_bn_relu(y, gamma, beta):
    mean = jnp.mean(y, axis=(0, 1, 2), keepdims=True)
    var = jnp.mean((y - mean) ** 2, axis=(0, 1, 2), keepdims=True)
    y = (y - mean) * jax.lax.rsqrt(var + _EPS)
    y = y * gamma.reshape(1, 1, 1, -1) + beta.reshape(1, 1, 1, -1)
    return jnp.maximum(y, 0.0)


def cnn_part_reference(x_nchw, params):
    x = jnp.transpose(x_nchw, (0, 2, 3, 1)).astype(jnp.float32)
    y = _ref_bn_relu(_ref_conv(x, params["w1"]) + params["b1"].reshape(1, 1, 1, -1),
                     params["g1"], params["be1"])
    y = _ref_bn_relu(_ref_conv(y, params["w2"]) + params["b2"].reshape(1, 1, 1, -1),
                     params["g2"], params["be2"])
    y = jax.nn.sigmoid(_ref_conv(y, params["w3"]) + params["b3"].reshape(1, 1, 1, -1))
    return jnp.transpose(y, (0, 3, 1, 2))


if __name__ == "__main__":
    # cnn_part(in_ch=3, out_ch=1): conv_block(3, 32, mid=64) -> Conv2d(32, 1) -> sigmoid
    N, H, W = 2, 16, 16
    in_ch, out_ch = 3, 1
    mid1, mid2 = 64, 32

    key = jax.random.PRNGKey(0)
    ks = jax.random.split(key, 11)

    x = jax.random.normal(ks[0], (N, in_ch, H, W), jnp.float32)
    params = {
        "w1": 0.1 * jax.random.normal(ks[1], (3, 3, in_ch, mid1), jnp.float32),
        "b1": 0.05 * jax.random.normal(ks[2], (mid1,), jnp.float32),
        "g1": 1.0 + 0.1 * jax.random.normal(ks[3], (mid1,), jnp.float32),
        "be1": 0.1 * jax.random.normal(ks[4], (mid1,), jnp.float32),
        "w2": 0.1 * jax.random.normal(ks[5], (3, 3, mid1, mid2), jnp.float32),
        "b2": 0.05 * jax.random.normal(ks[6], (mid2,), jnp.float32),
        "g2": 1.0 + 0.1 * jax.random.normal(ks[7], (mid2,), jnp.float32),
        "be2": 0.1 * jax.random.normal(ks[8], (mid2,), jnp.float32),
        "w3": 0.1 * jax.random.normal(ks[9], (3, 3, mid2, out_ch), jnp.float32),
        "b3": 0.05 * jax.random.normal(ks[10], (out_ch,), jnp.float32),
    }

    out = jax.block_until_ready(jax.jit(cnn_part_forward)(x, params))
    ref = jax.block_until_ready(cnn_part_reference(x, params))

    assert out.shape == (N, out_ch, H, W), out.shape
    assert bool(jnp.all(jnp.isfinite(out)))
    # Tolerance accounts for bf16 MXU operands + bf16 inter-stage staging activations
    # (the reference keeps f32 intermediates); post-sigmoid error is a few 1e-3.
    err = float(jnp.max(jnp.abs(out - ref)))
    assert err < 3e-2, err

    print("KERNEL_OK")
</pallas_src>

<mosaic_0001>
module attributes {stable_mosaic.version = 11 : i64} {
  func.func @_conv_stats_kernel(%arg0: i32, %arg1: memref<1x288x3xbf16, #tpu.memory_space<vmem>>, %arg2: memref<1x288x3xbf16, #tpu.memory_space<vmem>>, %arg3: memref<1x288x3xbf16, #tpu.memory_space<vmem>>, %arg4: memref<9x3x128xbf16, #tpu.memory_space<vmem>>, %arg5: memref<288x1xf32, #tpu.memory_space<vmem>>, %arg6: memref<1x288x128xbf16, #tpu.memory_space<vmem>>, %arg7: memref<1x2x128xf32, #tpu.memory_space<vmem>>) attributes {dimension_semantics = [#tpu.dimension_semantics<parallel>], iteration_bounds = array<i64: 2>, scalar_prefetch = 0 : i64, scratch_operands = 0 : i64, tpu.core_type = #tpu.core_type<tc>, window_params = [{transform_indices = @transform_0, window_bounds = array<i64: 1, 288, 3>}, {transform_indices = @transform_1, window_bounds = array<i64: 1, 288, 3>}, {transform_indices = @transform_2, window_bounds = array<i64: 1, 288, 3>}, {pipeline_mode = #tpu.pipeline_mode<synchronous>, transform_indices = @transform_3, window_bounds = array<i64: 9, 3, 128>}, {pipeline_mode = #tpu.pipeline_mode<synchronous>, transform_indices = @transform_4, window_bounds = array<i64: 288, 1>}, {transform_indices = @transform_5, window_bounds = array<i64: 1, 288, 128>}, {transform_indices = @transform_6, window_bounds = array<i64: 1, 2, 128>}]} {
    %c0 = arith.constant 0 : index
    %c0_0 = arith.constant 0 : index
    %c0_1 = arith.constant 0 : index
    %0 = vector.load %arg1[%c0, %c0_0, %c0_1] : memref<1x288x3xbf16, #tpu.memory_space<vmem>>, vector<1x288x3xbf16>
    %1 = vector.shape_cast %0 : vector<1x288x3xbf16> to vector<288x3xbf16>
    %c0_2 = arith.constant 0 : index
    %c0_3 = arith.constant 0 : index
    %c0_4 = arith.constant 0 : index
    %2 = vector.load %arg2[%c0_2, %c0_3, %c0_4] : memref<1x288x3xbf16, #tpu.memory_space<vmem>>, vector<1x288x3xbf16>
    %3 = vector.shape_cast %2 : vector<1x288x3xbf16> to vector<288x3xbf16>
    %c0_5 = arith.constant 0 : index
    %c0_6 = arith.constant 0 : index
    %c0_7 = arith.constant 0 : index
    %4 = vector.load %arg3[%c0_5, %c0_6, %c0_7] : memref<1x288x3xbf16, #tpu.memory_space<vmem>>, vector<1x288x3xbf16>
    %5 = vector.shape_cast %4 : vector<1x288x3xbf16> to vector<288x3xbf16>
    %cst = arith.constant 0.000000e+00 : f32
    %6 = vector.broadcast %cst : f32 to vector<288x128xf32>
    %c0_8 = arith.constant 0 : index
    %c0_9 = arith.constant 0 : index
    %c0_10 = arith.constant 0 : index
    %7 = vector.load %arg4[%c0_8, %c0_9, %c0_10] : memref<9x3x128xbf16, #tpu.memory_space<vmem>>, vector<1x3x128xbf16>
    %8 = vector.shape_cast %7 : vector<1x3x128xbf16> to vector<3x128xbf16>
    %cst_11 = arith.constant dense<0.000000e+00> : vector<288x128xf32>
    %9 = tpu.matmul %1, %8, %cst_11 {dimension_numbers = #tpu.dot_dimension_numbers<[1], [0], [0], [1], [0, 0, 1, 1], [], []>} : vector<288x3xbf16>, vector<3x128xbf16>, vector<288x128xf32> -> vector<288x128xf32>
    %10 = arith.addf %6, %9 : vector<288x128xf32>
    %c1 = arith.constant 1 : index
    %c0_12 = arith.constant 0 : index
    %c0_13 = arith.constant 0 : index
    %11 = vector.load %arg4[%c1, %c0_12, %c0_13] : memref<9x3x128xbf16, #tpu.memory_space<vmem>>, vector<1x3x128xbf16>
    %12 = vector.shape_cast %11 : vector<1x3x128xbf16> to vector<3x128xbf16>
    %cst_14 = arith.constant dense<0.000000e+00> : vector<288x128xf32>
    %13 = tpu.matmul %1, %12, %cst_14 {dimension_numbers = #tpu.dot_dimension_numbers<[1], [0], [0], [1], [0, 0, 1, 1], [], []>} : vector<288x3xbf16>, vector<3x128xbf16>, vector<288x128xf32> -> vector<288x128xf32>
    %14 = vector.extract_strided_slice %13 {offsets = [1, 0], sizes = [287, 128], strides = [1, 1]} : vector<288x128xf32> to vector<287x128xf32>
    %cst_15 = arith.constant 0.000000e+00 : f32
    %15 = vector.broadcast %cst_15 : f32 to vector<1x128xf32>
    %16 = tpu.concatenate %14, %15 in 0 : vector<287x128xf32>, vector<1x128xf32> -> vector<288x128xf32>
    %17 = arith.addf %10, %16 : vector<288x128xf32>
    %c2 = arith.constant 2 : index
    %c0_16 = arith.constant 0 : index
    %c0_17 = arith.constant 0 : index
    %18 = vector.load %arg4[%c2, %c0_16, %c0_17] : memref<9x3x128xbf16, #tpu.memory_space<vmem>>, vector<1x3x128xbf16>
    %19 = vector.shape_cast %18 : vector<1x3x128xbf16> to vector<3x128xbf16>
    %cst_18 = arith.constant dense<0.000000e+00> : vector<288x128xf32>
    %20 = tpu.matmul %1, %19, %cst_18 {dimension_numbers = #tpu.dot_dimension_numbers<[1], [0], [0], [1], [0, 0, 1, 1], [], []>} : vector<288x3xbf16>, vector<3x128xbf16>, vector<288x128xf32> -> vector<288x128xf32>
    %21 = vector.extract_strided_slice %20 {offsets = [2, 0], sizes = [286, 128], strides = [1, 1]} : vector<288x128xf32> to vector<286x128xf32>
    %cst_19 = arith.constant 0.000000e+00 : f32
    %22 = vector.broadcast %cst_19 : f32 to vector<2x128xf32>
    %23 = tpu.concatenate %21, %22 in 0 : vector<286x128xf32>, vector<2x128xf32> -> vector<288x128xf32>
    %24 = arith.addf %17, %23 : vector<288x128xf32>
    %c3 = arith.constant 3 : index
    %c0_20 = arith.constant 0 : index
    %c0_21 = arith.constant 0 : index
    %25 = vector.load %arg4[%c3, %c0_20, %c0_21] : memref<9x3x128xbf16, #tpu.memory_space<vmem>>, vector<1x3x128xbf16>
    %26 = vector.shape_cast %25 : vector<1x3x128xbf16> to vector<3x128xbf16>
    %cst_22 = arith.constant dense<0.000000e+00> : vector<288x128xf32>
    %27 = tpu.matmul %3, %26, %cst_22 {dimension_numbers = #tpu.dot_dimension_numbers<[1], [0], [0], [1], [0, 0, 1, 1], [], []>} : vector<288x3xbf16>, vector<3x128xbf16>, vector<288x128xf32> -> vector<288x128xf32>
    %28 = arith.addf %24, %27 : vector<288x128xf32>
    %c4 = arith.constant 4 : index
    %c0_23 = arith.constant 0 : index
    %c0_24 = arith.constant 0 : index
    %29 = vector.load %arg4[%c4, %c0_23, %c0_24] : memref<9x3x128xbf16, #tpu.memory_space<vmem>>, vector<1x3x128xbf16>
    %30 = vector.shape_cast %29 : vector<1x3x128xbf16> to vector<3x128xbf16>
    %cst_25 = arith.constant dense<0.000000e+00> : vector<288x128xf32>
    %31 = tpu.matmul %3, %30, %cst_25 {dimension_numbers = #tpu.dot_dimension_numbers<[1], [0], [0], [1], [0, 0, 1, 1], [], []>} : vector<288x3xbf16>, vector<3x128xbf16>, vector<288x128xf32> -> vector<288x128xf32>
    %32 = vector.extract_strided_slice %31 {offsets = [1, 0], sizes = [287, 128], strides = [1, 1]} : vector<288x128xf32> to vector<287x128xf32>
    %cst_26 = arith.constant 0.000000e+00 : f32
    %33 = vector.broadcast %cst_26 : f32 to vector<1x128xf32>
    %34 = tpu.concatenate %32, %33 in 0 : vector<287x128xf32>, vector<1x128xf32> -> vector<288x128xf32>
    %35 = arith.addf %28, %34 : vector<288x128xf32>
    %c5 = arith.constant 5 : index
    %c0_27 = arith.constant 0 : index
    %c0_28 = arith.constant 0 : index
    %36 = vector.load %arg4[%c5, %c0_27, %c0_28] : memref<9x3x128xbf16, #tpu.memory_space<vmem>>, vector<1x3x128xbf16>
    %37 = vector.shape_cast %36 : vector<1x3x128xbf16> to vector<3x128xbf16>
    %cst_29 = arith.constant dense<0.000000e+00> : vector<288x128xf32>
    %38 = tpu.matmul %3, %37, %cst_29 {dimension_numbers = #tpu.dot_dimension_numbers<[1], [0], [0], [1], [0, 0, 1, 1], [], []>} : vector<288x3xbf16>, vector<3x128xbf16>, vector<288x128xf32> -> vector<288x128xf32>
    %39 = vector.extract_strided_slice %38 {offsets = [2, 0], sizes = [286, 128], strides = [1, 1]} : vector<288x128xf32> to vector<286x128xf32>
    %cst_30 = arith.constant 0.000000e+00 : f32
    %40 = vector.broadcast %cst_30 : f32 to vector<2x128xf32>
    %41 = tpu.concatenate %39, %40 in 0 : vector<286x128xf32>, vector<2x128xf32> -> vector<288x128xf32>
    %42 = arith.addf %35, %41 : vector<288x128xf32>
    %c6 = arith.constant 6 : index
    %c0_31 = arith.constant 0 : index
    %c0_32 = arith.constant 0 : index
    %43 = vector.load %arg4[%c6, %c0_31, %c0_32] : memref<9x3x128xbf16, #tpu.memory_space<vmem>>, vector<1x3x128xbf16>
    %44 = vector.shape_cast %43 : vector<1x3x128xbf16> to vector<3x128xbf16>
    %cst_33 = arith.constant dense<0.000000e+00> : vector<288x128xf32>
    %45 = tpu.matmul %5, %44, %cst_33 {dimension_numbers = #tpu.dot_dimension_numbers<[1], [0], [0], [1], [0, 0, 1, 1], [], []>} : vector<288x3xbf16>, vector<3x128xbf16>, vector<288x128xf32> -> vector<288x128xf32>
    %46 = arith.addf %42, %45 : vector<288x128xf32>
    %c7 = arith.constant 7 : index
    %c0_34 = arith.constant 0 : index
    %c0_35 = arith.constant 0 : index
    %47 = vector.load %arg4[%c7, %c0_34, %c0_35] : memref<9x3x128xbf16, #tpu.memory_space<vmem>>, vector<1x3x128xbf16>
    %48 = vector.shape_cast %47 : vector<1x3x128xbf16> to vector<3x128xbf16>
    %cst_36 = arith.constant dense<0.000000e+00> : vector<288x128xf32>
    %49 = tpu.matmul %5, %48, %cst_36 {dimension_numbers = #tpu.dot_dimension_numbers<[1], [0], [0], [1], [0, 0, 1, 1], [], []>} : vector<288x3xbf16>, vector<3x128xbf16>, vector<288x128xf32> -> vector<288x128xf32>
    %50 = vector.extract_strided_slice %49 {offsets = [1, 0], sizes = [287, 128], strides = [1, 1]} : vector<288x128xf32> to vector<287x128xf32>
    %cst_37 = arith.constant 0.000000e+00 : f32
    %51 = vector.broadcast %cst_37 : f32 to vector<1x128xf32>
    %52 = tpu.concatenate %50, %51 in 0 : vector<287x128xf32>, vector<1x128xf32> -> vector<288x128xf32>
    %53 = arith.addf %46, %52 : vector<288x128xf32>
    %c8 = arith.constant 8 : index
    %c0_38 = arith.constant 0 : index
    %c0_39 = arith.constant 0 : index
    %54 = vector.load %arg4[%c8, %c0_38, %c0_39] : memref<9x3x128xbf16, #tpu.memory_space<vmem>>, vector<1x3x128xbf16>
    %55 = vector.shape_cast %54 : vector<1x3x128xbf16> to vector<3x128xbf16>
    %cst_40 = arith.constant dense<0.000000e+00> : vector<288x128xf32>
    %56 = tpu.matmul %5, %55, %cst_40 {dimension_numbers = #tpu.dot_dimension_numbers<[1], [0], [0], [1], [0, 0, 1, 1], [], []>} : vector<288x3xbf16>, vector<3x128xbf16>, vector<288x128xf32> -> vector<288x128xf32>
    %57 = vector.extract_strided_slice %56 {offsets = [2, 0], sizes = [286, 128], strides = [1, 1]} : vector<288x128xf32> to vector<286x128xf32>
    %cst_41 = arith.constant 0.000000e+00 : f32
    %58 = vector.broadcast %cst_41 : f32 to vector<2x128xf32>
    %59 = tpu.concatenate %57, %58 in 0 : vector<286x128xf32>, vector<2x128xf32> -> vector<288x128xf32>
    %60 = arith.addf %53, %59 : vector<288x128xf32>
    %61 = arith.truncf %60 : vector<288x128xf32> to vector<288x128xbf16>
    %c0_42 = arith.constant 0 : index
    %c0_43 = arith.constant 0 : index
    %c0_44 = arith.constant 0 : index
    %62 = vector.load %arg6[%c0_42, %c0_43, %c0_44] : memref<1x288x128xbf16, #tpu.memory_space<vmem>>, vector<1x288x128xbf16>
    %63 = vector.shape_cast %62 : vector<1x288x128xbf16> to vector<288x128xbf16>
    %64 = vector.shape_cast %61 : vector<288x128xbf16> to vector<1x288x128xbf16>
    tpu.vector_store %arg6[%c0_42, %c0_43, %c0_44], %64 {strides = array<i32>} : memref<1x288x128xbf16, #tpu.memory_space<vmem>>, vector<1x288x128xbf16>,
    %c0_45 = arith.constant 0 : index
    %c0_46 = arith.constant 0 : index
    %65 = vector.load %arg5[%c0_45, %c0_46] : memref<288x1xf32, #tpu.memory_space<vmem>>, vector<288x1xf32>
    %66 = vector.broadcast %65 : vector<288x1xf32> to vector<288x128xf32>
    %67 = arith.mulf %60, %66 : vector<288x128xf32>
    %cst_47 = arith.constant dense<0.000000e+00> : vector<128xf32>
    %68 = vector.multi_reduction <add>, %67, %cst_47 [0] : vector<288x128xf32> to vector<128xf32>
    %69 = vector.shape_cast %68 : vector<128xf32> to vector<1x128xf32>
    %70 = arith.mulf %67, %60 : vector<288x128xf32>
    %cst_48 = arith.constant dense<0.000000e+00> : vector<128xf32>
    %71 = vector.multi_reduction <add>, %70, %cst_48 [0] : vector<288x128xf32> to vector<128xf32>
    %72 = vector.shape_cast %71 : vector<128xf32> to vector<1x128xf32>
    %73 = tpu.concatenate %69, %72 in 0 : vector<1x128xf32>, vector<1x128xf32> -> vector<2x128xf32>
    %c0_49 = arith.constant 0 : index
    %c0_50 = arith.constant 0 : index
    %c0_51 = arith.constant 0 : index
    %74 = vector.load %arg7[%c0_49, %c0_50, %c0_51] : memref<1x2x128xf32, #tpu.memory_space<vmem>>, vector<1x2x128xf32>
    %75 = vector.shape_cast %74 : vector<1x2x128xf32> to vector<2x128xf32>
    %76 = vector.shape_cast %73 : vector<2x128xf32> to vector<1x2x128xf32>
    tpu.vector_store %arg7[%c0_49, %c0_50, %c0_51], %76 {strides = array<i32>} : memref<1x2x128xf32, #tpu.memory_space<vmem>>, vector<1x2x128xf32>,
    return
  }
  func.func @transform_0(%arg0: i32) -> (i32, i32, i32) {
    %c0_i32 = arith.constant 0 : i32
    %c0_i32_0 = arith.constant 0 : i32
    %c0_i32_1 = arith.constant 0 : i32
    return %arg0, %c0_i32, %c0_i32_0 : i32, i32, i32
  }
  func.func @transform_1(%arg0: i32) -> (i32, i32, i32) {
    %c0_i32 = arith.constant 0 : i32
    %c0_i32_0 = arith.constant 0 : i32
    %c0_i32_1 = arith.constant 0 : i32
    return %arg0, %c0_i32, %c0_i32_0 : i32, i32, i32
  }
  func.func @transform_2(%arg0: i32) -> (i32, i32, i32) {
    %c0_i32 = arith.constant 0 : i32
    %c0_i32_0 = arith.constant 0 : i32
    %c0_i32_1 = arith.constant 0 : i32
    return %arg0, %c0_i32, %c0_i32_0 : i32, i32, i32
  }
  func.func @transform_3(%arg0: i32) -> (i32, i32, i32) {
    %c0_i32 = arith.constant 0 : i32
    %c0_i32_0 = arith.constant 0 : i32
    %c0_i32_1 = arith.constant 0 : i32
    %c0_i32_2 = arith.constant 0 : i32
    return %c0_i32, %c0_i32_0, %c0_i32_1 : i32, i32, i32
  }
  func.func @transform_4(%arg0: i32) -> (i32, i32) {
    %c0_i32 = arith.constant 0 : i32
    %c0_i32_0 = arith.constant 0 : i32
    %c0_i32_1 = arith.constant 0 : i32
    return %c0_i32, %c0_i32_0 : i32, i32
  }
  func.func @transform_5(%arg0: i32) -> (i32, i32, i32) {
    %c0_i32 = arith.constant 0 : i32
    %c0_i32_0 = arith.constant 0 : i32
    %c0_i32_1 = arith.constant 0 : i32
    return %arg0, %c0_i32, %c0_i32_0 : i32, i32, i32
  }
  func.func @transform_6(%arg0: i32) -> (i32, i32, i32) {
    %c0_i32 = arith.constant 0 : i32
    %c0_i32_0 = arith.constant 0 : i32
    %c0_i32_1 = arith.constant 0 : i32
    return %arg0, %c0_i32, %c0_i32_0 : i32, i32, i32
  }
}

module attributes {stable_mosaic.version = 11 : i64} {
  func.func @_bnrelu_conv_stats_kernel(%arg0: i32, %arg1: memref<1x288x128xbf16, #tpu.memory_space<vmem>>, %arg2: memref<1x288x128xbf16, #tpu.memory_space<vmem>>, %arg3: memref<1x288x128xbf16, #tpu.memory_space<vmem>>, %arg4: memref<1x288x1xf32, #tpu.memory_space<vmem>>, %arg5: memref<1x288x1xf32, #tpu.memory_space<vmem>>, %arg6: memref<1x288x1xf32, #tpu.memory_space<vmem>>, %arg7: memref<1x128xf32, #tpu.memory_space<vmem>>, %arg8: memref<1x128xf32, #tpu.memory_space<vmem>>, %arg9: memref<9x128x128xbf16, #tpu.memory_space<vmem>>, %arg10: memref<288x1xf32, #tpu.memory_space<vmem>>, %arg11: memref<1x288x128xbf16, #tpu.memory_space<vmem>>, %arg12: memref<1x2x128xf32, #tpu.memory_space<vmem>>) attributes {dimension_semantics = [#tpu.dimension_semantics<parallel>], iteration_bounds = array<i64: 2>, scalar_prefetch = 0 : i64, scratch_operands = 0 : i64, tpu.core_type = #tpu.core_type<tc>, window_params = [{transform_indices = @transform_0, window_bounds = array<i64: 1, 288, 128>}, {transform_indices = @transform_1, window_bounds = array<i64: 1, 288, 128>}, {transform_indices = @transform_2, window_bounds = array<i64: 1, 288, 128>}, {transform_indices = @transform_3, window_bounds = array<i64: 1, 288, 1>}, {transform_indices = @transform_4, window_bounds = array<i64: 1, 288, 1>}, {transform_indices = @transform_5, window_bounds = array<i64: 1, 288, 1>}, {pipeline_mode = #tpu.pipeline_mode<synchronous>, transform_indices = @transform_6, window_bounds = array<i64: 1, 128>}, {pipeline_mode = #tpu.pipeline_mode<synchronous>, transform_indices = @transform_7, window_bounds = array<i64: 1, 128>}, {pipeline_mode = #tpu.pipeline_mode<synchronous>, transform_indices = @transform_8, window_bounds = array<i64: 9, 128, 128>}, {pipeline_mode = #tpu.pipeline_mode<synchronous>, transform_indices = @transform_9, window_bounds = array<i64: 288, 1>}, {transform_indices = @transform_10, window_bounds = array<i64: 1, 288, 128>}, {transform_indices = @transform_11, window_bounds = array<i64: 1, 2, 128>}]} {
    %c0 = arith.constant 0 : index
    %c0_0 = arith.constant 0 : index
    %0 = vector.load %arg7[%c0, %c0_0] : memref<1x128xf32, #tpu.memory_space<vmem>>, vector<1x128xf32>
    %c0_1 = arith.constant 0 : index
    %c0_2 = arith.constant 0 : index
    %1 = vector.load %arg8[%c0_1, %c0_2] : memref<1x128xf32, #tpu.memory_space<vmem>>, vector<1x128xf32>
    %c0_3 = arith.constant 0 : index
    %c0_4 = arith.constant 0 : index
    %c0_5 = arith.constant 0 : index
    %2 = vector.load %arg1[%c0_3, %c0_4, %c0_5] : memref<1x288x128xbf16, #tpu.memory_space<vmem>>, vector<1x288x128xbf16>
    %3 = vector.shape_cast %2 : vector<1x288x128xbf16> to vector<288x128xbf16>
    %4 = arith.extf %3 : vector<288x128xbf16> to vector<288x128xf32>
    %5 = vector.broadcast %0 : vector<1x128xf32> to vector<288x128xf32>
    %6 = arith.mulf %4, %5 : vector<288x128xf32>
    %7 = vector.broadcast %1 : vector<1x128xf32> to vector<288x128xf32>
    %8 = arith.addf %6, %7 : vector<288x128xf32>
    %cst = arith.constant 0.000000e+00 : f32
    %9 = vector.broadcast %cst : f32 to vector<288x128xf32>
    %10 = arith.maximumf %8, %9 : vector<288x128xf32>
    %c0_6 = arith.constant 0 : index
    %c0_7 = arith.constant 0 : index
    %c0_8 = arith.constant 0 : index
    %11 = vector.load %arg4[%c0_6, %c0_7, %c0_8] : memref<1x288x1xf32, #tpu.memory_space<vmem>>, vector<1x288x1xf32>
    %12 = vector.shape_cast %11 : vector<1x288x1xf32> to vector<288x1xf32>
    %13 = vector.broadcast %12 : vector<288x1xf32> to vector<288x128xf32>
    %14 = arith.mulf %10, %13 : vector<288x128xf32>
    %15 = arith.truncf %14 : vector<288x128xf32> to vector<288x128xbf16>
    %c0_9 = arith.constant 0 : index
    %c0_10 = arith.constant 0 : index
    %c0_11 = arith.constant 0 : index
    %16 = vector.load %arg2[%c0_9, %c0_10, %c0_11] : memref<1x288x128xbf16, #tpu.memory_space<vmem>>, vector<1x288x128xbf16>
    %17 = vector.shape_cast %16 : vector<1x288x128xbf16> to vector<288x128xbf16>
    %18 = arith.extf %17 : vector<288x128xbf16> to vector<288x128xf32>
    %19 = vector.broadcast %0 : vector<1x128xf32> to vector<288x128xf32>
    %20 = arith.mulf %18, %19 : vector<288x128xf32>
    %21 = vector.broadcast %1 : vector<1x128xf32> to vector<288x128xf32>
    %22 = arith.addf %20, %21 : vector<288x128xf32>
    %cst_12 = arith.constant 0.000000e+00 : f32
    %23 = vector.broadcast %cst_12 : f32 to vector<288x128xf32>
    %24 = arith.maximumf %22, %23 : vector<288x128xf32>
    %c0_13 = arith.constant 0 : index
    %c0_14 = arith.constant 0 : index
    %c0_15 = arith.constant 0 : index
    %25 = vector.load %arg5[%c0_13, %c0_14, %c0_15] : memref<1x288x1xf32, #tpu.memory_space<vmem>>, vector<1x288x1xf32>
    %26 = vector.shape_cast %25 : vector<1x288x1xf32> to vector<288x1xf32>
    %27 = vector.broadcast %26 : vector<288x1xf32> to vector<288x128xf32>
    %28 = arith.mulf %24, %27 : vector<288x128xf32>
    %29 = arith.truncf %28 : vector<288x128xf32> to vector<288x128xbf16>
    %c0_16 = arith.constant 0 : index
    %c0_17 = arith.constant 0 : index
    %c0_18 = arith.constant 0 : index
    %30 = vector.load %arg3[%c0_16, %c0_17, %c0_18] : memref<1x288x128xbf16, #tpu.memory_space<vmem>>, vector<1x288x128xbf16>
    %31 = vector.shape_cast %30 : vector<1x288x128xbf16> to vector<288x128xbf16>
    %32 = arith.extf %31 : vector<288x128xbf16> to vector<288x128xf32>
    %33 = vector.broadcast %0 : vector<1x128xf32> to vector<288x128xf32>
    %34 = arith.mulf %32, %33 : vector<288x128xf32>
    %35 = vector.broadcast %1 : vector<1x128xf32> to vector<288x128xf32>
    %36 = arith.addf %34, %35 : vector<288x128xf32>
    %cst_19 = arith.constant 0.000000e+00 : f32
    %37 = vector.broadcast %cst_19 : f32 to vector<288x128xf32>
    %38 = arith.maximumf %36, %37 : vector<288x128xf32>
    %c0_20 = arith.constant 0 : index
    %c0_21 = arith.constant 0 : index
    %c0_22 = arith.constant 0 : index
    %39 = vector.load %arg6[%c0_20, %c0_21, %c0_22] : memref<1x288x1xf32, #tpu.memory_space<vmem>>, vector<1x288x1xf32>
    %40 = vector.shape_cast %39 : vector<1x288x1xf32> to vector<288x1xf32>
    %41 = vector.broadcast %40 : vector<288x1xf32> to vector<288x128xf32>
    %42 = arith.mulf %38, %41 : vector<288x128xf32>
    %43 = arith.truncf %42 : vector<288x128xf32> to vector<288x128xbf16>
    %cst_23 = arith.constant 0.000000e+00 : f32
    %44 = vector.broadcast %cst_23 : f32 to vector<288x128xf32>
    %c0_24 = arith.constant 0 : index
    %c0_25 = arith.constant 0 : index
    %c0_26 = arith.constant 0 : index
    %45 = vector.load %arg9[%c0_24, %c0_25, %c0_26] : memref<9x128x128xbf16, #tpu.memory_space<vmem>>, vector<1x128x128xbf16>
    %46 = vector.shape_cast %45 : vector<1x128x128xbf16> to vector<128x128xbf16>
    %cst_27 = arith.constant dense<0.000000e+00> : vector<288x128xf32>
    %47 = tpu.matmul %15, %46, %cst_27 {dimension_numbers = #tpu.dot_dimension_numbers<[1], [0], [0], [1], [0, 0, 1, 1], [], []>} : vector<288x128xbf16>, vector<128x128xbf16>, vector<288x128xf32> -> vector<288x128xf32>
    %48 = arith.addf %44, %47 : vector<288x128xf32>
    %c1 = arith.constant 1 : index
    %c0_28 = arith.constant 0 : index
    %c0_29 = arith.constant 0 : index
    %49 = vector.load %arg9[%c1, %c0_28, %c0_29] : memref<9x128x128xbf16, #tpu.memory_space<vmem>>, vector<1x128x128xbf16>
    %50 = vector.shape_cast %49 : vector<1x128x128xbf16> to vector<128x128xbf16>
    %cst_30 = arith.constant dense<0.000000e+00> : vector<288x128xf32>
    %51 = tpu.matmul %15, %50, %cst_30 {dimension_numbers = #tpu.dot_dimension_numbers<[1], [0], [0], [1], [0, 0, 1, 1], [], []>} : vector<288x128xbf16>, vector<128x128xbf16>, vector<288x128xf32> -> vector<288x128xf32>
    %52 = vector.extract_strided_slice %51 {offsets = [1, 0], sizes = [287, 128], strides = [1, 1]} : vector<288x128xf32> to vector<287x128xf32>
    %cst_31 = arith.constant 0.000000e+00 : f32
    %53 = vector.broadcast %cst_31 : f32 to vector<1x128xf32>
    %54 = tpu.concatenate %52, %53 in 0 : vector<287x128xf32>, vector<1x128xf32> -> vector<288x128xf32>
    %55 = arith.addf %48, %54 : vector<288x128xf32>
    %c2 = arith.constant 2 : index
    %c0_32 = arith.constant 0 : index
    %c0_33 = arith.constant 0 : index
    %56 = vector.load %arg9[%c2, %c0_32, %c0_33] : memref<9x128x128xbf16, #tpu.memory_space<vmem>>, vector<1x128x128xbf16>
    %57 = vector.shape_cast %56 : vector<1x128x128xbf16> to vector<128x128xbf16>
    %cst_34 = arith.constant dense<0.000000e+00> : vector<288x128xf32>
    %58 = tpu.matmul %15, %57, %cst_34 {dimension_numbers = #tpu.dot_dimension_numbers<[1], [0], [0], [1], [0, 0, 1, 1], [], []>} : vector<288x128xbf16>, vector<128x128xbf16>, vector<288x128xf32> -> vector<288x128xf32>
    %59 = vector.extract_strided_slice %58 {offsets = [2, 0], sizes = [286, 128], strides = [1, 1]} : vector<288x128xf32> to vector<286x128xf32>
    %cst_35 = arith.constant 0.000000e+00 : f32
    %60 = vector.broadcast %cst_35 : f32 to vector<2x128xf32>
    %61 = tpu.concatenate %59, %60 in 0 : vector<286x128xf32>, vector<2x128xf32> -> vector<288x128xf32>
    %62 = arith.addf %55, %61 : vector<288x128xf32>
    %c3 = arith.constant 3 : index
    %c0_36 = arith.constant 0 : index
    %c0_37 = arith.constant 0 : index
    %63 = vector.load %arg9[%c3, %c0_36, %c0_37] : memref<9x128x128xbf16, #tpu.memory_space<vmem>>, vector<1x128x128xbf16>
    %64 = vector.shape_cast %63 : vector<1x128x128xbf16> to vector<128x128xbf16>
    %cst_38 = arith.constant dense<0.000000e+00> : vector<288x128xf32>
    %65 = tpu.matmul %29, %64, %cst_38 {dimension_numbers = #tpu.dot_dimension_numbers<[1], [0], [0], [1], [0, 0, 1, 1], [], []>} : vector<288x128xbf16>, vector<128x128xbf16>, vector<288x128xf32> -> vector<288x128xf32>
    %66 = arith.addf %62, %65 : vector<288x128xf32>
    %c4 = arith.constant 4 : index
    %c0_39 = arith.constant 0 : index
    %c0_40 = arith.constant 0 : index
    %67 = vector.load %arg9[%c4, %c0_39, %c0_40] : memref<9x128x128xbf16, #tpu.memory_space<vmem>>, vector<1x128x128xbf16>
    %68 = vector.shape_cast %67 : vector<1x128x128xbf16> to vector<128x128xbf16>
    %cst_41 = arith.constant dense<0.000000e+00> : vector<288x128xf32>
    %69 = tpu.matmul %29, %68, %cst_41 {dimension_numbers = #tpu.dot_dimension_numbers<[1], [0], [0], [1], [0, 0, 1, 1], [], []>} : vector<288x128xbf16>, vector<128x128xbf16>, vector<288x128xf32> -> vector<288x128xf32>
    %70 = vector.extract_strided_slice %69 {offsets = [1, 0], sizes = [287, 128], strides = [1, 1]} : vector<288x128xf32> to vector<287x128xf32>
    %cst_42 = arith.constant 0.000000e+00 : f32
    %71 = vector.broadcast %cst_42 : f32 to vector<1x128xf32>
    %72 = tpu.concatenate %70, %71 in 0 : vector<287x128xf32>, vector<1x128xf32> -> vector<288x128xf32>
    %73 = arith.addf %66, %72 : vector<288x128xf32>
    %c5 = arith.constant 5 : index
    %c0_43 = arith.constant 0 : index
    %c0_44 = arith.constant 0 : index
    %74 = vector.load %arg9[%c5, %c0_43, %c0_44] : memref<9x128x128xbf16, #tpu.memory_space<vmem>>, vector<1x128x128xbf16>
    %75 = vector.shape_cast %74 : vector<1x128x128xbf16> to vector<128x128xbf16>
    %cst_45 = arith.constant dense<0.000000e+00> : vector<288x128xf32>
    %76 = tpu.matmul %29, %75, %cst_45 {dimension_numbers = #tpu.dot_dimension_numbers<[1], [0], [0], [1], [0, 0, 1, 1], [], []>} : vector<288x128xbf16>, vector<128x128xbf16>, vector<288x128xf32> -> vector<288x128xf32>
    %77 = vector.extract_strided_slice %76 {offsets = [2, 0], sizes = [286, 128], strides = [1, 1]} : vector<288x128xf32> to vector<286x128xf32>
    %cst_46 = arith.constant 0.000000e+00 : f32
    %78 = vector.broadcast %cst_46 : f32 to vector<2x128xf32>
    %79 = tpu.concatenate %77, %78 in 0 : vector<286x128xf32>, vector<2x128xf32> -> vector<288x128xf32>
    %80 = arith.addf %73, %79 : vector<288x128xf32>
    %c6 = arith.constant 6 : index
    %c0_47 = arith.constant 0 : index
    %c0_48 = arith.constant 0 : index
    %81 = vector.load %arg9[%c6, %c0_47, %c0_48] : memref<9x128x128xbf16, #tpu.memory_space<vmem>>, vector<1x128x128xbf16>
    %82 = vector.shape_cast %81 : vector<1x128x128xbf16> to vector<128x128xbf16>
    %cst_49 = arith.constant dense<0.000000e+00> : vector<288x128xf32>
    %83 = tpu.matmul %43, %82, %cst_49 {dimension_numbers = #tpu.dot_dimension_numbers<[1], [0], [0], [1], [0, 0, 1, 1], [], []>} : vector<288x128xbf16>, vector<128x128xbf16>, vector<288x128xf32> -> vector<288x128xf32>
    %84 = arith.addf %80, %83 : vector<288x128xf32>
    %c7 = arith.constant 7 : index
    %c0_50 = arith.constant 0 : index
    %c0_51 = arith.constant 0 : index
    %85 = vector.load %arg9[%c7, %c0_50, %c0_51] : memref<9x128x128xbf16, #tpu.memory_space<vmem>>, vector<1x128x128xbf16>
    %86 = vector.shape_cast %85 : vector<1x128x128xbf16> to vector<128x128xbf16>
    %cst_52 = arith.constant dense<0.000000e+00> : vector<288x128xf32>
    %87 = tpu.matmul %43, %86, %cst_52 {dimension_numbers = #tpu.dot_dimension_numbers<[1], [0], [0], [1], [0, 0, 1, 1], [], []>} : vector<288x128xbf16>, vector<128x128xbf16>, vector<288x128xf32> -> vector<288x128xf32>
    %88 = vector.extract_strided_slice %87 {offsets = [1, 0], sizes = [287, 128], strides = [1, 1]} : vector<288x128xf32> to vector<287x128xf32>
    %cst_53 = arith.constant 0.000000e+00 : f32
    %89 = vector.broadcast %cst_53 : f32 to vector<1x128xf32>
    %90 = tpu.concatenate %88, %89 in 0 : vector<287x128xf32>, vector<1x128xf32> -> vector<288x128xf32>
    %91 = arith.addf %84, %90 : vector<288x128xf32>
    %c8 = arith.constant 8 : index
    %c0_54 = arith.constant 0 : index
    %c0_55 = arith.constant 0 : index
    %92 = vector.load %arg9[%c8, %c0_54, %c0_55] : memref<9x128x128xbf16, #tpu.memory_space<vmem>>, vector<1x128x128xbf16>
    %93 = vector.shape_cast %92 : vector<1x128x128xbf16> to vector<128x128xbf16>
    %cst_56 = arith.constant dense<0.000000e+00> : vector<288x128xf32>
    %94 = tpu.matmul %43, %93, %cst_56 {dimension_numbers = #tpu.dot_dimension_numbers<[1], [0], [0], [1], [0, 0, 1, 1], [], []>} : vector<288x128xbf16>, vector<128x128xbf16>, vector<288x128xf32> -> vector<288x128xf32>
    %95 = vector.extract_strided_slice %94 {offsets = [2, 0], sizes = [286, 128], strides = [1, 1]} : vector<288x128xf32> to vector<286x128xf32>
    %cst_57 = arith.constant 0.000000e+00 : f32
    %96 = vector.broadcast %cst_57 : f32 to vector<2x128xf32>
    %97 = tpu.concatenate %95, %96 in 0 : vector<286x128xf32>, vector<2x128xf32> -> vector<288x128xf32>
    %98 = arith.addf %91, %97 : vector<288x128xf32>
    %99 = arith.truncf %98 : vector<288x128xf32> to vector<288x128xbf16>
    %c0_58 = arith.constant 0 : index
    %c0_59 = arith.constant 0 : index
    %c0_60 = arith.constant 0 : index
    %100 = vector.load %arg11[%c0_58, %c0_59, %c0_60] : memref<1x288x128xbf16, #tpu.memory_space<vmem>>, vector<1x288x128xbf16>
    %101 = vector.shape_cast %100 : vector<1x288x128xbf16> to vector<288x128xbf16>
    %102 = vector.shape_cast %99 : vector<288x128xbf16> to vector<1x288x128xbf16>
    tpu.vector_store %arg11[%c0_58, %c0_59, %c0_60], %102 {strides = array<i32>} : memref<1x288x128xbf16, #tpu.memory_space<vmem>>, vector<1x288x128xbf16>,
    %c0_61 = arith.constant 0 : index
    %c0_62 = arith.constant 0 : index
    %103 = vector.load %arg10[%c0_61, %c0_62] : memref<288x1xf32, #tpu.memory_space<vmem>>, vector<288x1xf32>
    %104 = vector.broadcast %103 : vector<288x1xf32> to vector<288x128xf32>
    %105 = arith.mulf %98, %104 : vector<288x128xf32>
    %cst_63 = arith.constant dense<0.000000e+00> : vector<128xf32>
    %106 = vector.multi_reduction <add>, %105, %cst_63 [0] : vector<288x128xf32> to vector<128xf32>
    %107 = vector.shape_cast %106 : vector<128xf32> to vector<1x128xf32>
    %108 = arith.mulf %105, %98 : vector<288x128xf32>
    %cst_64 = arith.constant dense<0.000000e+00> : vector<128xf32>
    %109 = vector.multi_reduction <add>, %108, %cst_64 [0] : vector<288x128xf32> to vector<128xf32>
    %110 = vector.shape_cast %109 : vector<128xf32> to vector<1x128xf32>
    %111 = tpu.concatenate %107, %110 in 0 : vector<1x128xf32>, vector<1x128xf32> -> vector<2x128xf32>
    %c0_65 = arith.constant 0 : index
    %c0_66 = arith.constant 0 : index
    %c0_67 = arith.constant 0 : index
    %112 = vector.load %arg12[%c0_65, %c0_66, %c0_67] : memref<1x2x128xf32, #tpu.memory_space<vmem>>, vector<1x2x128xf32>
    %113 = vector.shape_cast %112 : vector<1x2x128xf32> to vector<2x128xf32>
    %114 = vector.shape_cast %111 : vector<2x128xf32> to vector<1x2x128xf32>
    tpu.vector_store %arg12[%c0_65, %c0_66, %c0_67], %114 {strides = array<i32>} : memref<1x2x128xf32, #tpu.memory_space<vmem>>, vector<1x2x128xf32>,
    return
  }
  func.func @transform_0(%arg0: i32) -> (i32, i32, i32) {
    %c0_i32 = arith.constant 0 : i32
    %c0_i32_0 = arith.constant 0 : i32
    %c0_i32_1 = arith.constant 0 : i32
    return %arg0, %c0_i32, %c0_i32_0 : i32, i32, i32
  }
  func.func @transform_1(%arg0: i32) -> (i32, i32, i32) {
    %c0_i32 = arith.constant 0 : i32
    %c0_i32_0 = arith.constant 0 : i32
    %c0_i32_1 = arith.constant 0 : i32
    return %arg0, %c0_i32, %c0_i32_0 : i32, i32, i32
  }
  func.func @transform_2(%arg0: i32) -> (i32, i32, i32) {
    %c0_i32 = arith.constant 0 : i32
    %c0_i32_0 = arith.constant 0 : i32
    %c0_i32_1 = arith.constant 0 : i32
    return %arg0, %c0_i32, %c0_i32_0 : i32, i32, i32
  }
  func.func @transform_3(%arg0: i32) -> (i32, i32, i32) {
    %c0_i32 = arith.constant 0 : i32
    %c0_i32_0 = arith.constant 0 : i32
    %c0_i32_1 = arith.constant 0 : i32
    return %arg0, %c0_i32, %c0_i32_0 : i32, i32, i32
  }
  func.func @transform_4(%arg0: i32) -> (i32, i32, i32) {
    %c0_i32 = arith.constant 0 : i32
    %c0_i32_0 = arith.constant 0 : i32
    %c0_i32_1 = arith.constant 0 : i32
    return %arg0, %c0_i32, %c0_i32_0 : i32, i32, i32
  }
  func.func @transform_5(%arg0: i32) -> (i32, i32, i32) {
    %c0_i32 = arith.constant 0 : i32
    %c0_i32_0 = arith.constant 0 : i32
    %c0_i32_1 = arith.constant 0 : i32
    return %arg0, %c0_i32, %c0_i32_0 : i32, i32, i32
  }
  func.func @transform_6(%arg0: i32) -> (i32, i32) {
    %c0_i32 = arith.constant 0 : i32
    %c0_i32_0 = arith.constant 0 : i32
    %c0_i32_1 = arith.constant 0 : i32
    return %c0_i32, %c0_i32_0 : i32, i32
  }
  func.func @transform_7(%arg0: i32) -> (i32, i32) {
    %c0_i32 = arith.constant 0 : i32
    %c0_i32_0 = arith.constant 0 : i32
    %c0_i32_1 = arith.constant 0 : i32
    return %c0_i32, %c0_i32_0 : i32, i32
  }
  func.func @transform_8(%arg0: i32) -> (i32, i32, i32) {
    %c0_i32 = arith.constant 0 : i32
    %c0_i32_0 = arith.constant 0 : i32
    %c0_i32_1 = arith.constant 0 : i32
    %c0_i32_2 = arith.constant 0 : i32
    return %c0_i32, %c0_i32_0, %c0_i32_1 : i32, i32, i32
  }
  func.func @transform_9(%arg0: i32) -> (i32, i32) {
    %c0_i32 = arith.constant 0 : i32
    %c0_i32_0 = arith.constant 0 : i32
    %c0_i32_1 = arith.constant 0 : i32
    return %c0_i32, %c0_i32_0 : i32, i32
  }
  func.func @transform_10(%arg0: i32) -> (i32, i32, i32) {
    %c0_i32 = arith.constant 0 : i32
    %c0_i32_0 = arith.constant 0 : i32
    %c0_i32_1 = arith.constant 0 : i32
    return %arg0, %c0_i32, %c0_i32_0 : i32, i32, i32
  }
  func.func @transform_11(%arg0: i32) -> (i32, i32, i32) {
    %c0_i32 = arith.constant 0 : i32
    %c0_i32_0 = arith.constant 0 : i32
    %c0_i32_1 = arith.constant 0 : i32
    return %arg0, %c0_i32, %c0_i32_0 : i32, i32, i32
  }
}

module attributes {stable_mosaic.version = 11 : i64} {
  func.func @_bnrelu_conv_bias_sigmoid_kernel(%arg0: i32, %arg1: memref<1x288x128xbf16, #tpu.memory_space<vmem>>, %arg2: memref<1x288x128xbf16, #tpu.memory_space<vmem>>, %arg3: memref<1x288x128xbf16, #tpu.memory_space<vmem>>, %arg4: memref<1x288x1xf32, #tpu.memory_space<vmem>>, %arg5: memref<1x288x1xf32, #tpu.memory_space<vmem>>, %arg6: memref<1x288x1xf32, #tpu.memory_space<vmem>>, %arg7: memref<1x128xf32, #tpu.memory_space<vmem>>, %arg8: memref<1x128xf32, #tpu.memory_space<vmem>>, %arg9: memref<9x128x128xbf16, #tpu.memory_space<vmem>>, %arg10: memref<1x128xf32, #tpu.memory_space<vmem>>, %arg11: memref<1x288x128xf32, #tpu.memory_space<vmem>>) attributes {dimension_semantics = [#tpu.dimension_semantics<parallel>], iteration_bounds = array<i64: 2>, scalar_prefetch = 0 : i64, scratch_operands = 0 : i64, tpu.core_type = #tpu.core_type<tc>, window_params = [{transform_indices = @transform_0, window_bounds = array<i64: 1, 288, 128>}, {transform_indices = @transform_1, window_bounds = array<i64: 1, 288, 128>}, {transform_indices = @transform_2, window_bounds = array<i64: 1, 288, 128>}, {transform_indices = @transform_3, window_bounds = array<i64: 1, 288, 1>}, {transform_indices = @transform_4, window_bounds = array<i64: 1, 288, 1>}, {transform_indices = @transform_5, window_bounds = array<i64: 1, 288, 1>}, {pipeline_mode = #tpu.pipeline_mode<synchronous>, transform_indices = @transform_6, window_bounds = array<i64: 1, 128>}, {pipeline_mode = #tpu.pipeline_mode<synchronous>, transform_indices = @transform_7, window_bounds = array<i64: 1, 128>}, {pipeline_mode = #tpu.pipeline_mode<synchronous>, transform_indices = @transform_8, window_bounds = array<i64: 9, 128, 128>}, {pipeline_mode = #tpu.pipeline_mode<synchronous>, transform_indices = @transform_9, window_bounds = array<i64: 1, 128>}, {transform_indices = @transform_10, window_bounds = array<i64: 1, 288, 128>}]} {
    %c0 = arith.constant 0 : index
    %c0_0 = arith.constant 0 : index
    %0 = vector.load %arg7[%c0, %c0_0] : memref<1x128xf32, #tpu.memory_space<vmem>>, vector<1x128xf32>
    %c0_1 = arith.constant 0 : index
    %c0_2 = arith.constant 0 : index
    %1 = vector.load %arg8[%c0_1, %c0_2] : memref<1x128xf32, #tpu.memory_space<vmem>>, vector<1x128xf32>
    %c0_3 = arith.constant 0 : index
    %c0_4 = arith.constant 0 : index
    %c0_5 = arith.constant 0 : index
    %2 = vector.load %arg1[%c0_3, %c0_4, %c0_5] : memref<1x288x128xbf16, #tpu.memory_space<vmem>>, vector<1x288x128xbf16>
    %3 = vector.shape_cast %2 : vector<1x288x128xbf16> to vector<288x128xbf16>
    %4 = arith.extf %3 : vector<288x128xbf16> to vector<288x128xf32>
    %5 = vector.broadcast %0 : vector<1x128xf32> to vector<288x128xf32>
    %6 = arith.mulf %4, %5 : vector<288x128xf32>
    %7 = vector.broadcast %1 : vector<1x128xf32> to vector<288x128xf32>
    %8 = arith.addf %6, %7 : vector<288x128xf32>
    %cst = arith.constant 0.000000e+00 : f32
    %9 = vector.broadcast %cst : f32 to vector<288x128xf32>
    %10 = arith.maximumf %8, %9 : vector<288x128xf32>
    %c0_6 = arith.constant 0 : index
    %c0_7 = arith.constant 0 : index
    %c0_8 = arith.constant 0 : index
    %11 = vector.load %arg4[%c0_6, %c0_7, %c0_8] : memref<1x288x1xf32, #tpu.memory_space<vmem>>, vector<1x288x1xf32>
    %12 = vector.shape_cast %11 : vector<1x288x1xf32> to vector<288x1xf32>
    %13 = vector.broadcast %12 : vector<288x1xf32> to vector<288x128xf32>
    %14 = arith.mulf %10, %13 : vector<288x128xf32>
    %15 = arith.truncf %14 : vector<288x128xf32> to vector<288x128xbf16>
    %c0_9 = arith.constant 0 : index
    %c0_10 = arith.constant 0 : index
    %c0_11 = arith.constant 0 : index
    %16 = vector.load %arg2[%c0_9, %c0_10, %c0_11] : memref<1x288x128xbf16, #tpu.memory_space<vmem>>, vector<1x288x128xbf16>
    %17 = vector.shape_cast %16 : vector<1x288x128xbf16> to vector<288x128xbf16>
    %18 = arith.extf %17 : vector<288x128xbf16> to vector<288x128xf32>
    %19 = vector.broadcast %0 : vector<1x128xf32> to vector<288x128xf32>
    %20 = arith.mulf %18, %19 : vector<288x128xf32>
    %21 = vector.broadcast %1 : vector<1x128xf32> to vector<288x128xf32>
    %22 = arith.addf %20, %21 : vector<288x128xf32>
    %cst_12 = arith.constant 0.000000e+00 : f32
    %23 = vector.broadcast %cst_12 : f32 to vector<288x128xf32>
    %24 = arith.maximumf %22, %23 : vector<288x128xf32>
    %c0_13 = arith.constant 0 : index
    %c0_14 = arith.constant 0 : index
    %c0_15 = arith.constant 0 : index
    %25 = vector.load %arg5[%c0_13, %c0_14, %c0_15] : memref<1x288x1xf32, #tpu.memory_space<vmem>>, vector<1x288x1xf32>
    %26 = vector.shape_cast %25 : vector<1x288x1xf32> to vector<288x1xf32>
    %27 = vector.broadcast %26 : vector<288x1xf32> to vector<288x128xf32>
    %28 = arith.mulf %24, %27 : vector<288x128xf32>
    %29 = arith.truncf %28 : vector<288x128xf32> to vector<288x128xbf16>
    %c0_16 = arith.constant 0 : index
    %c0_17 = arith.constant 0 : index
    %c0_18 = arith.constant 0 : index
    %30 = vector.load %arg3[%c0_16, %c0_17, %c0_18] : memref<1x288x128xbf16, #tpu.memory_space<vmem>>, vector<1x288x128xbf16>
    %31 = vector.shape_cast %30 : vector<1x288x128xbf16> to vector<288x128xbf16>
    %32 = arith.extf %31 : vector<288x128xbf16> to vector<288x128xf32>
    %33 = vector.broadcast %0 : vector<1x128xf32> to vector<288x128xf32>
    %34 = arith.mulf %32, %33 : vector<288x128xf32>
    %35 = vector.broadcast %1 : vector<1x128xf32> to vector<288x128xf32>
    %36 = arith.addf %34, %35 : vector<288x128xf32>
    %cst_19 = arith.constant 0.000000e+00 : f32
    %37 = vector.broadcast %cst_19 : f32 to vector<288x128xf32>
    %38 = arith.maximumf %36, %37 : vector<288x128xf32>
    %c0_20 = arith.constant 0 : index
    %c0_21 = arith.constant 0 : index
    %c0_22 = arith.constant 0 : index
    %39 = vector.load %arg6[%c0_20, %c0_21, %c0_22] : memref<1x288x1xf32, #tpu.memory_space<vmem>>, vector<1x288x1xf32>
    %40 = vector.shape_cast %39 : vector<1x288x1xf32> to vector<288x1xf32>
    %41 = vector.broadcast %40 : vector<288x1xf32> to vector<288x128xf32>
    %42 = arith.mulf %38, %41 : vector<288x128xf32>
    %43 = arith.truncf %42 : vector<288x128xf32> to vector<288x128xbf16>
    %cst_23 = arith.constant 0.000000e+00 : f32
    %44 = vector.broadcast %cst_23 : f32 to vector<288x128xf32>
    %c0_24 = arith.constant 0 : index
    %c0_25 = arith.constant 0 : index
    %c0_26 = arith.constant 0 : index
    %45 = vector.load %arg9[%c0_24, %c0_25, %c0_26] : memref<9x128x128xbf16, #tpu.memory_space<vmem>>, vector<1x128x128xbf16>
    %46 = vector.shape_cast %45 : vector<1x128x128xbf16> to vector<128x128xbf16>
    %cst_27 = arith.constant dense<0.000000e+00> : vector<288x128xf32>
    %47 = tpu.matmul %15, %46, %cst_27 {dimension_numbers = #tpu.dot_dimension_numbers<[1], [0], [0], [1], [0, 0, 1, 1], [], []>} : vector<288x128xbf16>, vector<128x128xbf16>, vector<288x128xf32> -> vector<288x128xf32>
    %48 = arith.addf %44, %47 : vector<288x128xf32>
    %c1 = arith.constant 1 : index
    %c0_28 = arith.constant 0 : index
    %c0_29 = arith.constant 0 : index
    %49 = vector.load %arg9[%c1, %c0_28, %c0_29] : memref<9x128x128xbf16, #tpu.memory_space<vmem>>, vector<1x128x128xbf16>
    %50 = vector.shape_cast %49 : vector<1x128x128xbf16> to vector<128x128xbf16>
    %cst_30 = arith.constant dense<0.000000e+00> : vector<288x128xf32>
    %51 = tpu.matmul %15, %50, %cst_30 {dimension_numbers = #tpu.dot_dimension_numbers<[1], [0], [0], [1], [0, 0, 1, 1], [], []>} : vector<288x128xbf16>, vector<128x128xbf16>, vector<288x128xf32> -> vector<288x128xf32>
    %52 = vector.extract_strided_slice %51 {offsets = [1, 0], sizes = [287, 128], strides = [1, 1]} : vector<288x128xf32> to vector<287x128xf32>
    %cst_31 = arith.constant 0.000000e+00 : f32
    %53 = vector.broadcast %cst_31 : f32 to vector<1x128xf32>
    %54 = tpu.concatenate %52, %53 in 0 : vector<287x128xf32>, vector<1x128xf32> -> vector<288x128xf32>
    %55 = arith.addf %48, %54 : vector<288x128xf32>
    %c2 = arith.constant 2 : index
    %c0_32 = arith.constant 0 : index
    %c0_33 = arith.constant 0 : index
    %56 = vector.load %arg9[%c2, %c0_32, %c0_33] : memref<9x128x128xbf16, #tpu.memory_space<vmem>>, vector<1x128x128xbf16>
    %57 = vector.shape_cast %56 : vector<1x128x128xbf16> to vector<128x128xbf16>
    %cst_34 = arith.constant dense<0.000000e+00> : vector<288x128xf32>
    %58 = tpu.matmul %15, %57, %cst_34 {dimension_numbers = #tpu.dot_dimension_numbers<[1], [0], [0], [1], [0, 0, 1, 1], [], []>} : vector<288x128xbf16>, vector<128x128xbf16>, vector<288x128xf32> -> vector<288x128xf32>
    %59 = vector.extract_strided_slice %58 {offsets = [2, 0], sizes = [286, 128], strides = [1, 1]} : vector<288x128xf32> to vector<286x128xf32>
    %cst_35 = arith.constant 0.000000e+00 : f32
    %60 = vector.broadcast %cst_35 : f32 to vector<2x128xf32>
    %61 = tpu.concatenate %59, %60 in 0 : vector<286x128xf32>, vector<2x128xf32> -> vector<288x128xf32>
    %62 = arith.addf %55, %61 : vector<288x128xf32>
    %c3 = arith.constant 3 : index
    %c0_36 = arith.constant 0 : index
    %c0_37 = arith.constant 0 : index
    %63 = vector.load %arg9[%c3, %c0_36, %c0_37] : memref<9x128x128xbf16, #tpu.memory_space<vmem>>, vector<1x128x128xbf16>
    %64 = vector.shape_cast %63 : vector<1x128x128xbf16> to vector<128x128xbf16>
    %cst_38 = arith.constant dense<0.000000e+00> : vector<288x128xf32>
    %65 = tpu.matmul %29, %64, %cst_38 {dimension_numbers = #tpu.dot_dimension_numbers<[1], [0], [0], [1], [0, 0, 1, 1], [], []>} : vector<288x128xbf16>, vector<128x128xbf16>, vector<288x128xf32> -> vector<288x128xf32>
    %66 = arith.addf %62, %65 : vector<288x128xf32>
    %c4 = arith.constant 4 : index
    %c0_39 = arith.constant 0 : index
    %c0_40 = arith.constant 0 : index
    %67 = vector.load %arg9[%c4, %c0_39, %c0_40] : memref<9x128x128xbf16, #tpu.memory_space<vmem>>, vector<1x128x128xbf16>
    %68 = vector.shape_cast %67 : vector<1x128x128xbf16> to vector<128x128xbf16>
    %cst_41 = arith.constant dense<0.000000e+00> : vector<288x128xf32>
    %69 = tpu.matmul %29, %68, %cst_41 {dimension_numbers = #tpu.dot_dimension_numbers<[1], [0], [0], [1], [0, 0, 1, 1], [], []>} : vector<288x128xbf16>, vector<128x128xbf16>, vector<288x128xf32> -> vector<288x128xf32>
    %70 = vector.extract_strided_slice %69 {offsets = [1, 0], sizes = [287, 128], strides = [1, 1]} : vector<288x128xf32> to vector<287x128xf32>
    %cst_42 = arith.constant 0.000000e+00 : f32
    %71 = vector.broadcast %cst_42 : f32 to vector<1x128xf32>
    %72 = tpu.concatenate %70, %71 in 0 : vector<287x128xf32>, vector<1x128xf32> -> vector<288x128xf32>
    %73 = arith.addf %66, %72 : vector<288x128xf32>
    %c5 = arith.constant 5 : index
    %c0_43 = arith.constant 0 : index
    %c0_44 = arith.constant 0 : index
    %74 = vector.load %arg9[%c5, %c0_43, %c0_44] : memref<9x128x128xbf16, #tpu.memory_space<vmem>>, vector<1x128x128xbf16>
    %75 = vector.shape_cast %74 : vector<1x128x128xbf16> to vector<128x128xbf16>
    %cst_45 = arith.constant dense<0.000000e+00> : vector<288x128xf32>
    %76 = tpu.matmul %29, %75, %cst_45 {dimension_numbers = #tpu.dot_dimension_numbers<[1], [0], [0], [1], [0, 0, 1, 1], [], []>} : vector<288x128xbf16>, vector<128x128xbf16>, vector<288x128xf32> -> vector<288x128xf32>
    %77 = vector.extract_strided_slice %76 {offsets = [2, 0], sizes = [286, 128], strides = [1, 1]} : vector<288x128xf32> to vector<286x128xf32>
    %cst_46 = arith.constant 0.000000e+00 : f32
    %78 = vector.broadcast %cst_46 : f32 to vector<2x128xf32>
    %79 = tpu.concatenate %77, %78 in 0 : vector<286x128xf32>, vector<2x128xf32> -> vector<288x128xf32>
    %80 = arith.addf %73, %79 : vector<288x128xf32>
    %c6 = arith.constant 6 : index
    %c0_47 = arith.constant 0 : index
    %c0_48 = arith.constant 0 : index
    %81 = vector.load %arg9[%c6, %c0_47, %c0_48] : memref<9x128x128xbf16, #tpu.memory_space<vmem>>, vector<1x128x128xbf16>
    %82 = vector.shape_cast %81 : vector<1x128x128xbf16> to vector<128x128xbf16>
    %cst_49 = arith.constant dense<0.000000e+00> : vector<288x128xf32>
    %83 = tpu.matmul %43, %82, %cst_49 {dimension_numbers = #tpu.dot_dimension_numbers<[1], [0], [0], [1], [0, 0, 1, 1], [], []>} : vector<288x128xbf16>, vector<128x128xbf16>, vector<288x128xf32> -> vector<288x128xf32>
    %84 = arith.addf %80, %83 : vector<288x128xf32>
    %c7 = arith.constant 7 : index
    %c0_50 = arith.constant 0 : index
    %c0_51 = arith.constant 0 : index
    %85 = vector.load %arg9[%c7, %c0_50, %c0_51] : memref<9x128x128xbf16, #tpu.memory_space<vmem>>, vector<1x128x128xbf16>
    %86 = vector.shape_cast %85 : vector<1x128x128xbf16> to vector<128x128xbf16>
    %cst_52 = arith.constant dense<0.000000e+00> : vector<288x128xf32>
    %87 = tpu.matmul %43, %86, %cst_52 {dimension_numbers = #tpu.dot_dimension_numbers<[1], [0], [0], [1], [0, 0, 1, 1], [], []>} : vector<288x128xbf16>, vector<128x128xbf16>, vector<288x128xf32> -> vector<288x128xf32>
    %88 = vector.extract_strided_slice %87 {offsets = [1, 0], sizes = [287, 128], strides = [1, 1]} : vector<288x128xf32> to vector<287x128xf32>
    %cst_53 = arith.constant 0.000000e+00 : f32
    %89 = vector.broadcast %cst_53 : f32 to vector<1x128xf32>
    %90 = tpu.concatenate %88, %89 in 0 : vector<287x128xf32>, vector<1x128xf32> -> vector<288x128xf32>
    %91 = arith.addf %84, %90 : vector<288x128xf32>
    %c8 = arith.constant 8 : index
    %c0_54 = arith.constant 0 : index
    %c0_55 = arith.constant 0 : index
    %92 = vector.load %arg9[%c8, %c0_54, %c0_55] : memref<9x128x128xbf16, #tpu.memory_space<vmem>>, vector<1x128x128xbf16>
    %93 = vector.shape_cast %92 : vector<1x128x128xbf16> to vector<128x128xbf16>
    %cst_56 = arith.constant dense<0.000000e+00> : vector<288x128xf32>
    %94 = tpu.matmul %43, %93, %cst_56 {dimension_numbers = #tpu.dot_dimension_numbers<[1], [0], [0], [1], [0, 0, 1, 1], [], []>} : vector<288x128xbf16>, vector<128x128xbf16>, vector<288x128xf32> -> vector<288x128xf32>
    %95 = vector.extract_strided_slice %94 {offsets = [2, 0], sizes = [286, 128], strides = [1, 1]} : vector<288x128xf32> to vector<286x128xf32>
    %cst_57 = arith.constant 0.000000e+00 : f32
    %96 = vector.broadcast %cst_57 : f32 to vector<2x128xf32>
    %97 = tpu.concatenate %95, %96 in 0 : vector<286x128xf32>, vector<2x128xf32> -> vector<288x128xf32>
    %98 = arith.addf %91, %97 : vector<288x128xf32>
    %c0_58 = arith.constant 0 : index
    %c0_59 = arith.constant 0 : index
    %99 = vector.load %arg10[%c0_58, %c0_59] : memref<1x128xf32, #tpu.memory_space<vmem>>, vector<1x128xf32>
    %100 = vector.broadcast %99 : vector<1x128xf32> to vector<288x128xf32>
    %101 = arith.addf %98, %100 : vector<288x128xf32>
    %cst_60 = arith.constant 0.000000e+00 : f32
    %102 = vector.broadcast %cst_60 : f32 to vector<288x128xf32>
    %103 = arith.subf %102, %101 : vector<288x128xf32>
    %104 = math.exp %103 : vector<288x128xf32>
    %cst_61 = arith.constant 1.000000e+00 : f32
    %105 = vector.broadcast %cst_61 : f32 to vector<288x128xf32>
    %106 = arith.addf %105, %104 : vector<288x128xf32>
    %107 = tpu.reciprocal %106 {approx = true} : vector<288x128xf32> -> vector<288x128xf32>
    %c0_62 = arith.constant 0 : index
    %c0_63 = arith.constant 0 : index
    %c0_64 = arith.constant 0 : index
    %108 = vector.load %arg11[%c0_62, %c0_63, %c0_64] : memref<1x288x128xf32, #tpu.memory_space<vmem>>, vector<1x288x128xf32>
    %109 = vector.shape_cast %108 : vector<1x288x128xf32> to vector<288x128xf32>
    %110 = vector.shape_cast %107 : vector<288x128xf32> to vector<1x288x128xf32>
    tpu.vector_store %arg11[%c0_62, %c0_63, %c0_64], %110 {strides = array<i32>} : memref<1x288x128xf32, #tpu.memory_space<vmem>>, vector<1x288x128xf32>,
    return
  }
  func.func @transform_0(%arg0: i32) -> (i32, i32, i32) {
    %c0_i32 = arith.constant 0 : i32
    %c0_i32_0 = arith.constant 0 : i32
    %c0_i32_1 = arith.constant 0 : i32
    return %arg0, %c0_i32, %c0_i32_0 : i32, i32, i32
  }
  func.func @transform_1(%arg0: i32) -> (i32, i32, i32) {
    %c0_i32 = arith.constant 0 : i32
    %c0_i32_0 = arith.constant 0 : i32
    %c0_i32_1 = arith.constant 0 : i32
    return %arg0, %c0_i32, %c0_i32_0 : i32, i32, i32
  }
  func.func @transform_2(%arg0: i32) -> (i32, i32, i32) {
    %c0_i32 = arith.constant 0 : i32
    %c0_i32_0 = arith.constant 0 : i32
    %c0_i32_1 = arith.constant 0 : i32
    return %arg0, %c0_i32, %c0_i32_0 : i32, i32, i32
  }
  func.func @transform_3(%arg0: i32) -> (i32, i32, i32) {
    %c0_i32 = arith.constant 0 : i32
    %c0_i32_0 = arith.constant 0 : i32
    %c0_i32_1 = arith.constant 0 : i32
    return %arg0, %c0_i32, %c0_i32_0 : i32, i32, i32
  }
  func.func @transform_4(%arg0: i32) -> (i32, i32, i32) {
    %c0_i32 = arith.constant 0 : i32
    %c0_i32_0 = arith.constant 0 : i32
    %c0_i32_1 = arith.constant 0 : i32
    return %arg0, %c0_i32, %c0_i32_0 : i32, i32, i32
  }
  func.func @transform_5(%arg0: i32) -> (i32, i32, i32) {
    %c0_i32 = arith.constant 0 : i32
    %c0_i32_0 = arith.constant 0 : i32
    %c0_i32_1 = arith.constant 0 : i32
    return %arg0, %c0_i32, %c0_i32_0 : i32, i32, i32
  }
  func.func @transform_6(%arg0: i32) -> (i32, i32) {
    %c0_i32 = arith.constant 0 : i32
    %c0_i32_0 = arith.constant 0 : i32
    %c0_i32_1 = arith.constant 0 : i32
    return %c0_i32, %c0_i32_0 : i32, i32
  }
  func.func @transform_7(%arg0: i32) -> (i32, i32) {
    %c0_i32 = arith.constant 0 : i32
    %c0_i32_0 = arith.constant 0 : i32
    %c0_i32_1 = arith.constant 0 : i32
    return %c0_i32, %c0_i32_0 : i32, i32
  }
  func.func @transform_8(%arg0: i32) -> (i32, i32, i32) {
    %c0_i32 = arith.constant 0 : i32
    %c0_i32_0 = arith.constant 0 : i32
    %c0_i32_1 = arith.constant 0 : i32
    %c0_i32_2 = arith.constant 0 : i32
    return %c0_i32, %c0_i32_0, %c0_i32_1 : i32, i32, i32
  }
  func.func @transform_9(%arg0: i32) -> (i32, i32) {
    %c0_i32 = arith.constant 0 : i32
    %c0_i32_0 = arith.constant 0 : i32
    %c0_i32_1 = arith.constant 0 : i32
    return %c0_i32, %c0_i32_0 : i32, i32
  }
  func.func @transform_10(%arg0: i32) -> (i32, i32, i32) {
    %c0_i32 = arith.constant 0 : i32
    %c0_i32_0 = arith.constant 0 : i32
    %c0_i32_1 = arith.constant 0 : i32
    return %arg0, %c0_i32, %c0_i32_0 : i32, i32, i32
  }
}

</mosaic_0001>

<bundles_post_ra>
// kernel: cnn_part_forward.3
= control target key start
LH: loop header
LB: loop body
LE: loop exit
PB: predicated region body
PF: predicated region fallthrough
CT: control target
= control target key end

     0   :  { %s5524_s21 = smov 0   ;;  %s7128_s0 = inlined_call_operand.vmem [shape: bf16[2,288,3], index: 0, kind: input, shape index: {}]   ;;  %s7129_s1 = inlined_call_operand.vmem [shape: bf16[2,288,3], index: 1, kind: input, shape index: {}]   ;;  %s7130_s2 = inlined_call_operand.vmem [shape: bf16[2,288,3], index: 2, kind: input, shape index: {}]   ;;  %s7131_s3 = inlined_call_operand.vmem [shape: bf16[9,3,128], index: 3, kind: input, shape index: {}]   ;;  %s7132_s4 = inlined_call_operand.vmem [shape: f32[288,1], index: 4, kind: input, shape index: {}]   ;;  %s7133_s5 = inlined_call_operand.vmem [shape: bf16[2,288,128], index: 5, kind: output, shape index: {0}]   ;;  %s7134_s6 = inlined_call_operand.vmem [shape: f32[2,2,128], index: 6, kind: output, shape index: {1}]  }
   0x1 LB: > { %s4266_s22 = sadd.s32 4294967295, %s5485_s21   ;;  %p4270_p0 = scmp.ge.s32.totalorder %s5485_s21, 1  ;;  %s5485_s21 = sphi %s5524_s21, %s17_s21  }
   0x2   : > { %p235_p1 = scmp.lt.s32.totalorder %s5485_s21, 3 }
   0x4   : > { %p236_p2 = pnand %p4270_p0, %p235_p1 }
   0x6   : > { %239 = sbr.rel (%p236_p2) target bundleno = 599 (0x257), region = 40 }
   0xd   : > { %v4276_v0 = vld [vmem:[%s7131_s3 + $0x2] sm:$0x3]  ;;  %vm560_vm0 = vcmask 1040384   ;;  %vm561_vm1 = vcmask 1041408   ;;  %p279_p3 = scmp.lt.s32.totalorder %s4266_s22, 1  ;;  %v5487_v1 = vmov 65535  }
   0xe   : > { %v562_v2 = vsel %vm560_vm0, 4294967295, %v5487_v1  ;;  %v4331_v3 = vld [vmem:[%s7131_s3 + $0x4] sm:$0x3]  ;;  %v412_v4 = vld [vmem:[%s7131_s3] sm:$0x3]  ;;  %vm505_vm2 = vcmask 23552  }
   0xf   : > { %v5542_v5 = vsel %vm561_vm1, %v562_v2, 0  ;;  %s7214_s22 = smov (!%p279_p3, %s4266_s22), 1  ;;  %v4387_v9 = vld [vmem:[%s7131_s3 + $0x8] sm:$0x3]  ;;  %v4350_v10 = vld [vmem:[%s7131_s3 + $0x6] sm:$0x3] }
  0x10   : > { %v565_v6 = vand.u32 %v4276_v0, %v5542_v5  ;;  %v1072_v7 = vand.u32 %v4331_v3, %v5542_v5  ;;  %v890_v8 = vand.u32 %v5542_v5, %v412_v4  ;;  %s5550_s29 = smul.u32 144, %s7214_s22  ;;  %v1797_v15 = vand.u32 %v4387_v9, %v5542_v5  ;;  %v4406_v30 = vld [vmem:[%s7131_s3 + $0xa] sm:$0x3]  ;;  %v4462_v33 = vld [vmem:[%s7131_s3 + $0xe] sm:$0x3]  ;;  %v3784_v55 = vld [vmem:[%s7132_s4] sm:$0xff] }
  0x11   : > { %v1579_v17 = vand.u32 %v4350_v10, %v5542_v5  ;;  %v2159_v32 = vand.u32 %v4406_v30, %v5542_v5  ;;  %v2883_v34 = vand.u32 %v4462_v33, %v5542_v5  ;;  %v4425_v36 = vld [vmem:[%s7131_s3 + $0xc] sm:$0x3]  ;;  %v4481_v40 = vld [vmem:[%s7131_s3 + $0x10] sm:$0x3]  ;;  %v5488_v54 = vmov 0   ;;  %v3787_v60 = vld [vmem:[%s7132_s4 + $0x18] sm:$0xff] }
  0x12   : > { %4852 = vmatprep.subr.bf16.mxu0 %v565_v6  ;;  %5194 = vmatprep.subr.bf16.mxu1 %v565_v6  ;;  %s5556_s8 = scalar_lea.vmem %s7128_s0, %s5550_s29  ;;  %s5602_s15 = scalar_lea.vmem %s7129_s1, %s5550_s29  ;;  %v5687_v39 = vand.u32 %v4425_v36, %v5542_v5  ;;  %v5707_v43 = vand.u32 %v4481_v40, %v5542_v5  ;;  %v3786_v56 = vld [vmem:[%s7132_s4 + $0x10] sm:$0xff]  ;;  %v3785_v57 = vld [vmem:[%s7132_s4 + $0x8] sm:$0xff]  ;;  %v3788_v61 = vld [vmem:[%s7132_s4 + $0x20] sm:$0xff]  ;;  %vm780_vm3 = vcmask 1046528   ;;  %vm1287_vm4 = vcmask 1045504  }
  0x13   : > { %4853 = vmatpush3.bf16.msra.mxu0 %v565_v6  ;;  %5195 = vmatpush3.bf16.msra.mxu1 %v565_v6  ;;  %v5425_v11 = vld [vmem:[%s5556_s8] sm:$0xff]   ;;  %v5566_v12 = vld [vmem:[%s5556_s8 + $0x50] sm:$0xff]   ;;  %v5427_v13 = vld [vmem:[%s5556_s8 + $0x8] sm:$0xff]   ;;  %s5641_s24 = scalar_lea.vmem %s7130_s2, %s5550_s29  ;;  %s6836_s20 = scalar_lea.vmem %s7133_s5, %s5550_s29 }
  0x14   : > { %4928 = vmatprep.subr.bf16.mxu0 %v1072_v7  ;;  %4890 = vmatprep.subr.bf16.mxu1 %v890_v8  ;;  %v5573_v14 = vld [vmem:[%s5556_s8 + $0x58] sm:$0xff]   ;;  %v5429_v16 = vld [vmem:[%s5556_s8 + $0x10] sm:$0xff]   ;;  %v5582_v18 = vld [vmem:[%s5556_s8 + $0x60] sm:$0xff]   ;;  %s4275_s29 = sshll.u32 %s7214_s22, 1 }
  0x15   : > { %4854 = vmatprep.mubr.msk.bf16.mxu0 %vm505_vm2, %v5425_v11  ;;  %4874 = vmatprep.mubr.msk.bf16.mxu1 %vm505_vm2, %v5566_v12  ;;  %v5431_v19 = vld [vmem:[%s5556_s8 + $0x18] sm:$0xff]   ;;  %v5432_v20 = vld [vmem:[%s5556_s8 + $0x68] sm:$0xff]   ;;  %v5433_v21 = vld [vmem:[%s5556_s8 + $0x20] sm:$0xff]   ;;  %s302_s26 = scalar_lea.vmem %s7134_s6, %s4275_s29 }
  0x16   : > { %4855 = vmatmul.mubr.msk.bf16.vlgmr.msra.gmra.mrb[0].mxu0 %vm505_vm2, %v5427_v13  ;;  %4875 = vmatmul.mubr.msk.bf16.vlgmr.msra.gmra.mrb[0].mxu1 %vm505_vm2, %v5573_v14  ;;  %v5434_v22 = vld [vmem:[%s5556_s8 + $0x70] sm:$0xff]   ;;  %v5435_v23 = vld [vmem:[%s5556_s8 + $0x28] sm:$0xff]   ;;  %v5436_v24 = vld [vmem:[%s5556_s8 + $0x78] sm:$0xff]  }
  0x17   : > { %4929 = vmatpush3.bf16.msra.mxu0 %v1072_v7  ;;  %4858 = vmatprep.mubr.msk.bf16.mxu0 %vm505_vm2, %v5429_v16  ;;  %v5437_v25 = vld [vmem:[%s5556_s8 + $0x30] sm:$0xff]   ;;  %v5438_v26 = vld [vmem:[%s5556_s8 + $0x80] sm:$0xff]   ;;  %v5439_v27 = vld [vmem:[%s5556_s8 + $0x38] sm:$0xff]  }
  0x18   : > { %4891 = vmatpush3.bf16.msra.mxu1 %v890_v8  ;;  %4878 = vmatprep.mubr.msk.bf16.mxu1 %vm505_vm2, %v5582_v18  ;;  %v5440_v28 = vld [vmem:[%s5556_s8 + $0x88] sm:$0xff]   ;;  %v5441_v29 = vld [vmem:[%s5556_s8 + $0x40] sm:$0xff]   ;;  %v5684_v38 = vld [vmem:[%s5602_s15 + $0x10] sm:$0xff]  }
  0x19   : > { %5004 = vmatprep.subr.bf16.mxu0 %v1797_v15  ;;  %4966 = vmatprep.subr.bf16.mxu1 %v1579_v17  ;;  %v5442_v31 = vld [vmem:[%s5556_s8 + $0x48] sm:$0xff]   ;;  %v5670_v35 = vld [vmem:[%s5602_s15] sm:$0xff]   ;;  %v5701_v41 = vld [vmem:[%s5602_s15 + $0x18] sm:$0xff]  }
  0x1a   : > { %v5681_v37 = vld [vmem:[%s5602_s15 + $0x8] sm:$0xff]   ;;  %v5704_v42 = vld [vmem:[%s5602_s15 + $0x20] sm:$0xff]   ;;  %v5722_v45 = vld [vmem:[%s5602_s15 + $0x30] sm:$0xff]   ;;  %5423 = vset.pattern.permute.xlu0 %v5488_v54  ;;  %5424 = vset.pattern.permute.xlu1 %v5488_v54 }
  0x1b   : > { %v5719_v44 = vld [vmem:[%s5602_s15 + $0x28] sm:$0xff]   ;;  %v5733_v46 = vld [vmem:[%s5602_s15 + $0x38] sm:$0xff]   ;;  %v5736_v47 = vld [vmem:[%s5602_s15 + $0x40] sm:$0xff]   ;;  %3822 = vperm.xlu0 %5423, %v3784_v55   ;;  %3832 = vperm.xlu1 %5424, %v3786_v56  }
  0x1c   : > { %v5747_v48 = vld [vmem:[%s5602_s15 + $0x48] sm:$0xff]   ;;  %v5750_v49 = vld [vmem:[%s5602_s15 + $0x50] sm:$0xff]   ;;  %v5761_v50 = vld [vmem:[%s5602_s15 + $0x58] sm:$0xff]  }
  0x1d   : > { %v5764_v51 = vld [vmem:[%s5602_s15 + $0x60] sm:$0xff]   ;;  %v5775_v52 = vld [vmem:[%s5602_s15 + $0x68] sm:$0xff]   ;;  %v5778_v53 = vld [vmem:[%s5602_s15 + $0x70] sm:$0xff]  }
  0x1e   : > { %4859 = vmatmul.mubr.msk.bf16.gmra.mrb[4].mxu0 %vm505_vm2, %v5431_v19  ;;  %4879 = vmatmul.mubr.msk.bf16.gmra.mrb[4].mxu1 %vm505_vm2, %v5432_v20  ;;  %v5798_v58 = vld [vmem:[%s5602_s15 + $0x78] sm:$0xff]   ;;  %v5801_v59 = vld [vmem:[%s5602_s15 + $0x80] sm:$0xff]   ;;  %v3789_v62 = vld [vmem:[%s7132_s4 + $0x28] sm:$0xff] }
  0x1f   : > { %4862 = vmatprep.mubr.msk.bf16.mxu0 %vm505_vm2, %v5433_v21  ;;  %4882 = vmatprep.mubr.msk.bf16.mxu1 %vm505_vm2, %v5434_v22  ;;  %v3790_v63 = vld [vmem:[%s7132_s4 + $0x30] sm:$0xff]  ;;  %v5824_v0 = vld [vmem:[%s5602_s15 + $0x88] sm:$0xff]   ;;  %v3791_v1 = vld [vmem:[%s7132_s4 + $0x38] sm:$0xff] }
  0x20   : > { %3827 = vperm.xlu0 %5423, %v3785_v57   ;;  %3837 = vperm.xlu1 %5424, %v3787_v60   ;;  %v3792_v2 = vld [vmem:[%s7132_s4 + $0x40] sm:$0xff]  ;;  %v3793_v3 = vld [vmem:[%s7132_s4 + $0x48] sm:$0xff]  ;;  %v3794_v4 = vld [vmem:[%s7132_s4 + $0x50] sm:$0xff] }
  0x21   : > { %v5847_v5 = vld [vmem:[%s5641_s24] sm:$0xff]   ;;  %v3795_v6 = vld [vmem:[%s7132_s4 + $0x58] sm:$0xff]  ;;  %v3797_v8 = vld [vmem:[%s7132_s4 + $0x68] sm:$0xff] }
  0x22   : > { %v3796_v7 = vld [vmem:[%s7132_s4 + $0x60] sm:$0xff]  ;;  %v3798_v9 = vld [vmem:[%s7132_s4 + $0x70] sm:$0xff]  ;;  %v5871_v10 = vld [vmem:[%s5641_s24 + $0x8] sm:$0xff]  }
  0x23   : > { %v3811_v30 = vld [vmem:[%s7132_s4 + $0xd8] sm:$0xff]  ;;  %v3814_v33 = vld [vmem:[%s7132_s4 + $0xf0] sm:$0xff] }
  0x24   : > { %3842 = vperm.xlu0 %5423, %v3788_v61   ;;  %3847 = vperm.xlu1 %5424, %v3789_v62  }
  0x26   : > { %4863 = vmatmul.mubr.msk.bf16.gmra.mrb[8].mxu0 %vm505_vm2, %v5435_v23  ;;  %4883 = vmatmul.mubr.msk.bf16.gmra.mrb[8].mxu1 %vm505_vm2, %v5436_v24 }
  0x27   : > { %4866 = vmatprep.mubr.msk.bf16.mxu0 %vm505_vm2, %v5437_v25  ;;  %4886 = vmatprep.mubr.msk.bf16.mxu1 %vm505_vm2, %v5438_v26 }
  0x28   : > { %3852 = vperm.xlu0 %5423, %v3790_v63   ;;  %3857 = vperm.xlu1 %5424, %v3791_v1   ;;  %v3817_v1 = vld [vmem:[%s7132_s4 + $0x108] sm:$0xff] }
  0x2c   : > { %3862 = vperm.xlu0 %5423, %v3792_v2   ;;  %3867 = vperm.xlu1 %5424, %v3793_v3   ;;  %v3818_v2 = vld [vmem:[%s7132_s4 + $0x110] sm:$0xff] }
  0x2e   : > { %4867 = vmatmul.mubr.msk.bf16.gmra.mrb[12].mxu0 %vm505_vm2, %v5439_v27  ;;  %4887 = vmatmul.mubr.msk.bf16.gmra.mrb[12].mxu1 %vm505_vm2, %v5440_v28 }
  0x2f   : > { %4870 = vmatprep.mubr.msk.bf16.mxu0 %vm505_vm2, %v5441_v29  ;;  %4892 = vmatprep.mubr.msk.bf16.mxu1 %vm505_vm2, %v5425_v11 }
  0x30   : > { %3872 = vperm.xlu0 %5423, %v3794_v4   ;;  %3877 = vperm.xlu1 %5424, %v3795_v6  }
  0x34   : > { %3882 = vperm.xlu0 %5423, %v3796_v7   ;;  %3887 = vperm.xlu1 %5424, %v3797_v8   ;;  %v6025_v8 = vld [vmem:[%s5641_s24 + $0x58] sm:$0xff]  }
  0x36   : > { %4871 = vmatmul.mubr.msk.bf16.gmra.mrb[16].mxu0 %vm505_vm2, %v5442_v31  ;;  %4893 = vmatmul.mubr.msk.bf16.vlgmr.msra.gmra.mrb[16].mxu1 %vm505_vm2, %v5427_v13 }
  0x37   : > { %4930 = vmatprep.mubr.msk.bf16.mxu0 %vm505_vm2, %v5425_v11  ;;  %4896 = vmatprep.mubr.msk.bf16.mxu1 %vm505_vm2, %v5429_v16  ;;  %v5874_v11 = vld [vmem:[%s5641_s24 + $0x10] sm:$0xff]  }
  0x38   : > { %4967 = vmatpush3.bf16.msra.mxu1 %v1579_v17  ;;  %3892 = vperm.xlu0 %5423, %v3798_v9   ;;  %v5901_v17 = vld [vmem:[%s5641_s24 + $0x20] sm:$0xff]  }
  0x39   : > { %5042 = vmatprep.subr.bf16.mxu1 %v2159_v32 }
  0x3e   : > { %4931 = vmatmul.mubr.msk.bf16.vlgmr.msra.gmra.mrb[20].mxu0 %vm505_vm2, %v5427_v13  ;;  %4897 = vmatmul.mubr.msk.bf16.gmra.mrb[20].mxu1 %vm505_vm2, %v5431_v19  ;;  %v3800_v13 = vld [vmem:[%s7132_s4 + $0x80] sm:$0xff] }
  0x3f   : > { %5005 = vmatpush3.bf16.msra.mxu0 %v1797_v15  ;;  %4900 = vmatprep.mubr.msk.bf16.mxu1 %vm505_vm2, %v5433_v21  ;;  %v3802_v15 = vld [vmem:[%s7132_s4 + $0x90] sm:$0xff] }
  0x40   : > { %4934 = vmatprep.mubr.msk.bf16.mxu0 %vm505_vm2, %v5429_v16  ;;  %5118 = vmatprep.subr.bf16.mxu0 %v2883_v34  ;;  %v5898_v16 = vld [vmem:[%s5641_s24 + $0x18] sm:$0xff]  }
  0x41   : > { %3902 = vperm.xlu0 %5423, %v3800_v13  }
  0x45   : > { %3912 = vperm.xlu0 %5423, %v3802_v15   ;;  %v6028_v15 = vld [vmem:[%s5641_s24 + $0x60] sm:$0xff]  }
  0x46   : > { %4935 = vmatmul.mubr.msk.bf16.gmra.mrb[24].mxu0 %vm505_vm2, %v5431_v19  ;;  %4901 = vmatmul.mubr.msk.bf16.gmra.mrb[24].mxu1 %vm505_vm2, %v5435_v23  ;;  %v3804_v19 = vld [vmem:[%s7132_s4 + $0xa0] sm:$0xff] }
  0x47   : > { %4938 = vmatprep.mubr.msk.bf16.mxu0 %vm505_vm2, %v5433_v21  ;;  %4904 = vmatprep.mubr.msk.bf16.mxu1 %vm505_vm2, %v5437_v25  ;;  %v3806_v21 = vld [vmem:[%s7132_s4 + $0xb0] sm:$0xff] }
  0x49   : > { %3922 = vperm.xlu0 %5423, %v3804_v19  }
  0x4d   : > { %3932 = vperm.xlu0 %5423, %v3806_v21  }
  0x4e   : > { %4939 = vmatmul.mubr.msk.bf16.gmra.mrb[28].mxu0 %vm505_vm2, %v5435_v23  ;;  %4905 = vmatmul.mubr.msk.bf16.gmra.mrb[28].mxu1 %vm505_vm2, %v5439_v27  ;;  %v5927_v23 = vld [vmem:[%s5641_s24 + $0x30] sm:$0xff]  }
  0x4f   : > { %4942 = vmatprep.mubr.msk.bf16.mxu0 %vm505_vm2, %v5437_v25  ;;  %4908 = vmatprep.mubr.msk.bf16.mxu1 %vm505_vm2, %v5441_v29  ;;  %v3808_v25 = vld [vmem:[%s7132_s4 + $0xc0] sm:$0xff] }
  0x51   : > { %3942 = vperm.xlu0 %5423, %v3808_v25  }
  0x56   : > { %4943 = vmatmul.mubr.msk.bf16.gmra.mrb[32].mxu0 %vm505_vm2, %v5439_v27  ;;  %4909 = vmatmul.mubr.msk.bf16.gmra.mrb[32].mxu1 %vm505_vm2, %v5442_v31  ;;  %v3810_v27 = vld [vmem:[%s7132_s4 + $0xd0] sm:$0xff] }
  0x57   : > { %4946 = vmatprep.mubr.msk.bf16.mxu0 %vm505_vm2, %v5441_v29  ;;  %4912 = vmatprep.mubr.msk.bf16.mxu1 %vm505_vm2, %v5566_v12  ;;  %v5953_v29 = vld [vmem:[%s5641_s24 + $0x40] sm:$0xff]  }
  0x58   : > { %3952 = vperm.xlu0 %5423, %v3810_v27  }
  0x5e   : > { %4947 = vmatmul.mubr.msk.bf16.gmra.mrb[36].mxu0 %vm505_vm2, %v5442_v31  ;;  %4913 = vmatmul.mubr.msk.bf16.gmra.mrb[36].mxu1 %vm505_vm2, %v5573_v14  ;;  %v3812_v31 = vld [vmem:[%s7132_s4 + $0xe0] sm:$0xff] }
  0x5f   : > { %4950 = vmatprep.mubr.msk.bf16.mxu0 %vm505_vm2, %v5566_v12  ;;  %4916 = vmatprep.mubr.msk.bf16.mxu1 %vm505_vm2, %v5582_v18  ;;  %v3799_v12 = vld [vmem:[%s7132_s4 + $0x78] sm:$0xff] }
  0x60   : > { %3897 = vperm.xlu1 %5424, %v3799_v12   ;;  %3962 = vperm.xlu0 %5423, %v3812_v31  }
  0x64   : > { %3972 = vperm.xlu0 %5423, %v3814_v33  }
  0x66   : > { %4951 = vmatmul.mubr.msk.bf16.gmra.mrb[40].mxu0 %vm505_vm2, %v5573_v14  ;;  %4917 = vmatmul.mubr.msk.bf16.gmra.mrb[40].mxu1 %vm505_vm2, %v5432_v20  ;;  %v3801_v14 = vld [vmem:[%s7132_s4 + $0x88] sm:$0xff] }
  0x67   : > { %4954 = vmatprep.mubr.msk.bf16.mxu0 %vm505_vm2, %v5582_v18  ;;  %4920 = vmatprep.mubr.msk.bf16.mxu1 %vm505_vm2, %v5434_v22  ;;  %v3803_v18 = vld [vmem:[%s7132_s4 + $0x98] sm:$0xff] }
  0x68   : > { %3907 = vperm.xlu1 %5424, %v3801_v14  }
  0x6c   : > { %3917 = vperm.xlu1 %5424, %v3803_v18  }
  0x6e   : > { %4955 = vmatmul.mubr.msk.bf16.gmra.mrb[44].mxu0 %vm505_vm2, %v5432_v20  ;;  %4921 = vmatmul.mubr.msk.bf16.gmra.mrb[44].mxu1 %vm505_vm2, %v5436_v24  ;;  %v3805_v20 = vld [vmem:[%s7132_s4 + $0xa8] sm:$0xff] }
  0x6f   : > { %4958 = vmatprep.mubr.msk.bf16.mxu0 %vm505_vm2, %v5434_v22  ;;  %4924 = vmatprep.mubr.msk.bf16.mxu1 %vm505_vm2, %v5438_v26  ;;  %v5924_v22 = vld [vmem:[%s5641_s24 + $0x28] sm:$0xff]  }
  0x70   : > { %3927 = vperm.xlu1 %5424, %v3805_v20  }
  0x76   : > { %4959 = vmatmul.mubr.msk.bf16.gmra.mrb[48].mxu0 %vm505_vm2, %v5436_v24  ;;  %4925 = vmatmul.mubr.msk.bf16.gmra.mrb[48].mxu1 %vm505_vm2, %v5440_v28  ;;  %v3807_v24 = vld [vmem:[%s7132_s4 + $0xb8] sm:$0xff] }
  0x77   : > { %4962 = vmatprep.mubr.msk.bf16.mxu0 %vm505_vm2, %v5438_v26  ;;  %4968 = vmatprep.mubr.msk.bf16.mxu1 %vm505_vm2, %v5670_v35  ;;  %v3809_v26 = vld [vmem:[%s7132_s4 + $0xc8] sm:$0xff] }
  0x78   : > { %3937 = vperm.xlu1 %5424, %v3807_v24  }
  0x7c   : > { %3947 = vperm.xlu1 %5424, %v3809_v26  }
  0x7e   : > { %4963 = vmatmul.mubr.msk.bf16.gmra.mrb[52].mxu0 %vm505_vm2, %v5440_v28  ;;  %4969 = vmatmul.mubr.msk.bf16.vlgmr.msra.gmra.mrb[16].mxu1 %vm505_vm2, %v5681_v37  ;;  %v5950_v28 = vld [vmem:[%s5641_s24 + $0x38] sm:$0xff]  }
  0x7f   : > { %5006 = vmatprep.mubr.msk.bf16.mxu0 %vm505_vm2, %v5670_v35  ;;  %4972 = vmatprep.mubr.msk.bf16.mxu1 %vm505_vm2, %v5684_v38 }
  0x80   : > { %5043 = vmatpush3.bf16.msra.mxu1 %v2159_v32  ;;  %3957 = vperm.xlu1 %5424, %v3811_v30   ;;  %v3813_v32 = vld [vmem:[%s7132_s4 + $0xe8] sm:$0xff] }
  0x81   : > { %5080 = vmatprep.subr.bf16.mxu1 %v5687_v39 }
  0x84   : > { %3967 = vperm.xlu1 %5424, %v3813_v32  }
  0x86   : > { %5007 = vmatmul.mubr.msk.bf16.vlgmr.msra.gmra.mrb[56].mxu0 %vm505_vm2, %v5681_v37  ;;  %4973 = vmatmul.mubr.msk.bf16.gmra.mrb[20].mxu1 %vm505_vm2, %v5701_v41 }
  0x87   : > { %5119 = vmatpush3.bf16.msra.mxu0 %v2883_v34  ;;  %4976 = vmatprep.mubr.msk.bf16.mxu1 %vm505_vm2, %v5704_v42 }
  0x88   : > { %5010 = vmatprep.mubr.msk.bf16.mxu0 %vm505_vm2, %v5684_v38  ;;  %5156 = vmatprep.subr.bf16.mxu0 %v5707_v43 }
  0x8e   : > { %5011 = vmatmul.mubr.msk.bf16.gmra.mrb[60].mxu0 %vm505_vm2, %v5701_v41  ;;  %4977 = vmatmul.mubr.msk.bf16.gmra.mrb[24].mxu1 %vm505_vm2, %v5719_v44 }
  0x8f   : > { %5014 = vmatprep.mubr.msk.bf16.mxu0 %vm505_vm2, %v5704_v42  ;;  %4980 = vmatprep.mubr.msk.bf16.mxu1 %vm505_vm2, %v5722_v45 }
  0x96   : > { %5015 = vmatmul.mubr.msk.bf16.gmra.mrb[64].mxu0 %vm505_vm2, %v5719_v44  ;;  %4981 = vmatmul.mubr.msk.bf16.gmra.mrb[28].mxu1 %vm505_vm2, %v5733_v46 }
  0x97   : > { %5018 = vmatprep.mubr.msk.bf16.mxu0 %vm505_vm2, %v5722_v45  ;;  %4984 = vmatprep.mubr.msk.bf16.mxu1 %vm505_vm2, %v5736_v47 }
  0x9e   : > { %5019 = vmatmul.mubr.msk.bf16.gmra.mrb[68].mxu0 %vm505_vm2, %v5733_v46  ;;  %4985 = vmatmul.mubr.msk.bf16.gmra.mrb[32].mxu1 %vm505_vm2, %v5747_v48 }
  0x9f   : > { %5022 = vmatprep.mubr.msk.bf16.mxu0 %vm505_vm2, %v5736_v47  ;;  %4988 = vmatprep.mubr.msk.bf16.mxu1 %vm505_vm2, %v5750_v49 }
  0xa6   : > { %5023 = vmatmul.mubr.msk.bf16.gmra.mrb[72].mxu0 %vm505_vm2, %v5747_v48  ;;  %4989 = vmatmul.mubr.msk.bf16.gmra.mrb[36].mxu1 %vm505_vm2, %v5761_v50 }
  0xa7   : > { %5026 = vmatprep.mubr.msk.bf16.mxu0 %vm505_vm2, %v5750_v49  ;;  %4992 = vmatprep.mubr.msk.bf16.mxu1 %vm505_vm2, %v5764_v51 }
  0xae   : > { %5027 = vmatmul.mubr.msk.bf16.gmra.mrb[76].mxu0 %vm505_vm2, %v5761_v50  ;;  %4993 = vmatmul.mubr.msk.bf16.gmra.mrb[40].mxu1 %vm505_vm2, %v5775_v52 }
  0xaf   : > { %5030 = vmatprep.mubr.msk.bf16.mxu0 %vm505_vm2, %v5764_v51  ;;  %4996 = vmatprep.mubr.msk.bf16.mxu1 %vm505_vm2, %v5778_v53 }
  0xb6   : > { %5031 = vmatmul.mubr.msk.bf16.gmra.mrb[80].mxu0 %vm505_vm2, %v5775_v52  ;;  %4997 = vmatmul.mubr.msk.bf16.gmra.mrb[44].mxu1 %vm505_vm2, %v5798_v58 }
  0xb7   : > { %5034 = vmatprep.mubr.msk.bf16.mxu0 %vm505_vm2, %v5778_v53  ;;  %5000 = vmatprep.mubr.msk.bf16.mxu1 %vm505_vm2, %v5801_v59 }
  0xbe   : > { %5035 = vmatmul.mubr.msk.bf16.gmra.mrb[84].mxu0 %vm505_vm2, %v5798_v58  ;;  %5001 = vmatmul.mubr.msk.bf16.gmra.mrb[48].mxu1 %vm505_vm2, %v5824_v0 }
  0xbf   : > { %5038 = vmatprep.mubr.msk.bf16.mxu0 %vm505_vm2, %v5801_v59  ;;  %5044 = vmatprep.mubr.msk.bf16.mxu1 %vm505_vm2, %v5670_v35 }
  0xc6   : > { %5039 = vmatmul.mubr.msk.bf16.gmra.mrb[88].mxu0 %vm505_vm2, %v5824_v0  ;;  %5045 = vmatmul.mubr.msk.bf16.vlgmr.msra.gmra.mrb[52].mxu1 %vm505_vm2, %v5681_v37  ;;  %v5976_v37 = vld [vmem:[%s5641_s24 + $0x48] sm:$0xff]  }
  0xc7   : > { %5120 = vmatprep.mubr.msk.bf16.mxu0 %vm505_vm2, %v5847_v5  ;;  %5048 = vmatprep.mubr.msk.bf16.mxu1 %vm505_vm2, %v5684_v38 }
  0xc8   : > { %5081 = vmatpush3.bf16.msra.mxu1 %v5687_v39 }
  0xce   : > { %5121 = vmatmul.mubr.msk.bf16.vlgmr.msra.gmra.mrb[92].mxu0 %vm505_vm2, %v5871_v10  ;;  %5049 = vmatmul.mubr.msk.bf16.gmra.mrb[56].mxu1 %vm505_vm2, %v5701_v41 }
  0xcf   : > { %5157 = vmatpush3.bf16.msra.mxu0 %v5707_v43  ;;  %5052 = vmatprep.mubr.msk.bf16.mxu1 %vm505_vm2, %v5704_v42  ;;  %v5981_v42 = vld [vmem:[%s5641_s24 + $0x50] sm:$0xff]  }
  0xd0   : > { %5124 = vmatprep.mubr.msk.bf16.mxu0 %vm505_vm2, %v5874_v11 }
  0xd6   : > { %5125 = vmatmul.mubr.msk.bf16.gmra.mrb[96].mxu0 %vm505_vm2, %v5898_v16  ;;  %5053 = vmatmul.mubr.msk.bf16.gmra.mrb[60].mxu1 %vm505_vm2, %v5719_v44 }
  0xd7   : > { %5128 = vmatprep.mubr.msk.bf16.mxu0 %vm505_vm2, %v5901_v17  ;;  %5056 = vmatprep.mubr.msk.bf16.mxu1 %vm505_vm2, %v5722_v45 }
  0xde   : > { %5129 = vmatmul.mubr.msk.bf16.gmra.mrb[100].mxu0 %vm505_vm2, %v5924_v22  ;;  %5057 = vmatmul.mubr.msk.bf16.gmra.mrb[64].mxu1 %vm505_vm2, %v5733_v46 }
  0xdf   : > { %5132 = vmatprep.mubr.msk.bf16.mxu0 %vm505_vm2, %v5927_v23  ;;  %5060 = vmatprep.mubr.msk.bf16.mxu1 %vm505_vm2, %v5736_v47  ;;  %v3815_v47 = vld [vmem:[%s7132_s4 + $0xf8] sm:$0xff] }
  0xe0   : > { %3977 = vperm.xlu1 %5424, %v3815_v47  }
  0xe4   : > { %3987 = vperm.xlu1 %5424, %v3817_v1  }
  0xe6   : > { %5133 = vmatmul.mubr.msk.bf16.gmra.mrb[104].mxu0 %vm505_vm2, %v5950_v28  ;;  %5061 = vmatmul.mubr.msk.bf16.gmra.mrb[68].mxu1 %vm505_vm2, %v5747_v48  ;;  %v3816_v48 = vld [vmem:[%s7132_s4 + $0x100] sm:$0xff] }
  0xe7   : > { %5136 = vmatprep.mubr.msk.bf16.mxu0 %vm505_vm2, %v5953_v29  ;;  %5064 = vmatprep.mubr.msk.bf16.mxu1 %vm505_vm2, %v5750_v49 }
  0xe8   : > { %3982 = vperm.xlu0 %5423, %v3816_v48  }
  0xe9   : > { %v4856_v34 = vpop.f32.mrb[0].mxu0  ;;  %v4876_v36 = vpop.f32.mrb[0].mxu1 }
  0xea   : > { %v601_v35 = vpop.f32.mrb[1].mxu0  ;;  %v784_v38 = vrot.slane %v4856_v34, 1  ;;  %v824_v40 = vrot.slane %v4876_v36, 1  ;;  %v5978_v41 = vpop.f32.mrb[1].mxu1 }
  0xeb   : > { %v4857_v39 = vpop.f32.mrb[2].mxu0  ;;  %v820_v45 = vrot.slane %v5978_v41, 1  ;;  %v4877_v46 = vpop.f32.mrb[2].mxu1  ;;  %v781_v49 = vrot.slane %v601_v35, 1 }
  0xec   : > { %v786_v43 = vrot.slane %v4857_v39, 1  ;;  %v604_v44 = vpop.f32.mrb[3].mxu0  ;;  %v826_v55 = vrot.slane %v4877_v46, 1  ;;  %v684_v56 = vpop.f32.mrb[3].mxu1  ;;  %3992 = vperm.xlu0 %5423, %v3818_v2   ;;  %v6066_v46 = vld [vmem:[%s5641_s24 + $0x68] sm:$0xff]  }
  0xed   : > { %v782_v54 = vrot.slane %v604_v44, 1  ;;  %v822_v60 = vrot.slane %v684_v56, 1 }
  0xee   : > { %v5991_v57 = vsel %vm780_vm3, %v784_v38, %v786_v43  ;;  %5137 = vmatmul.mubr.msk.bf16.gmra.mrb[108].mxu0 %vm505_vm2, %v5976_v37  ;;  %5065 = vmatmul.mubr.msk.bf16.gmra.mrb[72].mxu1 %vm505_vm2, %v5761_v50  ;;  %v6004_v63 = vsel %vm780_vm3, %v824_v40, %v826_v55 }
  0xef   : > { %v5996_v61 = vsel %vm780_vm3, %v781_v49, %v782_v54  ;;  %v5999_v62 = vsel %vm780_vm3, %v782_v54, %v784_v38  ;;  %5140 = vmatprep.mubr.msk.bf16.mxu0 %vm505_vm2, %v5981_v42  ;;  %v6017_v3 = vsel %vm780_vm3, %v820_v45, %v822_v60  ;;  %v6020_v50 = vsel %vm780_vm3, %v822_v60, %v824_v40  ;;  %v6069_v54 = vld [vmem:[%s5641_s24 + $0x70] sm:$0xff]  }
  0xf0   : > { %5068 = vmatprep.mubr.msk.bf16.mxu1 %vm505_vm2, %v5764_v51  ;;  %v3819_v51 = vld [vmem:[%s7132_s4 + $0x118] sm:$0xff] }
  0xf1   : > { %v4860_v4 = vpop.f32.mrb[4].mxu0  ;;  %v4880_v6 = vpop.f32.mrb[4].mxu1  ;;  %3997 = vperm.xlu1 %5424, %v3819_v51  }
  0xf2   : > { %v617_v7 = vpop.f32.mrb[5].mxu0  ;;  %v832_v9 = vrot.slane %v4880_v6, 1  ;;  %v697_v13 = vpop.f32.mrb[5].mxu1  ;;  %v792_v18 = vrot.slane %v4860_v4, 1 }
  0xf3   : > { %v788_v12 = vrot.slane %v617_v7, 1  ;;  %v4861_v14 = vpop.f32.mrb[6].mxu0  ;;  %v828_v19 = vrot.slane %v697_v13, 1  ;;  %v4881_v24 = vpop.f32.mrb[6].mxu1 }
  0xf4   : > { %v794_v20 = vrot.slane %v4861_v14, 1  ;;  %v620_v21 = vpop.f32.mrb[7].mxu0  ;;  %v834_v27 = vrot.slane %v4881_v24, 1  ;;  %v700_v30 = vpop.f32.mrb[7].mxu1 }
  0xf5   : > { %v6034_v25 = vsel %vm780_vm3, %v786_v43, %v788_v12  ;;  %v790_v26 = vrot.slane %v620_v21, 1  ;;  %v6037_v31 = vsel %vm780_vm3, %v826_v55, %v828_v19  ;;  %v830_v33 = vrot.slane %v700_v30, 1 }
  0xf6   : > { %v6040_v32 = vsel %vm780_vm3, %v792_v18, %v794_v20  ;;  %5141 = vmatmul.mubr.msk.bf16.gmra.mrb[112].mxu0 %vm505_vm2, %v6025_v8  ;;  %5069 = vmatmul.mubr.msk.bf16.gmra.mrb[76].mxu1 %vm505_vm2, %v5775_v52  ;;  %v6053_v36 = vsel %vm780_vm3, %v832_v9, %v834_v27 }
  0xf7   : > { %v6045_v34 = vsel %vm780_vm3, %v788_v12, %v790_v26  ;;  %v6048_v35 = vsel %vm780_vm3, %v790_v26, %v792_v18  ;;  %5144 = vmatprep.mubr.msk.bf16.mxu0 %vm505_vm2, %v6028_v15  ;;  %v6058_v38 = vsel %vm780_vm3, %v828_v19, %v830_v33  ;;  %v6061_v39 = vsel %vm780_vm3, %v830_v33, %v832_v9 }
  0xf8   : > { %5072 = vmatprep.mubr.msk.bf16.mxu1 %vm505_vm2, %v5778_v53 }
  0xf9   : > { %v4864_v40 = vpop.f32.mrb[8].mxu0  ;;  %v4884_v43 = vpop.f32.mrb[8].mxu1 }
  0xfa   : > { %v633_v44 = vpop.f32.mrb[9].mxu0  ;;  %v840_v52 = vrot.slane %v4884_v43, 1  ;;  %v713_v48 = vpop.f32.mrb[9].mxu1  ;;  %v800_v55 = vrot.slane %v4864_v40, 1  ;;  %v6107_v43 = vld [vmem:[%s5641_s24 + $0x80] sm:$0xff]  }
  0xfb   : > { %v796_v47 = vrot.slane %v633_v44, 1  ;;  %v4865_v49 = vpop.f32.mrb[10].mxu0  ;;  %v836_v56 = vrot.slane %v713_v48, 1  ;;  %v4885_v2 = vpop.f32.mrb[10].mxu1 }
  0xfc   : > { %v802_v60 = vrot.slane %v4865_v49, 1  ;;  %v636_v1 = vpop.f32.mrb[11].mxu0  ;;  %v842_v6 = vrot.slane %v4885_v2, 1  ;;  %v716_v7 = vpop.f32.mrb[11].mxu1 }
  0xfd   : > { %v6072_v4 = vsel %vm780_vm3, %v794_v20, %v796_v47  ;;  %v798_v53 = vrot.slane %v636_v1, 1  ;;  %v6075_v9 = vsel %vm780_vm3, %v834_v27, %v836_v56  ;;  %v838_v13 = vrot.slane %v716_v7, 1  ;;  %v6104_v27 = vld [vmem:[%s5641_s24 + $0x78] sm:$0xff]  }
  0xfe   : > { %v6078_v12 = vsel %vm780_vm3, %v800_v55, %v802_v60  ;;  %5145 = vmatmul.mubr.msk.bf16.gmra.mrb[116].mxu0 %vm505_vm2, %v6066_v46  ;;  %5073 = vmatmul.mubr.msk.bf16.gmra.mrb[80].mxu1 %vm505_vm2, %v5798_v58  ;;  %v6091_v19 = vsel %vm780_vm3, %v840_v52, %v842_v6 }
  0xff   : > { %v6083_v14 = vsel %vm780_vm3, %v796_v47, %v798_v53  ;;  %v6086_v18 = vsel %vm780_vm3, %v798_v53, %v800_v55  ;;  %5148 = vmatprep.mubr.msk.bf16.mxu0 %vm505_vm2, %v6069_v54  ;;  %v6096_v20 = vsel %vm780_vm3, %v836_v56, %v838_v13  ;;  %v6099_v21 = vsel %vm780_vm3, %v838_v13, %v840_v52 }
 0x100   : > { %5076 = vmatprep.mubr.msk.bf16.mxu1 %vm505_vm2, %v5801_v59 }
 0x101   : > { %v4868_v24 = vpop.f32.mrb[12].mxu0  ;;  %v4888_v51 = vpop.f32.mrb[12].mxu1 }
 0x102   : > { %v649_v26 = vpop.f32.mrb[13].mxu0  ;;  %v848_v58 = vrot.slane %v4888_v51, 1  ;;  %v729_v33 = vpop.f32.mrb[13].mxu1  ;;  %v808_v44 = vrot.slane %v4868_v24, 1 }
 0x103   : > { %v804_v30 = vrot.slane %v649_v26, 1  ;;  %v4869_v40 = vpop.f32.mrb[14].mxu0  ;;  %v844_v47 = vrot.slane %v729_v33, 1  ;;  %v6109_v52 = vpop.f32.mrb[14].mxu1 }
 0x104   : > { %v810_v48 = vrot.slane %v4869_v40, 1  ;;  %v652_v49 = vpop.f32.mrb[15].mxu0  ;;  %v7135_v56 = vrot.slane %v6109_v52, 1  ;;  %v732_v1 = vpop.f32.mrb[15].mxu1 }
 0x105   : > { %v6112_v55 = vsel %vm780_vm3, %v802_v60, %v804_v30  ;;  %v806_v59 = vrot.slane %v652_v49, 1  ;;  %v6116_v2 = vsel %vm780_vm3, %v842_v6, %v844_v47  ;;  %v846_v7 = vrot.slane %v732_v1, 1 }
 0x106   : > { %v6119_v53 = vsel %vm780_vm3, %v808_v44, %v810_v48  ;;  %5149 = vmatmul.mubr.msk.bf16.gmra.mrb[120].mxu0 %vm505_vm2, %v6104_v27  ;;  %5077 = vmatmul.mubr.msk.bf16.gmra.mrb[84].mxu1 %vm505_vm2, %v5824_v0  ;;  %v6134_v6 = vsel %vm780_vm3, %v848_v58, %v7135_v56  ;;  %v6147_v0 = vld [vmem:[%s5641_s24 + $0x88] sm:$0xff]  }
 0x107   : > { %v6124_v13 = vsel %vm780_vm3, %v804_v30, %v806_v59  ;;  %v6127_v60 = vsel %vm780_vm3, %v806_v59, %v808_v44  ;;  %5152 = vmatprep.mubr.msk.bf16.mxu0 %vm505_vm2, %v6107_v43  ;;  %v6139_v24 = vsel %vm780_vm3, %v844_v47, %v846_v7  ;;  %v6142_v51 = vsel %vm780_vm3, %v846_v7, %v848_v58 }
 0x108   : > { %7137 = vst [vmem:[#allocation2_spill] sm:$0xff] %v6142_v51  ;;  %5082 = vmatprep.mubr.msk.bf16.mxu1 %vm505_vm2, %v5847_v5 }
 0x109   : > { %v4872_v26 = vpop.f32.mrb[16].mxu0 }
 0x10a   : > { %v665_v30 = vpop.f32.mrb[17].mxu0  ;;  %v816_v44 = vrot.slane %v4872_v26, 1 }
 0x10b   : > { %v812_v33 = vrot.slane %v665_v30, 1  ;;  %v4873_v40 = vpop.f32.mrb[18].mxu0 }
 0x10c   : > { %v818_v49 = vrot.slane %v4873_v40, 1  ;;  %v668_v59 = vpop.f32.mrb[19].mxu0 }
 0x10d   : > { %v6150_v1 = vsel %vm780_vm3, %v810_v48, %v812_v33  ;;  %v814_v47 = vrot.slane %v668_v59, 1 }
 0x10e   : > { %v6153_v56 = vsel %vm780_vm3, %v816_v44, %v818_v49  ;;  %v6158_v58 = vsel %vm780_vm3, %v818_v49, %v820_v45  ;;  %5153 = vmatmul.mubr.msk.bf16.gmra.mrb[124].mxu0 %vm505_vm2, %v6147_v0  ;;  %5083 = vmatmul.mubr.msk.bf16.vlgmr.msra.gmra.mrb[16].mxu1 %vm505_vm2, %v5871_v10 }
 0x10f   : > { %v6163_v7 = vsel %vm780_vm3, %v812_v33, %v814_v47  ;;  %v6166_v26 = vsel %vm780_vm3, %v814_v47, %v816_v44  ;;  %5158 = vmatprep.mubr.msk.bf16.mxu0 %vm505_vm2, %v5847_v5  ;;  %5086 = vmatprep.mubr.msk.bf16.mxu1 %vm505_vm2, %v5874_v11 }
 0x111   : > { %v4932_v41 = vpop.f32.mrb[20].mxu0 }
 0x112   : > { %v1108_v45 = vpop.f32.mrb[21].mxu0  ;;  %v1291_v30 = vrot.slane %v4932_v41, 2 }
 0x113   : > { %v4933_v48 = vpop.f32.mrb[22].mxu0  ;;  %v1288_v49 = vrot.slane %v1108_v45, 2 }
 0x114   : > { %v1293_v40 = vrot.slane %v4933_v48, 2  ;;  %v1111_v33 = vpop.f32.mrb[23].mxu0 }
 0x115   : > { %v1289_v59 = vrot.slane %v1111_v33, 2 }
 0x116   : > { %v1294_v44 = vsel %vm1287_vm4, %v1291_v30, %v1293_v40  ;;  %5159 = vmatmul.mubr.msk.bf16.vlgmr.msra.gmra.mrb[128].mxu0 %vm505_vm2, %v5871_v10  ;;  %5087 = vmatmul.mubr.msk.bf16.gmra.mrb[20].mxu1 %vm505_vm2, %v5898_v16 }
 0x117   : > { %v6178_v47 = vadd.f32 %v1294_v44, %v5991_v57  ;;  %v1290_v5 = vsel %vm1287_vm4, %v1288_v49, %v1289_v59  ;;  %v1292_v51 = vsel %vm1287_vm4, %v1289_v59, %v1291_v30  ;;  %5162 = vmatprep.mubr.msk.bf16.mxu0 %vm505_vm2, %v5874_v11  ;;  %5090 = vmatprep.mubr.msk.bf16.mxu1 %vm505_vm2, %v5901_v17 }
 0x118   : > { %v6187_v41 = vadd.f32 %v1290_v5, %v5996_v61  ;;  %v6190_v45 = vadd.f32 %v1292_v51, %v5999_v62 }
 0x119   : > { %7138 = vst [vmem:[#allocation3_spill] sm:$0xff] %v6178_v47  ;;  %v4936_v10 = vpop.f32.mrb[24].mxu0 }
 0x11a   : > { %v1124_v57 = vpop.f32.mrb[25].mxu0  ;;  %v1299_v30 = vrot.slane %v4936_v10, 2 }
 0x11b   : > { %v1295_v48 = vrot.slane %v1124_v57, 2  ;;  %v4937_v33 = vpop.f32.mrb[26].mxu0 }
 0x11c   : > { %v1301_v49 = vrot.slane %v4937_v33, 2  ;;  %v1127_v59 = vpop.f32.mrb[27].mxu0 }
 0x11d   : > { %v1296_v44 = vsel %vm1287_vm4, %v1293_v40, %v1295_v48  ;;  %v1297_v47 = vrot.slane %v1127_v59, 2 }
 0x11e   : > { %v6196_v11 = vadd.f32 %v1296_v44, %v6034_v25  ;;  %v1302_v61 = vsel %vm1287_vm4, %v1299_v30, %v1301_v49  ;;  %5163 = vmatmul.mubr.msk.bf16.gmra.mrb[132].mxu0 %vm505_vm2, %v5898_v16  ;;  %5091 = vmatmul.mubr.msk.bf16.gmra.mrb[24].mxu1 %vm505_vm2, %v5924_v22 }
 0x11f   : > { %v6202_v62 = vadd.f32 %v1302_v61, %v6040_v32  ;;  %v1298_v51 = vsel %vm1287_vm4, %v1295_v48, %v1297_v47  ;;  %v1300_v5 = vsel %vm1287_vm4, %v1297_v47, %v1299_v30  ;;  %5166 = vmatprep.mubr.msk.bf16.mxu0 %vm505_vm2, %v5901_v17  ;;  %5094 = vmatprep.mubr.msk.bf16.mxu1 %vm505_vm2, %v5927_v23 }
 0x120   : > { %v6211_v25 = vadd.f32 %v1298_v51, %v6045_v34  ;;  %v6214_v40 = vadd.f32 %v1300_v5, %v6048_v35 }
 0x121   : > { %v4940_v16 = vpop.f32.mrb[28].mxu0 }
 0x122   : > { %v1140_v32 = vpop.f32.mrb[29].mxu0  ;;  %v1307_v47 = vrot.slane %v4940_v16, 2 }
 0x123   : > { %v1303_v10 = vrot.slane %v1140_v32, 2  ;;  %v4941_v57 = vpop.f32.mrb[30].mxu0 }
 0x124   : > { %v1309_v48 = vrot.slane %v4941_v57, 2  ;;  %v1143_v33 = vpop.f32.mrb[31].mxu0 }
 0x125   : > { %v1304_v30 = vsel %vm1287_vm4, %v1301_v49, %v1303_v10  ;;  %v1305_v59 = vrot.slane %v1143_v33, 2 }
 0x126   : > { %v6220_v17 = vadd.f32 %v1304_v30, %v6072_v4  ;;  %v1310_v34 = vsel %vm1287_vm4, %v1307_v47, %v1309_v48  ;;  %5167 = vmatmul.mubr.msk.bf16.gmra.mrb[136].mxu0 %vm505_vm2, %v5924_v22  ;;  %5095 = vmatmul.mubr.msk.bf16.gmra.mrb[28].mxu1 %vm505_vm2, %v5950_v28 }
 0x127   : > { %v6226_v35 = vadd.f32 %v1310_v34, %v6078_v12  ;;  %v1306_v44 = vsel %vm1287_vm4, %v1303_v10, %v1305_v59  ;;  %v1308_v61 = vsel %vm1287_vm4, %v1305_v59, %v1307_v47  ;;  %5170 = vmatprep.mubr.msk.bf16.mxu0 %vm505_vm2, %v5927_v23  ;;  %5098 = vmatprep.mubr.msk.bf16.mxu1 %vm505_vm2, %v5953_v29 }
 0x128   : > { %v6235_v4 = vadd.f32 %v1306_v44, %v6083_v14  ;;  %v6238_v49 = vadd.f32 %v1308_v61, %v6086_v18 }
 0x129   : > { %v4944_v22 = vpop.f32.mrb[32].mxu0 }
 0x12a   : > { %v1156_v12 = vpop.f32.mrb[33].mxu0  ;;  %v1315_v16 = vrot.slane %v4944_v22, 2 }
 0x12b   : > { %v1311_v51 = vrot.slane %v1156_v12, 2  ;;  %v4945_v5 = vpop.f32.mrb[34].mxu0 }
 0x12c   : > { %v1317_v32 = vrot.slane %v4945_v5, 2  ;;  %v1159_v10 = vpop.f32.mrb[35].mxu0 }
 0x12d   : > { %v1312_v57 = vsel %vm1287_vm4, %v1309_v48, %v1311_v51  ;;  %v1313_v47 = vrot.slane %v1159_v10, 2 }
 0x12e   : > { %v6244_v23 = vadd.f32 %v1312_v57, %v6112_v55  ;;  %v1318_v14 = vsel %vm1287_vm4, %v1315_v16, %v1317_v32  ;;  %5171 = vmatmul.mubr.msk.bf16.gmra.mrb[140].mxu0 %vm505_vm2, %v5950_v28  ;;  %5099 = vmatmul.mubr.msk.bf16.gmra.mrb[32].mxu1 %vm505_vm2, %v5976_v37 }
 0x12f   : > { %v6250_v18 = vadd.f32 %v1318_v14, %v6119_v53  ;;  %v1314_v33 = vsel %vm1287_vm4, %v1311_v51, %v1313_v47  ;;  %v1316_v30 = vsel %vm1287_vm4, %v1313_v47, %v1315_v16  ;;  %5174 = vmatprep.mubr.msk.bf16.mxu0 %vm505_vm2, %v5953_v29  ;;  %5102 = vmatprep.mubr.msk.bf16.mxu1 %vm505_vm2, %v5981_v42 }
 0x130   : > { %v6259_v55 = vadd.f32 %v1314_v33, %v6124_v13  ;;  %v6262_v48 = vadd.f32 %v1316_v30, %v6127_v60 }
 0x131   : > { %v4948_v28 = vpop.f32.mrb[36].mxu0 }
 0x132   : > { %v1172_v53 = vpop.f32.mrb[37].mxu0  ;;  %v1323_v44 = vrot.slane %v4948_v28, 2 }
 0x133   : > { %v1319_v59 = vrot.slane %v1172_v53, 2  ;;  %v4949_v34 = vpop.f32.mrb[38].mxu0 }
 0x134   : > { %v1325_v61 = vrot.slane %v4949_v34, 2  ;;  %v1175_v22 = vpop.f32.mrb[39].mxu0 }
 0x135   : > { %v1320_v12 = vsel %vm1287_vm4, %v1317_v32, %v1319_v59  ;;  %v1321_v51 = vrot.slane %v1175_v22, 2 }
 0x136   : > { %v6268_v29 = vadd.f32 %v1320_v12, %v6150_v1  ;;  %v1326_v13 = vsel %vm1287_vm4, %v1323_v44, %v1325_v61  ;;  %5175 = vmatmul.mubr.msk.bf16.gmra.mrb[144].mxu0 %vm505_vm2, %v5976_v37  ;;  %5103 = vmatmul.mubr.msk.bf16.gmra.mrb[36].mxu1 %vm505_vm2, %v6025_v8 }
 0x137   : > { %v6274_v60 = vadd.f32 %v1326_v13, %v6153_v56  ;;  %v1322_v5 = vsel %vm1287_vm4, %v1319_v59, %v1321_v51  ;;  %v1324_v16 = vsel %vm1287_vm4, %v1321_v51, %v1323_v44  ;;  %5178 = vmatprep.mubr.msk.bf16.mxu0 %vm505_vm2, %v5981_v42  ;;  %5106 = vmatprep.mubr.msk.bf16.mxu1 %vm505_vm2, %v6028_v15 }
 0x138   : > { %v6283_v1 = vadd.f32 %v1322_v5, %v6163_v7  ;;  %v6286_v32 = vadd.f32 %v1324_v16, %v6166_v26 }
 0x139   : > { %v4952_v37 = vpop.f32.mrb[40].mxu0 }
 0x13a   : > { %v1188_v56 = vpop.f32.mrb[41].mxu0  ;;  %v1331_v47 = vrot.slane %v4952_v37, 2 }
 0x13b   : > { %v1327_v10 = vrot.slane %v1188_v56, 2  ;;  %v4953_v57 = vpop.f32.mrb[42].mxu0 }
 0x13c   : > { %v1333_v14 = vrot.slane %v4953_v57, 2  ;;  %v1191_v33 = vpop.f32.mrb[43].mxu0 }
 0x13d   : > { %v1328_v30 = vsel %vm1287_vm4, %v1325_v61, %v1327_v10  ;;  %v1329_v28 = vrot.slane %v1191_v33, 2 }
 0x13e   : > { %v6292_v42 = vadd.f32 %v1328_v30, %v6158_v58  ;;  %v1334_v7 = vsel %vm1287_vm4, %v1331_v47, %v1333_v14  ;;  %5179 = vmatmul.mubr.msk.bf16.gmra.mrb[148].mxu0 %vm505_vm2, %v6025_v8  ;;  %5107 = vmatmul.mubr.msk.bf16.gmra.mrb[40].mxu1 %vm505_vm2, %v6066_v46 }
 0x13f   : > { %v6298_v26 = vadd.f32 %v1334_v7, %v6004_v63  ;;  %v1330_v53 = vsel %vm1287_vm4, %v1327_v10, %v1329_v28  ;;  %v1332_v59 = vsel %vm1287_vm4, %v1329_v28, %v1331_v47  ;;  %5182 = vmatprep.mubr.msk.bf16.mxu0 %vm505_vm2, %v6028_v15  ;;  %5110 = vmatprep.mubr.msk.bf16.mxu1 %vm505_vm2, %v6069_v54 }
 0x140   : > { %v6307_v58 = vadd.f32 %v1330_v53, %v6017_v3  ;;  %v6310_v34 = vadd.f32 %v1332_v59, %v6020_v50 }
 0x141   : > { %v4956_v63 = vpop.f32.mrb[44].mxu0 }
 0x142   : > { %v1204_v8 = vpop.f32.mrb[45].mxu0  ;;  %v1339_v22 = vrot.slane %v4956_v63, 2 }
 0x143   : > { %v1335_v44 = vrot.slane %v1204_v8, 2  ;;  %v4957_v61 = vpop.f32.mrb[46].mxu0 }
 0x144   : > { %v1341_v12 = vrot.slane %v4957_v61, 2  ;;  %v1207_v51 = vpop.f32.mrb[47].mxu0 }
 0x145   : > { %v1336_v13 = vsel %vm1287_vm4, %v1333_v14, %v1335_v44  ;;  %v1337_v5 = vrot.slane %v1207_v51, 2 }
 0x146   : > { %v6316_v15 = vadd.f32 %v1336_v13, %v6037_v31  ;;  %v1342_v3 = vsel %vm1287_vm4, %v1339_v22, %v1341_v12  ;;  %5183 = vmatmul.mubr.msk.bf16.gmra.mrb[152].mxu0 %vm505_vm2, %v6066_v46  ;;  %5111 = vmatmul.mubr.msk.bf16.gmra.mrb[44].mxu1 %vm505_vm2, %v6104_v27  ;;  %v7139_v13 = vrot.slane %v6109_v52, 1 }
 0x147   : > { %v6322_v50 = vadd.f32 %v1342_v3, %v6053_v36  ;;  %v1338_v16 = vsel %vm1287_vm4, %v1335_v44, %v1337_v5  ;;  %v1340_v37 = vsel %vm1287_vm4, %v1337_v5, %v1339_v22  ;;  %5186 = vmatprep.mubr.msk.bf16.mxu0 %vm505_vm2, %v6069_v54  ;;  %5114 = vmatprep.mubr.msk.bf16.mxu1 %vm505_vm2, %v6107_v43 }
 0x148   : > { %v6331_v31 = vadd.f32 %v1338_v16, %v6058_v38  ;;  %v6334_v56 = vadd.f32 %v1340_v37, %v6061_v39 }
 0x149   : > { %v4960_v36 = vpop.f32.mrb[48].mxu0 }
 0x14a   : > { %v1220_v46 = vpop.f32.mrb[49].mxu0  ;;  %v1347_v47 = vrot.slane %v4960_v36, 2 }
 0x14b   : > { %v1343_v10 = vrot.slane %v1220_v46, 2  ;;  %v4961_v57 = vpop.f32.mrb[50].mxu0 }
 0x14c   : > { %v1349_v14 = vrot.slane %v4961_v57, 2  ;;  %v1223_v33 = vpop.f32.mrb[51].mxu0 }
 0x14d   : > { %v1344_v30 = vsel %vm1287_vm4, %v1341_v12, %v1343_v10  ;;  %v1345_v28 = vrot.slane %v1223_v33, 2 }
 0x14e   : > { %v6340_v54 = vadd.f32 %v1344_v30, %v6075_v9  ;;  %v1350_v38 = vsel %vm1287_vm4, %v1347_v47, %v1349_v14  ;;  %5187 = vmatmul.mubr.msk.bf16.gmra.mrb[156].mxu0 %vm505_vm2, %v6104_v27  ;;  %5115 = vmatmul.mubr.msk.bf16.gmra.mrb[48].mxu1 %vm505_vm2, %v6147_v0 }
 0x14f   : > { %v6346_v39 = vadd.f32 %v1350_v38, %v6091_v19  ;;  %v1346_v7 = vsel %vm1287_vm4, %v1343_v10, %v1345_v28  ;;  %v1348_v53 = vsel %vm1287_vm4, %v1345_v28, %v1347_v47  ;;  %5190 = vmatprep.mubr.msk.bf16.mxu0 %vm505_vm2, %v6107_v43  ;;  %v888_v43 = vsel %vm780_vm3, %v7139_v13, 0.0 }
 0x150   : > { %v6355_v9 = vadd.f32 %v1346_v7, %v6096_v20  ;;  %v6358_v59 = vadd.f32 %v1348_v53, %v6099_v21  ;;  %v7141_v53 = vld [vmem:[#allocation3_spill] sm:$0xff] }
 0x151   : > { %v4964_v27 = vpop.f32.mrb[52].mxu0 }
 0x152   : > { %v1236_v63 = vpop.f32.mrb[53].mxu0  ;;  %v1355_v44 = vrot.slane %v4964_v27, 2 }
 0x153   : > { %v1351_v19 = vrot.slane %v1236_v63, 2  ;;  %v4965_v8 = vpop.f32.mrb[54].mxu0 }
 0x154   : > { %v1357_v61 = vrot.slane %v4965_v8, 2  ;;  %v1239_v22 = vpop.f32.mrb[55].mxu0 }
 0x155   : > { %v1352_v12 = vsel %vm1287_vm4, %v1349_v14, %v1351_v19  ;;  %v1353_v51 = vrot.slane %v1239_v22, 2 }
 0x156   : > { %v6365_v20 = vadd.f32 %v1352_v12, %v6116_v2  ;;  %v1358_v21 = vsel %vm1287_vm4, %v1355_v44, %v1357_v61  ;;  %v1395_v5 = vsel %vm1287_vm4, %v1357_v61, 0.0  ;;  %5191 = vmatmul.mubr.msk.bf16.gmra.mrb[160].mxu0 %vm505_vm2, %v6147_v0  ;;  %v7140_v2 = vld [vmem:[#allocation2_spill] sm:$0xff] }
 0x157   : > { %v6372_v3 = vadd.f32 %v1358_v21, %v6134_v6  ;;  %v6374_v16 = vadd.f32 %v1395_v5, %v888_v43  ;;  %v1354_v37 = vsel %vm1287_vm4, %v1351_v19, %v1353_v51  ;;  %v1356_v52 = vsel %vm1287_vm4, %v1353_v51, %v1355_v44 }
 0x158   : > { %v6379_v36 = vadd.f32 %v1354_v37, %v6139_v24  ;;  %v6382_v46 = vadd.f32 %v1356_v52, %v7140_v2 }
 0x159   : > { %v5008_v10 = vpop.f32.mrb[56].mxu0 }
 0x15a   : > { %v1833_v57 = vpop.f32.mrb[57].mxu0  ;;  %v2015_v14 = vrot.slane %v5008_v10, 1 }
 0x15b   : > { %v5009_v47 = vpop.f32.mrb[58].mxu0  ;;  %v2012_v6 = vrot.slane %v1833_v57, 1 }
 0x15c   : > { %v2017_v0 = vrot.slane %v5009_v47, 1  ;;  %v1836_v33 = vpop.f32.mrb[59].mxu0 }
 0x15d   : > { %v2013_v30 = vrot.slane %v1836_v33, 1 }
 0x15e   : > { %v2018_v28 = vsel %vm780_vm3, %v2015_v14, %v2017_v0 }
 0x15f   : > { %v2014_v38 = vsel %vm780_vm3, %v2012_v6, %v2013_v30  ;;  %v2016_v7 = vsel %vm780_vm3, %v2013_v30, %v2015_v14  ;;  %v6388_v24 = vadd.f32 %v7141_v53, %v2018_v28 }
 0x160   : > { %v6391_v27 = vadd.f32 %v6187_v41, %v2014_v38  ;;  %v6394_v63 = vadd.f32 %v6190_v45, %v2016_v7 }
 0x161   : > { %v5012_v19 = vpop.f32.mrb[60].mxu0 }
 0x162   : > { %v1849_v8 = vpop.f32.mrb[61].mxu0  ;;  %v2023_v22 = vrot.slane %v5012_v19, 1 }
 0x163   : > { %v2019_v44 = vrot.slane %v1849_v8, 1  ;;  %v5013_v61 = vpop.f32.mrb[62].mxu0 }
 0x164   : > { %v2025_v12 = vrot.slane %v5013_v61, 1  ;;  %v1852_v51 = vpop.f32.mrb[63].mxu0 }
 0x165   : > { %v2020_v13 = vsel %vm780_vm3, %v2017_v0, %v2019_v44  ;;  %v2021_v43 = vrot.slane %v1852_v51, 1 }
 0x166   : > { %v2026_v21 = vsel %vm780_vm3, %v2023_v22, %v2025_v12  ;;  %v6399_v5 = vadd.f32 %v6196_v11, %v2020_v13 }
 0x167   : > { %v2022_v41 = vsel %vm780_vm3, %v2019_v44, %v2021_v43  ;;  %v2024_v45 = vsel %vm780_vm3, %v2021_v43, %v2023_v22  ;;  %v6404_v37 = vadd.f32 %v6202_v62, %v2026_v21 }
 0x168   : > { %v6407_v52 = vadd.f32 %v6211_v25, %v2022_v41  ;;  %v6410_v2 = vadd.f32 %v6214_v40, %v2024_v45 }
 0x169   : > { %v5016_v10 = vpop.f32.mrb[64].mxu0 }
 0x16a   : > { %v1865_v57 = vpop.f32.mrb[65].mxu0  ;;  %v2031_v0 = vrot.slane %v5016_v10, 1 }
 0x16b   : > { %v2027_v47 = vrot.slane %v1865_v57, 1  ;;  %v5017_v14 = vpop.f32.mrb[66].mxu0 }
 0x16c   : > { %v2033_v11 = vrot.slane %v5017_v14, 1  ;;  %v1868_v33 = vpop.f32.mrb[67].mxu0 }
 0x16d   : > { %v2028_v6 = vsel %vm780_vm3, %v2025_v12, %v2027_v47  ;;  %v2029_v30 = vrot.slane %v1868_v33, 1 }
 0x16e   : > { %v2034_v28 = vsel %vm780_vm3, %v2031_v0, %v2033_v11  ;;  %v6415_v62 = vadd.f32 %v6220_v17, %v2028_v6 }
 0x16f   : > { %v2030_v25 = vsel %vm780_vm3, %v2027_v47, %v2029_v30  ;;  %v2032_v40 = vsel %vm780_vm3, %v2029_v30, %v2031_v0  ;;  %v6420_v38 = vadd.f32 %v6226_v35, %v2034_v28 }
 0x170   : > { %v6423_v7 = vadd.f32 %v6235_v4, %v2030_v25  ;;  %v6426_v53 = vadd.f32 %v6238_v49, %v2032_v40 }
 0x171   : > { %v5020_v19 = vpop.f32.mrb[68].mxu0 }
 0x172   : > { %v1881_v8 = vpop.f32.mrb[69].mxu0  ;;  %v2039_v22 = vrot.slane %v5020_v19, 1 }
 0x173   : > { %v2035_v44 = vrot.slane %v1881_v8, 1  ;;  %v5021_v61 = vpop.f32.mrb[70].mxu0 }
 0x174   : > { %v2041_v17 = vrot.slane %v5021_v61, 1  ;;  %v1884_v12 = vpop.f32.mrb[71].mxu0 }
 0x175   : > { %v2036_v51 = vsel %vm780_vm3, %v2033_v11, %v2035_v44  ;;  %v2037_v13 = vrot.slane %v1884_v12, 1 }
 0x176   : > { %v2042_v43 = vsel %vm780_vm3, %v2039_v22, %v2041_v17  ;;  %v6431_v35 = vadd.f32 %v6244_v23, %v2036_v51 }
 0x177   : > { %v2038_v4 = vsel %vm780_vm3, %v2035_v44, %v2037_v13  ;;  %v2040_v49 = vsel %vm780_vm3, %v2037_v13, %v2039_v22  ;;  %v6436_v21 = vadd.f32 %v6250_v18, %v2042_v43 }
 0x178   : > { %v6439_v41 = vadd.f32 %v6259_v55, %v2038_v4  ;;  %v6442_v45 = vadd.f32 %v6262_v48, %v2040_v49 }
 0x179   : > { %v5024_v10 = vpop.f32.mrb[72].mxu0 }
 0x17a   : > { %v1897_v57 = vpop.f32.mrb[73].mxu0  ;;  %v2047_v0 = vrot.slane %v5024_v10, 1 }
 0x17b   : > { %v2043_v47 = vrot.slane %v1897_v57, 1  ;;  %v5025_v14 = vpop.f32.mrb[74].mxu0 }
 0x17c   : > { %v2049_v23 = vrot.slane %v5025_v14, 1  ;;  %v1900_v11 = vpop.f32.mrb[75].mxu0 }
 0x17d   : > { %v2044_v33 = vsel %vm780_vm3, %v2041_v17, %v2043_v47  ;;  %v2045_v6 = vrot.slane %v1900_v11, 1 }
 0x17e   : > { %v2050_v30 = vsel %vm780_vm3, %v2047_v0, %v2049_v23  ;;  %v6447_v18 = vadd.f32 %v6268_v29, %v2044_v33 }
 0x17f   : > { %v2046_v55 = vsel %vm780_vm3, %v2043_v47, %v2045_v6  ;;  %v2048_v48 = vsel %vm780_vm3, %v2045_v6, %v2047_v0  ;;  %v6452_v28 = vadd.f32 %v6274_v60, %v2050_v30 }
 0x180   : > { %v6455_v25 = vadd.f32 %v6283_v1, %v2046_v55  ;;  %v6458_v40 = vadd.f32 %v6286_v32, %v2048_v48 }
 0x181   : > { %v5028_v19 = vpop.f32.mrb[76].mxu0 }
 0x182   : > { %v1913_v8 = vpop.f32.mrb[77].mxu0  ;;  %v2055_v22 = vrot.slane %v5028_v19, 1 }
 0x183   : > { %v2051_v44 = vrot.slane %v1913_v8, 1  ;;  %v5029_v61 = vpop.f32.mrb[78].mxu0 }
 0x184   : > { %v2057_v29 = vrot.slane %v5029_v61, 1  ;;  %v1916_v17 = vpop.f32.mrb[79].mxu0 }
 0x185   : > { %v2052_v12 = vsel %vm780_vm3, %v2049_v23, %v2051_v44  ;;  %v2053_v51 = vrot.slane %v1916_v17, 1 }
 0x186   : > { %v2058_v13 = vsel %vm780_vm3, %v2055_v22, %v2057_v29  ;;  %v6463_v60 = vadd.f32 %v6292_v42, %v2052_v12 }
 0x187   : > { %v2054_v1 = vsel %vm780_vm3, %v2051_v44, %v2053_v51  ;;  %v2056_v32 = vsel %vm780_vm3, %v2053_v51, %v2055_v22  ;;  %v6468_v43 = vadd.f32 %v6298_v26, %v2058_v13 }
 0x188   : > { %v6471_v4 = vadd.f32 %v6307_v58, %v2054_v1  ;;  %v6474_v49 = vadd.f32 %v6310_v34, %v2056_v32 }
 0x189   : > { %v5032_v10 = vpop.f32.mrb[80].mxu0 }
 0x18a   : > { %v1929_v57 = vpop.f32.mrb[81].mxu0  ;;  %v2063_v0 = vrot.slane %v5032_v10, 1 }
 0x18b   : > { %v2059_v47 = vrot.slane %v1929_v57, 1  ;;  %v5033_v14 = vpop.f32.mrb[82].mxu0 }
 0x18c   : > { %v2065_v42 = vrot.slane %v5033_v14, 1  ;;  %v1932_v23 = vpop.f32.mrb[83].mxu0 }
 0x18d   : > { %v2060_v11 = vsel %vm780_vm3, %v2057_v29, %v2059_v47  ;;  %v2061_v33 = vrot.slane %v1932_v23, 1 }
 0x18e   : > { %v2066_v6 = vsel %vm780_vm3, %v2063_v0, %v2065_v42  ;;  %v6479_v26 = vadd.f32 %v6316_v15, %v2060_v11 }
 0x18f   : > { %v2062_v58 = vsel %vm780_vm3, %v2059_v47, %v2061_v33  ;;  %v2064_v34 = vsel %vm780_vm3, %v2061_v33, %v2063_v0  ;;  %v6484_v30 = vadd.f32 %v6322_v50, %v2066_v6 }
 0x190   : > { %v6487_v55 = vadd.f32 %v6331_v31, %v2062_v58  ;;  %v6490_v48 = vadd.f32 %v6334_v56, %v2064_v34 }
 0x191   : > { %v5036_v19 = vpop.f32.mrb[84].mxu0 }
 0x192   : > { %v1945_v8 = vpop.f32.mrb[85].mxu0  ;;  %v2071_v22 = vrot.slane %v5036_v19, 1 }
 0x193   : > { %v2067_v44 = vrot.slane %v1945_v8, 1  ;;  %v5037_v61 = vpop.f32.mrb[86].mxu0 }
 0x194   : > { %v2073_v15 = vrot.slane %v5037_v61, 1  ;;  %v1948_v29 = vpop.f32.mrb[87].mxu0 }
 0x195   : > { %v2068_v17 = vsel %vm780_vm3, %v2065_v42, %v2067_v44  ;;  %v2069_v12 = vrot.slane %v1948_v29, 1 }
 0x196   : > { %v2074_v51 = vsel %vm780_vm3, %v2071_v22, %v2073_v15  ;;  %v6495_v50 = vadd.f32 %v6340_v54, %v2068_v17 }
 0x197   : > { %v2070_v31 = vsel %vm780_vm3, %v2067_v44, %v2069_v12  ;;  %v2072_v56 = vsel %vm780_vm3, %v2069_v12, %v2071_v22  ;;  %v6500_v13 = vadd.f32 %v6346_v39, %v2074_v51 }
 0x198   : > { %v6503_v1 = vadd.f32 %v6355_v9, %v2070_v31  ;;  %v6506_v32 = vadd.f32 %v6358_v59, %v2072_v56 }
 0x199   : > { %v5040_v10 = vpop.f32.mrb[88].mxu0  ;;  %v5046_v57 = vpop.f32.mrb[52].mxu1 }
 0x19a   : > { %v1961_v47 = vpop.f32.mrb[89].mxu0  ;;  %v2377_v14 = vrot.slane %v5046_v57, 2  ;;  %v2195_v54 = vpop.f32.mrb[53].mxu1  ;;  %v2079_v23 = vrot.slane %v5040_v10, 1 }
 0x19b   : > { %v2075_v0 = vrot.slane %v1961_v47, 1  ;;  %v5041_v42 = vpop.f32.mrb[90].mxu0  ;;  %v2374_v11 = vrot.slane %v2195_v54, 2  ;;  %v5047_v6 = vpop.f32.mrb[54].mxu1 }
 0x19c   : > { %v2081_v33 = vrot.slane %v5041_v42, 1  ;;  %v1964_v58 = vpop.f32.mrb[91].mxu0  ;;  %v2379_v34 = vrot.slane %v5047_v6, 2  ;;  %v2198_v19 = vpop.f32.mrb[55].mxu1 }
 0x19d   : > { %v2076_v39 = vsel %vm780_vm3, %v2073_v15, %v2075_v0  ;;  %v2077_v9 = vrot.slane %v1964_v58, 1  ;;  %v2375_v44 = vrot.slane %v2198_v19, 2 }
 0x19e   : > { %v2082_v59 = vsel %vm780_vm3, %v2079_v23, %v2081_v33  ;;  %v2119_v8 = vsel %vm780_vm3, %v2081_v33, 0.0  ;;  %v6512_v61 = vadd.f32 %v6365_v20, %v2076_v39  ;;  %v2380_v15 = vsel %vm1287_vm4, %v2377_v14, %v2379_v34 }
 0x19f   : > { %v6515_v22 = vadd.f32 %v6374_v16, %v2119_v8  ;;  %v2078_v29 = vsel %vm780_vm3, %v2075_v0, %v2077_v9  ;;  %v2080_v17 = vsel %vm780_vm3, %v2077_v9, %v2079_v23  ;;  %v6521_v12 = vadd.f32 %v6388_v24, %v2380_v15 }
 0x1a0   : > { %v2376_v51 = vsel %vm1287_vm4, %v2374_v11, %v2375_v44  ;;  %v2378_v31 = vsel %vm1287_vm4, %v2375_v44, %v2377_v14  ;;  %v6526_v56 = vadd.f32 %v6372_v3, %v2082_v59  ;;  %v6535_v57 = vadd.f32 %v6379_v36, %v2078_v29 }
 0x1a1   : > { %v5122_v20 = vpop.f32.mrb[92].mxu0  ;;  %v6529_v16 = vadd.f32 %v6391_v27, %v2376_v51  ;;  %v6532_v10 = vadd.f32 %v6394_v63, %v2378_v31  ;;  %v6538_v24 = vadd.f32 %v6382_v46, %v2080_v17  ;;  %v5050_v47 = vpop.f32.mrb[56].mxu1 }
 0x1a2   : > { %v2919_v0 = vpop.f32.mrb[93].mxu0  ;;  %v2385_v54 = vrot.slane %v5050_v47, 2  ;;  %v2211_v14 = vpop.f32.mrb[57].mxu1  ;;  %v3101_v3 = vrot.slane %v5122_v20, 1 }
 0x1a3   : > { %v5123_v42 = vpop.f32.mrb[94].mxu0  ;;  %v2381_v23 = vrot.slane %v2211_v14, 2  ;;  %v5051_v11 = vpop.f32.mrb[58].mxu1  ;;  %v3098_v6 = vrot.slane %v2919_v0, 1 }
 0x1a4   : > { %v3103_v33 = vrot.slane %v5123_v42, 1  ;;  %v2922_v27 = vpop.f32.mrb[95].mxu0  ;;  %v2387_v58 = vrot.slane %v5051_v11, 2  ;;  %v2214_v63 = vpop.f32.mrb[59].mxu1 }
 0x1a5   : > { %v3099_v39 = vrot.slane %v2922_v27, 1  ;;  %v2383_v9 = vrot.slane %v2214_v63, 2  ;;  %v2382_v46 = vsel %vm1287_vm4, %v2379_v34, %v2381_v23 }
 0x1a6   : > { %v6541_v36 = vsel %vm780_vm3, %v3101_v3, %v3103_v33  ;;  %v6548_v59 = vadd.f32 %v6399_v5, %v2382_v46  ;;  %v2388_v44 = vsel %vm1287_vm4, %v2385_v54, %v2387_v58 }
 0x1a7   : > { %v6545_v19 = vsel %vm780_vm3, %v3098_v6, %v3099_v39  ;;  %v6551_v8 = vsel %vm780_vm3, %v3099_v39, %v3101_v3  ;;  %v6555_v29 = vadd.f32 %v6404_v37, %v2388_v44  ;;  %v2384_v17 = vsel %vm1287_vm4, %v2381_v23, %v2383_v9 }
 0x1a8   : > { %v2386_v15 = vsel %vm1287_vm4, %v2383_v9, %v2385_v54  ;;  %v6560_v34 = vadd.f32 %v6407_v52, %v2384_v17 }
 0x1a9   : > { %v5126_v51 = vpop.f32.mrb[96].mxu0  ;;  %v6563_v31 = vadd.f32 %v6410_v2, %v2386_v15  ;;  %v5054_v5 = vpop.f32.mrb[60].mxu1 }
 0x1aa   : > { %v2935_v20 = vpop.f32.mrb[97].mxu0  ;;  %v2393_v47 = vrot.slane %v5054_v5, 2  ;;  %v2227_v0 = vpop.f32.mrb[61].mxu1  ;;  %v3109_v3 = vrot.slane %v5126_v51, 1 }
 0x1ab   : > { %v3105_v14 = vrot.slane %v2935_v20, 1  ;;  %v5127_v42 = vpop.f32.mrb[98].mxu0  ;;  %v2389_v37 = vrot.slane %v2227_v0, 2  ;;  %v5055_v11 = vpop.f32.mrb[62].mxu1 }
 0x1ac   : > { %v3111_v27 = vrot.slane %v5127_v42, 1  ;;  %v2938_v23 = vpop.f32.mrb[99].mxu0  ;;  %v2395_v6 = vrot.slane %v5055_v11, 2  ;;  %v2230_v54 = vpop.f32.mrb[63].mxu1 }
 0x1ad   : > { %v3107_v63 = vrot.slane %v2938_v23, 1  ;;  %v6566_v52 = vsel %vm780_vm3, %v3103_v33, %v3105_v14  ;;  %v2391_v39 = vrot.slane %v2230_v54, 2  ;;  %v2390_v9 = vsel %vm1287_vm4, %v2387_v58, %v2389_v37 }
 0x1ae   : > { %v6569_v2 = vsel %vm780_vm3, %v3109_v3, %v3111_v27  ;;  %v6576_v44 = vadd.f32 %v6415_v62, %v2390_v9  ;;  %v2396_v15 = vsel %vm1287_vm4, %v2393_v47, %v2395_v6 }
 0x1af   : > { %v6573_v46 = vsel %vm780_vm3, %v3105_v14, %v3107_v63  ;;  %v6579_v17 = vsel %vm780_vm3, %v3107_v63, %v3109_v3  ;;  %v6583_v33 = vadd.f32 %v6420_v38, %v2396_v15  ;;  %v2392_v51 = vsel %vm1287_vm4, %v2389_v37, %v2391_v39 }
 0x1b0   : > { %v2394_v5 = vsel %vm1287_vm4, %v2391_v39, %v2393_v47  ;;  %v6588_v58 = vadd.f32 %v6423_v7, %v2392_v51 }
 0x1b1   : > { %v5130_v20 = vpop.f32.mrb[100].mxu0  ;;  %v6591_v0 = vadd.f32 %v6426_v53, %v2394_v5  ;;  %v5058_v62 = vpop.f32.mrb[64].mxu1 }
 0x1b2   : > { %v2951_v14 = vpop.f32.mrb[101].mxu0  ;;  %v2401_v42 = vrot.slane %v5058_v62, 2  ;;  %v2243_v3 = vpop.f32.mrb[65].mxu1  ;;  %v3117_v54 = vrot.slane %v5130_v20, 1 }
 0x1b3   : > { %7142 = vst [vmem:[#allocation2_spill] sm:$0xff] %v6591_v0  ;;  %v3113_v11 = vrot.slane %v2951_v14, 1  ;;  %v5131_v23 = vpop.f32.mrb[102].mxu0  ;;  %v2397_v38 = vrot.slane %v2243_v3, 2  ;;  %v5059_v63 = vpop.f32.mrb[66].mxu1 }
 0x1b4   : > { %v3119_v9 = vrot.slane %v5131_v23, 1  ;;  %v2954_v37 = vpop.f32.mrb[103].mxu0  ;;  %v2403_v15 = vrot.slane %v5059_v63, 2  ;;  %v2246_v47 = vpop.f32.mrb[67].mxu1 }
 0x1b5   : > { %v3115_v39 = vrot.slane %v2954_v37, 1  ;;  %v6594_v7 = vsel %vm780_vm3, %v3111_v27, %v3113_v11  ;;  %v2399_v51 = vrot.slane %v2246_v47, 2  ;;  %v2398_v5 = vsel %vm1287_vm4, %v2395_v6, %v2397_v38 }
 0x1b6   : > { %v6597_v53 = vsel %vm780_vm3, %v3117_v54, %v3119_v9  ;;  %v6604_v20 = vadd.f32 %v6431_v35, %v2398_v5  ;;  %v2404_v3 = vsel %vm1287_vm4, %v2401_v42, %v2403_v15 }
 0x1b7   : > { %v6601_v62 = vsel %vm780_vm3, %v3113_v11, %v3115_v39  ;;  %v6607_v14 = vsel %vm780_vm3, %v3115_v39, %v3117_v54  ;;  %v6611_v27 = vadd.f32 %v6436_v21, %v2404_v3  ;;  %v2400_v23 = vsel %vm1287_vm4, %v2397_v38, %v2399_v51 }
 0x1b8   : > { %7143 = vst [vmem:[#allocation3_spill] sm:$0xff] %v6601_v62  ;;  %7144 = vst [vmem:[#allocation4_spill] sm:$0xff] %v6607_v14  ;;  %v2402_v63 = vsel %vm1287_vm4, %v2399_v51, %v2401_v42  ;;  %v6616_v6 = vadd.f32 %v6439_v41, %v2400_v23 }
 0x1b9   : > { %7145 = vst [vmem:[#allocation5_spill] sm:$0xff] %v6611_v27  ;;  %v5134_v37 = vpop.f32.mrb[104].mxu0  ;;  %v6619_v11 = vadd.f32 %v6442_v45, %v2402_v63  ;;  %v5062_v35 = vpop.f32.mrb[68].mxu1 }
 0x1ba   : > { %v2967_v47 = vpop.f32.mrb[105].mxu0  ;;  %v2409_v54 = vrot.slane %v5062_v35, 2  ;;  %v2259_v39 = vpop.f32.mrb[69].mxu1  ;;  %v3125_v0 = vrot.slane %v5134_v37, 1 }
 0x1bb   : > { %7146 = vst [vmem:[#allocation6_spill] sm:$0xff] %v6619_v11  ;;  %v3121_v5 = vrot.slane %v2967_v47, 1  ;;  %v5135_v14 = vpop.f32.mrb[106].mxu0  ;;  %v2405_v21 = vrot.slane %v2259_v39, 2  ;;  %v5063_v3 = vpop.f32.mrb[70].mxu1 }
 0x1bc   : > { %v3127_v27 = vrot.slane %v5135_v14, 1  ;;  %v2970_v38 = vpop.f32.mrb[107].mxu0  ;;  %v2411_v62 = vrot.slane %v5063_v3, 2  ;;  %v2262_v42 = vpop.f32.mrb[71].mxu1 }
 0x1bd   : > { %v3123_v51 = vrot.slane %v2970_v38, 1  ;;  %v6622_v41 = vsel %vm780_vm3, %v3119_v9, %v3121_v5  ;;  %v2407_v23 = vrot.slane %v2262_v42, 2  ;;  %v2406_v63 = vsel %vm1287_vm4, %v2403_v15, %v2405_v21  ;;  %v6638_v39 = vpop.permute.xlu0 %3822  ;;  %v6645_v38 = vpop.permute.xlu1 %3832 }
 0x1be   : > { %v6625_v45 = vsel %vm780_vm3, %v3125_v0, %v3127_v27  ;;  %v6632_v37 = vadd.f32 %v6447_v18, %v2406_v63  ;;  %v2412_v47 = vsel %vm1287_vm4, %v2409_v54, %v2411_v62 }
 0x1bf   : > { %7147 = vst [vmem:[#allocation7_spill] sm:$0xff] %v6625_v45  ;;  %v6629_v35 = vsel %vm780_vm3, %v3121_v5, %v3123_v51  ;;  %v6635_v14 = vsel %vm780_vm3, %v3123_v51, %v3125_v0  ;;  %v6641_v9 = vadd.f32 %v6452_v28, %v2412_v47  ;;  %v2408_v3 = vsel %vm1287_vm4, %v2405_v21, %v2407_v23 }
 0x1c0   : > { %7148 = vst [vmem:[#allocation8_spill] sm:$0xff] %v6629_v35  ;;  %7149 = vst [vmem:[#allocation9_spill] sm:$0xff] %v6632_v37  ;;  %v2410_v15 = vsel %vm1287_vm4, %v2407_v23, %v2409_v54  ;;  %v6648_v18 = vadd.f32 %v6455_v25, %v2408_v3 }
 0x1c1   : > { %7150 = vst [vmem:[#allocation10_spill] sm:$0xff] %v6635_v14  ;;  %7151 = vst [vmem:[#allocation11_spill] sm:$0xff] %v6641_v9  ;;  %v5138_v5 = vpop.f32.mrb[108].mxu0  ;;  %v6651_v0 = vadd.f32 %v6458_v40, %v2410_v15  ;;  %v5066_v42 = vpop.f32.mrb[72].mxu1 }
 0x1c2   : > { %7152 = vst [vmem:[#allocation12_spill] sm:$0xff] %v6648_v18  ;;  %v2983_v51 = vpop.f32.mrb[109].mxu0  ;;  %v2417_v63 = vrot.slane %v5066_v42, 2  ;;  %v2275_v14 = vpop.f32.mrb[73].mxu1  ;;  %v3133_v47 = vrot.slane %v5138_v5, 1 }
 0x1c3   : > { %7153 = vst [vmem:[#allocation13_spill] sm:$0xff] %v6651_v0  ;;  %v3129_v11 = vrot.slane %v2983_v51, 1  ;;  %v5139_v28 = vpop.f32.mrb[110].mxu0  ;;  %v2413_v9 = vrot.slane %v2275_v14, 2  ;;  %v5067_v21 = vpop.f32.mrb[74].mxu1 }
 0x1c4   : > { %v3135_v37 = vrot.slane %v5139_v28, 1  ;;  %v2986_v54 = vpop.f32.mrb[111].mxu0  ;;  %v2419_v23 = vrot.slane %v5067_v21, 2  ;;  %v2278_v35 = vpop.f32.mrb[75].mxu1 }
 0x1c5   : > { %v3131_v45 = vrot.slane %v2986_v54, 1  ;;  %v6654_v25 = vsel %vm780_vm3, %v3127_v27, %v3129_v11  ;;  %v2415_v3 = vrot.slane %v2278_v35, 2  ;;  %v2414_v15 = vsel %vm1287_vm4, %v2411_v62, %v2413_v9  ;;  %v6670_v28 = vpop.permute.xlu0 %3827  ;;  %v6677_v21 = vpop.permute.xlu1 %3837 }
 0x1c6   : > { %v6657_v40 = vsel %vm780_vm3, %v3133_v47, %v3135_v37  ;;  %v6664_v14 = vadd.f32 %v6463_v60, %v2414_v15  ;;  %v2420_v51 = vsel %vm1287_vm4, %v2417_v63, %v2419_v23 }
 0x1c7   : > { %v6661_v42 = vsel %vm780_vm3, %v3129_v11, %v3131_v45  ;;  %v6667_v5 = vsel %vm780_vm3, %v3131_v45, %v3133_v47  ;;  %v6673_v27 = vadd.f32 %v6468_v43, %v2420_v51  ;;  %v2416_v35 = vsel %vm1287_vm4, %v2413_v9, %v2415_v3 }
 0x1c8   : > { %7154 = vst [vmem:[#allocation14_spill] sm:$0xff] %v6661_v42  ;;  %7155 = vst [vmem:[#allocation15_spill] sm:$0xff] %v6664_v14  ;;  %v2418_v62 = vsel %vm1287_vm4, %v2415_v3, %v2417_v63  ;;  %v6680_v60 = vadd.f32 %v6471_v4, %v2416_v35 }
 0x1c9   : > { %7156 = vst [vmem:[#allocation16_spill] sm:$0xff] %v6667_v5  ;;  %7157 = vst [vmem:[#allocation17_spill] sm:$0xff] %v6673_v27  ;;  %v5142_v11 = vpop.f32.mrb[112].mxu0  ;;  %v6683_v45 = vadd.f32 %v6474_v49, %v2418_v62  ;;  %v5070_v47 = vpop.f32.mrb[76].mxu1 }
 0x1ca   : > { %v2999_v54 = vpop.f32.mrb[113].mxu0  ;;  %v2425_v15 = vrot.slane %v5070_v47, 2  ;;  %v2291_v5 = vpop.f32.mrb[77].mxu1  ;;  %v3141_v51 = vrot.slane %v5142_v11, 1 }
 0x1cb   : > { %7158 = vst [vmem:[#allocation18_spill] sm:$0xff] %v6683_v45  ;;  %v3137_v0 = vrot.slane %v2999_v54, 1  ;;  %v5143_v43 = vpop.f32.mrb[114].mxu0  ;;  %v2421_v27 = vrot.slane %v2291_v5, 2  ;;  %v5071_v9 = vpop.f32.mrb[78].mxu1 }
 0x1cc   : > { %v3143_v42 = vrot.slane %v5143_v43, 1  ;;  %v3002_v63 = vpop.f32.mrb[115].mxu0  ;;  %v2427_v3 = vrot.slane %v5071_v9, 2  ;;  %v2294_v14 = vpop.f32.mrb[79].mxu1 }
 0x1cd   : > { %v3139_v18 = vrot.slane %v3002_v63, 1  ;;  %v6686_v4 = vsel %vm780_vm3, %v3135_v37, %v3137_v0  ;;  %v2423_v35 = vrot.slane %v2294_v14, 2  ;;  %v2422_v62 = vsel %vm1287_vm4, %v2419_v23, %v2421_v27  ;;  %v6702_v43 = vpop.permute.xlu0 %3842  ;;  %v6709_v9 = vpop.permute.xlu1 %3847 }
 0x1ce   : > { %v6689_v49 = vsel %vm780_vm3, %v3141_v51, %v3143_v42  ;;  %v6696_v5 = vadd.f32 %v6479_v26, %v2422_v62  ;;  %v2428_v54 = vsel %vm1287_vm4, %v2425_v15, %v2427_v3 }
 0x1cf   : > { %7159 = vst [vmem:[#allocation19_spill] sm:$0xff] %v6689_v49  ;;  %v6693_v47 = vsel %vm780_vm3, %v3137_v0, %v3139_v18  ;;  %v6699_v11 = vsel %vm780_vm3, %v3139_v18, %v3141_v51  ;;  %v6705_v37 = vadd.f32 %v6484_v30, %v2428_v54  ;;  %v2424_v14 = vsel %vm1287_vm4, %v2421_v27, %v2423_v35 }
 0x1d0   : > { %7160 = vst [vmem:[#allocation20_spill] sm:$0xff] %v6693_v47  ;;  %7161 = vst [vmem:[#allocation21_spill] sm:$0xff] %v6696_v5  ;;  %v2426_v23 = vsel %vm1287_vm4, %v2423_v35, %v2425_v15  ;;  %v6712_v26 = vadd.f32 %v6487_v55, %v2424_v14 }
 0x1d1   : > { %7162 = vst [vmem:[#allocation22_spill] sm:$0xff] %v6699_v11  ;;  %7163 = vst [vmem:[#allocation23_spill] sm:$0xff] %v6705_v37  ;;  %v5146_v0 = vpop.f32.mrb[116].mxu0  ;;  %v6715_v18 = vadd.f32 %v6490_v48, %v2426_v23  ;;  %v5074_v51 = vpop.f32.mrb[80].mxu1 }
 0x1d2   : > { %7164 = vst [vmem:[#allocation24_spill] sm:$0xff] %v6712_v26  ;;  %v3015_v63 = vpop.f32.mrb[117].mxu0  ;;  %v2433_v62 = vrot.slane %v5074_v51, 2  ;;  %v2307_v11 = vpop.f32.mrb[81].mxu1  ;;  %v3149_v54 = vrot.slane %v5146_v0, 1 }
 0x1d3   : > { %7165 = vst [vmem:[#allocation25_spill] sm:$0xff] %v6715_v18  ;;  %v3145_v45 = vrot.slane %v3015_v63, 1  ;;  %v5147_v30 = vpop.f32.mrb[118].mxu0  ;;  %v2429_v37 = vrot.slane %v2307_v11, 2  ;;  %v5075_v27 = vpop.f32.mrb[82].mxu1 }
 0x1d4   : > { %v3151_v5 = vrot.slane %v5147_v30, 1  ;;  %v3018_v15 = vpop.f32.mrb[119].mxu0  ;;  %v2435_v35 = vrot.slane %v5075_v27, 2  ;;  %v2310_v47 = vpop.f32.mrb[83].mxu1 }
 0x1d5   : > { %v3147_v49 = vrot.slane %v3018_v15, 1  ;;  %v6718_v55 = vsel %vm780_vm3, %v3143_v42, %v3145_v45  ;;  %v2431_v14 = vrot.slane %v2310_v47, 2  ;;  %v2430_v23 = vsel %vm1287_vm4, %v2427_v3, %v2429_v37  ;;  %v6734_v30 = vpop.permute.xlu0 %3852  ;;  %v6741_v27 = vpop.permute.xlu1 %3857 }
 0x1d6   : > { %v6721_v48 = vsel %vm780_vm3, %v3149_v54, %v3151_v5  ;;  %v6728_v11 = vadd.f32 %v6495_v50, %v2430_v23  ;;  %v2436_v63 = vsel %vm1287_vm4, %v2433_v62, %v2435_v35 }
 0x1d7   : > { %v6725_v51 = vsel %vm780_vm3, %v3145_v45, %v3147_v49  ;;  %v6731_v0 = vsel %vm780_vm3, %v3147_v49, %v3149_v54  ;;  %v6737_v42 = vadd.f32 %v6500_v13, %v2436_v63  ;;  %v2432_v47 = vsel %vm1287_vm4, %v2429_v37, %v2431_v14 }
 0x1d8   : > { %7166 = vst [vmem:[#allocation26_spill] sm:$0xff] %v6725_v51  ;;  %7167 = vst [vmem:[#allocation27_spill] sm:$0xff] %v6728_v11  ;;  %v2434_v3 = vsel %vm1287_vm4, %v2431_v14, %v2433_v62  ;;  %v6744_v50 = vadd.f32 %v6503_v1, %v2432_v47 }
 0x1d9   : > { %7168 = vst [vmem:[#allocation28_spill] sm:$0xff] %v6731_v0  ;;  %7169 = vst [vmem:[#allocation29_spill] sm:$0xff] %v6737_v42  ;;  %v5150_v45 = vpop.f32.mrb[120].mxu0  ;;  %v6747_v49 = vadd.f32 %v6506_v32, %v2434_v3  ;;  %v5078_v54 = vpop.f32.mrb[84].mxu1 }
 0x1da   : > { %v3031_v15 = vpop.f32.mrb[121].mxu0  ;;  %v2323_v23 = vpop.f32.mrb[85].mxu1  ;;  %v2441_v13 = vrot.slane %v5078_v54, 2  ;;  %v3157_v63 = vrot.slane %v5150_v45, 1 }
 0x1db   : > { %v3153_v0 = vrot.slane %v3031_v15, 1  ;;  %v5151_v18 = vpop.f32.mrb[122].mxu0  ;;  %v2437_v42 = vrot.slane %v2323_v23, 2  ;;  %v5079_v37 = vpop.f32.mrb[86].mxu1 }
 0x1dc   : > { %v3159_v11 = vrot.slane %v5151_v18, 1  ;;  %v3034_v62 = vpop.f32.mrb[123].mxu0  ;;  %v2443_v14 = vrot.slane %v5079_v37, 2  ;;  %v2326_v51 = vpop.f32.mrb[87].mxu1 }
 0x1dd   : > { %v3155_v26 = vrot.slane %v3034_v62, 1  ;;  %v6750_v1 = vsel %vm780_vm3, %v3151_v5, %v3153_v0  ;;  %v2439_v47 = vrot.slane %v2326_v51, 2  ;;  %v2438_v3 = vsel %vm1287_vm4, %v2435_v35, %v2437_v42  ;;  %v6766_v23 = vpop.permute.xlu0 %3862  ;;  %v6774_v62 = vpop.permute.xlu1 %3867 }
 0x1de   : > { %v6753_v32 = vsel %vm780_vm3, %v3157_v63, %v3159_v11  ;;  %v2481_v15 = vsel %vm1287_vm4, %v2443_v14, 0.0  ;;  %v6761_v18 = vadd.f32 %v6512_v61, %v2438_v3  ;;  %v2444_v5 = vsel %vm1287_vm4, %v2441_v13, %v2443_v14 }
 0x1df   : > { %v6758_v45 = vsel %vm780_vm3, %v3153_v0, %v3155_v26  ;;  %v6764_v54 = vsel %vm780_vm3, %v3155_v26, %v3157_v63  ;;  %v2440_v51 = vsel %vm1287_vm4, %v2437_v42, %v2439_v47  ;;  %v6771_v37 = vadd.f32 %v6515_v22, %v2481_v15 }
 0x1e0   : > { %7170 = vst [vmem:[#allocation30_spill] sm:$0xff] %v6764_v54  ;;  %v2442_v35 = vsel %vm1287_vm4, %v2439_v47, %v2441_v13  ;;  %v6777_v61 = vadd.f32 %v6526_v56, %v2444_v5  ;;  %v6780_v26 = vadd.f32 %v6535_v57, %v2440_v51 }
 0x1e1   : > { %7171 = vst [vmem:[#allocation31_spill] sm:$0xff] %v6771_v37  ;;  %v5154_v0 = vpop.f32.mrb[124].mxu0  ;;  %v6783_v63 = vadd.f32 %v6538_v24, %v2442_v35  ;;  %v5084_v14 = vpop.f32.mrb[16].mxu1 }
 0x1e2   : > { %7172 = vst [vmem:[#allocation32_spill] sm:$0xff] %v6780_v26  ;;  %v3047_v3 = vpop.f32.mrb[125].mxu0  ;;  %v5199_v42 = vadd.f32 %v6521_v12, %v5084_v14  ;;  %v2701_v22 = vpop.f32.mrb[17].mxu1  ;;  %v3165_v13 = vrot.slane %v5154_v0, 1 }
 0x1e3   : > { %7173 = vst [vmem:[#allocation33_spill] sm:$0xff] %v6783_v63  ;;  %v3161_v15 = vrot.slane %v3047_v3, 1  ;;  %v6786_v37 = vpop.f32.mrb[126].mxu0  ;;  %v5203_v47 = vadd.f32 %v6529_v16, %v2701_v22  ;;  %v5085_v54 = vpop.f32.mrb[18].mxu1 }
 0x1e4   : > { %v7136_v56 = vrot.slane %v6786_v37, 1  ;;  %v3050_v5 = vpop.f32.mrb[127].mxu0  ;;  %v3208_v57 = vadd.f32 %v5199_v42, %v6541_v36  ;;  %v5207_v24 = vadd.f32 %v6548_v59, %v5085_v54  ;;  %v2704_v51 = vpop.f32.mrb[19].mxu1 }
 0x1e5   : > { %v3163_v35 = vrot.slane %v3050_v5, 1  ;;  %v6793_v63 = vsel %vm780_vm3, %v3159_v11, %v3161_v15  ;;  %v3206_v12 = vadd.f32 %v5203_v47, %v6545_v19  ;;  %v5211_v14 = vadd.f32 %v6532_v10, %v2704_v51  ;;  %v6809_v54 = vpop.permute.xlu0 %3872  ;;  %v6812_v19 = vpop.permute.xlu1 %3877 }
 0x1e6   : > { %v6800_v16 = vsel %vm780_vm3, %v3165_v13, %v7136_v56  ;;  %v3209_v0 = vadd.f32 %v5207_v24, %v6566_v52 }
 0x1e7   : > { %7174 = vst [vmem:[#allocation34_spill] sm:$0xff] %v6800_v16  ;;  %v6804_v36 = vsel %vm780_vm3, %v3161_v15, %v3163_v35  ;;  %v6807_v59 = vsel %vm780_vm3, %v3163_v35, %v3165_v13  ;;  %v3207_v11 = vadd.f32 %v5211_v14, %v6551_v8 }
 0x1e8   : > { %7175 = vst [vmem:[#allocation35_spill] sm:$0xff] %v6804_v36  ;;  %7176 = vst [vmem:[#allocation36_spill] sm:$0xff] %v6807_v59 }
 0x1e9   : > { %v5160_v10 = vpop.f32.mrb[128].mxu0  ;;  %v5088_v3 = vpop.f32.mrb[20].mxu1 }
 0x1ea   : > { %v3281_v42 = vpop.f32.mrb[129].mxu0  ;;  %v5215_v22 = vadd.f32 %v6555_v29, %v5088_v3  ;;  %v2717_v47 = vpop.f32.mrb[21].mxu1  ;;  %v3463_v52 = vrot.slane %v5160_v10, 2 }
 0x1eb   : > { %v5161_v5 = vpop.f32.mrb[130].mxu0  ;;  %v5219_v15 = vadd.f32 %v6560_v34, %v2717_v47  ;;  %v5089_v24 = vpop.f32.mrb[22].mxu1  ;;  %v3460_v56 = vrot.slane %v3281_v42, 2 }
 0x1ec   : > { %v3465_v51 = vrot.slane %v5161_v5, 2  ;;  %v3284_v13 = vpop.f32.mrb[131].mxu0  ;;  %v3212_v35 = vadd.f32 %v5215_v22, %v6569_v2  ;;  %v5223_v8 = vadd.f32 %v6576_v44, %v5089_v24  ;;  %v2720_v14 = vpop.f32.mrb[23].mxu1 }
 0x1ed   : > { %v3461_v59 = vrot.slane %v3284_v13, 2  ;;  %v3210_v36 = vadd.f32 %v5219_v15, %v6573_v46  ;;  %v5227_v3 = vadd.f32 %v6563_v31, %v2720_v14  ;;  %v6826_v42 = vpop.permute.xlu0 %3882  ;;  %v6829_v24 = vpop.permute.xlu1 %3887 }
 0x1ee   : > { %v3466_v29 = vsel %vm1287_vm4, %v3463_v52, %v3465_v51  ;;  %v6822_v10 = vadd.f32 %v5223_v8, %v6594_v7 }
 0x1ef   : > { %v3570_v34 = vadd.f32 %v3466_v29, %v3208_v57  ;;  %v3462_v47 = vsel %vm1287_vm4, %v3460_v56, %v3461_v59  ;;  %v3464_v2 = vsel %vm1287_vm4, %v3461_v59, %v3463_v52  ;;  %v3211_v44 = vadd.f32 %v5227_v3, %v6579_v17 }
 0x1f0   : > { %v3568_v22 = vadd.f32 %v3462_v47, %v3206_v12  ;;  %v3569_v5 = vadd.f32 %v3464_v2, %v3207_v11 }
 0x1f1   : > { %v4002_v46 = vmul.f32 %v6645_v38, %v3570_v34  ;;  %v5164_v31 = vpop.f32.mrb[132].mxu0  ;;  %v5092_v59 = vpop.f32.mrb[24].mxu1 }
 0x1f2   : > { %v4577_v7 = vpack.c.bf16 %v3569_v5, %v3568_v22  ;;  %v4000_v56 = vmul.f32 %v6638_v39, %v3568_v22  ;;  %v4001_v57 = vmul.f32 %v6670_v28, %v3569_v5  ;;  %v3297_v17 = vpop.f32.mrb[133].mxu0  ;;  %v5231_v11 = vadd.f32 %v6583_v33, %v5092_v59  ;;  %v2733_v15 = vpop.f32.mrb[25].mxu1 }
 0x1f3   : > { %v4079_v12 = vmul.f32 %v4002_v46, %v3570_v34  ;;  %v3471_v52 = vrot.slane %v5164_v31, 2  ;;  %v3467_v38 = vrot.slane %v3297_v17, 2  ;;  %v5165_v13 = vpop.f32.mrb[134].mxu0  ;;  %v5235_v3 = vadd.f32 %v6588_v58, %v2733_v15  ;;  %v5093_v47 = vpop.f32.mrb[26].mxu1  ;;  %v7177_v17 = vld [vmem:[#allocation3_spill] sm:$0xff] }
 0x1f4   : > { %4578 = vst [vmem:[%s6836_s20] sm:$0xff] %v4577_v7   ;;  %v4036_v8 = vadd.f32 %v4001_v57, %v4000_v56  ;;  %v4077_v14 = vmul.f32 %v4000_v56, %v3568_v22  ;;  %v4078_v29 = vmul.f32 %v4001_v57, %v3569_v5  ;;  %v3300_v2 = vpop.f32.mrb[135].mxu0  ;;  %v6844_v39 = vadd.f32 %v5231_v11, %v6597_v53  ;;  %v2736_v31 = vpop.f32.mrb[27].mxu1  ;;  %v7178_v53 = vld [vmem:[#allocation2_spill] sm:$0xff] }
 0x1f5   : > { %v3468_v28 = vsel %vm1287_vm4, %v3465_v51, %v3467_v38  ;;  %v5239_v26 = vadd.f32 %v6604_v20, %v5093_v47  ;;  %v3473_v33 = vrot.slane %v5165_v13, 2  ;;  %v6849_v16 = vadd.f32 %v5235_v3, %v7177_v17  ;;  %v6856_v51 = vpop.permute.xlu0 %3892 }
 0x1f6   : > { %v4113_v59 = vadd.f32 %v4078_v29, %v4077_v14  ;;  %v3571_v7 = vadd.f32 %v3468_v28, %v3209_v0  ;;  %v4037_v22 = vadd.f32 %v4036_v8, %v4002_v46  ;;  %v5243_v56 = vadd.f32 %v7178_v53, %v2736_v31  ;;  %v6859_v14 = vpop.permute.xlu1 %3897  ;;  %v7181_v28 = vld [vmem:[#allocation5_spill] sm:$0xff] }
 0x1f7   : > { %v6852_v58 = vadd.f32 %v5239_v26, %v6622_v41  ;;  %v3474_v5 = vsel %vm1287_vm4, %v3471_v52, %v3473_v33  ;;  %v3469_v57 = vrot.slane %v3300_v2, 2  ;;  %v7179_v0 = vrot.slane %v6786_v37, 1  ;;  %v7180_v41 = vld [vmem:[#allocation4_spill] sm:$0xff] }
 0x1f8   : > { %v4582_v20 = vpack.c.bf16 %v3571_v7, %v3570_v34  ;;  %v4003_v11 = vmul.f32 %v6677_v21, %v3571_v7  ;;  %v4114_v15 = vadd.f32 %v4113_v59, %v4079_v12  ;;  %v3574_v13 = vadd.f32 %v3474_v5, %v3212_v35 }
 0x1f9   : > { %v6864_v46 = vsel %vm780_vm3, %v7179_v0, 0.0  ;;  %v6867_v26 = vadd.f32 %v5243_v56, %v7180_v41  ;;  %v3470_v8 = vsel %vm1287_vm4, %v3467_v38, %v3469_v57  ;;  %v3472_v29 = vsel %vm1287_vm4, %v3469_v57, %v3471_v52  ;;  %v5168_v3 = vpop.f32.mrb[136].mxu0  ;;  %v5096_v47 = vpop.f32.mrb[28].mxu1 }
 0x1fa   : > { %4664 = vst [vmem:[%s6836_s20 + $0x8] sm:$0xff] %v4582_v20   ;;  %v4038_v34 = vadd.f32 %v4037_v22, %v4003_v11  ;;  %v4080_v21 = vmul.f32 %v4003_v11, %v3571_v7  ;;  %v4006_v35 = vmul.f32 %v6734_v30, %v3574_v13  ;;  %v3572_v12 = vadd.f32 %v3470_v8, %v3210_v36  ;;  %v3313_v2 = vpop.f32.mrb[137].mxu0  ;;  %v2749_v17 = vpop.f32.mrb[29].mxu1 }
 0x1fb   : > { %v3573_v37 = vadd.f32 %v3472_v29, %v3211_v44  ;;  %v5247_v31 = vadd.f32 %v7181_v28, %v5096_v47  ;;  %v3479_v59 = vrot.slane %v5168_v3, 2  ;;  %v3475_v5 = vrot.slane %v3313_v2, 2  ;;  %v6874_v53 = vpop.f32.mrb[138].mxu0  ;;  %v5097_v22 = vpop.f32.mrb[30].mxu1  ;;  %v7182_v44 = vld [vmem:[#allocation7_spill] sm:$0xff]  ;;  %v7183_v29 = vld [vmem:[#allocation8_spill] sm:$0xff] }
 0x1fc   : > { %v4115_v38 = vadd.f32 %v4114_v15, %v4080_v21  ;;  %v4083_v52 = vmul.f32 %v4006_v35, %v3574_v13  ;;  %v4004_v56 = vmul.f32 %v6702_v43, %v3572_v12  ;;  %v5251_v7 = vadd.f32 %v6616_v6, %v2749_v17  ;;  %v3316_v30 = vpop.f32.mrb[139].mxu0  ;;  %v2752_v0 = vpop.f32.mrb[31].mxu1  ;;  %v7184_v3 = vld [vmem:[#allocation9_spill] sm:$0xff]  ;;  %v7185_v47 = vld [vmem:[#allocation6_spill] sm:$0xff] }
 0x1fd   : > { %v4587_v36 = vpack.c.bf16 %v3573_v37, %v3572_v12  ;;  %v4005_v57 = vmul.f32 %v6709_v9, %v3573_v37  ;;  %v6880_v20 = vadd.f32 %v5247_v31, %v7182_v44  ;;  %v3476_v11 = vsel %vm1287_vm4, %v3473_v33, %v3475_v5  ;;  %v6891_v28 = vpop.permute.xlu0 %3902  ;;  %v6894_v17 = vpop.permute.xlu1 %3907 }
 0x1fe   : > { %v4039_v41 = vadd.f32 %v4038_v34, %v4004_v56  ;;  %v4081_v8 = vmul.f32 %v4004_v56, %v3572_v12  ;;  %v6884_v15 = vadd.f32 %v5251_v7, %v7183_v29  ;;  %v3575_v43 = vadd.f32 %v3476_v11, %v6822_v10  ;;  %v7186_v56 = vld [vmem:[#allocation10_spill] sm:$0xff] }
 0x1ff   : > { %4665 = vst [vmem:[%s6836_s20 + $0x10] sm:$0xff] %v4587_v36   ;;  %v4082_v6 = vmul.f32 %v4005_v57, %v3573_v37  ;;  %v5255_v21 = vadd.f32 %v7184_v3, %v5097_v22  ;;  %v3481_v9 = vrot.slane %v6874_v53, 2  ;;  %v5259_v2 = vadd.f32 %v7185_v47, %v2752_v0  ;;  %v7187_v0 = vld [vmem:[#allocation11_spill] sm:$0xff] }
 0x200   : > { %v4040_v33 = vadd.f32 %v4039_v41, %v4005_v57  ;;  %v4116_v31 = vadd.f32 %v4115_v38, %v4081_v8  ;;  %v4592_v34 = vpack.c.bf16 %v3575_v43, %v3574_v13  ;;  %v4007_v12 = vmul.f32 %v6741_v27, %v3575_v43 }
 0x201   : > { %v6897_v10 = vadd.f32 %v5255_v21, %v6654_v25  ;;  %v3482_v37 = vsel %vm1287_vm4, %v3479_v59, %v3481_v9  ;;  %v6901_v7 = vadd.f32 %v5259_v2, %v7186_v56  ;;  %v3477_v53 = vrot.slane %v3316_v30, 2  ;;  %v5172_v22 = vpop.f32.mrb[140].mxu0  ;;  %v5100_v38 = vpop.f32.mrb[32].mxu1 }
 0x202   : > { %v4117_v36 = vadd.f32 %v4116_v31, %v4082_v6  ;;  %4666 = vst [vmem:[%s6836_s20 + $0x18] sm:$0xff] %v4592_v34   ;;  %v4041_v44 = vadd.f32 %v4040_v33, %v4006_v35  ;;  %v4084_v57 = vmul.f32 %v4007_v12, %v3575_v43  ;;  %v3578_v13 = vadd.f32 %v3482_v37, %v6844_v39  ;;  %v3329_v27 = vpop.f32.mrb[141].mxu0  ;;  %v2765_v29 = vpop.f32.mrb[33].mxu1 }
 0x203   : > { %v3478_v11 = vsel %vm1287_vm4, %v3475_v5, %v3477_v53  ;;  %v3480_v25 = vsel %vm1287_vm4, %v3477_v53, %v3479_v59  ;;  %v5263_v41 = vadd.f32 %v7187_v0, %v5100_v38  ;;  %v3487_v8 = vrot.slane %v5172_v22, 2  ;;  %v6908_v3 = vpop.f32.mrb[142].mxu0  ;;  %v5101_v43 = vpop.f32.mrb[34].mxu1  ;;  %v7188_v59 = vld [vmem:[#allocation12_spill] sm:$0xff]  ;;  %v7190_v53 = vld [vmem:[#allocation14_spill] sm:$0xff] }
 0x204   : > { %v4042_v30 = vadd.f32 %v4041_v44, %v4007_v12  ;;  %v4118_v21 = vadd.f32 %v4117_v36, %v4083_v52  ;;  %v4010_v6 = vmul.f32 %v6809_v54, %v3578_v13  ;;  %v3576_v35 = vadd.f32 %v3478_v11, %v6849_v16  ;;  %v3332_v39 = vpop.f32.mrb[143].mxu0  ;;  %v2768_v31 = vpop.f32.mrb[35].mxu1  ;;  %v7189_v12 = vld [vmem:[#allocation15_spill] sm:$0xff]  ;;  %v7191_v11 = vld [vmem:[#allocation13_spill] sm:$0xff] }
 0x205   : > { %v3577_v47 = vadd.f32 %v3480_v25, %v6867_v26  ;;  %v6914_v5 = vadd.f32 %v5263_v41, %v6657_v40  ;;  %v5267_v2 = vadd.f32 %v7188_v59, %v2765_v29  ;;  %v3483_v33 = vrot.slane %v3329_v27, 2  ;;  %v6924_v26 = vpop.permute.xlu0 %3912 }
 0x206   : > { %v4119_v34 = vadd.f32 %v4118_v21, %v4084_v57  ;;  %v4087_v37 = vmul.f32 %v4010_v6, %v3578_v13  ;;  %v4008_v52 = vmul.f32 %v6766_v23, %v3576_v35  ;;  %v5271_v54 = vadd.f32 %v7189_v12, %v5101_v43  ;;  %v6930_v23 = vpop.permute.xlu1 %3917  ;;  %v7192_v43 = vld [vmem:[#allocation16_spill] sm:$0xff] }
 0x207   : > { %v4597_v56 = vpack.c.bf16 %v3577_v47, %v3576_v35  ;;  %v4009_v16 = vmul.f32 %v6774_v62, %v3577_v47  ;;  %v6921_v22 = vadd.f32 %v5267_v2, %v7190_v53  ;;  %v3484_v40 = vsel %vm1287_vm4, %v3481_v9, %v3483_v33 }
 0x208   : > { %v4043_v36 = vadd.f32 %v4042_v30, %v4008_v52  ;;  %v4085_v44 = vmul.f32 %v4008_v52, %v3576_v35  ;;  %v3579_v38 = vadd.f32 %v3484_v40, %v6852_v58  ;;  %v6928_v57 = vadd.f32 %v5271_v54, %v6686_v4 }
 0x209   : > { %4667 = vst [vmem:[%s6836_s20 + $0x20] sm:$0xff] %v4597_v56   ;;  %v4086_v27 = vmul.f32 %v4009_v16, %v3577_v47  ;;  %v3489_v62 = vrot.slane %v6908_v3, 2  ;;  %v5275_v25 = vadd.f32 %v7191_v11, %v2768_v31  ;;  %v3485_v0 = vrot.slane %v3332_v39, 2  ;;  %v5176_v9 = vpop.f32.mrb[144].mxu0  ;;  %v5104_v58 = vpop.f32.mrb[36].mxu1  ;;  %v7194_v11 = vld [vmem:[#allocation19_spill] sm:$0xff] }
 0x20a   : > { %v4044_v41 = vadd.f32 %v4043_v36, %v4009_v16  ;;  %v4120_v29 = vadd.f32 %v4119_v34, %v4085_v44  ;;  %v4602_v30 = vpack.c.bf16 %v3579_v38, %v3578_v13  ;;  %v4011_v21 = vmul.f32 %v6812_v19, %v3579_v38  ;;  %v3345_v35 = vpop.f32.mrb[145].mxu0  ;;  %v2781_v2 = vpop.f32.mrb[37].mxu1  ;;  %v7193_v16 = vld [vmem:[#allocation17_spill] sm:$0xff] }
 0x20b   : > { %v3490_v4 = vsel %vm1287_vm4, %v3487_v8, %v3489_v62  ;;  %v3223_v59 = vadd.f32 %v5275_v25, %v7192_v43  ;;  %v3486_v47 = vsel %vm1287_vm4, %v3483_v33, %v3485_v0  ;;  %v3488_v3 = vsel %vm1287_vm4, %v3485_v0, %v3487_v8  ;;  %v6940_v31 = vpop.f32.mrb[146].mxu0  ;;  %v5105_v19 = vpop.f32.mrb[38].mxu1  ;;  %v7197_v43 = vld [vmem:[#allocation18_spill] sm:$0xff] }
 0x20c   : > { %v4121_v39 = vadd.f32 %v4120_v29, %v4086_v27  ;;  %4668 = vst [vmem:[%s6836_s20 + $0x28] sm:$0xff] %v4602_v30   ;;  %v4045_v52 = vadd.f32 %v4044_v41, %v4010_v6  ;;  %v4088_v34 = vmul.f32 %v4011_v21, %v3579_v38  ;;  %v3582_v13 = vadd.f32 %v3490_v4, %v6880_v20  ;;  %v3348_v12 = vpop.f32.mrb[147].mxu0  ;;  %v2784_v8 = vpop.f32.mrb[39].mxu1 }
 0x20d   : > { %v3580_v54 = vadd.f32 %v3486_v47, %v6884_v15  ;;  %v3581_v56 = vadd.f32 %v3488_v3, %v6901_v7  ;;  %v5279_v53 = vadd.f32 %v7193_v16, %v5104_v58  ;;  %v3495_v33 = vrot.slane %v5176_v9, 2  ;;  %v6954_v7 = vpop.permute.xlu0 %3922  ;;  %v7195_v9 = vld [vmem:[#allocation20_spill] sm:$0xff]  ;;  %v6959_v29 = vpop.permute.xlu1 %3927 }
 0x20e   : > { %v4046_v40 = vadd.f32 %v4045_v52, %v4011_v21  ;;  %v4122_v36 = vadd.f32 %v4121_v39, %v4087_v37  ;;  %v4014_v44 = vmul.f32 %v6856_v51, %v3582_v13  ;;  %v5283_v6 = vadd.f32 %v6680_v60, %v2781_v2 }
 0x20f   : > { %v4607_v38 = vpack.c.bf16 %v3581_v56, %v3580_v54  ;;  %v4012_v20 = vmul.f32 %v6826_v42, %v3580_v54  ;;  %v4013_v27 = vmul.f32 %v6829_v24, %v3581_v56  ;;  %v6952_v15 = vadd.f32 %v5279_v53, %v7194_v11  ;;  %v7196_v42 = vld [vmem:[#allocation21_spill] sm:$0xff] }
 0x210   : > { %v4123_v25 = vadd.f32 %v4122_v36, %v4088_v34  ;;  %v4091_v0 = vmul.f32 %v4014_v44, %v3582_v13  ;;  %v6957_v41 = vadd.f32 %v5283_v6, %v7195_v9  ;;  %v3491_v37 = vrot.slane %v3345_v35, 2 }
 0x211   : > { %4669 = vst [vmem:[%s6836_s20 + $0x30] sm:$0xff] %v4607_v38   ;;  %v4047_v60 = vadd.f32 %v4046_v40, %v4012_v20  ;;  %v4089_v51 = vmul.f32 %v4012_v20, %v3580_v54  ;;  %v4090_v30 = vmul.f32 %v4013_v27, %v3581_v56  ;;  %v5287_v21 = vadd.f32 %v7196_v42, %v5105_v19  ;;  %v6963_v24 = vpop.f32.mrb[148].mxu0  ;;  %v5108_v2 = vpop.f32.mrb[40].mxu1 }
 0x212   : > { %v3492_v58 = vsel %vm1287_vm4, %v3489_v62, %v3491_v37  ;;  %v3497_v4 = vrot.slane %v6940_v31, 2  ;;  %v5291_v47 = vadd.f32 %v7197_v43, %v2784_v8  ;;  %v3493_v3 = vrot.slane %v3348_v12, 2  ;;  %v6968_v39 = vpop.f32.mrb[149].mxu0  ;;  %v2797_v19 = vpop.f32.mrb[41].mxu1  ;;  %v7198_v31 = vld [vmem:[#allocation22_spill] sm:$0xff] }
 0x213   : > { %v4048_v35 = vadd.f32 %v4047_v60, %v4013_v27  ;;  %v4124_v52 = vadd.f32 %v4123_v25, %v4089_v51  ;;  %v3583_v34 = vadd.f32 %v3492_v58, %v6897_v10  ;;  %v6972_v54 = vadd.f32 %v5287_v21, %v6718_v55  ;;  %v6974_v56 = vpop.f32.mrb[150].mxu0  ;;  %v5109_v8 = vpop.f32.mrb[42].mxu1  ;;  %v7199_v25 = vld [vmem:[#allocation23_spill] sm:$0xff]  ;;  %v7200_v21 = vld [vmem:[#allocation24_spill] sm:$0xff] }
 0x214   : > { %v3498_v62 = vsel %vm1287_vm4, %v3495_v33, %v3497_v4  ;;  %v6978_v16 = vadd.f32 %v5291_v47, %v7198_v31  ;;  %v3494_v12 = vsel %vm1287_vm4, %v3491_v37, %v3493_v3  ;;  %v3496_v53 = vsel %vm1287_vm4, %v3493_v3, %v3495_v33  ;;  %v3364_v40 = vpop.f32.mrb[151].mxu0  ;;  %v2800_v38 = vpop.f32.mrb[43].mxu1 }
 0x215   : > { %v4125_v36 = vadd.f32 %v4124_v52, %v4090_v30  ;;  %v4612_v10 = vpack.c.bf16 %v3583_v34, %v3582_v13  ;;  %v4015_v55 = vmul.f32 %v6859_v14, %v3583_v34  ;;  %v4049_v6 = vadd.f32 %v4048_v35, %v4014_v44  ;;  %v3933_v30 = vpop.permute.xlu0 %3932  ;;  %v6991_v42 = vpop.permute.xlu1 %3937  ;;  %v7202_v52 = vld [vmem:[#allocation27_spill] sm:$0xff] }
 0x216   : > { %v3586_v20 = vadd.f32 %v3498_v62, %v6914_v5  ;;  %v3584_v27 = vadd.f32 %v3494_v12, %v6921_v22  ;;  %v3585_v11 = vadd.f32 %v3496_v53, %v3223_v59  ;;  %v5295_v9 = vadd.f32 %v7199_v25, %v5108_v2 }
 0x217   : > { %4670 = vst [vmem:[%s6836_s20 + $0x38] sm:$0xff] %v4612_v10   ;;  %v4050_v60 = vadd.f32 %v4049_v6, %v4015_v55  ;;  %v4092_v37 = vmul.f32 %v4015_v55, %v3583_v34  ;;  %v4126_v33 = vadd.f32 %v4125_v36, %v4091_v0  ;;  %v3503_v51 = vrot.slane %v6963_v24, 2  ;;  %v7203_v36 = vld [vmem:[#allocation25_spill] sm:$0xff] }
 0x218   : > { %v4018_v13 = vmul.f32 %v6924_v26, %v3586_v20  ;;  %v4617_v14 = vpack.c.bf16 %v3585_v11, %v3584_v27  ;;  %v4016_v44 = vmul.f32 %v6891_v28, %v3584_v27  ;;  %v4017_v5 = vmul.f32 %v6894_v17, %v3585_v11  ;;  %v7201_v17 = vld [vmem:[#allocation26_spill] sm:$0xff] }
 0x219   : > { %v4127_v22 = vadd.f32 %v4126_v33, %v4092_v37  ;;  %v6994_v59 = vadd.f32 %v5295_v9, %v6721_v48  ;;  %v5299_v58 = vadd.f32 %v7200_v21, %v2797_v19  ;;  %v3499_v0 = vrot.slane %v6968_v39, 2  ;;  %v6998_v43 = vpop.f32.mrb[152].mxu0  ;;  %v5112_v28 = vpop.f32.mrb[44].mxu1  ;;  %v7205_v33 = vld [vmem:[#allocation28_spill] sm:$0xff] }
 0x21a   : > { %v4095_v24 = vmul.f32 %v4018_v13, %v3586_v20  ;;  %4671 = vst [vmem:[%s6836_s20 + $0x40] sm:$0xff] %v4617_v14   ;;  %v4051_v26 = vadd.f32 %v4050_v60, %v4016_v44  ;;  %v4093_v47 = vmul.f32 %v4016_v44, %v3584_v27  ;;  %v4094_v3 = vmul.f32 %v4017_v5, %v3585_v11  ;;  %v7001_v2 = vpop.f32.mrb[153].mxu0  ;;  %v2813_v39 = vpop.f32.mrb[45].mxu1 }
 0x21b   : > { %v7004_v35 = vadd.f32 %v5299_v58, %v7201_v17  ;;  %v3500_v48 = vsel %vm1287_vm4, %v3497_v4, %v3499_v0  ;;  %v5303_v34 = vadd.f32 %v7202_v52, %v5109_v8  ;;  %v3505_v19 = vrot.slane %v6974_v56, 2  ;;  %v7009_v62 = vpop.f32.mrb[154].mxu0  ;;  %v5113_v55 = vpop.f32.mrb[46].mxu1  ;;  %v7204_v56 = vld [vmem:[#allocation29_spill] sm:$0xff] }
 0x21c   : > { %v4052_v31 = vadd.f32 %v4051_v26, %v4017_v5  ;;  %v4128_v12 = vadd.f32 %v4127_v22, %v4093_v47  ;;  %v3587_v53 = vadd.f32 %v3500_v48, %v6928_v57  ;;  %v5307_v10 = vadd.f32 %v7203_v36, %v2800_v38  ;;  %v7013_v6 = vpop.f32.mrb[155].mxu0  ;;  %v2816_v25 = vpop.f32.mrb[47].mxu1 }
 0x21d   : > { %v7016_v27 = vadd.f32 %v5303_v34, %v6750_v1  ;;  %v3506_v4 = vsel %vm1287_vm4, %v3503_v51, %v3505_v19  ;;  %v3501_v8 = vrot.slane %v3364_v40, 2  ;;  %v5311_v11 = vadd.f32 %v7204_v56, %v5112_v28  ;;  %v7027_v5 = vpop.permute.xlu0 %3942  ;;  %v7031_v58 = vpop.permute.xlu1 %3947 }
 0x21e   : > { %v4129_v9 = vadd.f32 %v4128_v12, %v4094_v3  ;;  %v4622_v60 = vpack.c.bf16 %v3587_v53, %v3586_v20  ;;  %v4019_v37 = vmul.f32 %v6930_v23, %v3587_v53  ;;  %v4053_v57 = vadd.f32 %v4052_v31, %v4018_v13 }
 0x21f   : > { %v3590_v38 = vadd.f32 %v3506_v4, %v6952_v15  ;;  %v7023_v14 = vadd.f32 %v5307_v10, %v7205_v33  ;;  %v3502_v44 = vsel %vm1287_vm4, %v3499_v0, %v3501_v8  ;;  %v3504_v1 = vsel %vm1287_vm4, %v3501_v8, %v3503_v51 }
 0x220   : > { %4672 = vst [vmem:[%s6836_s20 + $0x48] sm:$0xff] %v4622_v60   ;;  %v4054_v40 = vadd.f32 %v4053_v57, %v4019_v37  ;;  %v4096_v22 = vmul.f32 %v4019_v37, %v3587_v53  ;;  %v4130_v21 = vadd.f32 %v4129_v9, %v4095_v24  ;;  %v3588_v20 = vadd.f32 %v3502_v44, %v6957_v41  ;;  %v7206_v9 = vld [vmem:[#allocation30_spill] sm:$0xff] }
 0x221   : > { %v4022_v23 = vmul.f32 %v3933_v30, %v3590_v38  ;;  %v3589_v15 = vadd.f32 %v3504_v1, %v6978_v16  ;;  %v7035_v13 = vadd.f32 %v5311_v11, %v6753_v32  ;;  %v3511_v0 = vrot.slane %v6998_v43, 2  ;;  %v7038_v26 = vpop.f32.mrb[156].mxu0  ;;  %v5116_v24 = vpop.f32.mrb[48].mxu1 }
 0x222   : > { %v4131_v51 = vadd.f32 %v4130_v21, %v4096_v22  ;;  %v4020_v47 = vmul.f32 %v6954_v7, %v3588_v20  ;;  %v5315_v3 = vadd.f32 %v6744_v50, %v2813_v39  ;;  %v3507_v41 = vrot.slane %v7001_v2, 2  ;;  %v7043_v28 = vpop.f32.mrb[157].mxu0  ;;  %v2829_v43 = vpop.f32.mrb[49].mxu1  ;;  %v7208_v21 = vld [vmem:[#allocation32_spill] sm:$0xff] }
 0x223   : > { %v4099_v30 = vmul.f32 %v4022_v23, %v3590_v38  ;;  %v4627_v16 = vpack.c.bf16 %v3589_v15, %v3588_v20  ;;  %v4021_v32 = vmul.f32 %v6959_v29, %v3589_v15  ;;  %v5319_v17 = vadd.f32 %v6761_v18, %v5113_v55  ;;  %v7047_v48 = vpop.f32.mrb[158].mxu0  ;;  %v5117_v2 = vpop.f32.mrb[50].mxu1 }
 0x224   : > { %v4055_v52 = vadd.f32 %v4054_v40, %v4020_v47  ;;  %v4097_v34 = vmul.f32 %v4020_v47, %v3588_v20  ;;  %v7050_v7 = vadd.f32 %v5315_v3, %v6758_v45  ;;  %v3508_v50 = vsel %vm1287_vm4, %v3505_v19, %v3507_v41  ;;  %v7053_v39 = vpop.f32.mrb[159].mxu0  ;;  %v2832_v53 = vpop.f32.mrb[51].mxu1  ;;  %v7209_v3 = vld [vmem:[#allocation31_spill] sm:$0xff] }
 0x225   : > { %4673 = vst [vmem:[%s6836_s20 + $0x50] sm:$0xff] %v4627_v16   ;;  %v4098_v31 = vmul.f32 %v4021_v32, %v3589_v15  ;;  %v3591_v12 = vadd.f32 %v3508_v50, %v6972_v54  ;;  %v7058_v29 = vadd.f32 %v5319_v17, %v6793_v63  ;;  %v3513_v18 = vrot.slane %v7009_v62, 2  ;;  %v3953_v55 = vpop.permute.xlu0 %3952  ;;  %v3958_v37 = vpop.permute.xlu1 %3957  ;;  %v7210_v16 = vld [vmem:[#allocation35_spill] sm:$0xff] }
 0x226   : > { %v4056_v36 = vadd.f32 %v4055_v52, %v4021_v32  ;;  %v4132_v10 = vadd.f32 %v4131_v51, %v4097_v34  ;;  %v5323_v45 = vadd.f32 %v6747_v49, %v2816_v25  ;;  %v3509_v19 = vrot.slane %v7013_v6, 2  ;;  %v7207_v25 = vld [vmem:[#allocation34_spill] sm:$0xff] }
 0x227   : > { %v4632_v4 = vpack.c.bf16 %v3591_v12, %v3590_v38  ;;  %v4023_v8 = vmul.f32 %v6991_v42, %v3591_v12  ;;  %v3514_v56 = vsel %vm1287_vm4, %v3511_v0, %v3513_v18  ;;  %v5327_v54 = vadd.f32 %v6777_v61, %v5116_v24 }
 0x228   : > { %v4133_v63 = vadd.f32 %v4132_v10, %v4098_v31  ;;  %v4057_v11 = vadd.f32 %v4056_v36, %v4022_v23  ;;  %v3594_v62 = vadd.f32 %v3514_v56, %v6994_v59  ;;  %v3235_v60 = vadd.f32 %v5323_v45, %v7206_v9 }
 0x229   : > { %4674 = vst [vmem:[%s6836_s20 + $0x58] sm:$0xff] %v4632_v4   ;;  %v4100_v57 = vmul.f32 %v4023_v8, %v3591_v12  ;;  %v3510_v49 = vsel %vm1287_vm4, %v3507_v41, %v3509_v19  ;;  %v3512_v6 = vsel %vm1287_vm4, %v3509_v19, %v3511_v0  ;;  %v7072_v38 = vadd.f32 %v5327_v54, %v7207_v25  ;;  %v7074_v42 = vpop.f32.mrb[160].mxu0  ;;  %v7212_v19 = vld [vmem:[#allocation36_spill] sm:$0xff] }
 0x22a   : > { %v4058_v33 = vadd.f32 %v4057_v11, %v4023_v8  ;;  %v4134_v61 = vadd.f32 %v4133_v63, %v4099_v30  ;;  %v4026_v44 = vmul.f32 %v3953_v55, %v3594_v62  ;;  %v3592_v1 = vadd.f32 %v3510_v49, %v7004_v35  ;;  %v7077_v59 = vpop.f32.mrb[161].mxu0  ;;  %v3963_v35 = vpop.permute.xlu0 %3962 }
 0x22b   : > { %v3593_v40 = vadd.f32 %v3512_v6, %v7023_v14  ;;  %v3519_v22 = vrot.slane %v7038_v26, 2  ;;  %v5331_v20 = vadd.f32 %v7208_v21, %v2829_v43  ;;  %v3515_v23 = vrot.slane %v7043_v28, 2  ;;  %v5193_v15 = vpop.f32.mrb[162].mxu0 }
 0x22c   : > { %v4135_v0 = vadd.f32 %v4134_v61, %v4100_v57  ;;  %v4103_v51 = vmul.f32 %v4026_v44, %v3594_v62  ;;  %v4024_v47 = vmul.f32 %v7027_v5, %v3592_v1  ;;  %v5335_v41 = vadd.f32 %v7209_v3, %v5117_v2  ;;  %v7085_v24 = vpop.f32.mrb[163].mxu0  ;;  %v3968_v5 = vpop.permute.xlu1 %3967  ;;  %v7211_v2 = vld [vmem:[#allocation33_spill] sm:$0xff] }
 0x22d   : > { %v4637_v30 = vpack.c.bf16 %v3593_v40, %v3592_v1  ;;  %v4025_v14 = vmul.f32 %v7031_v58, %v3593_v40  ;;  %v7089_v26 = vadd.f32 %v5331_v20, %v7210_v16  ;;  %v3516_v32 = vsel %vm1287_vm4, %v3513_v18, %v3515_v23 }
 0x22e   : > { %v4059_v28 = vadd.f32 %v4058_v33, %v4024_v47  ;;  %v4101_v17 = vmul.f32 %v4024_v47, %v3592_v1  ;;  %v3595_v43 = vadd.f32 %v3516_v32, %v7016_v27  ;;  %v3241_v52 = vadd.f32 %v5335_v41, %v6864_v46  ;;  %v3973_v56 = vpop.permute.xlu0 %3972 }
 0x22f   : > { %4675 = vst [vmem:[%s6836_s20 + $0x60] sm:$0xff] %v4637_v30   ;;  %v4102_v34 = vmul.f32 %v4025_v14, %v3593_v40  ;;  %v3521_v50 = vrot.slane %v7047_v48, 2  ;;  %v5339_v31 = vadd.f32 %v7211_v2, %v2832_v53  ;;  %v3517_v58 = vrot.slane %v7053_v39, 2 }
 0x230   : > { %v4060_v12 = vadd.f32 %v4059_v28, %v4025_v14  ;;  %v4136_v36 = vadd.f32 %v4135_v0, %v4101_v17  ;;  %v4642_v10 = vpack.c.bf16 %v3595_v43, %v3594_v62  ;;  %v4027_v18 = vmul.f32 %v3958_v37, %v3595_v43  ;;  %v3978_v57 = vpop.permute.xlu1 %3977 }
 0x231   : > { %v3522_v45 = vsel %vm1287_vm4, %v3519_v22, %v3521_v50  ;;  %v3239_v27 = vadd.f32 %v5339_v31, %v7212_v19  ;;  %v3518_v46 = vsel %vm1287_vm4, %v3515_v23, %v3517_v58  ;;  %v3520_v55 = vsel %vm1287_vm4, %v3517_v58, %v3519_v22 }
 0x232   : > { %v4137_v4 = vadd.f32 %v4136_v36, %v4102_v34  ;;  %4676 = vst [vmem:[%s6836_s20 + $0x68] sm:$0xff] %v4642_v10   ;;  %v4061_v8 = vadd.f32 %v4060_v12, %v4026_v44  ;;  %v4104_v48 = vmul.f32 %v4027_v18, %v3595_v43  ;;  %v3598_v53 = vadd.f32 %v3522_v45, %v7035_v13  ;;  %v3983_v20 = vpop.permute.xlu0 %3982 }
 0x233   : > { %v3596_v39 = vadd.f32 %v3518_v46, %v7050_v7  ;;  %v3597_v54 = vadd.f32 %v3520_v55, %v3235_v60  ;;  %v3523_v63 = vrot.slane %v7077_v59, 2  ;;  %v3527_v9 = vrot.slane %v7074_v42, 2 }
 0x234   : > { %v4062_v11 = vadd.f32 %v4061_v8, %v4027_v18  ;;  %v4138_v62 = vadd.f32 %v4137_v4, %v4103_v51  ;;  %v3529_v37 = vrot.slane %v5193_v15, 2  ;;  %v4030_v13 = vmul.f32 %v3973_v56, %v3598_v53  ;;  %v3988_v41 = vpop.permute.xlu1 %3987 }
 0x235   : > { %v4647_v49 = vpack.c.bf16 %v3597_v54, %v3596_v39  ;;  %v4028_v6 = vmul.f32 %v3963_v35, %v3596_v39  ;;  %v4029_v25 = vmul.f32 %v3968_v5, %v3597_v54  ;;  %v3524_v33 = vsel %vm1287_vm4, %v3521_v50, %v3523_v63 }
 0x236   : > { %v4139_v61 = vadd.f32 %v4138_v62, %v4104_v48  ;;  %v3599_v44 = vadd.f32 %v3524_v33, %v7058_v29  ;;  %v3530_v7 = vsel %vm1287_vm4, %v3527_v9, %v3529_v37  ;;  %v3567_v59 = vsel %vm1287_vm4, %v3529_v37, 0.0  ;;  %v3993_v5 = vpop.permute.xlu0 %3992 }
 0x237   : > { %4677 = vst [vmem:[%s6836_s20 + $0x70] sm:$0xff] %v4647_v49   ;;  %v4063_v60 = vadd.f32 %v4062_v11, %v4028_v6  ;;  %v4105_v1 = vmul.f32 %v4028_v6, %v3596_v39  ;;  %v3602_v22 = vadd.f32 %v3530_v7, %v7072_v38  ;;  %v3603_v21 = vadd.f32 %v3567_v59, %v3241_v52 }
 0x238   : > { %v4652_v42 = vpack.c.bf16 %v3599_v44, %v3598_v53  ;;  %v4031_v40 = vmul.f32 %v3978_v57, %v3599_v44  ;;  %v4106_v15 = vmul.f32 %v4029_v25, %v3597_v54  ;;  %v3525_v29 = vrot.slane %v7085_v24, 2  ;;  %v3998_v58 = vpop.permute.xlu1 %3997 }
 0x239   : > { %v4064_v23 = vadd.f32 %v4063_v60, %v4029_v25  ;;  %v4140_v0 = vadd.f32 %v4139_v61, %v4105_v1  ;;  %v4107_v51 = vmul.f32 %v4030_v13, %v3598_v53  ;;  %v4662_v3 = vpack.c.bf16 %v3603_v21, %v3602_v22 }
 0x23a   : > { %4678 = vst [vmem:[%s6836_s20 + $0x78] sm:$0xff] %v4652_v42   ;;  %v4108_v47 = vmul.f32 %v4031_v40, %v3599_v44  ;;  %v3526_v14 = vsel %vm1287_vm4, %v3523_v63, %v3525_v29  ;;  %v3528_v38 = vsel %vm1287_vm4, %v3525_v29, %v3527_v9  ;;  %v4034_v50 = vmul.f32 %v3993_v5, %v3602_v22 }
 0x23b   : > { %v4141_v35 = vadd.f32 %v4140_v0, %v4106_v15  ;;  %v4065_v30 = vadd.f32 %v4064_v23, %v4030_v13  ;;  %4680 = vst [vmem:[%s6836_s20 + $0x88] sm:$0xff] %v4662_v3   ;;  %v3600_v16 = vadd.f32 %v3526_v14, %v7089_v26  ;;  %v3601_v32 = vadd.f32 %v3528_v38, %v3239_v27 }
 0x23c   : > { %v4035_v12 = vmul.f32 %v3998_v58, %v3603_v21  ;;  %v4111_v45 = vmul.f32 %v4034_v50, %v3602_v22 }
 0x23d   : > { %v4066_v28 = vadd.f32 %v4065_v30, %v4031_v40  ;;  %v4142_v17 = vadd.f32 %v4141_v35, %v4107_v51  ;;  %v4657_v43 = vpack.c.bf16 %v3601_v32, %v3600_v16  ;;  %v4032_v24 = vmul.f32 %v3983_v20, %v3600_v16 }
 0x23e   : > { %v4033_v52 = vmul.f32 %v3988_v41, %v3601_v32  ;;  %v4112_v27 = vmul.f32 %v4035_v12, %v3603_v21 }
 0x23f   : > { %v4143_v34 = vadd.f32 %v4142_v17, %v4108_v47  ;;  %4679 = vst [vmem:[%s6836_s20 + $0x80] sm:$0xff] %v4657_v43   ;;  %v4067_v2 = vadd.f32 %v4066_v28, %v4032_v24  ;;  %v4109_v31 = vmul.f32 %v4032_v24, %v3600_v16 }
 0x240   : > { %v4110_v10 = vmul.f32 %v4033_v52, %v3601_v32 }
 0x241   : > { %v4068_v36 = vadd.f32 %v4067_v2, %v4033_v52  ;;  %v4144_v18 = vadd.f32 %v4143_v34, %v4109_v31 }
 0x243   : > { %v4069_v26 = vadd.f32 %v4068_v36, %v4034_v50  ;;  %v4145_v19 = vadd.f32 %v4144_v18, %v4110_v10 }
 0x245   : > { %v4070_v46 = vadd.f32 %v4069_v26, %v4035_v12  ;;  %v4146_v55 = vadd.f32 %v4145_v19, %v4111_v45 }
 0x247   : > { %v4071_v4 = vrot.slane %v4070_v46, 4  ;;  %v4147_v8 = vadd.f32 %v4146_v55, %v4112_v27 }
 0x249   : > { %v4072_v48 = vadd.f32 %v4071_v4, %v4070_v46  ;;  %v4148_v53 = vrot.slane %v4147_v8, 4 }
 0x24b   : > { %v4073_v56 = vrot.slane %v4072_v48, 2  ;;  %v4149_v39 = vadd.f32 %v4148_v53, %v4147_v8 }
 0x24d   : > { %v4074_v54 = vadd.f32 %v4073_v56, %v4072_v48  ;;  %v4150_v63 = vrot.slane %v4149_v39, 2 }
 0x24f   : > { %v4075_v11 = vrot.slane %v4074_v54, 1  ;;  %v4151_v62 = vadd.f32 %v4150_v63, %v4149_v39 }
 0x251   : > { %v4152_v9 = vrot.slane %v4151_v62, 1  ;;  %v4076_v37 = vadd.f32 %v4075_v11, %v4074_v54 }
 0x253   : > { %v4153_v57 = vadd.f32 %v4152_v9, %v4151_v62 }
 0x255   : > { %v4154_v49 = vsel %vm560_vm0, %v4076_v37, %v4153_v57 }
 0x256   : > { %4155 = vst [vmem:[%s302_s26] sm:$0x3] %v4154_v49 }
 0x257 PF: > { %s17_s21 = sadd.s32 1, %s5485_s21  }
 0x258   : > { %p14_p4 = scmp.ge.s32.totalorder %s17_s21, 4  }
 0x25a   :  { %16 = sbr.rel (!%p14_p4) target bundleno = 1 (0x1), region = 96 }

// kernel: cnn_part_forward.4
= control target key start
LH: loop header
LB: loop body
LE: loop exit
PB: predicated region body
PF: predicated region fallthrough
CT: control target
= control target key end

     0   :  { %s7612_s17 = smov 0   ;;  %s9898_s0 = inlined_call_operand.vmem [shape: bf16[2,288,128], index: 0, kind: input, shape index: {}]   ;;  %s9899_s1 = inlined_call_operand.vmem [shape: bf16[2,288,128], index: 1, kind: input, shape index: {}]   ;;  %s9900_s2 = inlined_call_operand.vmem [shape: bf16[2,288,128], index: 2, kind: input, shape index: {}]   ;;  %s9901_s3 = inlined_call_operand.vmem [shape: f32[2,288,1], index: 3, kind: input, shape index: {}]   ;;  %s9902_s4 = inlined_call_operand.vmem [shape: f32[2,288,1], index: 4, kind: input, shape index: {}]   ;;  %s9903_s5 = inlined_call_operand.vmem [shape: f32[2,288,1], index: 5, kind: input, shape index: {}]   ;;  %s9904_s6 = inlined_call_operand.vmem [shape: f32[1,128], index: 6, kind: input, shape index: {}]   ;;  %s9905_s7 = inlined_call_operand.vmem [shape: f32[1,128], index: 7, kind: input, shape index: {}]   ;;  %s9906_s8 = inlined_call_operand.vmem [shape: bf16[9,128,128], index: 8, kind: input, shape index: {}]   ;;  %s9907_s9 = inlined_call_operand.vmem [shape: f32[288,1], index: 9, kind: input, shape index: {}]   ;;  %s9908_s10 = inlined_call_operand.vmem [shape: bf16[2,288,128], index: 10, kind: output, shape index: {0}]   ;;  %s9909_s11 = inlined_call_operand.vmem [shape: f32[2,2,128], index: 11, kind: output, shape index: {1}]  }
   0x1 LB: > { %s5857_s18 = sadd.s32 4294967295, %s7549_s17   ;;  %p5861_p0 = scmp.ge.s32.totalorder %s7549_s17, 1  ;;  %s7549_s17 = sphi %s7612_s17, %s22_s17  }
   0x2   : > { %p390_p1 = scmp.lt.s32.totalorder %s7549_s17, 3 }
   0x4   : > { %p391_p2 = pnand %p5861_p0, %p390_p1 }
   0x6   : > { %394 = sbr.rel (%p391_p2) target bundleno = 765 (0x2fd), region = 60 }
   0xd   : > { %p459_p3 = scmp.lt.s32.totalorder %s5857_s18, 1  ;;  %v7551_v0 = vmov 0   ;;  %v7467_v1 = vld [vmem:[%s9906_s8 + $0x40] sm:$0xff]   ;;  %v7468_v2 = vld [vmem:[%s9906_s8 + $0x48] sm:$0xff]   ;;  %v7469_v3 = vld [vmem:[%s9906_s8 + $0x50] sm:$0xff]   ;;  %vm2157_vm0 = vcmask 1046528  }
   0xe   : > { %7466 = vset.pattern.permute.xlu1 %v7551_v0  ;;  %7465 = vset.pattern.permute.xlu0 %v7551_v0  ;;  %v7470_v8 = vld [vmem:[%s9906_s8 + $0x58] sm:$0xff]   ;;  %v7471_v11 = vld [vmem:[%s9906_s8 + $0x60] sm:$0xff]   ;;  %v7472_v14 = vld [vmem:[%s9906_s8 + $0x68] sm:$0xff]   ;;  %vm2769_vm1 = vcmask 1045504   ;;  %vm5708_vm2 = vcmask 1040384  }
   0xf   : > { %s10030_s18 = smov (!%p459_p3, %s5857_s18), 1  ;;  %7222 = vmatprep.subr.bf16.mxu1 %v7467_v1  ;;  %6754 = vmatprep.subr.bf16.mxu0 %v7467_v1  ;;  %v7473_v21 = vld [vmem:[%s9906_s8 + $0x70] sm:$0xff]   ;;  %v7474_v22 = vld [vmem:[%s9906_s8 + $0x78] sm:$0xff]   ;;  %v7680_v31 = vld [vmem:[%s9906_s8] sm:$0xff]  }
  0x10   : > { %s7629_s23 = smul.u32 288, %s10030_s18  ;;  %7230 = vmatpush3.bf16.msra.mxu1 %v7467_v1  ;;  %6755 = vmatpush3.bf16.msra.mxu0 %v7467_v1  ;;  %v7685_v32 = vld [vmem:[%s9906_s8 + $0x80] sm:$0xff]  }
  0x11   : > { %7223 = vmatprep.subr.bf16.mxu1 %v7468_v2  ;;  %6756 = vmatprep.subr.bf16.mxu0 %v7468_v2 }
  0x12   : > { %s7635_s26 = scalar_lea.vmem %s9901_s3, %s7629_s23  ;;  %s7707_s30 = scalar_lea.vmem %s9902_s4, %s7629_s23 }
  0x13   : > { %v711_v4 = vld [vmem:[%s7635_s26 + $0x90] sm:$0xff]  ;;  %v709_v5 = vld [vmem:[%s7635_s26 + $0x80] sm:$0xff]  ;;  %v712_v6 = vld [vmem:[%s7635_s26 + $0x98] sm:$0xff]  ;;  %s7809_s27 = scalar_lea.vmem %s9903_s5, %s7629_s23 }
  0x14   : > { %821 = vperm.xlu1 %7466, %v711_v4   ;;  %811 = vperm.xlu0 %7465, %v709_v5   ;;  %v710_v7 = vld [vmem:[%s7635_s26 + $0x88] sm:$0xff]  ;;  %v693_v10 = vld [vmem:[%s7635_s26] sm:$0xff]  ;;  %v696_v12 = vld [vmem:[%s7635_s26 + $0x18] sm:$0xff] }
  0x15   : > { %7231 = vmatpush3.bf16.msra.mxu1 %v7468_v2  ;;  %6757 = vmatpush3.bf16.msra.mxu0 %v7468_v2  ;;  %v694_v9 = vld [vmem:[%s7635_s26 + $0x8] sm:$0xff]  ;;  %v695_v13 = vld [vmem:[%s7635_s26 + $0x10] sm:$0xff]  ;;  %v713_v16 = vld [vmem:[%s7635_s26 + $0xa0] sm:$0xff] }
  0x16   : > { %7224 = vmatprep.subr.bf16.mxu1 %v7469_v3  ;;  %6758 = vmatprep.subr.bf16.mxu0 %v7469_v3  ;;  %v714_v15 = vld [vmem:[%s7635_s26 + $0xa8] sm:$0xff]  ;;  %v716_v17 = vld [vmem:[%s7635_s26 + $0xb8] sm:$0xff]  ;;  %v715_v18 = vld [vmem:[%s7635_s26 + $0xb0] sm:$0xff] }
  0x17   : > { %v698_v19 = vld [vmem:[%s7635_s26 + $0x28] sm:$0xff]  ;;  %v697_v20 = vld [vmem:[%s7635_s26 + $0x20] sm:$0xff]  ;;  %v700_v23 = vld [vmem:[%s7635_s26 + $0x38] sm:$0xff] }
  0x18   : > { %826 = vperm.xlu1 %7466, %v712_v6   ;;  %816 = vperm.xlu0 %7465, %v710_v7   ;;  %v699_v24 = vld [vmem:[%s7635_s26 + $0x30] sm:$0xff]  ;;  %v718_v25 = vld [vmem:[%s7635_s26 + $0xc8] sm:$0xff]  ;;  %v717_v26 = vld [vmem:[%s7635_s26 + $0xc0] sm:$0xff] }
  0x19   : > { %7232 = vmatpush3.bf16.msra.mxu1 %v7469_v3  ;;  %6759 = vmatpush3.bf16.msra.mxu0 %v7469_v3  ;;  %v720_v27 = vld [vmem:[%s7635_s26 + $0xd8] sm:$0xff]  ;;  %v719_v28 = vld [vmem:[%s7635_s26 + $0xd0] sm:$0xff]  ;;  %v702_v29 = vld [vmem:[%s7635_s26 + $0x48] sm:$0xff] }
  0x1a   : > { %7225 = vmatprep.subr.bf16.mxu1 %v7470_v8  ;;  %6760 = vmatprep.subr.bf16.mxu0 %v7470_v8  ;;  %v701_v30 = vld [vmem:[%s7635_s26 + $0x40] sm:$0xff]  ;;  %v704_v33 = vld [vmem:[%s7635_s26 + $0x58] sm:$0xff]  ;;  %v703_v34 = vld [vmem:[%s7635_s26 + $0x50] sm:$0xff] }
  0x1b   : > { %v722_v35 = vld [vmem:[%s7635_s26 + $0xe8] sm:$0xff]  ;;  %v721_v36 = vld [vmem:[%s7635_s26 + $0xe0] sm:$0xff]  ;;  %v724_v37 = vld [vmem:[%s7635_s26 + $0xf8] sm:$0xff] }
  0x1c   : > { %736 = vperm.xlu1 %7466, %v694_v9   ;;  %731 = vperm.xlu0 %7465, %v693_v10   ;;  %v723_v38 = vld [vmem:[%s7635_s26 + $0xf0] sm:$0xff]  ;;  %v706_v39 = vld [vmem:[%s7635_s26 + $0x68] sm:$0xff]  ;;  %v705_v40 = vld [vmem:[%s7635_s26 + $0x60] sm:$0xff] }
  0x1d   : > { %7233 = vmatpush3.bf16.msra.mxu1 %v7470_v8  ;;  %6761 = vmatpush3.bf16.msra.mxu0 %v7470_v8  ;;  %v708_v41 = vld [vmem:[%s7635_s26 + $0x78] sm:$0xff]  ;;  %v707_v42 = vld [vmem:[%s7635_s26 + $0x70] sm:$0xff]  ;;  %v726_v43 = vld [vmem:[%s7635_s26 + $0x108] sm:$0xff] }
  0x1e   : > { %7226 = vmatprep.subr.bf16.mxu1 %v7471_v11  ;;  %6762 = vmatprep.subr.bf16.mxu0 %v7471_v11  ;;  %v725_v44 = vld [vmem:[%s7635_s26 + $0x100] sm:$0xff]  ;;  %v728_v45 = vld [vmem:[%s7635_s26 + $0x118] sm:$0xff]  ;;  %v727_v46 = vld [vmem:[%s7635_s26 + $0x110] sm:$0xff]  ;;  %s7730_s26 = smul.u32 144, %s10030_s18 }
  0x1f   : > { %v1144_v47 = vld [vmem:[%s7707_s30 + $0x8] sm:$0xff]  ;;  %v1143_v48 = vld [vmem:[%s7707_s30] sm:$0xff]  ;;  %v1146_v49 = vld [vmem:[%s7707_s30 + $0x18] sm:$0xff] }
  0x20   : > { %746 = vperm.xlu1 %7466, %v696_v12   ;;  %741 = vperm.xlu0 %7465, %v695_v13   ;;  %v1145_v50 = vld [vmem:[%s7707_s30 + $0x10] sm:$0xff]  ;;  %v1148_v51 = vld [vmem:[%s7707_s30 + $0x28] sm:$0xff]  ;;  %v1147_v52 = vld [vmem:[%s7707_s30 + $0x20] sm:$0xff]  ;;  %s7738_s14 = scalar_lea.vmem %s9898_s0, %s7730_s26  ;;  %s8506_s13 = scalar_lea.vmem %s9900_s2, %s7730_s26 }
  0x21   : > { %7234 = vmatpush3.bf16.msra.mxu1 %v7471_v11  ;;  %6763 = vmatpush3.bf16.msra.mxu0 %v7471_v11  ;;  %v1150_v53 = vld [vmem:[%s7707_s30 + $0x38] sm:$0xff]  ;;  %v1149_v54 = vld [vmem:[%s7707_s30 + $0x30] sm:$0xff]  ;;  %v1152_v55 = vld [vmem:[%s7707_s30 + $0x48] sm:$0xff]  ;;  %s9677_s21 = scalar_lea.vmem %s9908_s10, %s7730_s26 }
  0x22   : > { %7227 = vmatprep.subr.bf16.mxu1 %v7472_v14  ;;  %6764 = vmatprep.subr.bf16.mxu0 %v7472_v14  ;;  %v1151_v56 = vld [vmem:[%s7707_s30 + $0x40] sm:$0xff]  ;;  %v1154_v57 = vld [vmem:[%s7707_s30 + $0x58] sm:$0xff]  ;;  %v1153_v58 = vld [vmem:[%s7707_s30 + $0x50] sm:$0xff] }
  0x23   : > { %v1156_v59 = vld [vmem:[%s7707_s30 + $0x68] sm:$0xff]  ;;  %v1155_v60 = vld [vmem:[%s7707_s30 + $0x60] sm:$0xff]  ;;  %v1158_v61 = vld [vmem:[%s7707_s30 + $0x78] sm:$0xff] }
  0x24   : > { %836 = vperm.xlu1 %7466, %v714_v15   ;;  %831 = vperm.xlu0 %7465, %v713_v16   ;;  %v1157_v62 = vld [vmem:[%s7707_s30 + $0x70] sm:$0xff]  ;;  %v1160_v63 = vld [vmem:[%s7707_s30 + $0x88] sm:$0xff]  ;;  %v1159_v0 = vld [vmem:[%s7707_s30 + $0x80] sm:$0xff] }
  0x25   : > { %7235 = vmatpush3.bf16.msra.mxu1 %v7472_v14  ;;  %6765 = vmatpush3.bf16.msra.mxu0 %v7472_v14  ;;  %v1162_v1 = vld [vmem:[%s7707_s30 + $0x98] sm:$0xff]  ;;  %v1161_v2 = vld [vmem:[%s7707_s30 + $0x90] sm:$0xff]  ;;  %v1164_v3 = vld [vmem:[%s7707_s30 + $0xa8] sm:$0xff] }
  0x26   : > { %7228 = vmatprep.subr.bf16.mxu1 %v7473_v21  ;;  %6766 = vmatprep.subr.bf16.mxu0 %v7473_v21  ;;  %v1163_v4 = vld [vmem:[%s7707_s30 + $0xa0] sm:$0xff]  ;;  %v6460_v5 = vld [vmem:[%s7738_s14 + $0x48] sm:$0xff]   ;;  %v1166_v7 = vld [vmem:[%s7707_s30 + $0xb8] sm:$0xff] }
  0x27   : > { %v6459_v6 = vld [vmem:[%s7738_s14 + $0x40] sm:$0xff]   ;;  %v1165_v8 = vld [vmem:[%s7707_s30 + $0xb0] sm:$0xff]  ;;  %v6184_v9 = vunpack.c.l.bf16 %v6460_v5  ;;  %v6185_v12 = vunpack.c.h.bf16 %v6460_v5  ;;  %v1168_v15 = vld [vmem:[%s7707_s30 + $0xc8] sm:$0xff] }
  0x28   : > { %846 = vperm.xlu1 %7466, %v716_v17   ;;  %841 = vperm.xlu0 %7465, %v715_v18   ;;  %v6180_v10 = vunpack.c.l.bf16 %v6459_v6  ;;  %v7747_v11 = vld [vmem:[%s9904_s6] ss:$0 sm:$0xff]  ;;  %v6181_v13 = vunpack.c.h.bf16 %v6459_v6  ;;  %v6453_v5 = vld [vmem:[%s7738_s14 + $0x10] sm:$0xff]   ;;  %v1176_v6 = vld [vmem:[%s7707_s30 + $0x108] sm:$0xff] }
  0x29   : > { %7236 = vmatpush3.bf16.msra.mxu1 %v7473_v21  ;;  %6767 = vmatpush3.bf16.msra.mxu0 %v7473_v21  ;;  %v6147_v14 = vld [vmem:[%s7738_s14] sm:$0xff]   ;;  %v597_v17 = vmul.f32 %v6184_v9, %v7747_v11 }
  0x2a   : > { %7229 = vmatprep.subr.bf16.mxu1 %v7474_v22  ;;  %6768 = vmatprep.subr.bf16.mxu0 %v7474_v22  ;;  %v1167_v16 = vld [vmem:[%s7707_s30 + $0xc0] sm:$0xff]  ;;  %v595_v18 = vmul.f32 %v6180_v10, %v7747_v11 }
  0x2b   : > { %v7758_v21 = vld [vmem:[%s9905_s7] ss:$0 sm:$0xff] }
  0x2c   : > { %756 = vperm.xlu1 %7466, %v698_v19   ;;  %751 = vperm.xlu0 %7465, %v697_v20   ;;  %v6149_v19 = vunpack.c.h.bf16 %v6147_v14  ;;  %v6452_v20 = vld [vmem:[%s7738_s14 + $0x8] sm:$0xff]  }
  0x2d   : > { %7237 = vmatpush3.bf16.msra.mxu1 %v7474_v22  ;;  %6769 = vmatpush3.bf16.msra.mxu0 %v7474_v22  ;;  %v598_v22 = vmul.f32 %v6185_v12, %v7747_v11 }
  0x2e   : > { %6806 = vmatprep.subr.bf16.mxu1 %v7680_v31  ;;  %6858 = vmatprep.subr.bf16.mxu0 %v7685_v32 }
  0x30   : > { %766 = vperm.xlu1 %7466, %v700_v23   ;;  %761 = vperm.xlu0 %7465, %v699_v24   ;;  %v596_v23 = vmul.f32 %v6181_v13, %v7747_v11  ;;  %v6148_v24 = vunpack.c.l.bf16 %v6147_v14 }
  0x34   : > { %856 = vperm.xlu1 %7466, %v718_v25   ;;  %851 = vperm.xlu0 %7465, %v717_v26   ;;  %v1170_v25 = vld [vmem:[%s7707_s30 + $0xd8] sm:$0xff]  ;;  %v1169_v26 = vld [vmem:[%s7707_s30 + $0xd0] sm:$0xff] }
  0x38   : > { %866 = vperm.xlu1 %7466, %v720_v27   ;;  %861 = vperm.xlu0 %7465, %v719_v28   ;;  %v6153_v27 = vunpack.c.h.bf16 %v6452_v20  ;;  %v639_v28 = vadd.f32 %v7758_v21, %v597_v17 }
  0x3c   : > { %776 = vperm.xlu1 %7466, %v702_v29   ;;  %771 = vperm.xlu0 %7465, %v701_v30   ;;  %v637_v29 = vadd.f32 %v7758_v21, %v595_v18  ;;  %v580_v30 = vmul.f32 %v6149_v19, %v7747_v11  ;;  %v6157_v18 = vunpack.c.h.bf16 %v6453_v5  ;;  %v6454_v19 = vld [vmem:[%s7738_s14 + $0x18] sm:$0xff]  }
  0x40   : > { %786 = vperm.xlu1 %7466, %v704_v33   ;;  %781 = vperm.xlu0 %7465, %v703_v34   ;;  %v6152_v33 = vunpack.c.l.bf16 %v6452_v20  ;;  %v6461_v34 = vld [vmem:[%s7738_s14 + $0x50] sm:$0xff]  }
  0x44   : > { %876 = vperm.xlu1 %7466, %v722_v35   ;;  %871 = vperm.xlu0 %7465, %v721_v36   ;;  %v640_v35 = vadd.f32 %v7758_v21, %v598_v22  ;;  %v638_v36 = vadd.f32 %v7758_v21, %v596_v23 }
  0x48   : > { %886 = vperm.xlu1 %7466, %v724_v37   ;;  %881 = vperm.xlu0 %7465, %v723_v38   ;;  %v579_v37 = vmul.f32 %v6148_v24, %v7747_v11  ;;  %v1172_v38 = vld [vmem:[%s7707_s30 + $0xe8] sm:$0xff]  ;;  %v6156_v24 = vunpack.c.l.bf16 %v6453_v5 }
  0x4c   : > { %796 = vperm.xlu1 %7466, %v706_v39   ;;  %791 = vperm.xlu0 %7465, %v705_v40   ;;  %v1171_v39 = vld [vmem:[%s7707_s30 + $0xe0] sm:$0xff]  ;;  %v582_v40 = vmul.f32 %v6153_v27, %v7747_v11  ;;  %v7477_v27 = vld [vmem:[%s9906_s8 + $0x8] sm:$0xff]  }
  0x50   : > { %806 = vperm.xlu1 %7466, %v708_v41   ;;  %801 = vperm.xlu0 %7465, %v707_v42   ;;  %v6189_v41 = vunpack.c.h.bf16 %v6461_v34 }
  0x54   : > { %896 = vperm.xlu1 %7466, %v726_v43   ;;  %891 = vperm.xlu0 %7465, %v725_v44   ;;  %v675_v43 = vmax.f32 %v639_v28, 0.0 }
  0x58   : > { %906 = vperm.xlu1 %7466, %v728_v45   ;;  %901 = vperm.xlu0 %7465, %v727_v46   ;;  %v622_v45 = vadd.f32 %v7758_v21, %v580_v30  ;;  %v581_v46 = vmul.f32 %v6152_v33, %v7747_v11  ;;  %v6161_v30 = vunpack.c.h.bf16 %v6454_v19 }
  0x5c   : > { %1186 = vperm.xlu1 %7466, %v1144_v47   ;;  %1181 = vperm.xlu0 %7465, %v1143_v48   ;;  %v6188_v47 = vunpack.c.l.bf16 %v6461_v34  ;;  %v6462_v48 = vld [vmem:[%s7738_s14 + $0x58] sm:$0xff]  }
  0x60   : > { %1196 = vperm.xlu1 %7466, %v1146_v49   ;;  %1191 = vperm.xlu0 %7465, %v1145_v50   ;;  %v673_v49 = vmax.f32 %v637_v29, 0.0  ;;  %v676_v50 = vmax.f32 %v640_v35, 0.0 }
  0x64   : > { %1206 = vperm.xlu1 %7466, %v1148_v51   ;;  %1201 = vperm.xlu0 %7465, %v1147_v52   ;;  %v674_v51 = vmax.f32 %v638_v36, 0.0  ;;  %v621_v52 = vadd.f32 %v7758_v21, %v579_v37  ;;  %v584_v37 = vmul.f32 %v6157_v18, %v7747_v11  ;;  %v1597_v18 = vld [vmem:[%s7809_s27 + $0x20] sm:$0xff] }
  0x68   : > { %1216 = vperm.xlu1 %7466, %v1150_v53   ;;  %1211 = vperm.xlu0 %7465, %v1149_v54   ;;  %v1174_v53 = vld [vmem:[%s7707_s30 + $0xf8] sm:$0xff]  ;;  %v1173_v54 = vld [vmem:[%s7707_s30 + $0xf0] sm:$0xff] }
  0x6c   : > { %1226 = vperm.xlu1 %7466, %v1152_v55   ;;  %1221 = vperm.xlu0 %7465, %v1151_v56   ;;  %v624_v55 = vadd.f32 %v7758_v21, %v582_v40  ;;  %v600_v56 = vmul.f32 %v6189_v41, %v7747_v11 }
  0x6e   : > { %v642_v17 = vadd.f32 %v7758_v21, %v600_v56  ;;  %v7478_v56 = vld [vmem:[%s9906_s8 + $0x88] sm:$0xff]  }
  0x70   : > { %1236 = vperm.xlu1 %7466, %v1154_v57   ;;  %1231 = vperm.xlu0 %7465, %v1153_v58   ;;  %v6193_v57 = vunpack.c.h.bf16 %v6462_v48  ;;  %v6192_v58 = vunpack.c.l.bf16 %v6462_v48  ;;  %v678_v35 = vmax.f32 %v642_v17, 0.0  ;;  %v586_v48 = vmul.f32 %v6161_v30, %v7747_v11  ;;  %v1598_v17 = vld [vmem:[%s7809_s27 + $0x28] sm:$0xff] }
  0x72   : > { %v602_v10 = vmul.f32 %v6193_v57, %v7747_v11  ;;  %v601_v12 = vmul.f32 %v6192_v58, %v7747_v11 }
  0x74   : > { %1246 = vperm.xlu1 %7466, %v1156_v59   ;;  %1241 = vperm.xlu0 %7465, %v1155_v60   ;;  %v644_v29 = vadd.f32 %v7758_v21, %v602_v10  ;;  %v643_v36 = vadd.f32 %v7758_v21, %v601_v12  ;;  %v7479_v12 = vld [vmem:[%s9906_s8 + $0x90] sm:$0xff]  }
  0x78   : > { %1256 = vperm.xlu1 %7466, %v1158_v61   ;;  %1251 = vperm.xlu0 %7465, %v1157_v62   ;;  %v658_v62 = vmax.f32 %v622_v45, 0.0  ;;  %v1593_v45 = vld [vmem:[%s7809_s27] sm:$0xff] }
  0x7c   : > { %1266 = vperm.xlu1 %7466, %v1160_v63   ;;  %1261 = vperm.xlu0 %7465, %v1159_v0   ;;  %v623_v63 = vadd.f32 %v7758_v21, %v581_v46  ;;  %v599_v0 = vmul.f32 %v6188_v47, %v7747_v11  ;;  %v7480_v46 = vld [vmem:[%s9906_s8 + $0x10] sm:$0xff]  }
  0x7e   : > { %v641_v23 = vadd.f32 %v7758_v21, %v599_v0 }
  0x80   : > { %1276 = vperm.xlu1 %7466, %v1162_v1   ;;  %1271 = vperm.xlu0 %7465, %v1161_v2   ;;  %v677_v41 = vmax.f32 %v641_v23, 0.0 }
  0x84   : > { %1286 = vperm.xlu1 %7466, %v1164_v3   ;;  %1281 = vperm.xlu0 %7465, %v1163_v4   ;;  %v657_v4 = vmax.f32 %v621_v52, 0.0 }
  0x88   : > { %1296 = vperm.xlu1 %7466, %v1166_v7   ;;  %1291 = vperm.xlu0 %7465, %v1165_v8   ;;  %v1175_v7 = vld [vmem:[%s7707_s30 + $0x100] sm:$0xff] }
  0x8c   : > { %1306 = vperm.xlu1 %7466, %v1168_v15   ;;  %1301 = vperm.xlu0 %7465, %v1167_v16   ;;  %v660_v15 = vmax.f32 %v624_v55, 0.0  ;;  %v659_v16 = vmax.f32 %v623_v63, 0.0  ;;  %v6464_v55 = vld [vmem:[%s7738_s14 + $0x68] sm:$0xff]   ;;  %v7482_v63 = vld [vmem:[%s9906_s8 + $0x18] sm:$0xff]  }
  0x90   : > { %1316 = vperm.xlu1 %7466, %v1170_v25   ;;  %1311 = vperm.xlu0 %7465, %v1169_v26   ;;  %v1178_v25 = vld [vmem:[%s7707_s30 + $0x118] sm:$0xff]  ;;  %v1177_v26 = vld [vmem:[%s7707_s30 + $0x110] sm:$0xff] }
  0x93   : > { %v822_v42 = vpop.permute.xlu1 %821  ;;  %v812_v44 = vpop.permute.xlu0 %811 }
  0x94   : > { %1326 = vperm.xlu1 %7466, %v1172_v38   ;;  %1321 = vperm.xlu0 %7465, %v1171_v39   ;;  %v927_v59 = vmul.f32 %v822_v42, %v675_v43  ;;  %v925_v1 = vmul.f32 %v812_v44, %v673_v49  ;;  %v6160_v38 = vunpack.c.l.bf16 %v6454_v19  ;;  %v583_v42 = vmul.f32 %v6156_v24, %v7747_v11  ;;  %v6463_v43 = vld [vmem:[%s7738_s14 + $0x60] sm:$0xff]   ;;  %v1594_v44 = vld [vmem:[%s7809_s27 + $0x8] sm:$0xff] }
  0x95   : > { %v7484_v19 = vld [vmem:[%s9906_s8 + $0x20] sm:$0xff]  }
  0x96   : > { %v585_v52 = vmul.f32 %v6160_v38, %v7747_v11 }
  0x97   : > { %v827_v60 = vpop.permute.xlu1 %826  ;;  %v817_v61 = vpop.permute.xlu0 %816 }
  0x98   : > { %v928_v2 = vmul.f32 %v827_v60, %v676_v50  ;;  %v926_v3 = vmul.f32 %v817_v61, %v674_v51  ;;  %1336 = vperm.xlu1 %7466, %v1174_v53   ;;  %1331 = vperm.xlu0 %7465, %v1173_v54   ;;  %v626_v51 = vadd.f32 %v7758_v21, %v584_v37  ;;  %v6197_v53 = vunpack.c.h.bf16 %v6463_v43  ;;  %v1596_v61 = vld [vmem:[%s7809_s27 + $0x18] sm:$0xff] }
  0x99   : > { %v6196_v54 = vunpack.c.l.bf16 %v6463_v43  ;;  %v625_v60 = vadd.f32 %v7758_v21, %v583_v42 }
  0x9a   : > { %v7787_v8 = vpack.c.bf16 %v928_v2, %v927_v59  ;;  %v7789_v9 = vpack.c.bf16 %v926_v3, %v925_v1  ;;  %v679_v59 = vmax.f32 %v643_v36, 0.0  ;;  %v7842_v1 = vadd.f32 %v7758_v21, %v586_v48 }
  0x9b   : > { %v737_v13 = vpop.permute.xlu1 %736  ;;  %v732_v14 = vpop.permute.xlu0 %731  ;;  %v6201_v2 = vunpack.c.h.bf16 %v6464_v55  ;;  %v6200_v3 = vunpack.c.l.bf16 %v6464_v55  ;;  %v603_v10 = vmul.f32 %v6196_v54, %v7747_v11 }
  0x9c   : > { %v910_v20 = vmul.f32 %v737_v13, %v658_v62  ;;  %v909_v22 = vmul.f32 %v732_v14, %v657_v4  ;;  %1346 = vperm.xlu1 %7466, %v1176_v6   ;;  %1341 = vperm.xlu0 %7465, %v1175_v7   ;;  %v1595_v62 = vld [vmem:[%s7809_s27 + $0x10] sm:$0xff]  ;;  %v627_v6 = vadd.f32 %v7758_v21, %v585_v52 }
  0x9d   : > { %6786 = vmatprep.mubr.bf16.mxu1 %v7789_v9  ;;  %v604_v7 = vmul.f32 %v6197_v53, %v7747_v11  ;;  %v605_v23 = vmul.f32 %v6200_v3, %v7747_v11  ;;  %v645_v37 = vadd.f32 %v7758_v21, %v603_v10 }
  0x9e   : > { %v7802_v28 = vpack.c.bf16 %v910_v20, %v909_v22  ;;  %6787 = vmatmul.mubr.bf16.vlgmr.msra.gmra.mrb[0].mxu1 %v7787_v8  ;;  %v606_v22 = vmul.f32 %v6201_v2, %v7747_v11 }
  0x9f   : > { %v747_v33 = vpop.permute.xlu1 %746  ;;  %v742_v34 = vpop.permute.xlu0 %741  ;;  %6807 = vmatpush3.bf16.msra.mxu1 %v7680_v31  ;;  %v680_v31 = vmax.f32 %v644_v29, 0.0  ;;  %v646_v29 = vadd.f32 %v7758_v21, %v604_v7  ;;  %v647_v48 = vadd.f32 %v7758_v21, %v605_v23  ;;  %v681_v54 = vmax.f32 %v645_v37, 0.0  ;;  %v7485_v7 = vld [vmem:[%s9906_s8 + $0xa8] sm:$0xff]  }
  0xa0   : > { %v912_v39 = vmul.f32 %v747_v33, %v660_v15  ;;  %v911_v40 = vmul.f32 %v742_v34, %v659_v16  ;;  %1356 = vperm.xlu1 %7466, %v1178_v25   ;;  %1351 = vperm.xlu0 %7465, %v1177_v26   ;;  %v661_v15 = vmax.f32 %v625_v60, 0.0  ;;  %v6455_v16 = vld [vmem:[%s7738_s14 + $0x20] sm:$0xff]   ;;  %v664_v26 = vmax.f32 %v7842_v1, 0.0  ;;  %v6456_v33 = vld [vmem:[%s7738_s14 + $0x28] sm:$0xff]   ;;  %v7481_v34 = vld [vmem:[%s9906_s8 + $0x98] sm:$0xff]  }
  0xa1   : > { %6770 = vmatprep.mubr.bf16.mxu0 %v7802_v28  ;;  %6808 = vmatprep.subr.bf16.mxu1 %v7477_v27  ;;  %v6165_v30 = vunpack.c.h.bf16 %v6455_v16  ;;  %v6164_v38 = vunpack.c.l.bf16 %v6455_v16  ;;  %v7878_v43 = vadd.f32 %v7758_v21, %v606_v22  ;;  %v7490_v16 = vld [vmem:[%s9906_s8 + $0x38] sm:$0xff]   ;;  %v1606_v37 = vld [vmem:[%s7809_s27 + $0x68] sm:$0xff] }
  0xa2   : > { %v7823_v47 = vpack.c.bf16 %v912_v39, %v911_v40  ;;  %v1600_v39 = vld [vmem:[%s7809_s27 + $0x38] sm:$0xff]  ;;  %v1599_v40 = vld [vmem:[%s7809_s27 + $0x30] sm:$0xff] }
  0xa3   : > { %v837_v49 = vpop.permute.xlu1 %836  ;;  %v832_v50 = vpop.permute.xlu0 %831  ;;  %6809 = vmatpush3.bf16.msra.mxu1 %v7477_v27  ;;  %v663_v27 = vmax.f32 %v627_v6, 0.0  ;;  %v587_v55 = vmul.f32 %v6164_v38, %v7747_v11  ;;  %v6466_v6 = vld [vmem:[%s7738_s14 + $0x78] sm:$0xff]   ;;  %v1605_v38 = vld [vmem:[%s7809_s27 + $0x60] sm:$0xff] }
  0xa4   : > { %v930_v57 = vmul.f32 %v837_v49, %v678_v35  ;;  %v929_v58 = vmul.f32 %v832_v50, %v677_v41  ;;  %1636 = vperm.xlu1 %7466, %v1594_v44   ;;  %1631 = vperm.xlu0 %7465, %v1593_v45   ;;  %v7486_v41 = vld [vmem:[%s9906_s8 + $0x28] sm:$0xff]   ;;  %v6169_v44 = vunpack.c.h.bf16 %v6456_v33  ;;  %v588_v49 = vmul.f32 %v6165_v30, %v7747_v11  ;;  %v7487_v30 = vld [vmem:[%s9906_s8 + $0xb0] sm:$0xff]  }
  0xa5   : > { %6771 = vmatmul.mubr.bf16.vlgmr.msra.gmra.mrb[0].mxu0 %v7823_v47  ;;  %6810 = vmatprep.subr.bf16.mxu1 %v7480_v46  ;;  %v6168_v50 = vunpack.c.l.bf16 %v6456_v33 }
  0xa6   : > { %v7839_v0 = vpack.c.bf16 %v930_v57, %v929_v58  ;;  %6859 = vmatpush3.bf16.msra.mxu0 %v7685_v32  ;;  %v662_v32 = vmax.f32 %v626_v51, 0.0  ;;  %v7483_v51 = vld [vmem:[%s9906_s8 + $0xa0] sm:$0xff]   ;;  %v1602_v57 = vld [vmem:[%s7809_s27 + $0x48] sm:$0xff]  ;;  %v630_v2 = vadd.f32 %v7758_v21, %v588_v49 }
  0xa7   : > { %v847_v4 = vpop.permute.xlu1 %846  ;;  %v842_v5 = vpop.permute.xlu0 %841  ;;  %6860 = vmatprep.subr.bf16.mxu0 %v7478_v56  ;;  %6811 = vmatpush3.bf16.msra.mxu1 %v7480_v46  ;;  %v1601_v58 = vld [vmem:[%s7809_s27 + $0x40] sm:$0xff]  ;;  %v589_v3 = vmul.f32 %v6168_v50, %v7747_v11  ;;  %v7488_v50 = vld [vmem:[%s9906_s8 + $0xb8] sm:$0xff]  }
  0xa8   : > { %v932_v13 = vmul.f32 %v847_v4, %v680_v31  ;;  %v931_v14 = vmul.f32 %v842_v5, %v679_v59  ;;  %1646 = vperm.xlu1 %7466, %v1596_v61   ;;  %1641 = vperm.xlu0 %7465, %v1595_v62   ;;  %v682_v31 = vmax.f32 %v646_v29, 0.0  ;;  %v7489_v59 = vld [vmem:[%s9906_s8 + $0x30] sm:$0xff]   ;;  %v684_v61 = vmax.f32 %v7878_v43, 0.0 }
  0xa9   : > { %6790 = vmatprep.mubr.bf16.mxu1 %v7839_v0  ;;  %6812 = vmatprep.subr.bf16.mxu1 %v7482_v63  ;;  %v590_v62 = vmul.f32 %v6169_v44, %v7747_v11  ;;  %v6457_v29 = vld [vmem:[%s7738_s14 + $0x30] sm:$0xff]  }
  0xaa   : > { %v7858_v20 = vpack.c.bf16 %v932_v13, %v931_v14  ;;  %6861 = vmatpush3.bf16.msra.mxu0 %v7478_v56  ;;  %v6465_v56 = vld [vmem:[%s7738_s14 + $0x70] sm:$0xff]   ;;  %v683_v13 = vmax.f32 %v647_v48, 0.0  ;;  %v629_v14 = vadd.f32 %v7758_v21, %v587_v55  ;;  %v6172_v43 = vunpack.c.l.bf16 %v6457_v29  ;;  %v6458_v55 = vld [vmem:[%s7738_s14 + $0x38] sm:$0xff]  }
  0xab   : > { %v757_v24 = vpop.permute.xlu1 %756  ;;  %v752_v25 = vpop.permute.xlu0 %751  ;;  %6862 = vmatprep.subr.bf16.mxu0 %v7479_v12  ;;  %6813 = vmatpush3.bf16.msra.mxu1 %v7482_v63  ;;  %v6205_v4 = vunpack.c.h.bf16 %v6465_v56  ;;  %v6204_v5 = vunpack.c.l.bf16 %v6465_v56  ;;  %v1608_v56 = vld [vmem:[%s7809_s27 + $0x78] sm:$0xff] }
  0xac   : > { %v914_v35 = vmul.f32 %v757_v24, %v662_v32  ;;  %v913_v36 = vmul.f32 %v752_v25, %v661_v15  ;;  %1656 = vperm.xlu1 %7466, %v1598_v17   ;;  %1651 = vperm.xlu0 %7465, %v1597_v18   ;;  %v1604_v32 = vld [vmem:[%s7809_s27 + $0x58] sm:$0xff]  ;;  %v1603_v15 = vld [vmem:[%s7809_s27 + $0x50] sm:$0xff]  ;;  %v632_v18 = vadd.f32 %v7758_v21, %v590_v62 }
  0xad   : > { %6791 = vmatmul.mubr.bf16.gmra.mrb[4].mxu1 %v7858_v20  ;;  %6814 = vmatprep.subr.bf16.mxu1 %v7484_v19  ;;  %v631_v24 = vadd.f32 %v7758_v21, %v589_v3  ;;  %v608_v25 = vmul.f32 %v6205_v4, %v7747_v11  ;;  %v6177_v4 = vunpack.c.h.bf16 %v6458_v55 }
  0xae   : > { %v7875_v42 = vpack.c.bf16 %v914_v35, %v913_v36  ;;  %6863 = vmatpush3.bf16.msra.mxu0 %v7479_v12  ;;  %v666_v35 = vmax.f32 %v630_v2, 0.0  ;;  %v665_v36 = vmax.f32 %v629_v14, 0.0  ;;  %v1610_v14 = vld [vmem:[%s7809_s27 + $0x88] sm:$0xff] }
  0xaf   : > { %v767_v45 = vpop.permute.xlu1 %766  ;;  %v762_v46 = vpop.permute.xlu0 %761  ;;  %6864 = vmatprep.subr.bf16.mxu0 %v7481_v34  ;;  %6815 = vmatpush3.bf16.msra.mxu1 %v7484_v19  ;;  %v6209_v19 = vunpack.c.h.bf16 %v6466_v6 }
  0xb0   : > { %v916_v52 = vmul.f32 %v767_v45, %v664_v26  ;;  %v915_v53 = vmul.f32 %v762_v46, %v663_v27  ;;  %1666 = vperm.xlu1 %7466, %v1600_v39   ;;  %1661 = vperm.xlu0 %7465, %v1599_v40   ;;  %v607_v26 = vmul.f32 %v6204_v5, %v7747_v11  ;;  %v6208_v27 = vunpack.c.l.bf16 %v6466_v6  ;;  %v7926_v39 = vld [vmem:[%s9906_s8 + $0xc0] sm:$0xff]  }
  0xb1   : > { %6774 = vmatprep.mubr.bf16.mxu0 %v7875_v42  ;;  %6816 = vmatprep.subr.bf16.mxu1 %v7486_v41  ;;  %v668_v46 = vmax.f32 %v632_v18, 0.0  ;;  %v610_v48 = vmul.f32 %v6209_v19, %v7747_v11  ;;  %v7951_v5 = vld [vmem:[%s9906_s8 + $0x100] sm:$0xff]  }
  0xb2   : > { %v7893_v60 = vpack.c.bf16 %v916_v52, %v915_v53  ;;  %6865 = vmatpush3.bf16.msra.mxu0 %v7481_v34  ;;  %v609_v49 = vmul.f32 %v6208_v27, %v7747_v11  ;;  %v667_v53 = vmax.f32 %v631_v24, 0.0  ;;  %v594_v24 = vmul.f32 %v6177_v4, %v7747_v11 }
  0xb3   : > { %v857_v63 = vpop.permute.xlu1 %856  ;;  %v852_v1 = vpop.permute.xlu0 %851  ;;  %6866 = vmatprep.subr.bf16.mxu0 %v7483_v51  ;;  %6817 = vmatpush3.bf16.msra.mxu1 %v7486_v41  ;;  %v6173_v41 = vunpack.c.h.bf16 %v6457_v29  ;;  %v652_v2 = vadd.f32 %v7758_v21, %v610_v48 }
  0xb4   : > { %v934_v10 = vmul.f32 %v857_v63, %v682_v31  ;;  %v933_v12 = vmul.f32 %v852_v1, %v681_v54  ;;  %1676 = vperm.xlu1 %7466, %v1602_v57   ;;  %1671 = vperm.xlu0 %7465, %v1601_v58   ;;  %v650_v31 = vadd.f32 %v7758_v21, %v608_v25  ;;  %v1607_v57 = vld [vmem:[%s7809_s27 + $0x70] sm:$0xff] }
  0xb5   : > { %6775 = vmatmul.mubr.bf16.gmra.mrb[4].mxu0 %v7893_v60  ;;  %6818 = vmatprep.subr.bf16.mxu1 %v7489_v59  ;;  %v649_v54 = vadd.f32 %v7758_v21, %v607_v26  ;;  %v651_v3 = vadd.f32 %v7758_v21, %v609_v49 }
  0xb6   : > { %v7910_v17 = vpack.c.bf16 %v934_v10, %v933_v12  ;;  %6867 = vmatpush3.bf16.msra.mxu0 %v7483_v51  ;;  %v686_v1 = vmax.f32 %v650_v31, 0.0  ;;  %v6176_v12 = vunpack.c.l.bf16 %v6458_v55 }
  0xb7   : > { %v867_v22 = vpop.permute.xlu1 %866  ;;  %v862_v23 = vpop.permute.xlu0 %861  ;;  %6868 = vmatprep.subr.bf16.mxu0 %v7485_v7  ;;  %6819 = vmatpush3.bf16.msra.mxu1 %v7489_v59  ;;  %v592_v59 = vmul.f32 %v6173_v41, %v7747_v11  ;;  %v685_v10 = vmax.f32 %v649_v54, 0.0  ;;  %v1613_v54 = vld [vmem:[%s7809_s27 + $0xa0] sm:$0xff] }
  0xb8   : > { %v936_v33 = vmul.f32 %v867_v22, %v684_v61  ;;  %v935_v34 = vmul.f32 %v862_v23, %v683_v13  ;;  %1686 = vperm.xlu1 %7466, %v1604_v32   ;;  %1681 = vperm.xlu0 %7465, %v1603_v15   ;;  %v591_v61 = vmul.f32 %v6172_v43, %v7747_v11  ;;  %v6467_v13 = vld [vmem:[%s7738_s14 + $0x80] sm:$0xff]   ;;  %v688_v23 = vmax.f32 %v652_v2, 0.0 }
  0xb9   : > { %6794 = vmatprep.mubr.bf16.mxu1 %v7910_v17  ;;  %6820 = vmatprep.subr.bf16.mxu1 %v7490_v16  ;;  %v1609_v32 = vld [vmem:[%s7809_s27 + $0x80] sm:$0xff]  ;;  %v6213_v25 = vunpack.c.h.bf16 %v6467_v13  ;;  %v6212_v26 = vunpack.c.l.bf16 %v6467_v13 }
  0xba   : > { %v7928_v40 = vpack.c.bf16 %v936_v33, %v935_v34  ;;  %6869 = vmatpush3.bf16.msra.mxu0 %v7485_v7  ;;  %v633_v18 = vadd.f32 %v7758_v21, %v591_v61  ;;  %v593_v33 = vmul.f32 %v6176_v12, %v7747_v11  ;;  %v6468_v34 = vld [vmem:[%s7738_s14 + $0x88] sm:$0xff]  }
  0xbb   : > { %v777_v44 = vpop.permute.xlu1 %776  ;;  %v772_v45 = vpop.permute.xlu0 %771  ;;  %6870 = vmatprep.subr.bf16.mxu0 %v7487_v30  ;;  %6821 = vmatpush3.bf16.msra.mxu1 %v7490_v16  ;;  %v634_v16 = vadd.f32 %v7758_v21, %v592_v59  ;;  %v611_v31 = vmul.f32 %v6212_v26, %v7747_v11  ;;  %v6217_v48 = vunpack.c.h.bf16 %v6468_v34 }
  0xbc   : > { %v918_v51 = vmul.f32 %v777_v44, %v666_v35  ;;  %v917_v52 = vmul.f32 %v772_v45, %v665_v36  ;;  %1696 = vperm.xlu1 %7466, %v1606_v37   ;;  %1691 = vperm.xlu0 %7465, %v1605_v38   ;;  %v1612_v35 = vld [vmem:[%s7809_s27 + $0x98] sm:$0xff]  ;;  %v1611_v36 = vld [vmem:[%s7809_s27 + $0x90] sm:$0xff]  ;;  %v669_v41 = vmax.f32 %v633_v18, 0.0  ;;  %v636_v45 = vadd.f32 %v7758_v21, %v594_v24 }
  0xbd   : > { %6795 = vmatmul.mubr.bf16.gmra.mrb[8].mxu1 %v7928_v40  ;;  %6910 = vmatprep.subr.bf16.mxu1 %v7926_v39  ;;  %v670_v38 = vmax.f32 %v634_v16, 0.0 }
  0xbe   : > { %v7942_v58 = vpack.c.bf16 %v918_v51, %v917_v52  ;;  %6871 = vmatpush3.bf16.msra.mxu0 %v7487_v30  ;;  %v687_v30 = vmax.f32 %v651_v3, 0.0  ;;  %v635_v51 = vadd.f32 %v7758_v21, %v593_v33  ;;  %v6216_v52 = vunpack.c.l.bf16 %v6468_v34  ;;  %v1620_v34 = vld [vmem:[%s7809_s27 + $0xd8] sm:$0xff] }
  0xbf   : > { %v787_v62 = vpop.permute.xlu1 %786  ;;  %v782_v63 = vpop.permute.xlu0 %781  ;;  %6872 = vmatprep.subr.bf16.mxu0 %v7488_v50  ;;  %v672_v59 = vmax.f32 %v636_v45, 0.0  ;;  %v1621_v45 = vld [vmem:[%s7809_s27 + $0xe0] sm:$0xff] }
  0xc0   : > { %v920_v6 = vmul.f32 %v787_v62, %v668_v46  ;;  %v919_v7 = vmul.f32 %v782_v63, %v667_v53  ;;  %1706 = vperm.xlu1 %7466, %v1608_v56   ;;  %1701 = vperm.xlu0 %7465, %v1607_v57   ;;  %v612_v46 = vmul.f32 %v6213_v25, %v7747_v11  ;;  %v1614_v53 = vld [vmem:[%s7809_s27 + $0xa8] sm:$0xff]  ;;  %v671_v3 = vmax.f32 %v635_v51, 0.0 }
  0xc1   : > { %6778 = vmatprep.mubr.bf16.mxu0 %v7942_v58  ;;  %v653_v62 = vadd.f32 %v7758_v21, %v611_v31  ;;  %v614_v63 = vmul.f32 %v6217_v48, %v7747_v11  ;;  %v613_v4 = vmul.f32 %v6216_v52, %v7747_v11  ;;  %v7493_v51 = vld [vmem:[%s9906_s8 + $0x108] sm:$0xff]  }
  0xc2   : > { %v7957_v15 = vpack.c.bf16 %v920_v6, %v919_v7  ;;  %6873 = vmatpush3.bf16.msra.mxu0 %v7488_v50  ;;  %v654_v61 = vadd.f32 %v7758_v21, %v612_v46  ;;  %v1616_v6 = vld [vmem:[%s7809_s27 + $0xb8] sm:$0xff]  ;;  %v1615_v7 = vld [vmem:[%s7809_s27 + $0xb0] sm:$0xff] }
  0xc3   : > { %v877_v19 = vpop.permute.xlu1 %876  ;;  %v872_v22 = vpop.permute.xlu0 %871  ;;  %6962 = vmatprep.subr.bf16.mxu0 %v7951_v5  ;;  %v655_v11 = vadd.f32 %v7758_v21, %v613_v4 }
  0xc4   : > { %v938_v27 = vmul.f32 %v877_v19, %v686_v1  ;;  %v937_v29 = vmul.f32 %v872_v22, %v685_v10  ;;  %1716 = vperm.xlu1 %7466, %v1610_v14   ;;  %1711 = vperm.xlu0 %7465, %v1609_v32   ;;  %v690_v14 = vmax.f32 %v654_v61, 0.0  ;;  %v656_v32 = vadd.f32 %v7758_v21, %v614_v63  ;;  %v1618_v22 = vld [vmem:[%s7809_s27 + $0xc8] sm:$0xff]  ;;  %v1619_v21 = vld [vmem:[%s7809_s27 + $0xd0] sm:$0xff] }
  0xc5   : > { %6779 = vmatmul.mubr.bf16.gmra.mrb[8].mxu0 %v7957_v15  ;;  %v689_v19 = vmax.f32 %v653_v62, 0.0  ;;  %v691_v33 = vmax.f32 %v655_v11, 0.0  ;;  %v1627_v61 = vld [vmem:[%s7809_s27 + $0x110] sm:$0xff] }
  0xc6   : > { %v7968_v37 = vpack.c.bf16 %v938_v27, %v937_v29  ;;  %v7495_v62 = vld [vmem:[%s9906_s8 + $0x110] sm:$0xff]  }
  0xc7   : > { %v887_v43 = vpop.permute.xlu1 %886  ;;  %v882_v44 = vpop.permute.xlu0 %881 }
  0xc8   : > { %v940_v49 = vmul.f32 %v887_v43, %v688_v23  ;;  %v939_v50 = vmul.f32 %v882_v44, %v687_v30  ;;  %1726 = vperm.xlu1 %7466, %v1612_v35   ;;  %1721 = vperm.xlu0 %7465, %v1611_v36   ;;  %v1617_v23 = vld [vmem:[%s7809_s27 + $0xc0] sm:$0xff]  ;;  %v692_v30 = vmax.f32 %v656_v32, 0.0  ;;  %v1622_v44 = vld [vmem:[%s7809_s27 + $0xe8] sm:$0xff] }
  0xc9   : > { %6798 = vmatprep.mubr.bf16.mxu1 %v7968_v37  ;;  %v5343_v32 = vld [vmem:[%s9907_s9 + $0x28] sm:$0xff] }
  0xca   : > { %v7977_v55 = vpack.c.bf16 %v940_v49, %v939_v50  ;;  %v1624_v49 = vld [vmem:[%s7809_s27 + $0xf8] sm:$0xff]  ;;  %v1623_v50 = vld [vmem:[%s7809_s27 + $0xf0] sm:$0xff] }
  0xcb   : > { %v797_v56 = vpop.permute.xlu1 %796  ;;  %v792_v57 = vpop.permute.xlu0 %791 }
  0xcc   : > { %v922_v1 = vmul.f32 %v797_v56, %v670_v38  ;;  %v921_v2 = vmul.f32 %v792_v57, %v669_v41  ;;  %1736 = vperm.xlu1 %7466, %v1614_v53   ;;  %1731 = vperm.xlu0 %7465, %v1613_v54   ;;  %v1626_v54 = vld [vmem:[%s7809_s27 + $0x108] sm:$0xff]  ;;  %v1625_v56 = vld [vmem:[%s7809_s27 + $0x100] sm:$0xff] }
  0xcd   : > { %6799 = vmatmul.mubr.bf16.gmra.mrb[12].mxu1 %v7977_v55 }
  0xce   : > { %v7986_v10 = vpack.c.bf16 %v922_v1, %v921_v2  ;;  %v7497_v2 = vld [vmem:[%s9906_s8 + $0x118] sm:$0xff]  }
  0xcf   : > { %v807_v12 = vpop.permute.xlu1 %806  ;;  %v802_v13 = vpop.permute.xlu0 %801 }
  0xd0   : > { %v924_v16 = vmul.f32 %v807_v12, %v672_v59  ;;  %v923_v18 = vmul.f32 %v802_v13, %v671_v3  ;;  %1746 = vperm.xlu1 %7466, %v1616_v6   ;;  %1741 = vperm.xlu0 %7465, %v1615_v7   ;;  %v5341_v6 = vld [vmem:[%s9907_s9 + $0x18] sm:$0xff]  ;;  %v5340_v7 = vld [vmem:[%s9907_s9 + $0x10] sm:$0xff]  ;;  %v7499_v13 = vld [vmem:[%s9906_s8 + $0x120] sm:$0xff]  }
  0xd1   : > { %6782 = vmatprep.mubr.bf16.mxu0 %v7986_v10  ;;  %v7498_v12 = vld [vmem:[%s9906_s8 + $0xd8] sm:$0xff]  }
  0xd2   : > { %v7993_v24 = vpack.c.bf16 %v924_v16, %v923_v18  ;;  %v5342_v16 = vld [vmem:[%s9907_s9 + $0x20] sm:$0xff]  ;;  %v7501_v18 = vld [vmem:[%s9906_s8 + $0x128] sm:$0xff]  }
  0xd3   : > { %v897_v25 = vpop.permute.xlu1 %896  ;;  %v892_v26 = vpop.permute.xlu0 %891 }
  0xd4   : > { %v942_v27 = vmul.f32 %v897_v25, %v690_v14  ;;  %v941_v29 = vmul.f32 %v892_v26, %v689_v19  ;;  %1756 = vperm.xlu1 %7466, %v1618_v22   ;;  %1751 = vperm.xlu0 %7465, %v1617_v23   ;;  %v5345_v22 = vld [vmem:[%s9907_s9 + $0x38] sm:$0xff]  ;;  %v5344_v23 = vld [vmem:[%s9907_s9 + $0x30] sm:$0xff]  ;;  %v7502_v25 = vld [vmem:[%s9906_s8 + $0xe8] sm:$0xff]  }
  0xd5   : > { %6783 = vmatmul.mubr.bf16.gmra.mrb[12].mxu0 %v7993_v24  ;;  %v5347_v26 = vld [vmem:[%s9907_s9 + $0x48] sm:$0xff] }
  0xd6   : > { %v7998_v35 = vpack.c.bf16 %v942_v27, %v941_v29  ;;  %6874 = vmatprep.mubr.bf16.mxu0 %v7802_v28 }
  0xd7   : > { %v907_v36 = vpop.permute.xlu1 %906  ;;  %v902_v38 = vpop.permute.xlu0 %901 }
  0xd8   : > { %v944_v41 = vmul.f32 %v907_v36, %v692_v30  ;;  %v943_v43 = vmul.f32 %v902_v38, %v691_v33  ;;  %1766 = vperm.xlu1 %7466, %v1620_v34   ;;  %1761 = vperm.xlu0 %7465, %v1619_v21   ;;  %v5349_v30 = vld [vmem:[%s9907_s9 + $0x58] sm:$0xff]  ;;  %v5348_v33 = vld [vmem:[%s9907_s9 + $0x50] sm:$0xff]  ;;  %v5351_v38 = vld [vmem:[%s9907_s9 + $0x68] sm:$0xff] }
  0xd9   : > { %6802 = vmatprep.mubr.bf16.mxu1 %v7998_v35  ;;  %v7504_v34 = vld [vmem:[%s9906_s8 + $0xf0] sm:$0xff]   ;;  %v7505_v21 = vld [vmem:[%s9906_s8 + $0x138] sm:$0xff]  }
  0xda   : > { %v8004_v46 = vpack.c.bf16 %v944_v41, %v943_v43  ;;  %v5350_v41 = vld [vmem:[%s9907_s9 + $0x60] sm:$0xff] }
  0xdb   : > { %v8006_v31 = vpop.permute.xlu1 %1186  ;;  %v8008_v48 = vpop.permute.xlu0 %1181  ;;  %v8163_v43 = vld [vmem:[%s9906_s8 + $0x1c0] sm:$0xff]  }
  0xdc   : > { %1776 = vperm.xlu1 %7466, %v1622_v44   ;;  %1771 = vperm.xlu0 %7465, %v1621_v45   ;;  %v5353_v45 = vld [vmem:[%s9907_s9 + $0x78] sm:$0xff] }
  0xdd   : > { %6803 = vmatmul.mubr.bf16.gmra.mrb[16].mxu1 %v8004_v46  ;;  %6875 = vmatmul.mubr.bf16.vlgmr.msra.gmra.mrb[16].mxu0 %v7823_v47 }
  0xde   : > { %6822 = vmatprep.mubr.bf16.mxu1 %v7802_v28  ;;  %6878 = vmatprep.mubr.bf16.mxu0 %v7875_v42  ;;  %v7494_v28 = vld [vmem:[%s9906_s8 + $0xc8] sm:$0xff]  }
  0xdf   : > { %v8019_v52 = vpop.permute.xlu1 %1196  ;;  %v8021_v53 = vpop.permute.xlu0 %1191  ;;  %6963 = vmatpush3.bf16.msra.mxu0 %v7951_v5  ;;  %v1628_v5 = vld [vmem:[%s7809_s27 + $0x118] sm:$0xff]  ;;  %s8155_s27 = scalar_lea.vmem %s9899_s1, %s7730_s26  ;;  %s5869_s26 = sshll.u32 %s10030_s18, 1 }
  0xe0   : > { %1786 = vperm.xlu1 %7466, %v1624_v49   ;;  %1781 = vperm.xlu0 %7465, %v1623_v50   ;;  %v6219_v44 = vld [vmem:[%s8155_s27] sm:$0xff]   ;;  %v5352_v49 = vld [vmem:[%s9907_s9 + $0x70] sm:$0xff]  ;;  %s497_s25 = scalar_lea.vmem %s9909_s11, %s5869_s26 }
  0xe1   : > { %6964 = vmatprep.subr.bf16.mxu0 %v7493_v51 }
  0xe3   : > { %v8026_v57 = vpop.permute.xlu1 %1206  ;;  %v8028_v59 = vpop.permute.xlu0 %1201  ;;  %6965 = vmatpush3.bf16.msra.mxu0 %v7493_v51 }
  0xe4   : > { %1796 = vperm.xlu1 %7466, %v1626_v54   ;;  %1791 = vperm.xlu0 %7465, %v1625_v56   ;;  %v6221_v54 = vunpack.c.h.bf16 %v6219_v44  ;;  %v6220_v56 = vunpack.c.l.bf16 %v6219_v44  ;;  %v6472_v44 = vld [vmem:[%s8155_s27 + $0x20] sm:$0xff]  }
  0xe5   : > { %6823 = vmatmul.mubr.bf16.vlgmr.msra.gmra.mrb[20].mxu1 %v7823_v47  ;;  %6879 = vmatmul.mubr.bf16.gmra.mrb[20].mxu0 %v7893_v60  ;;  %v7496_v47 = vld [vmem:[%s9906_s8 + $0xd0] sm:$0xff]  }
  0xe6   : > { %6911 = vmatpush3.bf16.msra.mxu1 %v7926_v39  ;;  %6826 = vmatprep.mubr.bf16.mxu1 %v7875_v42  ;;  %v5339_v42 = vld [vmem:[%s9907_s9 + $0x8] sm:$0xff]  ;;  %v5338_v39 = vld [vmem:[%s9907_s9] sm:$0xff] }
  0xe7   : > { %6882 = vmatprep.mubr.bf16.mxu0 %v7942_v58  ;;  %v8043_v63 = vpop.permute.xlu1 %1216  ;;  %v8045_v1 = vpop.permute.xlu0 %1211  ;;  %6912 = vmatprep.subr.bf16.mxu1 %v7494_v28 }
  0xe8   : > { %1806 = vperm.xlu1 %7466, %v1628_v5   ;;  %1801 = vperm.xlu0 %7465, %v1627_v61   ;;  %v8196_v5 = vld [vmem:[%s9904_s6] ss:$0 sm:$0xff] }
  0xe9   : > { %6966 = vmatprep.subr.bf16.mxu0 %v7495_v62  ;;  %v1036_v61 = vmul.f32 %v8196_v5, %v6221_v54 }
  0xea   : > { %6913 = vmatpush3.bf16.msra.mxu1 %v7494_v28  ;;  %6967 = vmatpush3.bf16.msra.mxu0 %v7495_v62  ;;  %v5354_v28 = vld [vmem:[%s9907_s9 + $0x80] sm:$0xff]  ;;  %v1035_v62 = vmul.f32 %v8196_v5, %v6220_v56 }
  0xeb   : > { %v8059_v3 = vpop.permute.xlu1 %1226  ;;  %v8061_v4 = vpop.permute.xlu0 %1221  ;;  %6914 = vmatprep.subr.bf16.mxu1 %v7496_v47  ;;  %6968 = vmatprep.subr.bf16.mxu0 %v7497_v2 }
  0xec   : > { %5381 = vperm.xlu1 %7466, %v5339_v42   ;;  %5376 = vperm.xlu0 %7465, %v5338_v39  }
  0xed   : > { %6827 = vmatmul.mubr.bf16.gmra.mrb[24].mxu1 %v7893_v60  ;;  %6883 = vmatmul.mubr.bf16.gmra.mrb[24].mxu0 %v7957_v15 }
  0xee   : > { %6830 = vmatprep.mubr.bf16.mxu1 %v7942_v58  ;;  %6886 = vmatprep.mubr.bf16.mxu0 %v7986_v10  ;;  %v7500_v58 = vld [vmem:[%s9906_s8 + $0xe0] sm:$0xff]  }
  0xef   : > { %v8079_v14 = vpop.permute.xlu1 %1236  ;;  %v8081_v60 = vpop.permute.xlu0 %1231  ;;  %6915 = vmatpush3.bf16.msra.mxu1 %v7496_v47  ;;  %6969 = vmatpush3.bf16.msra.mxu0 %v7497_v2  ;;  %v6469_v47 = vld [vmem:[%s8155_s27 + $0x8] sm:$0xff]   ;;  %v6470_v2 = vld [vmem:[%s8155_s27 + $0x10] sm:$0xff]  }
  0xf0   : > { %5391 = vperm.xlu1 %7466, %v5341_v6   ;;  %5386 = vperm.xlu0 %7465, %v5340_v7   ;;  %v5357_v6 = vld [vmem:[%s9907_s9 + $0x98] sm:$0xff]  ;;  %v5356_v7 = vld [vmem:[%s9907_s9 + $0x90] sm:$0xff] }
  0xf1   : > { %6916 = vmatprep.subr.bf16.mxu1 %v7498_v12  ;;  %6970 = vmatprep.subr.bf16.mxu0 %v7499_v13 }
  0xf3   : > { %6917 = vmatpush3.bf16.msra.mxu1 %v7498_v12  ;;  %6971 = vmatpush3.bf16.msra.mxu0 %v7499_v13  ;;  %v8095_v19 = vpop.permute.xlu1 %1246  ;;  %v8097_v11 = vpop.permute.xlu0 %1241  ;;  %v6225_v12 = vunpack.c.h.bf16 %v6469_v47  ;;  %v6224_v13 = vunpack.c.l.bf16 %v6469_v47 }
  0xf4   : > { %5401 = vperm.xlu1 %7466, %v5343_v32   ;;  %5396 = vperm.xlu0 %7465, %v5342_v16   ;;  %v6229_v32 = vunpack.c.h.bf16 %v6470_v2 }
  0xf5   : > { %6831 = vmatmul.mubr.bf16.gmra.mrb[28].mxu1 %v7957_v15  ;;  %6887 = vmatmul.mubr.bf16.gmra.mrb[28].mxu0 %v7993_v24  ;;  %v7503_v15 = vld [vmem:[%s9906_s8 + $0x130] sm:$0xff]  }
  0xf6   : > { %6834 = vmatprep.mubr.bf16.mxu1 %v7986_v10  ;;  %6890 = vmatprep.mubr.bf16.mxu0 %v7789_v9  ;;  %v5346_v10 = vld [vmem:[%s9907_s9 + $0x40] sm:$0xff] }
  0xf7   : > { %6918 = vmatprep.subr.bf16.mxu1 %v7500_v58  ;;  %6972 = vmatprep.subr.bf16.mxu0 %v7501_v18  ;;  %v8121_v27 = vpop.permute.xlu1 %1256  ;;  %v8123_v29 = vpop.permute.xlu0 %1251 }
  0xf8   : > { %5411 = vperm.xlu1 %7466, %v5345_v22   ;;  %5406 = vperm.xlu0 %7465, %v5344_v23   ;;  %v5358_v22 = vld [vmem:[%s9907_s9 + $0xa0] sm:$0xff] }
  0xf9   : > { %6919 = vmatpush3.bf16.msra.mxu1 %v7500_v58  ;;  %6973 = vmatpush3.bf16.msra.mxu0 %v7501_v18  ;;  %v6228_v18 = vunpack.c.l.bf16 %v6470_v2  ;;  %v5363_v2 = vld [vmem:[%s9907_s9 + $0xc8] sm:$0xff] }
  0xfa   : > { %6920 = vmatprep.subr.bf16.mxu1 %v7502_v25  ;;  %6974 = vmatprep.subr.bf16.mxu0 %v7503_v15 }
  0xfb   : > { %v8143_v36 = vpop.permute.xlu0 %1261 }
  0xfc   : > { %5421 = vperm.xlu1 %7466, %v5347_v26   ;;  %5416 = vperm.xlu0 %7465, %v5346_v10   ;;  %v1040_v26 = vmul.f32 %v8196_v5, %v6229_v32  ;;  %v6471_v10 = vld [vmem:[%s8155_s27 + $0x18] sm:$0xff]  }
  0xfd   : > { %6835 = vmatmul.mubr.bf16.gmra.mrb[32].mxu1 %v7993_v24  ;;  %6891 = vmatmul.mubr.bf16.gmra.mrb[32].mxu0 %v7787_v8  ;;  %v8141_v24 = vpop.permute.xlu1 %1266  ;;  %v6232_v54 = vunpack.c.l.bf16 %v6471_v10 }
  0xfe   : > { %6838 = vmatprep.mubr.bf16.mxu1 %v7789_v9  ;;  %6894 = vmatprep.mubr.bf16.mxu0 %v7839_v0  ;;  %v7506_v9 = vld [vmem:[%s9906_s8 + $0xf8] sm:$0xff]  }
  0xff   : > { %6921 = vmatpush3.bf16.msra.mxu1 %v7502_v25  ;;  %6975 = vmatpush3.bf16.msra.mxu0 %v7503_v15  ;;  %v8183_v51 = vpop.permute.xlu0 %1271  ;;  %v1038_v25 = vmul.f32 %v8196_v5, %v6225_v12  ;;  %v1037_v15 = vmul.f32 %v8196_v5, %v6224_v13  ;;  %v1041_v12 = vmul.f32 %v8196_v5, %v6232_v54  ;;  %v6473_v13 = vld [vmem:[%s8155_s27 + $0x28] sm:$0xff]  }
 0x100   : > { %5431 = vperm.xlu1 %7466, %v5349_v30   ;;  %5426 = vperm.xlu0 %7465, %v5348_v33  }
 0x101   : > { %6922 = vmatprep.subr.bf16.mxu1 %v7504_v34  ;;  %6976 = vmatprep.subr.bf16.mxu0 %v7505_v21  ;;  %v8174_v50 = vpop.permute.xlu1 %1276 }
 0x103   : > { %6923 = vmatpush3.bf16.msra.mxu1 %v7504_v34  ;;  %6977 = vmatpush3.bf16.msra.mxu0 %v7505_v21  ;;  %v8204_v39 = vpop.permute.xlu0 %1281  ;;  %v1039_v21 = vmul.f32 %v8196_v5, %v6228_v18 }
 0x104   : > { %5441 = vperm.xlu1 %7466, %v5351_v38   ;;  %5436 = vperm.xlu0 %7465, %v5350_v41   ;;  %v5361_v38 = vld [vmem:[%s9907_s9 + $0xb8] sm:$0xff]  ;;  %v5360_v41 = vld [vmem:[%s9907_s9 + $0xb0] sm:$0xff] }
 0x105   : > { %6839 = vmatmul.mubr.bf16.gmra.mrb[36].mxu1 %v7787_v8  ;;  %6895 = vmatmul.mubr.bf16.gmra.mrb[36].mxu0 %v7858_v20  ;;  %v8181_v8 = vld [vmem:[%s9906_s8 + $0x140] sm:$0xff]   ;;  %v8202_v42 = vpop.permute.xlu1 %1286 }
 0x106   : > { %6842 = vmatprep.mubr.bf16.mxu1 %v7839_v0  ;;  %6898 = vmatprep.mubr.bf16.mxu0 %v7910_v17  ;;  %v5355_v0 = vld [vmem:[%s9907_s9 + $0x88] sm:$0xff] }
 0x107   : > { %6924 = vmatprep.subr.bf16.mxu1 %v7506_v9  ;;  %7118 = vmatprep.subr.bf16.mxu0 %v8163_v43  ;;  %v8235_v30 = vpop.permute.xlu0 %1291 }
 0x108   : > { %5451 = vperm.xlu1 %7466, %v5353_v45   ;;  %5446 = vperm.xlu0 %7465, %v5352_v49  }
 0x109   : > { %6925 = vmatpush3.bf16.msra.mxu1 %v7506_v9  ;;  %v8229_v23 = vpop.permute.xlu1 %1296  ;;  %v6233_v9 = vunpack.c.h.bf16 %v6471_v10  ;;  %v6241_v10 = vunpack.c.h.bf16 %v6473_v13 }
 0x10a   : > { %7014 = vmatprep.subr.bf16.mxu1 %v8181_v8 }
 0x10b   : > { %v8257_v47 = vpop.permute.xlu0 %1301 }
 0x10c   : > { %5461 = vperm.xlu1 %7466, %v5355_v0   ;;  %5456 = vperm.xlu0 %7465, %v5354_v28  }
 0x10d   : > { %6843 = vmatmul.mubr.bf16.gmra.mrb[40].mxu1 %v7858_v20  ;;  %6899 = vmatmul.mubr.bf16.gmra.mrb[40].mxu0 %v7928_v40  ;;  %v8219_v20 = vld [vmem:[%s9905_s7] ss:$0 sm:$0xff] }
 0x10e   : > { %6846 = vmatprep.mubr.bf16.mxu1 %v7910_v17  ;;  %6902 = vmatprep.mubr.bf16.mxu0 %v7968_v37  ;;  %v1072_v16 = vadd.f32 %v8219_v20, %v1036_v61  ;;  %v1071_v58 = vadd.f32 %v8219_v20, %v1035_v62  ;;  %v5359_v17 = vld [vmem:[%s9907_s9 + $0xa8] sm:$0xff]  ;;  %v1074_v45 = vadd.f32 %v8219_v20, %v1038_v25  ;;  %v8255_v61 = vpop.permute.xlu1 %1306  ;;  %v6236_v62 = vunpack.c.l.bf16 %v6472_v44  ;;  %v5365_v25 = vld [vmem:[%s9907_s9 + $0xd8] sm:$0xff] }
 0x10f   : > { %v1076_v49 = vadd.f32 %v8219_v20, %v1040_v26  ;;  %v1075_v28 = vadd.f32 %v8219_v20, %v1039_v21  ;;  %v1077_v21 = vadd.f32 %v8219_v20, %v1041_v12 }
 0x110   : > { %5471 = vperm.xlu1 %7466, %v5357_v6   ;;  %5466 = vperm.xlu0 %7465, %v5356_v7   ;;  %v1108_v33 = vmax.f32 %v1072_v16, 0.0  ;;  %v1107_v34 = vmax.f32 %v1071_v58, 0.0  ;;  %v1110_v6 = vmax.f32 %v1074_v45, 0.0 }
 0x111   : > { %v1112_v16 = vmax.f32 %v1076_v49, 0.0  ;;  %v1111_v58 = vmax.f32 %v1075_v28, 0.0  ;;  %v5366_v49 = vld [vmem:[%s9907_s9 + $0xe0] sm:$0xff]  ;;  %v6475_v28 = vld [vmem:[%s8155_s27 + $0x38] sm:$0xff]  }
 0x112   : > { %v1360_v56 = vmul.f32 %v8006_v31, %v1108_v33  ;;  %v1359_v0 = vmul.f32 %v8008_v48, %v1107_v34  ;;  %v5362_v31 = vld [vmem:[%s9907_s9 + $0xc0] sm:$0xff]  ;;  %v1042_v48 = vmul.f32 %v8196_v5, %v6233_v9  ;;  %v8282_v33 = vpop.permute.xlu1 %1316 }
 0x113   : > { %v1364_v9 = vmul.f32 %v8026_v57, %v1112_v16  ;;  %v1046_v57 = vmul.f32 %v8196_v5, %v6241_v10  ;;  %v5368_v16 = vld [vmem:[%s9907_s9 + $0xf0] sm:$0xff] }
 0x114   : > { %5481 = vperm.xlu1 %7466, %v5359_v17   ;;  %5476 = vperm.xlu0 %7465, %v5358_v22   ;;  %v8268_v32 = vpack.c.bf16 %v1360_v56, %v1359_v0  ;;  %v1043_v17 = vmul.f32 %v8196_v5, %v6236_v62  ;;  %v6474_v22 = vld [vmem:[%s8155_s27 + $0x30] sm:$0xff]   ;;  %v1078_v26 = vadd.f32 %v8219_v20, %v1042_v48  ;;  %v1113_v56 = vmax.f32 %v1077_v21, 0.0 }
 0x115   : > { %6847 = vmatmul.mubr.bf16.gmra.mrb[44].mxu1 %v7928_v40  ;;  %6903 = vmatmul.mubr.bf16.gmra.mrb[44].mxu0 %v7977_v55  ;;  %v1073_v40 = vadd.f32 %v8219_v20, %v1037_v15  ;;  %v5364_v15 = vld [vmem:[%s9907_s9 + $0xd0] sm:$0xff]  ;;  %v6245_v45 = vunpack.c.h.bf16 %v6474_v22 }
 0x116   : > { %6850 = vmatprep.mubr.bf16.mxu1 %v7968_v37  ;;  %6906 = vmatprep.mubr.bf16.mxu0 %v7998_v35  ;;  %v6237_v37 = vunpack.c.h.bf16 %v6472_v44  ;;  %v1363_v44 = vmul.f32 %v8028_v59, %v1111_v58  ;;  %v1114_v54 = vmax.f32 %v1078_v26, 0.0  ;;  %v8311_v48 = vpop.permute.xlu1 %1326  ;;  %v7509_v58 = vld [vmem:[%s9906_s8 + $0x1c8] sm:$0xff]  }
 0x117   : > { %v1109_v7 = vmax.f32 %v1073_v40, 0.0  ;;  %v6244_v40 = vunpack.c.l.bf16 %v6474_v22  ;;  %v1048_v62 = vmul.f32 %v8196_v5, %v6245_v45  ;;  %v6248_v22 = vunpack.c.l.bf16 %v6475_v28 }
 0x118   : > { %5491 = vperm.xlu1 %7466, %v5361_v38   ;;  %5486 = vperm.xlu0 %7465, %v5360_v41   ;;  %v1044_v18 = vmul.f32 %v8196_v5, %v6237_v37  ;;  %v6240_v38 = vunpack.c.l.bf16 %v6473_v13  ;;  %v8289_v41 = vpop.permute.xlu0 %1311  ;;  %v8306_v37 = vpack.c.bf16 %v1364_v9, %v1363_v44  ;;  %v5369_v13 = vld [vmem:[%s9907_s9 + $0xf8] sm:$0xff] }
 0x119   : > { %v1361_v34 = vmul.f32 %v8021_v53, %v1109_v7  ;;  %v5367_v53 = vld [vmem:[%s9907_s9 + $0xe8] sm:$0xff]  ;;  %v1084_v10 = vadd.f32 %v8219_v20, %v1048_v62  ;;  %v1049_v9 = vmul.f32 %v8196_v5, %v6248_v22  ;;  %v5372_v62 = vld [vmem:[%s9907_s9 + $0x110] sm:$0xff] }
 0x11a   : > { %v1045_v0 = vmul.f32 %v8196_v5, %v6240_v38  ;;  %v8345_v44 = vpop.permute.xlu1 %1336  ;;  %v7512_v22 = vld [vmem:[%s9906_s8 + $0x150] sm:$0xff]  }
 0x11c   : > { %5501 = vperm.xlu1 %7466, %v5363_v2   ;;  %5496 = vperm.xlu0 %7465, %v5362_v31   ;;  %v1047_v2 = vmul.f32 %v8196_v5, %v6244_v40  ;;  %v6476_v31 = vld [vmem:[%s8155_s27 + $0x40] sm:$0xff]   ;;  %v8313_v12 = vpop.permute.xlu0 %1321 }
 0x11d   : > { %6851 = vmatmul.mubr.bf16.gmra.mrb[48].mxu1 %v7977_v55  ;;  %6907 = vmatmul.mubr.bf16.gmra.mrb[48].mxu0 %v8004_v46  ;;  %v1362_v55 = vmul.f32 %v8019_v52, %v1110_v6  ;;  %v1079_v52 = vadd.f32 %v8219_v20, %v1043_v17  ;;  %v6249_v17 = vunpack.c.h.bf16 %v6475_v28  ;;  %v6253_v26 = vunpack.c.h.bf16 %v6476_v31  ;;  %v5373_v28 = vld [vmem:[%s9907_s9 + $0x118] sm:$0xff] }
 0x11e   : > { %6854 = vmatprep.mubr.bf16.mxu1 %v7998_v35  ;;  %6978 = vmatprep.mubr.bf16.mxu0 %v8268_v32  ;;  %v1080_v35 = vadd.f32 %v8219_v20, %v1044_v18  ;;  %v1082_v18 = vadd.f32 %v8219_v20, %v1046_v57 }
 0x11f   : > { %v8302_v59 = vpack.c.bf16 %v1362_v55, %v1361_v34  ;;  %v1115_v7 = vmax.f32 %v1079_v52, 0.0  ;;  %v1083_v55 = vadd.f32 %v8219_v20, %v1047_v2  ;;  %v6252_v34 = vunpack.c.l.bf16 %v6476_v31  ;;  %v7511_v2 = vld [vmem:[%s9906_s8 + $0x1d0] sm:$0xff]  }
 0x120   : > { %5511 = vperm.xlu1 %7466, %v5365_v25   ;;  %5506 = vperm.xlu0 %7465, %v5364_v15   ;;  %v1116_v6 = vmax.f32 %v1080_v35, 0.0  ;;  %v1365_v25 = vmul.f32 %v8045_v1, %v1113_v56  ;;  %v1081_v15 = vadd.f32 %v8219_v20, %v1045_v0  ;;  %v5370_v1 = vld [vmem:[%s9907_s9 + $0x100] sm:$0xff]  ;;  %v1052_v40 = vmul.f32 %v8196_v5, %v6253_v26  ;;  %v6477_v35 = vld [vmem:[%s8155_s27 + $0x48] sm:$0xff]   ;;  %v8351_v52 = vpop.permute.xlu0 %1331  ;;  %v6478_v56 = vld [vmem:[%s8155_s27 + $0x50] sm:$0xff]  }
 0x121   : > { %v1367_v38 = vmul.f32 %v8061_v4, %v1115_v7  ;;  %v1119_v57 = vmax.f32 %v1083_v55, 0.0  ;;  %v6257_v7 = vunpack.c.h.bf16 %v6477_v35 }
 0x122   : > { %v1368_v21 = vmul.f32 %v8059_v3, %v1116_v6  ;;  %v1118_v3 = vmax.f32 %v1082_v18, 0.0  ;;  %v1117_v4 = vmax.f32 %v1081_v15, 0.0  ;;  %v1085_v6 = vadd.f32 %v8219_v20, %v1049_v9  ;;  %v8388_v15 = vpop.permute.xlu1 %1346 }
 0x123   : > { %v1088_v18 = vadd.f32 %v8219_v20, %v1052_v40  ;;  %v7515_v40 = vld [vmem:[%s9906_s8 + $0x1e0] sm:$0xff]  }
 0x124   : > { %5521 = vperm.xlu1 %7466, %v5367_v53   ;;  %5516 = vperm.xlu0 %7465, %v5366_v49   ;;  %v7510_v53 = vld [vmem:[%s9906_s8 + $0x148] sm:$0xff]   ;;  %v1120_v49 = vmax.f32 %v1084_v10, 0.0  ;;  %v8358_v0 = vpack.c.bf16 %v1368_v21, %v1367_v38  ;;  %v8390_v26 = vpop.permute.xlu0 %1341  ;;  %v1054_v10 = vmul.f32 %v8196_v5, %v6257_v7  ;;  %v1121_v21 = vmax.f32 %v1085_v6, 0.0 }
 0x125   : > { %6855 = vmatmul.mubr.bf16.gmra.mrb[52].mxu1 %v8004_v46  ;;  %6979 = vmatmul.mubr.bf16.vlgmr.msra.gmra.mrb[52].mxu0 %v8302_v59  ;;  %v1366_v46 = vmul.f32 %v8043_v63, %v1114_v54  ;;  %v5371_v63 = vld [vmem:[%s9907_s9 + $0x108] sm:$0xff]  ;;  %v1051_v54 = vmul.f32 %v8196_v5, %v6252_v34  ;;  %v6479_v34 = vld [vmem:[%s8155_s27 + $0x58] sm:$0xff]  }
 0x126   : > { %6926 = vmatprep.mubr.bf16.mxu1 %v8268_v32  ;;  %6982 = vmatprep.mubr.bf16.mxu0 %v8306_v37 }
 0x127   : > { %7119 = vmatpush3.bf16.msra.mxu0 %v8163_v43  ;;  %v1050_v43 = vmul.f32 %v8196_v5, %v6249_v17  ;;  %v8347_v45 = vpack.c.bf16 %v1366_v46, %v1365_v25  ;;  %v6261_v17 = vunpack.c.h.bf16 %v6478_v56  ;;  %v1372_v46 = vmul.f32 %v8095_v19, %v1120_v49 }
 0x128   : > { %5531 = vperm.xlu1 %7466, %v5369_v13   ;;  %5526 = vperm.xlu0 %7465, %v5368_v16   ;;  %v6256_v13 = vunpack.c.l.bf16 %v6477_v35  ;;  %v1370_v16 = vmul.f32 %v8079_v14, %v1118_v3  ;;  %v1371_v14 = vmul.f32 %v8097_v11, %v1119_v57  ;;  %v6260_v25 = vunpack.c.l.bf16 %v6478_v56  ;;  %v6480_v3 = vld [vmem:[%s8155_s27 + $0x60] sm:$0xff]  }
 0x129   : > { %7120 = vmatprep.subr.bf16.mxu0 %v7509_v58  ;;  %v1086_v31 = vadd.f32 %v8219_v20, %v1050_v43  ;;  %v1056_v38 = vmul.f32 %v8196_v5, %v6261_v17  ;;  %v6265_v35 = vunpack.c.h.bf16 %v6479_v34  ;;  %v6264_v57 = vunpack.c.l.bf16 %v6479_v34  ;;  %v7518_v34 = vld [vmem:[%s9906_s8 + $0x168] sm:$0xff]  }
 0x12a   : > { %v1053_v55 = vmul.f32 %v8196_v5, %v6256_v13  ;;  %v1055_v9 = vmul.f32 %v8196_v5, %v6260_v25 }
 0x12b   : > { %7121 = vmatpush3.bf16.msra.mxu0 %v7509_v58  ;;  %v1369_v58 = vmul.f32 %v8081_v60, %v1117_v4  ;;  %v1087_v60 = vadd.f32 %v8219_v20, %v1051_v54  ;;  %v1122_v11 = vmax.f32 %v1086_v31, 0.0  ;;  %v7514_v4 = vld [vmem:[%s9906_s8 + $0x158] sm:$0xff]   ;;  %v8412_v54 = vpop.permute.xlu1 %1356  ;;  %v8419_v31 = vpop.permute.xlu0 %1351 }
 0x12c   : > { %5541 = vperm.xlu1 %7466, %v5371_v63   ;;  %5536 = vperm.xlu0 %7465, %v5370_v1   ;;  %v8398_v63 = vpack.c.bf16 %v1372_v46, %v1371_v14  ;;  %v1124_v1 = vmax.f32 %v1088_v18, 0.0  ;;  %v1089_v49 = vadd.f32 %v8219_v20, %v1053_v55  ;;  %v1091_v13 = vadd.f32 %v8219_v20, %v1055_v9  ;;  %v6482_v46 = vld [vmem:[%s8155_s27 + $0x70] sm:$0xff]  }
 0x12d   : > { %6927 = vmatmul.mubr.bf16.vlgmr.msra.gmra.mrb[20].mxu1 %v8302_v59  ;;  %6983 = vmatmul.mubr.bf16.gmra.mrb[56].mxu0 %v8347_v45  ;;  %v8395_v19 = vpack.c.bf16 %v1370_v16, %v1369_v58  ;;  %v1123_v43 = vmax.f32 %v1087_v60, 0.0  ;;  %v1374_v56 = vmul.f32 %v8121_v27, %v1122_v11  ;;  %v6268_v16 = vunpack.c.l.bf16 %v6480_v3  ;;  %v7516_v27 = vld [vmem:[%s9906_s8 + $0x160] sm:$0xff]   ;;  %v7519_v11 = vld [vmem:[%s9906_s8 + $0x1f0] sm:$0xff]  }
 0x12e   : > { %7015 = vmatpush3.bf16.msra.mxu1 %v8181_v8  ;;  %6930 = vmatprep.mubr.bf16.mxu1 %v8306_v37  ;;  %v7513_v8 = vld [vmem:[%s9906_s8 + $0x1d8] sm:$0xff]   ;;  %v1376_v6 = vmul.f32 %v8141_v24, %v1124_v1  ;;  %v1058_v58 = vmul.f32 %v8196_v5, %v6265_v35  ;;  %v1057_v18 = vmul.f32 %v8196_v5, %v6264_v57  ;;  %v1125_v17 = vmax.f32 %v1089_v49, 0.0 }
 0x12f   : > { %6986 = vmatprep.mubr.bf16.mxu0 %v8358_v0  ;;  %7016 = vmatprep.subr.bf16.mxu1 %v7510_v53  ;;  %v1375_v7 = vmul.f32 %v8143_v36, %v1123_v43  ;;  %v1127_v25 = vmax.f32 %v1091_v13, 0.0  ;;  %v8440_v55 = vpop.permute.xlu1 %1636 }
 0x130   : > { %5551 = vperm.xlu1 %7466, %v5373_v28   ;;  %5546 = vperm.xlu0 %7465, %v5372_v62   ;;  %v1373_v28 = vmul.f32 %v8123_v29, %v1121_v21  ;;  %v1092_v62 = vadd.f32 %v8219_v20, %v1056_v38  ;;  %v7517_v29 = vld [vmem:[%s9906_s8 + $0x1e8] sm:$0xff]   ;;  %v1094_v21 = vadd.f32 %v8219_v20, %v1058_v58  ;;  %v8449_v38 = vpop.permute.xlu0 %1631 }
 0x131   : > { %7122 = vmatprep.subr.bf16.mxu0 %v7511_v2  ;;  %v8437_v14 = vpack.c.bf16 %v1376_v6, %v1375_v7  ;;  %v1093_v1 = vadd.f32 %v8219_v20, %v1057_v18  ;;  %v1379_v57 = vmul.f32 %v8204_v39, %v1127_v25 }
 0x132   : > { %7017 = vmatpush3.bf16.msra.mxu1 %v7510_v53  ;;  %7123 = vmatpush3.bf16.msra.mxu0 %v7511_v2  ;;  %v1090_v53 = vadd.f32 %v8219_v20, %v1054_v10  ;;  %v6269_v2 = vunpack.c.h.bf16 %v6480_v3  ;;  %v8432_v24 = vpack.c.bf16 %v1374_v56, %v1373_v28  ;;  %v1128_v60 = vmax.f32 %v1092_v62, 0.0 }
 0x133   : > { %7018 = vmatprep.subr.bf16.mxu1 %v7512_v22  ;;  %7124 = vmatprep.subr.bf16.mxu0 %v7513_v8  ;;  %v1059_v10 = vmul.f32 %v8196_v5, %v6268_v16  ;;  %v6277_v3 = vunpack.c.h.bf16 %v6482_v46  ;;  %v1130_v6 = vmax.f32 %v1094_v21, 0.0  ;;  %v1129_v7 = vmax.f32 %v1093_v1, 0.0  ;;  %v6483_v16 = vld [vmem:[%s8155_s27 + $0x78] sm:$0xff]  }
 0x134   : > { %v1126_v36 = vmax.f32 %v1090_v53, 0.0  ;;  %v6276_v53 = vunpack.c.l.bf16 %v6482_v46  ;;  %v1380_v49 = vmul.f32 %v8202_v42, %v1128_v60  ;;  %v6281_v25 = vunpack.c.h.bf16 %v6483_v16 }
 0x135   : > { %6931 = vmatmul.mubr.bf16.gmra.mrb[24].mxu1 %v8347_v45  ;;  %6987 = vmatmul.mubr.bf16.gmra.mrb[60].mxu0 %v8395_v19  ;;  %v1095_v56 = vadd.f32 %v8219_v20, %v1059_v10  ;;  %v1064_v42 = vmul.f32 %v8196_v5, %v6277_v3  ;;  %v1382_v10 = vmul.f32 %v8229_v23, %v1130_v6  ;;  %v6280_v21 = vunpack.c.l.bf16 %v6483_v16 }
 0x136   : > { %6934 = vmatprep.mubr.bf16.mxu1 %v8358_v0  ;;  %6990 = vmatprep.mubr.bf16.mxu0 %v8398_v63  ;;  %v1063_v13 = vmul.f32 %v8196_v5, %v6276_v53 }
 0x137   : > { %7019 = vmatpush3.bf16.msra.mxu1 %v7512_v22  ;;  %7125 = vmatpush3.bf16.msra.mxu0 %v7513_v8  ;;  %v1060_v22 = vmul.f32 %v8196_v5, %v6269_v2  ;;  %v6481_v8 = vld [vmem:[%s8155_s27 + $0x68] sm:$0xff]   ;;  %v8471_v2 = vpop.permute.xlu1 %1646  ;;  %v1131_v18 = vmax.f32 %v1095_v56, 0.0  ;;  %v1100_v60 = vadd.f32 %v8219_v20, %v1064_v42  ;;  %v6291_v56 = vld [vmem:[%s8506_s13] sm:$0xff]  }
 0x138   : > { %7020 = vmatprep.subr.bf16.mxu1 %v7514_v4  ;;  %7126 = vmatprep.subr.bf16.mxu0 %v7515_v40  ;;  %v6273_v43 = vunpack.c.h.bf16 %v6481_v8  ;;  %v6272_v9 = vunpack.c.l.bf16 %v6481_v8 }
 0x139   : > { %v1096_v35 = vadd.f32 %v8219_v20, %v1060_v22  ;;  %v6484_v22 = vld [vmem:[%s8155_s27 + $0x80] sm:$0xff]   ;;  %v1136_v53 = vmax.f32 %v1100_v60, 0.0 }
 0x13a   : > { %v1062_v28 = vmul.f32 %v8196_v5, %v6273_v43  ;;  %v1061_v62 = vmul.f32 %v8196_v5, %v6272_v9  ;;  %v1383_v43 = vmul.f32 %v8257_v47, %v1131_v18  ;;  %v6285_v9 = vunpack.c.h.bf16 %v6484_v22 }
 0x13b   : > { %7021 = vmatpush3.bf16.msra.mxu1 %v7514_v4  ;;  %7127 = vmatpush3.bf16.msra.mxu0 %v7515_v40  ;;  %v1378_v4 = vmul.f32 %v8174_v50, %v1126_v36  ;;  %v1377_v40 = vmul.f32 %v8183_v51, %v1125_v17  ;;  %v7520_v50 = vld [vmem:[%s9906_s8 + $0x170] sm:$0xff]   ;;  %v7521_v51 = vld [vmem:[%s9906_s8 + $0x1f8] sm:$0xff]   ;;  %v1132_v58 = vmax.f32 %v1096_v35, 0.0  ;;  %v8487_v17 = vld [vmem:[%s9906_s8 + $0x200] sm:$0xff]   ;;  %v6284_v3 = vunpack.c.l.bf16 %v6484_v22  ;;  %v8508_v23 = vpop.permute.xlu1 %1656 }
 0x13c   : > { %7022 = vmatprep.subr.bf16.mxu1 %v7516_v27  ;;  %7128 = vmatprep.subr.bf16.mxu0 %v7517_v29  ;;  %v7522_v36 = vld [vmem:[%s9906_s8 + $0x178] sm:$0xff]   ;;  %v1098_v8 = vadd.f32 %v8219_v20, %v1062_v28  ;;  %v1097_v46 = vadd.f32 %v8219_v20, %v1061_v62  ;;  %v1068_v28 = vmul.f32 %v8196_v5, %v6285_v9  ;;  %v6292_v22 = vunpack.c.l.bf16 %v6291_v56 }
 0x13d   : > { %6935 = vmatmul.mubr.bf16.gmra.mrb[28].mxu1 %v8395_v19  ;;  %6991 = vmatmul.mubr.bf16.gmra.mrb[64].mxu0 %v8432_v24  ;;  %v8473_v39 = vpack.c.bf16 %v1378_v4, %v1377_v40  ;;  %v1384_v1 = vmul.f32 %v8255_v61, %v1132_v58  ;;  %v1066_v4 = vmul.f32 %v8196_v5, %v6281_v25 }
 0x13e   : > { %6938 = vmatprep.mubr.bf16.mxu1 %v8398_v63  ;;  %6994 = vmatprep.mubr.bf16.mxu0 %v8437_v14  ;;  %v1134_v47 = vmax.f32 %v1098_v8, 0.0  ;;  %v1133_v35 = vmax.f32 %v1097_v46, 0.0  ;;  %v1067_v62 = vmul.f32 %v8196_v5, %v6284_v3  ;;  %v1388_v46 = vmul.f32 %v8311_v48, %v1136_v53  ;;  %v6486_v48 = vld [vmem:[%s8506_s13 + $0x8] sm:$0xff]  }
 0x13f   : > { %7023 = vmatpush3.bf16.msra.mxu1 %v7516_v27  ;;  %7129 = vmatpush3.bf16.msra.mxu0 %v7517_v29  ;;  %v8477_v27 = vpop.permute.xlu0 %1641  ;;  %v8479_v29 = vpack.c.bf16 %v1380_v49, %v1379_v57  ;;  %v1065_v49 = vmul.f32 %v8196_v5, %v6280_v21  ;;  %v6485_v57 = vld [vmem:[%s8155_s27 + $0x88] sm:$0xff]   ;;  %v1102_v42 = vadd.f32 %v8219_v20, %v1066_v4  ;;  %v8532_v16 = vpop.permute.xlu1 %1666  ;;  %v6487_v4 = vld [vmem:[%s8506_s13 + $0x10] sm:$0xff]  }
 0x140   : > { %7024 = vmatprep.subr.bf16.mxu1 %v7518_v34  ;;  %7130 = vmatprep.subr.bf16.mxu0 %v7519_v11  ;;  %v6289_v6 = vunpack.c.h.bf16 %v6485_v57  ;;  %v1386_v58 = vmul.f32 %v8282_v33, %v1134_v47  ;;  %v1385_v18 = vmul.f32 %v8289_v41, %v1133_v35  ;;  %v1104_v25 = vadd.f32 %v8219_v20, %v1068_v28 }
 0x141   : > { %v1138_v21 = vmax.f32 %v1102_v42, 0.0  ;;  %v6296_v42 = vunpack.c.l.bf16 %v6486_v48 }
 0x143   : > { %7025 = vmatpush3.bf16.msra.mxu1 %v7518_v34  ;;  %7131 = vmatpush3.bf16.msra.mxu0 %v7519_v11  ;;  %v1381_v34 = vmul.f32 %v8235_v30, %v1129_v7  ;;  %v1099_v11 = vadd.f32 %v8219_v20, %v1063_v13  ;;  %v8514_v30 = vld [vmem:[%s9906_s8 + $0x180] sm:$0xff]   ;;  %v8516_v61 = vpop.permute.xlu0 %1651  ;;  %v6288_v7 = vunpack.c.l.bf16 %v6485_v57  ;;  %v6293_v13 = vunpack.c.h.bf16 %v6291_v56  ;;  %v8554_v47 = vpop.permute.xlu1 %1676 }
 0x144   : > { %7026 = vmatprep.subr.bf16.mxu1 %v7520_v50  ;;  %7132 = vmatprep.subr.bf16.mxu0 %v7521_v51  ;;  %v6297_v56 = vunpack.c.h.bf16 %v6486_v48 }
 0x145   : > { %6939 = vmatmul.mubr.bf16.gmra.mrb[32].mxu1 %v8432_v24  ;;  %6995 = vmatmul.mubr.bf16.gmra.mrb[68].mxu0 %v8473_v39  ;;  %v8519_v40 = vpack.c.bf16 %v1382_v10, %v1381_v34  ;;  %v1103_v10 = vadd.f32 %v8219_v20, %v1067_v62  ;;  %v1070_v34 = vmul.f32 %v8196_v5, %v6289_v6 }
 0x146   : > { %6942 = vmatprep.mubr.bf16.mxu1 %v8437_v14  ;;  %6998 = vmatprep.mubr.bf16.mxu0 %v8479_v29  ;;  %v1069_v33 = vmul.f32 %v8196_v5, %v6288_v7  ;;  %v1486_v41 = vmul.f32 %v8196_v5, %v6293_v13  ;;  %v6301_v13 = vunpack.c.h.bf16 %v6487_v4 }
 0x147   : > { %7027 = vmatpush3.bf16.msra.mxu1 %v7520_v50  ;;  %7133 = vmatpush3.bf16.msra.mxu0 %v7521_v51  ;;  %v8524_v50 = vpack.c.bf16 %v1384_v1, %v1383_v43  ;;  %v1135_v51 = vmax.f32 %v1099_v11, 0.0  ;;  %v8539_v8 = vpop.permute.xlu0 %1661  ;;  %v8548_v11 = vpack.c.bf16 %v1386_v58, %v1385_v18  ;;  %v1485_v43 = vmul.f32 %v8196_v5, %v6292_v22  ;;  %v8572_v22 = vpop.permute.xlu1 %1686 }
 0x148   : > { %7028 = vmatprep.subr.bf16.mxu1 %v7522_v36  ;;  %7170 = vmatprep.subr.bf16.mxu0 %v8487_v17  ;;  %v1139_v3 = vmax.f32 %v1103_v10, 0.0  ;;  %v1106_v53 = vadd.f32 %v8219_v20, %v1070_v34  ;;  %v1522_v57 = vadd.f32 %v8219_v20, %v1486_v41  ;;  %v6300_v58 = vunpack.c.l.bf16 %v6487_v4 }
 0x149   : > { %v1387_v60 = vmul.f32 %v8313_v12, %v1135_v51  ;;  %v1140_v12 = vmax.f32 %v1104_v25, 0.0  ;;  %v1390_v51 = vmul.f32 %v8345_v44, %v1138_v21  ;;  %v1521_v62 = vadd.f32 %v8219_v20, %v1485_v43  ;;  %v6488_v25 = vld [vmem:[%s8506_s13 + $0x18] sm:$0xff]  }
 0x14a   : > { %v1391_v7 = vmul.f32 %v8390_v26, %v1139_v3  ;;  %v1142_v18 = vmax.f32 %v1106_v53, 0.0  ;;  %v1490_v34 = vmul.f32 %v8196_v5, %v6301_v13  ;;  %v6305_v21 = vunpack.c.h.bf16 %v6488_v25 }
 0x14b   : > { %7029 = vmatpush3.bf16.msra.mxu1 %v7522_v36  ;;  %v1101_v36 = vadd.f32 %v8219_v20, %v1065_v49  ;;  %v8552_v9 = vpack.c.bf16 %v1388_v46, %v1387_v60  ;;  %v8557_v35 = vpop.permute.xlu0 %1671  ;;  %v1105_v49 = vadd.f32 %v8219_v20, %v1069_v33  ;;  %v1392_v6 = vmul.f32 %v8388_v15, %v1140_v12 }
 0x14c   : > { %7066 = vmatprep.subr.bf16.mxu1 %v8514_v30  ;;  %v1558_v60 = vmax.f32 %v1522_v57, 0.0  ;;  %v1557_v26 = vmax.f32 %v1521_v62, 0.0  ;;  %v1489_v33 = vmul.f32 %v8196_v5, %v6300_v58  ;;  %v1394_v43 = vmul.f32 %v8412_v54, %v1142_v18 }
 0x14d   : > { %6943 = vmatmul.mubr.bf16.gmra.mrb[36].mxu1 %v8473_v39  ;;  %6999 = vmatmul.mubr.bf16.gmra.mrb[72].mxu0 %v8519_v40  ;;  %v1137_v1 = vmax.f32 %v1101_v36, 0.0  ;;  %v1488_v36 = vmul.f32 %v8196_v5, %v6297_v56  ;;  %v1141_v44 = vmax.f32 %v1105_v49, 0.0  ;;  %v8580_v15 = vpack.c.bf16 %v1392_v6, %v1391_v7  ;;  %v8597_v56 = vpop.permute.xlu1 %1696 }
 0x14e   : > { %6946 = vmatprep.mubr.bf16.mxu1 %v8479_v29  ;;  %7002 = vmatprep.mubr.bf16.mxu0 %v8524_v50  ;;  %v6304_v3 = vunpack.c.l.bf16 %v6488_v25  ;;  %v1810_v4 = vmul.f32 %v8440_v55, %v1558_v60  ;;  %v1809_v53 = vmul.f32 %v8449_v38, %v1557_v26  ;;  %v1526_v49 = vadd.f32 %v8219_v20, %v1490_v34  ;;  %v6491_v38 = vld [vmem:[%s8506_s13 + $0x30] sm:$0xff]  }
 0x14f   : > { %v1389_v28 = vmul.f32 %v8351_v52, %v1137_v1  ;;  %v1487_v52 = vmul.f32 %v8196_v5, %v6296_v42  ;;  %v8578_v10 = vpop.permute.xlu0 %1681  ;;  %v1524_v41 = vadd.f32 %v8219_v20, %v1488_v36  ;;  %v6489_v1 = vld [vmem:[%s8506_s13 + $0x20] sm:$0xff]   ;;  %v1393_v48 = vmul.f32 %v8419_v31, %v1141_v44  ;;  %v6490_v31 = vld [vmem:[%s8506_s13 + $0x28] sm:$0xff]  }
 0x150   : > { %v1525_v57 = vadd.f32 %v8219_v20, %v1489_v33  ;;  %v1492_v54 = vmul.f32 %v8196_v5, %v6305_v21  ;;  %v1491_v55 = vmul.f32 %v8196_v5, %v6304_v3  ;;  %v8607_v13 = vpack.c.bf16 %v1810_v4, %v1809_v53  ;;  %v6493_v4 = vld [vmem:[%s8506_s13 + $0x40] sm:$0xff]  }
 0x151   : > { %v8574_v46 = vpack.c.bf16 %v1390_v51, %v1389_v28  ;;  %v1523_v12 = vadd.f32 %v8219_v20, %v1487_v52  ;;  %v6309_v51 = vunpack.c.h.bf16 %v6489_v1  ;;  %v6308_v28 = vunpack.c.l.bf16 %v6489_v1  ;;  %v8614_v33 = vpop.permute.xlu1 %1706 }
 0x152   : > { %v8603_v42 = vpack.c.bf16 %v1394_v43, %v1393_v48  ;;  %v1560_v6 = vmax.f32 %v1524_v41, 0.0  ;;  %v1562_v58 = vmax.f32 %v1526_v49, 0.0  ;;  %v1561_v18 = vmax.f32 %v1525_v57, 0.0  ;;  %v6492_v43 = vld [vmem:[%s8506_s13 + $0x38] sm:$0xff]  }
 0x153   : > { %v8599_v62 = vpop.permute.xlu0 %1691  ;;  %v1559_v7 = vmax.f32 %v1523_v12, 0.0  ;;  %v1494_v36 = vmul.f32 %v8196_v5, %v6309_v51  ;;  %v1493_v44 = vmul.f32 %v8196_v5, %v6308_v28  ;;  %v6313_v60 = vunpack.c.h.bf16 %v6490_v31 }
 0x154   : > { %v6312_v52 = vunpack.c.l.bf16 %v6490_v31  ;;  %v1528_v25 = vadd.f32 %v8219_v20, %v1492_v54  ;;  %v6317_v26 = vunpack.c.h.bf16 %v6491_v38  ;;  %v6316_v34 = vunpack.c.l.bf16 %v6491_v38 }
 0x155   : > { %6947 = vmatmul.mubr.bf16.gmra.mrb[40].mxu1 %v8519_v40  ;;  %7003 = vmatmul.mubr.bf16.gmra.mrb[76].mxu0 %v8548_v11  ;;  %v1812_v41 = vmul.f32 %v8471_v2, %v1560_v6  ;;  %v1811_v21 = vmul.f32 %v8477_v27, %v1559_v7  ;;  %v1527_v1 = vadd.f32 %v8219_v20, %v1491_v55  ;;  %v6321_v54 = vunpack.c.h.bf16 %v6492_v43  ;;  %v8637_v55 = vpop.permute.xlu1 %1716 }
 0x156   : > { %6950 = vmatprep.mubr.bf16.mxu1 %v8524_v50  ;;  %7006 = vmatprep.mubr.bf16.mxu0 %v8552_v9  ;;  %v1814_v12 = vmul.f32 %v8508_v23, %v1562_v58  ;;  %v1813_v3 = vmul.f32 %v8516_v61, %v1561_v18  ;;  %v1530_v53 = vadd.f32 %v8219_v20, %v1494_v36  ;;  %v1564_v51 = vmax.f32 %v1528_v25, 0.0  ;;  %v7525_v58 = vld [vmem:[%s9906_s8 + $0x208] sm:$0xff]  }
 0x157   : > { %v8622_v48 = vpop.permute.xlu0 %1701  ;;  %v1529_v49 = vadd.f32 %v8219_v20, %v1493_v44  ;;  %v1496_v57 = vmul.f32 %v8196_v5, %v6313_v60  ;;  %v1495_v2 = vmul.f32 %v8196_v5, %v6312_v52  ;;  %v1498_v27 = vmul.f32 %v8196_v5, %v6317_v26 }
 0x158   : > { %v1497_v28 = vmul.f32 %v8196_v5, %v6316_v34  ;;  %v8633_v31 = vpack.c.bf16 %v1812_v41, %v1811_v21  ;;  %v1563_v23 = vmax.f32 %v1527_v1, 0.0  ;;  %v6320_v6 = vunpack.c.l.bf16 %v6492_v43 }
 0x159   : > { %v6325_v61 = vunpack.c.h.bf16 %v6493_v4  ;;  %v8635_v7 = vpack.c.bf16 %v1814_v12, %v1813_v3  ;;  %v6324_v38 = vunpack.c.l.bf16 %v6493_v4  ;;  %v1566_v18 = vmax.f32 %v1530_v53, 0.0  ;;  %v6494_v12 = vld [vmem:[%s8506_s13 + $0x48] sm:$0xff]  }
 0x15a   : > { %v1565_v36 = vmax.f32 %v1529_v49, 0.0  ;;  %v1532_v44 = vadd.f32 %v8219_v20, %v1496_v57  ;;  %v1531_v60 = vadd.f32 %v8219_v20, %v1495_v2  ;;  %v1534_v25 = vadd.f32 %v8219_v20, %v1498_v27 }
 0x15b   : > { %v8644_v52 = vpop.permute.xlu0 %1711  ;;  %v1533_v26 = vadd.f32 %v8219_v20, %v1497_v28  ;;  %v1500_v34 = vmul.f32 %v8196_v5, %v6321_v54  ;;  %v1816_v41 = vmul.f32 %v8532_v16, %v1564_v51  ;;  %v1815_v21 = vmul.f32 %v8539_v8, %v1563_v23  ;;  %v6495_v28 = vld [vmem:[%s8506_s13 + $0x50] sm:$0xff]  }
 0x15c   : > { %v1499_v1 = vmul.f32 %v8196_v5, %v6320_v6  ;;  %v1502_v43 = vmul.f32 %v8196_v5, %v6325_v61  ;;  %v1501_v3 = vmul.f32 %v8196_v5, %v6324_v38  ;;  %v1818_v4 = vmul.f32 %v8554_v47, %v1566_v18  ;;  %v7526_v38 = vld [vmem:[%s9906_s8 + $0x188] sm:$0xff]  }
 0x15d   : > { %6951 = vmatmul.mubr.bf16.gmra.mrb[44].mxu1 %v8548_v11  ;;  %7007 = vmatmul.mubr.bf16.gmra.mrb[80].mxu0 %v8574_v46  ;;  %v1817_v16 = vmul.f32 %v8557_v35, %v1565_v36  ;;  %v1568_v8 = vmax.f32 %v1532_v44, 0.0  ;;  %v1567_v53 = vmax.f32 %v1531_v60, 0.0  ;;  %v1570_v57 = vmax.f32 %v1534_v25, 0.0 }
 0x15e   : > { %6954 = vmatprep.mubr.bf16.mxu1 %v8552_v9  ;;  %7010 = vmatprep.mubr.bf16.mxu0 %v8580_v15  ;;  %v1569_v2 = vmax.f32 %v1533_v26, 0.0  ;;  %v8666_v51 = vadd.f32 %v8219_v20, %v1500_v34  ;;  %v6329_v27 = vunpack.c.h.bf16 %v6494_v12  ;;  %v8673_v23 = vpack.c.bf16 %v1816_v41, %v1815_v21 }
 0x15f   : > { %v8676_v47 = vadd.f32 %v8219_v20, %v1499_v1  ;;  %v8679_v35 = vadd.f32 %v8219_v20, %v1502_v43  ;;  %v8681_v6 = vpop.permute.xlu0 %1721  ;;  %v8689_v18 = vadd.f32 %v8219_v20, %v1501_v3  ;;  %v6328_v36 = vunpack.c.l.bf16 %v6494_v12  ;;  %v7529_v20 = vld [vmem:[%s9906_s8 + $0x218] sm:$0xff]  }
 0x160   : > { %v8692_v26 = vpack.c.bf16 %v1818_v4, %v1817_v16  ;;  %v6333_v34 = vunpack.c.h.bf16 %v6495_v28  ;;  %v1504_v1 = vmul.f32 %v8196_v5, %v6329_v27  ;;  %v6332_v43 = vunpack.c.l.bf16 %v6495_v28 }
 0x161   : > { %v1571_v27 = vmax.f32 %v8676_v47, 0.0  ;;  %v1573_v28 = vmax.f32 %v8689_v18, 0.0  ;;  %v6497_v47 = vld [vmem:[%s8506_s13 + $0x60] sm:$0xff]  }
 0x165   : > { %6955 = vmatmul.mubr.bf16.gmra.mrb[48].mxu1 %v8574_v46  ;;  %7011 = vmatmul.mubr.bf16.gmra.mrb[84].mxu0 %v8603_v42 }
 0x166   : > { %6958 = vmatprep.mubr.bf16.mxu1 %v8580_v15  ;;  %7134 = vmatprep.mubr.bf16.mxu0 %v8607_v13 }
 0x16d   : > { %6959 = vmatmul.mubr.bf16.gmra.mrb[52].mxu1 %v8603_v42  ;;  %7135 = vmatmul.mubr.bf16.vlgmr.msra.gmra.mrb[88].mxu0 %v8633_v31 }
 0x16e   : > { %7030 = vmatprep.mubr.bf16.mxu1 %v8268_v32  ;;  %7138 = vmatprep.mubr.bf16.mxu0 %v8635_v7  ;;  %v7527_v32 = vld [vmem:[%s9906_s8 + $0x210] sm:$0xff]  }
 0x16f   : > { %7171 = vmatpush3.bf16.msra.mxu0 %v8487_v17  ;;  %v8668_v17 = vpop.permute.xlu1 %1726 }
 0x170   : > { %7172 = vmatprep.subr.bf16.mxu0 %v7525_v58 }
 0x171   : > { %v6788_v49 = vpop.f32.mrb[0].mxu1 }
 0x172   : > { %v8671_v54 = vpop.f32.mrb[1].mxu1  ;;  %v2193_v44 = vrot.slane %v6788_v49, 1  ;;  %v1572_v49 = vmax.f32 %v8666_v51, 0.0 }
 0x173   : > { %v8683_v61 = vpop.f32.mrb[2].mxu1  ;;  %7173 = vmatpush3.bf16.msra.mxu0 %v7525_v58  ;;  %v9910_v41 = vrot.slane %v8671_v54, 1  ;;  %v1820_v58 = vmul.f32 %v8572_v22, %v1568_v8  ;;  %v7528_v22 = vld [vmem:[%s9906_s8 + $0x190] sm:$0xff]   ;;  %v8730_v16 = vpop.permute.xlu1 %1736  ;;  %v6496_v8 = vld [vmem:[%s8506_s13 + $0x58] sm:$0xff]  }
 0x174   : > { %v9911_v60 = vrot.slane %v8683_v61, 1  ;;  %v2045_v25 = vpop.f32.mrb[3].mxu1  ;;  %7174 = vmatprep.subr.bf16.mxu0 %v7527_v32 }
 0x175   : > { %v2191_v21 = vrot.slane %v2045_v25, 1  ;;  %7031 = vmatmul.mubr.bf16.vlgmr.msra.gmra.mrb[56].mxu1 %v8302_v59  ;;  %7139 = vmatmul.mubr.bf16.gmra.mrb[92].mxu0 %v8673_v23  ;;  %v1819_v59 = vmul.f32 %v8578_v10, %v1567_v53  ;;  %v8727_v10 = vld [vmem:[%s9904_s6] ss:$0 sm:$0xff] }
 0x176   : > { %v8705_v12 = vsel %vm2157_vm0, %v2193_v44, %v9911_v60  ;;  %7067 = vmatpush3.bf16.msra.mxu1 %v8514_v30  ;;  %7034 = vmatprep.mubr.bf16.mxu1 %v8306_v37  ;;  %v1822_v30 = vmul.f32 %v8597_v56, %v1570_v57  ;;  %v1821_v37 = vmul.f32 %v8599_v62, %v1569_v2  ;;  %v8736_v62 = vpop.permute.xlu0 %1731  ;;  %v1574_v2 = vmax.f32 %v8679_v35, 0.0 }
 0x177   : > { %v8713_v3 = vsel %vm2157_vm0, %v9910_v41, %v2191_v21  ;;  %v8716_v5 = vsel %vm2157_vm0, %v2191_v21, %v2193_v44  ;;  %7142 = vmatprep.mubr.bf16.mxu0 %v8692_v26  ;;  %7068 = vmatprep.subr.bf16.mxu1 %v7526_v38  ;;  %v1503_v4 = vmul.f32 %v8727_v10, %v6328_v36  ;;  %v8743_v36 = vld [vmem:[%s9905_s7] ss:$0 sm:$0xff] }
 0x178   : > { %9919 = vst [vmem:[#allocation2_spill] sm:$0xff] %v8713_v3  ;;  %9920 = vst [vmem:[#allocation3_spill] sm:$0xff] %v8716_v5  ;;  %v6772_v53 = vpop.f32.mrb[0].mxu0  ;;  %7175 = vmatpush3.bf16.msra.mxu0 %v7527_v32  ;;  %v1506_v56 = vmul.f32 %v8727_v10, %v6333_v34  ;;  %v8746_v32 = vadd.f32 %v8743_v36, %v1504_v1  ;;  %v1505_v51 = vmul.f32 %v8727_v10, %v6332_v43  ;;  %v7531_v41 = vld [vmem:[%s9906_s8 + $0x220] sm:$0xff]  }
 0x179   : > { %v1978_v57 = vpop.f32.mrb[1].mxu0  ;;  %7176 = vmatprep.subr.bf16.mxu0 %v7529_v20  ;;  %v8752_v25 = vpack.c.bf16 %v1820_v58, %v1819_v59  ;;  %v6337_v34 = vunpack.c.h.bf16 %v6496_v8  ;;  %v2161_v35 = vrot.slane %v6772_v53, 1  ;;  %v8758_v1 = vpack.c.bf16 %v1822_v30, %v1821_v37  ;;  %v7533_v37 = vld [vmem:[%s9906_s8 + $0x228] sm:$0xff]  }
 0x17a   : > { %v8750_v44 = vpop.f32.mrb[2].mxu0  ;;  %7069 = vmatpush3.bf16.msra.mxu1 %v7526_v38  ;;  %v8761_v43 = vadd.f32 %v8743_v36, %v1503_v4  ;;  %v2158_v60 = vrot.slane %v1978_v57, 1  ;;  %v7530_v38 = vld [vmem:[%s9906_s8 + $0x198] sm:$0xff]   ;;  %v8767_v58 = vadd.f32 %v8743_v36, %v1506_v56  ;;  %v6336_v59 = vunpack.c.l.bf16 %v6496_v8  ;;  %v8782_v4 = vpop.permute.xlu1 %1746 }
 0x17b   : > { %v9912_v18 = vrot.slane %v8750_v44, 1  ;;  %v1981_v21 = vpop.f32.mrb[3].mxu0  ;;  %7070 = vmatprep.subr.bf16.mxu1 %v7528_v22  ;;  %v6341_v53 = vunpack.c.h.bf16 %v6497_v47  ;;  %v6340_v8 = vunpack.c.l.bf16 %v6497_v47 }
 0x17c   : > { %v2159_v5 = vrot.slane %v1981_v21, 1  ;;  %7177 = vmatpush3.bf16.msra.mxu0 %v7529_v20  ;;  %v8780_v20 = vadd.f32 %v8743_v36, %v1505_v51  ;;  %v1823_v21 = vmul.f32 %v8622_v48, %v1571_v27  ;;  %v1508_v51 = vmul.f32 %v8727_v10, %v6337_v34  ;;  %v6498_v27 = vld [vmem:[%s8506_s13 + $0x68] sm:$0xff]  }
 0x17d   : > { %v8772_v30 = vsel %vm2157_vm0, %v2161_v35, %v9912_v18  ;;  %7035 = vmatmul.mubr.bf16.gmra.mrb[60].mxu1 %v8347_v45  ;;  %7143 = vmatmul.mubr.bf16.gmra.mrb[96].mxu0 %v8752_v25  ;;  %v1824_v45 = vmul.f32 %v8614_v33, %v1572_v49  ;;  %v8795_v18 = vpop.permute.xlu0 %1741  ;;  %v1576_v33 = vmax.f32 %v8746_v32, 0.0  ;;  %v1575_v48 = vmax.f32 %v8761_v43, 0.0  ;;  %v6499_v43 = vld [vmem:[%s8506_s13 + $0x70] sm:$0xff]  }
 0x17e   : > { %v8785_v56 = vsel %vm2157_vm0, %v2158_v60, %v2159_v5  ;;  %v8788_v57 = vsel %vm2157_vm0, %v2159_v5, %v2161_v35  ;;  %7038 = vmatprep.mubr.bf16.mxu1 %v8358_v0  ;;  %7146 = vmatprep.mubr.bf16.mxu0 %v8758_v1  ;;  %v1826_v60 = vmul.f32 %v8637_v55, %v1574_v2  ;;  %v7532_v0 = vld [vmem:[%s9906_s8 + $0x1a0] sm:$0xff]   ;;  %v1577_v2 = vmax.f32 %v8780_v20, 0.0 }
 0x17f   : > { %7071 = vmatpush3.bf16.msra.mxu1 %v7528_v22  ;;  %7178 = vmatprep.subr.bf16.mxu0 %v7531_v41  ;;  %v1825_v5 = vmul.f32 %v8644_v52, %v1573_v28  ;;  %v1507_v49 = vmul.f32 %v8727_v10, %v6336_v59  ;;  %v1510_v22 = vmul.f32 %v8727_v10, %v6341_v53  ;;  %v1578_v52 = vmax.f32 %v8767_v58, 0.0  ;;  %v7535_v58 = vld [vmem:[%s9906_s8 + $0x230] sm:$0xff]  }
 0x180   : > { %v6792_v47 = vpop.f32.mrb[4].mxu1  ;;  %7072 = vmatprep.subr.bf16.mxu1 %v7530_v38  ;;  %7179 = vmatpush3.bf16.msra.mxu0 %v7531_v41  ;;  %v1509_v28 = vmul.f32 %v8727_v10, %v6340_v8  ;;  %v8812_v41 = vpack.c.bf16 %v1824_v45, %v1823_v21  ;;  %v8815_v32 = vadd.f32 %v8743_v36, %v1508_v51  ;;  %v8824_v8 = vpop.permute.xlu1 %1756  ;;  %v9921_v45 = vrot.slane %v8683_v61, 1 }
 0x181   : > { %v2058_v55 = vpop.f32.mrb[5].mxu1  ;;  %7180 = vmatprep.subr.bf16.mxu0 %v7533_v37  ;;  %v2201_v59 = vrot.slane %v6792_v47, 1  ;;  %v8822_v20 = vpack.c.bf16 %v1826_v60, %v1825_v5  ;;  %v8835_v47 = vadd.f32 %v8743_v36, %v1507_v49  ;;  %v8838_v60 = vadd.f32 %v8743_v36, %v1510_v22  ;;  %v8840_v5 = vpop.permute.xlu0 %1751 }
 0x182   : > { %v2197_v34 = vrot.slane %v2058_v55, 1  ;;  %v8810_v35 = vpop.f32.mrb[6].mxu1  ;;  %v6345_v55 = vunpack.c.h.bf16 %v6498_v27  ;;  %v6344_v53 = vunpack.c.l.bf16 %v6498_v27  ;;  %v6349_v49 = vunpack.c.h.bf16 %v6499_v43 }
 0x183   : > { %v2061_v3 = vpop.f32.mrb[7].mxu1  ;;  %7073 = vmatpush3.bf16.msra.mxu1 %v7530_v38  ;;  %v7534_v38 = vld [vmem:[%s9906_s8 + $0x1a8] sm:$0xff]   ;;  %v9923_v61 = vrot.slane %v8810_v35, 1 }
 0x184   : > { %v8829_v21 = vsel %vm2157_vm0, %v9921_v45, %v2197_v34  ;;  %v2199_v51 = vrot.slane %v2061_v3, 1  ;;  %7074 = vmatprep.subr.bf16.mxu1 %v7532_v0  ;;  %7181 = vmatpush3.bf16.msra.mxu0 %v7533_v37  ;;  %v7537_v3 = vld [vmem:[%s9906_s8 + $0x238] sm:$0xff]   ;;  %v8853_v37 = vadd.f32 %v8743_v36, %v1509_v28  ;;  %v1830_v28 = vmul.f32 %v8730_v16, %v1578_v52 }
 0x185   : > { %9922 = vst [vmem:[#allocation4_spill] sm:$0xff] %v8829_v21  ;;  %v8845_v45 = vsel %vm2157_vm0, %v2201_v59, %v9923_v61  ;;  %7039 = vmatmul.mubr.bf16.gmra.mrb[64].mxu1 %v8395_v19  ;;  %7147 = vmatmul.mubr.bf16.gmra.mrb[100].mxu0 %v8812_v41  ;;  %v1828_v19 = vmul.f32 %v8668_v17, %v1576_v33  ;;  %v1580_v17 = vmax.f32 %v8815_v32, 0.0  ;;  %v8884_v32 = vpop.permute.xlu0 %1761 }
 0x186   : > { %9924 = vst [vmem:[#allocation5_spill] sm:$0xff] %v8845_v45  ;;  %v8856_v22 = vsel %vm2157_vm0, %v2197_v34, %v2199_v51  ;;  %v8859_v27 = vsel %vm2157_vm0, %v2199_v51, %v2201_v59  ;;  %7042 = vmatprep.mubr.bf16.mxu1 %v8398_v63  ;;  %7150 = vmatprep.mubr.bf16.mxu0 %v8822_v20  ;;  %v6348_v45 = vunpack.c.l.bf16 %v6499_v43  ;;  %v7536_v63 = vld [vmem:[%s9906_s8 + $0x1b0] sm:$0xff]   ;;  %v1581_v33 = vmax.f32 %v8853_v37, 0.0  ;;  %v6501_v51 = vld [vmem:[%s8506_s13 + $0x80] sm:$0xff]  }
 0x187   : > { %9925 = vst [vmem:[#allocation6_spill] sm:$0xff] %v8856_v22  ;;  %9926 = vst [vmem:[#allocation7_spill] sm:$0xff] %v8859_v27  ;;  %v1827_v61 = vmul.f32 %v8681_v6, %v1575_v48  ;;  %7075 = vmatpush3.bf16.msra.mxu1 %v7532_v0  ;;  %7182 = vmatprep.subr.bf16.mxu0 %v7535_v58  ;;  %v1829_v34 = vmul.f32 %v8736_v62, %v1577_v2  ;;  %v1579_v6 = vmax.f32 %v8835_v47, 0.0  ;;  %v8876_v48 = vpop.permute.xlu1 %1766  ;;  %v6500_v2 = vld [vmem:[%s8506_s13 + $0x78] sm:$0xff]  }
 0x188   : > { %v1512_v22 = vmul.f32 %v8727_v10, %v6345_v55  ;;  %v6776_v59 = vpop.f32.mrb[4].mxu0  ;;  %7076 = vmatprep.subr.bf16.mxu1 %v7534_v38  ;;  %7183 = vmatpush3.bf16.msra.mxu0 %v7535_v58  ;;  %v1511_v0 = vmul.f32 %v8727_v10, %v6344_v53  ;;  %v1582_v62 = vmax.f32 %v8838_v60, 0.0  ;;  %v1514_v52 = vmul.f32 %v8727_v10, %v6349_v49 }
 0x189   : > { %v1994_v16 = vpop.f32.mrb[5].mxu0  ;;  %7184 = vmatprep.subr.bf16.mxu0 %v7537_v3  ;;  %v8882_v55 = vpack.c.bf16 %v1828_v19, %v1827_v61  ;;  %v1513_v53 = vmul.f32 %v8727_v10, %v6348_v45  ;;  %v2169_v47 = vrot.slane %v6776_v59, 1  ;;  %v8889_v37 = vpack.c.bf16 %v1830_v28, %v1829_v34  ;;  %v7538_v45 = vld [vmem:[%s9906_s8 + $0x1b8] sm:$0xff]  }
 0x18a   : > { %v2165_v43 = vrot.slane %v1994_v16, 1  ;;  %v8880_v58 = vpop.f32.mrb[6].mxu0  ;;  %v1548_v49 = vadd.f32 %v8743_v36, %v1512_v22  ;;  %v9928_v16 = vrot.slane %v8750_v44, 1  ;;  %v1547_v61 = vadd.f32 %v8743_v36, %v1511_v0 }
 0x18b   : > { %v9913_v60 = vrot.slane %v8880_v58, 1  ;;  %v1997_v27 = vpop.f32.mrb[7].mxu0  ;;  %7077 = vmatpush3.bf16.msra.mxu1 %v7534_v38  ;;  %9927 = vst [vmem:[#allocation8_spill] sm:$0xff] %v8889_v37  ;;  %v6353_v59 = vunpack.c.h.bf16 %v6500_v2  ;;  %v6352_v38 = vunpack.c.l.bf16 %v6500_v2  ;;  %v1550_v44 = vadd.f32 %v8743_v36, %v1514_v52 }
 0x18c   : > { %v8895_v21 = vsel %vm2157_vm0, %v9928_v16, %v2165_v43  ;;  %v2167_v19 = vrot.slane %v1997_v27, 1  ;;  %7078 = vmatprep.subr.bf16.mxu1 %v7536_v63  ;;  %7185 = vmatpush3.bf16.msra.mxu0 %v7537_v3  ;;  %v6357_v3 = vunpack.c.h.bf16 %v6501_v51  ;;  %v1832_v34 = vmul.f32 %v8782_v4, %v1580_v17 }
 0x18d   : > { %v8904_v22 = vsel %vm2157_vm0, %v2169_v47, %v9913_v60  ;;  %7043 = vmatmul.mubr.bf16.gmra.mrb[68].mxu1 %v8432_v24  ;;  %7151 = vmatmul.mubr.bf16.gmra.mrb[104].mxu0 %v8882_v55  ;;  %v1831_v0 = vmul.f32 %v8795_v18, %v1579_v6  ;;  %v1549_v24 = vadd.f32 %v8743_v36, %v1513_v53  ;;  %v6356_v16 = vunpack.c.l.bf16 %v6501_v51 }
 0x18e   : > { %v8910_v27 = vsel %vm2157_vm0, %v2165_v43, %v2167_v19  ;;  %v8913_v28 = vsel %vm2157_vm0, %v2167_v19, %v2169_v47  ;;  %7046 = vmatprep.mubr.bf16.mxu1 %v8437_v14  ;;  %7154 = vmatprep.mubr.bf16.mxu0 %v8889_v37  ;;  %v1834_v52 = vmul.f32 %v8824_v8, %v1582_v62  ;;  %v1777_v43 = vpop.permute.xlu1 %1776  ;;  %v1584_v19 = vmax.f32 %v1548_v49, 0.0  ;;  %v1772_v14 = vpop.permute.xlu0 %1771 }
 0x18f   : > { %7079 = vmatpush3.bf16.msra.mxu1 %v7536_v63  ;;  %v1833_v2 = vmul.f32 %v8840_v5, %v1581_v33  ;;  %v1516_v60 = vmul.f32 %v8727_v10, %v6353_v59  ;;  %v1515_v4 = vmul.f32 %v8727_v10, %v6352_v38  ;;  %v1583_v18 = vmax.f32 %v1547_v61, 0.0  ;;  %v6502_v33 = vld [vmem:[%s8506_s13 + $0x88] sm:$0xff]  }
 0x190   : > { %v6796_v47 = vpop.f32.mrb[8].mxu1  ;;  %7080 = vmatprep.subr.bf16.mxu1 %v7538_v45  ;;  %v1586_v6 = vmax.f32 %v1550_v44, 0.0  ;;  %v1518_v63 = vmul.f32 %v8727_v10, %v6357_v3  ;;  %v8927_v5 = vpack.c.bf16 %v1832_v34, %v1831_v0  ;;  %v1585_v62 = vmax.f32 %v1549_v24, 0.0 }
 0x191   : > { %v2074_v17 = vpop.f32.mrb[9].mxu1  ;;  %v2209_v51 = vrot.slane %v6796_v47, 1  ;;  %v8931_v59 = vpack.c.bf16 %v1834_v52, %v1833_v2  ;;  %v1517_v38 = vmul.f32 %v8727_v10, %v6356_v16  ;;  %v9929_v61 = vrot.slane %v8810_v35, 1 }
 0x192   : > { %v2205_v53 = vrot.slane %v2074_v17, 1  ;;  %v8925_v8 = vpop.f32.mrb[10].mxu1  ;;  %v1552_v34 = vadd.f32 %v8743_v36, %v1516_v60  ;;  %v1551_v0 = vadd.f32 %v8743_v36, %v1515_v4  ;;  %v6361_v35 = vunpack.c.h.bf16 %v6502_v33  ;;  %v1782_v16 = vpop.permute.xlu0 %1781 }
 0x193   : > { %v9916_v49 = vrot.slane %v8925_v8, 1  ;;  %v2077_v37 = vpop.f32.mrb[11].mxu1  ;;  %7081 = vmatpush3.bf16.msra.mxu1 %v7538_v45  ;;  %v1554_v45 = vadd.f32 %v8743_v36, %v1518_v63  ;;  %v1836_v60 = vmul.f32 %v8876_v48, %v1584_v19  ;;  %v1835_v2 = vmul.f32 %v8884_v32, %v1583_v18 }
 0x194   : > { %v8937_v44 = vsel %vm2157_vm0, %v9929_v61, %v2205_v53  ;;  %v2207_v3 = vrot.slane %v2077_v37, 1  ;;  %v6360_v47 = vunpack.c.l.bf16 %v6502_v33  ;;  %v1838_v4 = vmul.f32 %v1777_v43, %v1586_v6 }
 0x195   : > { %v8944_v24 = vsel %vm2157_vm0, %v2209_v51, %v9916_v49  ;;  %7047 = vmatmul.mubr.bf16.gmra.mrb[72].mxu1 %v8473_v39  ;;  %7155 = vmatmul.mubr.bf16.gmra.mrb[108].mxu0 %v8927_v5  ;;  %v1787_v39 = vpop.permute.xlu1 %1786  ;;  %v1837_v17 = vmul.f32 %v1772_v14, %v1585_v62  ;;  %v1553_v63 = vadd.f32 %v8743_v36, %v1517_v38  ;;  %v1588_v61 = vmax.f32 %v1552_v34, 0.0 }
 0x196   : > { %9930 = vst [vmem:[#allocation9_spill] sm:$0xff] %v8944_v24  ;;  %v8950_v52 = vsel %vm2157_vm0, %v2205_v53, %v2207_v3  ;;  %v8953_v37 = vsel %vm2157_vm0, %v2207_v3, %v2209_v51  ;;  %7050 = vmatprep.mubr.bf16.mxu1 %v8479_v29  ;;  %7158 = vmatprep.mubr.bf16.mxu0 %v8931_v59  ;;  %v1587_v51 = vmax.f32 %v1551_v0, 0.0  ;;  %v1590_v3 = vmax.f32 %v1554_v45, 0.0  ;;  %v1792_v34 = vpop.permute.xlu0 %1791 }
 0x197   : > { %9931 = vst [vmem:[#allocation10_spill] sm:$0xff] %v8950_v52  ;;  %9932 = vst [vmem:[#allocation11_spill] sm:$0xff] %v8953_v37  ;;  %v1520_v29 = vmul.f32 %v8727_v10, %v6361_v35  ;;  %v8961_v24 = vpack.c.bf16 %v1836_v60, %v1835_v2  ;;  %v1519_v48 = vmul.f32 %v8727_v10, %v6360_v47  ;;  %v1589_v14 = vmax.f32 %v1553_v63, 0.0 }
 0x198   : > { %v6780_v53 = vpop.f32.mrb[8].mxu0  ;;  %v8964_v43 = vpack.c.bf16 %v1838_v4, %v1837_v17  ;;  %v9933_v6 = vrot.slane %v8880_v58, 1  ;;  %v1840_v45 = vmul.f32 %v1787_v39, %v1588_v61  ;;  %v1839_v35 = vmul.f32 %v1782_v16, %v1587_v51 }
 0x199   : > { %v2010_v49 = vpop.f32.mrb[9].mxu0  ;;  %v2177_v32 = vrot.slane %v6780_v53, 1  ;;  %v1797_v38 = vpop.permute.xlu1 %1796  ;;  %v1556_v10 = vadd.f32 %v8743_v36, %v1520_v29  ;;  %v9934_v16 = vrot.slane %v8925_v8, 1 }
 0x19a   : > { %v2173_v37 = vrot.slane %v2010_v49, 1  ;;  %v6781_v52 = vpop.f32.mrb[10].mxu0  ;;  %v1842_v60 = vmul.f32 %v1797_v38, %v1590_v3  ;;  %v1802_v39 = vpop.permute.xlu0 %1801 }
 0x19b   : > { %v2179_v19 = vrot.slane %v6781_v52, 1  ;;  %v2013_v18 = vpop.f32.mrb[11].mxu0  ;;  %v1555_v52 = vadd.f32 %v8743_v36, %v1519_v48  ;;  %v1592_v4 = vmax.f32 %v1556_v10, 0.0 }
 0x19c   : > { %v8969_v62 = vsel %vm2157_vm0, %v9933_v6, %v2173_v37  ;;  %v2175_v33 = vrot.slane %v2013_v18, 1 }
 0x19d   : > { %v8972_v49 = vsel %vm2157_vm0, %v2177_v32, %v2179_v19  ;;  %7051 = vmatmul.mubr.bf16.gmra.mrb[76].mxu1 %v8519_v40  ;;  %7159 = vmatmul.mubr.bf16.gmra.mrb[112].mxu0 %v8961_v24  ;;  %v1841_v40 = vmul.f32 %v1792_v34, %v1589_v14  ;;  %v1591_v53 = vmax.f32 %v1555_v52, 0.0  ;;  %v1807_v6 = vpop.permute.xlu1 %1806 }
 0x19e   : > { %v8978_v0 = vsel %vm2157_vm0, %v2173_v37, %v2175_v33  ;;  %v8981_v58 = vsel %vm2157_vm0, %v2175_v33, %v2177_v32  ;;  %7054 = vmatprep.mubr.bf16.mxu1 %v8524_v50  ;;  %7162 = vmatprep.mubr.bf16.mxu0 %v8964_v43  ;;  %v8986_v37 = vpack.c.bf16 %v1840_v45, %v1839_v35 }
 0x19f   : > { %v8988_v50 = vpack.c.bf16 %v1842_v60, %v1841_v40  ;;  %v1844_v8 = vmul.f32 %v1807_v6, %v1592_v4  ;;  %v1843_v14 = vmul.f32 %v1802_v39, %v1591_v53 }
 0x1a0   : > { %v6800_v2 = vpop.f32.mrb[12].mxu1 }
 0x1a1   : > { %v2090_v47 = vpop.f32.mrb[13].mxu1  ;;  %v2217_v29 = vrot.slane %v6800_v2, 1  ;;  %v9008_v45 = vpack.c.bf16 %v1844_v8, %v1843_v14 }
 0x1a2   : > { %v2213_v17 = vrot.slane %v2090_v47, 1  ;;  %v6801_v63 = vpop.f32.mrb[14].mxu1 }
 0x1a3   : > { %v2219_v32 = vrot.slane %v6801_v63, 1  ;;  %v2093_v18 = vpop.f32.mrb[15].mxu1 }
 0x1a4   : > { %v8993_v36 = vsel %vm2157_vm0, %v9934_v16, %v2213_v17  ;;  %v2215_v61 = vrot.slane %v2093_v18, 1 }
 0x1a5   : > { %v8996_v51 = vsel %vm2157_vm0, %v2217_v29, %v2219_v32  ;;  %7055 = vmatmul.mubr.bf16.gmra.mrb[80].mxu1 %v8548_v11  ;;  %7163 = vmatmul.mubr.bf16.gmra.mrb[116].mxu0 %v8986_v37 }
 0x1a6   : > { %v9001_v3 = vsel %vm2157_vm0, %v2213_v17, %v2215_v61  ;;  %v9004_v48 = vsel %vm2157_vm0, %v2215_v61, %v2217_v29  ;;  %7058 = vmatprep.mubr.bf16.mxu1 %v8552_v9  ;;  %7166 = vmatprep.mubr.bf16.mxu0 %v8988_v50  ;;  %v9935_v9 = vrot.slane %v8671_v54, 1 }
 0x1a8   : > { %v6784_v33 = vpop.f32.mrb[12].mxu0 }
 0x1a9   : > { %v2026_v38 = vpop.f32.mrb[13].mxu0  ;;  %v2185_v11 = vrot.slane %v6784_v33, 1 }
 0x1aa   : > { %v2181_v34 = vrot.slane %v2026_v38, 1  ;;  %v6785_v10 = vpop.f32.mrb[14].mxu0 }
 0x1ab   : > { %v2187_v35 = vrot.slane %v6785_v10, 1  ;;  %v2029_v52 = vpop.f32.mrb[15].mxu0 }
 0x1ac   : > { %v9011_v60 = vsel %vm2157_vm0, %v2179_v19, %v2181_v34  ;;  %v2183_v40 = vrot.slane %v2029_v52, 1 }
 0x1ad   : > { %v9014_v2 = vsel %vm2157_vm0, %v2185_v11, %v2187_v35  ;;  %v9019_v47 = vsel %vm2157_vm0, %v2187_v35, %v9935_v9  ;;  %7059 = vmatmul.mubr.bf16.gmra.mrb[84].mxu1 %v8574_v46  ;;  %7167 = vmatmul.mubr.bf16.gmra.mrb[120].mxu0 %v9008_v45 }
 0x1ae   : > { %v9024_v4 = vsel %vm2157_vm0, %v2181_v34, %v2183_v40  ;;  %v9027_v17 = vsel %vm2157_vm0, %v2183_v40, %v2185_v11  ;;  %7062 = vmatprep.mubr.bf16.mxu1 %v8580_v15  ;;  %7186 = vmatprep.mubr.bf16.mxu0 %v8607_v13 }
 0x1b0   : > { %v6804_v19 = vpop.f32.mrb[16].mxu1  ;;  %v6876_v63 = vpop.f32.mrb[16].mxu0 }
 0x1b1   : > { %v2106_v54 = vpop.f32.mrb[17].mxu1  ;;  %v2590_v29 = vpop.f32.mrb[17].mxu0  ;;  %v2225_v46 = vrot.slane %v6804_v19, 1  ;;  %v2773_v61 = vrot.slane %v6876_v63, 2 }
 0x1b2   : > { %v2221_v53 = vrot.slane %v2106_v54, 1  ;;  %v9031_v18 = vpop.f32.mrb[18].mxu1  ;;  %v6877_v39 = vpop.f32.mrb[18].mxu0  ;;  %v2770_v38 = vrot.slane %v2590_v29, 2 }
 0x1b3   : > { %v2227_v6 = vrot.slane %v9031_v18, 1  ;;  %v2109_v16 = vpop.f32.mrb[19].mxu1  ;;  %v2775_v15 = vrot.slane %v6877_v39, 2  ;;  %v2593_v33 = vpop.f32.mrb[19].mxu0 }
 0x1b4   : > { %v9035_v8 = vsel %vm2157_vm0, %v2219_v32, %v2221_v53  ;;  %v2223_v14 = vrot.slane %v2109_v16, 1  ;;  %v2771_v10 = vrot.slane %v2593_v33, 2 }
 0x1b5   : > { %v9040_v34 = vsel %vm2157_vm0, %v2225_v46, %v2227_v6  ;;  %7063 = vmatmul.mubr.bf16.gmra.mrb[88].mxu1 %v8603_v42  ;;  %7187 = vmatmul.mubr.bf16.vlgmr.msra.gmra.mrb[124].mxu0 %v8633_v31  ;;  %v2776_v11 = vsel %vm2769_vm1, %v2773_v61, %v2775_v15 }
 0x1b6   : > { %v9046_v35 = vsel %vm2157_vm0, %v2221_v53, %v2223_v14  ;;  %v9049_v32 = vsel %vm2157_vm0, %v2223_v14, %v2225_v46  ;;  %7082 = vmatprep.mubr.bf16.mxu1 %v8607_v13  ;;  %7190 = vmatprep.mubr.bf16.mxu0 %v8635_v7  ;;  %v9054_v52 = vadd.f32 %v2776_v11, %v8772_v30 }
 0x1b7   : > { %v2772_v40 = vsel %vm2769_vm1, %v2770_v38, %v2771_v10  ;;  %v2774_v42 = vsel %vm2769_vm1, %v2771_v10, %v2773_v61 }
 0x1b8   : > { %v9059_v9 = vadd.f32 %v2772_v40, %v8785_v56  ;;  %v9062_v19 = vadd.f32 %v2774_v42, %v8788_v57  ;;  %v6880_v63 = vpop.f32.mrb[20].mxu0 }
 0x1b9   : > { %v2606_v54 = vpop.f32.mrb[21].mxu0  ;;  %v2781_v13 = vrot.slane %v6880_v63, 2 }
 0x1ba   : > { %v2777_v53 = vrot.slane %v2606_v54, 2  ;;  %v6881_v29 = vpop.f32.mrb[22].mxu0 }
 0x1bb   : > { %v2783_v46 = vrot.slane %v6881_v29, 2  ;;  %v2609_v39 = vpop.f32.mrb[23].mxu0 }
 0x1bc   : > { %v2778_v30 = vsel %vm2769_vm1, %v2775_v15, %v2777_v53  ;;  %v2779_v16 = vrot.slane %v2609_v39, 2 }
 0x1bd   : > { %v9066_v14 = vadd.f32 %v2778_v30, %v8895_v21  ;;  %v2784_v61 = vsel %vm2769_vm1, %v2781_v13, %v2783_v46  ;;  %7083 = vmatmul.mubr.bf16.vlgmr.msra.gmra.mrb[20].mxu1 %v8633_v31  ;;  %7191 = vmatmul.mubr.bf16.gmra.mrb[128].mxu0 %v8673_v23 }
 0x1be   : > { %v9072_v56 = vadd.f32 %v2784_v61, %v8904_v22  ;;  %v2780_v57 = vsel %vm2769_vm1, %v2777_v53, %v2779_v16  ;;  %v2782_v33 = vsel %vm2769_vm1, %v2779_v16, %v2781_v13  ;;  %7086 = vmatprep.mubr.bf16.mxu1 %v8635_v7  ;;  %7194 = vmatprep.mubr.bf16.mxu0 %v8692_v26 }
 0x1bf   : > { %v9079_v21 = vadd.f32 %v2780_v57, %v8910_v27  ;;  %v9082_v15 = vadd.f32 %v2782_v33, %v8913_v28 }
 0x1c0   : > { %v6884_v31 = vpop.f32.mrb[24].mxu0 }
 0x1c1   : > { %v2622_v38 = vpop.f32.mrb[25].mxu0  ;;  %v2789_v22 = vrot.slane %v6884_v31, 2 }
 0x1c2   : > { %v2785_v10 = vrot.slane %v2622_v38, 2  ;;  %v6885_v11 = vpop.f32.mrb[26].mxu0 }
 0x1c3   : > { %v2791_v40 = vrot.slane %v6885_v11, 2  ;;  %v2625_v42 = vpop.f32.mrb[27].mxu0 }
 0x1c4   : > { %v2786_v63 = vsel %vm2769_vm1, %v2783_v46, %v2785_v10  ;;  %v2787_v54 = vrot.slane %v2625_v42, 2 }
 0x1c5   : > { %v9086_v7 = vadd.f32 %v2786_v63, %v8969_v62  ;;  %v2792_v53 = vsel %vm2769_vm1, %v2789_v22, %v2791_v40  ;;  %7087 = vmatmul.mubr.bf16.gmra.mrb[24].mxu1 %v8673_v23  ;;  %7195 = vmatmul.mubr.bf16.gmra.mrb[132].mxu0 %v8752_v25 }
 0x1c6   : > { %v9092_v27 = vadd.f32 %v2792_v53, %v8972_v49  ;;  %v2788_v28 = vsel %vm2769_vm1, %v2785_v10, %v2787_v54  ;;  %v2790_v29 = vsel %vm2769_vm1, %v2787_v54, %v2789_v22  ;;  %7090 = vmatprep.mubr.bf16.mxu1 %v8692_v26  ;;  %7198 = vmatprep.mubr.bf16.mxu0 %v8758_v1 }
 0x1c7   : > { %v9099_v62 = vadd.f32 %v2788_v28, %v8978_v0  ;;  %v9102_v13 = vadd.f32 %v2790_v29, %v8981_v58 }
 0x1c8   : > { %v6888_v23 = vpop.f32.mrb[28].mxu0 }
 0x1c9   : > { %v2638_v46 = vpop.f32.mrb[29].mxu0  ;;  %v2797_v49 = vrot.slane %v6888_v23, 2  ;;  %v9936_v23 = vld [vmem:[#allocation8_spill] sm:$0xff] }
 0x1ca   : > { %v2793_v39 = vrot.slane %v2638_v46, 2  ;;  %v6889_v30 = vpop.f32.mrb[30].mxu0  ;;  %v9937_v46 = vld [vmem:[#allocation2_spill] sm:$0xff] }
 0x1cb   : > { %v2799_v16 = vrot.slane %v6889_v30, 2  ;;  %v2641_v61 = vpop.f32.mrb[31].mxu0 }
 0x1cc   : > { %v2794_v57 = vsel %vm2769_vm1, %v2791_v40, %v2793_v39  ;;  %v2795_v33 = vrot.slane %v2641_v61, 2 }
 0x1cd   : > { %v9106_v26 = vadd.f32 %v2794_v57, %v9011_v60  ;;  %v2800_v31 = vsel %vm2769_vm1, %v2797_v49, %v2799_v16  ;;  %7091 = vmatmul.mubr.bf16.gmra.mrb[28].mxu1 %v8752_v25  ;;  %7199 = vmatmul.mubr.bf16.gmra.mrb[136].mxu0 %v8812_v41 }
 0x1ce   : > { %v9112_v0 = vadd.f32 %v2800_v31, %v9014_v2  ;;  %v2796_v58 = vsel %vm2769_vm1, %v2793_v39, %v2795_v33  ;;  %v2798_v38 = vsel %vm2769_vm1, %v2795_v33, %v2797_v49  ;;  %7094 = vmatprep.mubr.bf16.mxu1 %v8758_v1  ;;  %7202 = vmatprep.mubr.bf16.mxu0 %v8822_v20  ;;  %v9938_v39 = vld [vmem:[#allocation3_spill] sm:$0xff] }
 0x1cf   : > { %v9119_v60 = vadd.f32 %v2796_v58, %v9024_v4  ;;  %v9122_v10 = vadd.f32 %v2798_v38, %v9027_v17  ;;  %v9939_v38 = vld [vmem:[#allocation4_spill] sm:$0xff] }
 0x1d0   : > { %v6892_v25 = vpop.f32.mrb[32].mxu0 }
 0x1d1   : > { %v2654_v11 = vpop.f32.mrb[33].mxu0  ;;  %v2805_v2 = vrot.slane %v6892_v25, 2 }
 0x1d2   : > { %v2801_v22 = vrot.slane %v2654_v11, 2  ;;  %v6893_v40 = vpop.f32.mrb[34].mxu0  ;;  %v9940_v11 = vld [vmem:[#allocation5_spill] sm:$0xff] }
 0x1d3   : > { %v2807_v42 = vrot.slane %v6893_v40, 2  ;;  %v2657_v63 = vpop.f32.mrb[35].mxu0 }
 0x1d4   : > { %v2802_v54 = vsel %vm2769_vm1, %v2799_v16, %v2801_v22  ;;  %v2803_v53 = vrot.slane %v2657_v63, 2 }
 0x1d5   : > { %v9126_v1 = vadd.f32 %v2802_v54, %v9019_v47  ;;  %v2808_v28 = vsel %vm2769_vm1, %v2805_v2, %v2807_v42  ;;  %7095 = vmatmul.mubr.bf16.gmra.mrb[32].mxu1 %v8812_v41  ;;  %7203 = vmatmul.mubr.bf16.gmra.mrb[140].mxu0 %v8882_v55  ;;  %v9942_v54 = vld [vmem:[#allocation7_spill] sm:$0xff] }
 0x1d6   : > { %v9132_v4 = vadd.f32 %v2808_v28, %v8705_v12  ;;  %v2804_v17 = vsel %vm2769_vm1, %v2801_v22, %v2803_v53  ;;  %v2806_v29 = vsel %vm2769_vm1, %v2803_v53, %v2805_v2  ;;  %7098 = vmatprep.mubr.bf16.mxu1 %v8822_v20  ;;  %7206 = vmatprep.mubr.bf16.mxu0 %v9936_v23 }
 0x1d7   : > { %v9139_v47 = vadd.f32 %v2804_v17, %v9937_v46  ;;  %v9142_v30 = vadd.f32 %v2806_v29, %v9938_v39 }
 0x1d8   : > { %v6896_v41 = vpop.f32.mrb[36].mxu0 }
 0x1d9   : > { %v2670_v49 = vpop.f32.mrb[37].mxu0  ;;  %v2813_v12 = vrot.slane %v6896_v41, 2 }
 0x1da   : > { %v2809_v16 = vrot.slane %v2670_v49, 2  ;;  %v6897_v61 = vpop.f32.mrb[38].mxu0 }
 0x1db   : > { %v2815_v57 = vrot.slane %v6897_v61, 2  ;;  %v2673_v33 = vpop.f32.mrb[39].mxu0 }
 0x1dc   : > { %v2810_v31 = vsel %vm2769_vm1, %v2807_v42, %v2809_v16  ;;  %v2811_v58 = vrot.slane %v2673_v33, 2  ;;  %v9941_v42 = vld [vmem:[#allocation6_spill] sm:$0xff] }
 0x1dd   : > { %v9146_v20 = vadd.f32 %v2810_v31, %v9939_v38  ;;  %v2816_v25 = vsel %vm2769_vm1, %v2813_v12, %v2815_v57  ;;  %7099 = vmatmul.mubr.bf16.gmra.mrb[36].mxu1 %v8882_v55  ;;  %7207 = vmatmul.mubr.bf16.gmra.mrb[144].mxu0 %v8927_v5  ;;  %v9945_v38 = vld [vmem:[#allocation11_spill] sm:$0xff] }
 0x1de   : > { %v9152_v22 = vadd.f32 %v2816_v25, %v9940_v11  ;;  %v2812_v40 = vsel %vm2769_vm1, %v2809_v16, %v2811_v58  ;;  %v2814_v2 = vsel %vm2769_vm1, %v2811_v58, %v2813_v12  ;;  %7102 = vmatprep.mubr.bf16.mxu1 %v9936_v23  ;;  %7210 = vmatprep.mubr.bf16.mxu0 %v8931_v59  ;;  %v9943_v12 = vld [vmem:[#allocation9_spill] sm:$0xff] }
 0x1df   : > { %v9159_v63 = vadd.f32 %v2812_v40, %v9941_v42  ;;  %v9162_v53 = vadd.f32 %v2814_v2, %v9942_v54 }
 0x1e0   : > { %v6900_v55 = vpop.f32.mrb[40].mxu0 }
 0x1e1   : > { %v2686_v28 = vpop.f32.mrb[41].mxu0  ;;  %v2821_v46 = vrot.slane %v6900_v55, 2 }
 0x1e2   : > { %v2817_v17 = vrot.slane %v2686_v28, 2  ;;  %v6901_v29 = vpop.f32.mrb[42].mxu0 }
 0x1e3   : > { %v2823_v39 = vrot.slane %v6901_v29, 2  ;;  %v2689_v41 = vpop.f32.mrb[43].mxu0 }
 0x1e4   : > { %v2818_v49 = vsel %vm2769_vm1, %v2815_v57, %v2817_v17  ;;  %v2819_v16 = vrot.slane %v2689_v41, 2  ;;  %v9944_v57 = vld [vmem:[#allocation10_spill] sm:$0xff] }
 0x1e5   : > { %v9166_v23 = vadd.f32 %v2818_v49, %v8937_v44  ;;  %v2824_v61 = vsel %vm2769_vm1, %v2821_v46, %v2823_v39  ;;  %7103 = vmatmul.mubr.bf16.gmra.mrb[40].mxu1 %v8927_v5  ;;  %7211 = vmatmul.mubr.bf16.gmra.mrb[148].mxu0 %v8961_v24 }
 0x1e6   : > { %v9172_v33 = vadd.f32 %v2824_v61, %v9943_v12  ;;  %v2820_v31 = vsel %vm2769_vm1, %v2817_v17, %v2819_v16  ;;  %v2822_v58 = vsel %vm2769_vm1, %v2819_v16, %v2821_v46  ;;  %7106 = vmatprep.mubr.bf16.mxu1 %v8931_v59  ;;  %7214 = vmatprep.mubr.bf16.mxu0 %v8964_v43 }
 0x1e7   : > { %v9179_v44 = vadd.f32 %v2820_v31, %v9944_v57  ;;  %v9182_v25 = vadd.f32 %v2822_v58, %v9945_v38 }
 0x1e8   : > { %v6904_v5 = vpop.f32.mrb[44].mxu0 }
 0x1e9   : > { %v2702_v11 = vpop.f32.mrb[45].mxu0  ;;  %v2829_v42 = vrot.slane %v6904_v5, 2 }
 0x1ea   : > { %v2825_v40 = vrot.slane %v2702_v11, 2  ;;  %v6905_v2 = vpop.f32.mrb[46].mxu0 }
 0x1eb   : > { %v2831_v54 = vrot.slane %v6905_v2, 2  ;;  %v2705_v55 = vpop.f32.mrb[47].mxu0 }
 0x1ec   : > { %v2826_v28 = vsel %vm2769_vm1, %v2823_v39, %v2825_v40  ;;  %v2827_v17 = vrot.slane %v2705_v55, 2 }
 0x1ed   : > { %v9186_v59 = vadd.f32 %v2826_v28, %v8993_v36  ;;  %v2832_v29 = vsel %vm2769_vm1, %v2829_v42, %v2831_v54  ;;  %7107 = vmatmul.mubr.bf16.gmra.mrb[44].mxu1 %v8961_v24  ;;  %7215 = vmatmul.mubr.bf16.gmra.mrb[152].mxu0 %v8986_v37 }
 0x1ee   : > { %v9192_v46 = vadd.f32 %v2832_v29, %v8996_v51  ;;  %v2828_v41 = vsel %vm2769_vm1, %v2825_v40, %v2827_v17  ;;  %v2830_v49 = vsel %vm2769_vm1, %v2827_v17, %v2829_v42  ;;  %7110 = vmatprep.mubr.bf16.mxu1 %v8964_v43  ;;  %7218 = vmatprep.mubr.bf16.mxu0 %v8988_v50  ;;  %v2265_v43 = vsel %vm2157_vm0, %v2227_v6, 0.0 }
 0x1ef   : > { %v9199_v36 = vadd.f32 %v2828_v41, %v9001_v3  ;;  %v9202_v39 = vadd.f32 %v2830_v49, %v9004_v48 }
 0x1f0   : > { %v6908_v24 = vpop.f32.mrb[48].mxu0 }
 0x1f1   : > { %v2718_v16 = vpop.f32.mrb[49].mxu0  ;;  %v2837_v51 = vrot.slane %v6908_v24, 2 }
 0x1f2   : > { %v2833_v61 = vrot.slane %v2718_v16, 2  ;;  %v6909_v12 = vpop.f32.mrb[50].mxu0 }
 0x1f3   : > { %v2839_v31 = vrot.slane %v6909_v12, 2  ;;  %v2721_v58 = vpop.f32.mrb[51].mxu0 }
 0x1f4   : > { %v2834_v57 = vsel %vm2769_vm1, %v2831_v54, %v2833_v61  ;;  %v2835_v38 = vrot.slane %v2721_v58, 2 }
 0x1f5   : > { %v9209_v3 = vadd.f32 %v2834_v57, %v9035_v8  ;;  %v2840_v48 = vsel %vm2769_vm1, %v2837_v51, %v2839_v31  ;;  %v2877_v5 = vsel %vm2769_vm1, %v2839_v31, 0.0  ;;  %7111 = vmatmul.mubr.bf16.gmra.mrb[48].mxu1 %v8986_v37  ;;  %7219 = vmatmul.mubr.bf16.gmra.mrb[156].mxu0 %v9008_v45 }
 0x1f6   : > { %v9216_v11 = vadd.f32 %v2840_v48, %v9040_v34  ;;  %v9218_v40 = vadd.f32 %v2877_v5, %v2265_v43  ;;  %v2836_v18 = vsel %vm2769_vm1, %v2833_v61, %v2835_v38  ;;  %v2838_v6 = vsel %vm2769_vm1, %v2835_v38, %v2837_v51  ;;  %7114 = vmatprep.mubr.bf16.mxu1 %v8988_v50 }
 0x1f7   : > { %v9224_v8 = vadd.f32 %v2836_v18, %v9046_v35  ;;  %v9227_v2 = vadd.f32 %v2838_v6, %v9049_v32 }
 0x1f8   : > { %v6980_v37 = vpop.f32.mrb[52].mxu0 }
 0x1f9   : > { %v3291_v42 = vpop.f32.mrb[53].mxu0  ;;  %v3473_v55 = vrot.slane %v6980_v37, 1 }
 0x1fa   : > { %v6981_v54 = vpop.f32.mrb[54].mxu0  ;;  %v3470_v17 = vrot.slane %v3291_v42, 1 }
 0x1fb   : > { %v3475_v34 = vrot.slane %v6981_v54, 1  ;;  %v3294_v28 = vpop.f32.mrb[55].mxu0 }
 0x1fc   : > { %v3471_v29 = vrot.slane %v3294_v28, 1 }
 0x1fd   : > { %v3476_v41 = vsel %vm2157_vm0, %v3473_v55, %v3475_v34  ;;  %7115 = vmatmul.mubr.bf16.gmra.mrb[52].mxu1 %v9008_v45 }
 0x1fe   : > { %v3472_v50 = vsel %vm2157_vm0, %v3470_v17, %v3471_v29  ;;  %v3474_v35 = vsel %vm2157_vm0, %v3471_v29, %v3473_v55  ;;  %v9234_v49 = vadd.f32 %v9054_v52, %v3476_v41 }
 0x1ff   : > { %v9237_v32 = vadd.f32 %v9059_v9, %v3472_v50  ;;  %v9240_v24 = vadd.f32 %v9062_v19, %v3474_v35 }
 0x200   : > { %v6984_v16 = vpop.f32.mrb[56].mxu0 }
 0x201   : > { %v3307_v61 = vpop.f32.mrb[57].mxu0  ;;  %v3481_v31 = vrot.slane %v6984_v16, 1 }
 0x202   : > { %v3477_v12 = vrot.slane %v3307_v61, 1  ;;  %v6985_v51 = vpop.f32.mrb[58].mxu0 }
 0x203   : > { %v3483_v58 = vrot.slane %v6985_v51, 1  ;;  %v3310_v45 = vpop.f32.mrb[59].mxu0 }
 0x204   : > { %v3478_v57 = vsel %vm2157_vm0, %v3475_v34, %v3477_v12  ;;  %v3479_v38 = vrot.slane %v3310_v45, 1 }
 0x205   : > { %v3484_v43 = vsel %vm2157_vm0, %v3481_v31, %v3483_v58  ;;  %v9245_v52 = vadd.f32 %v9066_v14, %v3478_v57 }
 0x206   : > { %v3480_v9 = vsel %vm2157_vm0, %v3477_v12, %v3479_v38  ;;  %v3482_v19 = vsel %vm2157_vm0, %v3479_v38, %v3481_v31  ;;  %v9250_v48 = vadd.f32 %v9072_v56, %v3484_v43 }
 0x207   : > { %v9253_v5 = vadd.f32 %v9079_v21, %v3480_v9  ;;  %v9256_v18 = vadd.f32 %v9082_v15, %v3482_v19 }
 0x208   : > { %v6988_v6 = vpop.f32.mrb[60].mxu0 }
 0x209   : > { %v3323_v37 = vpop.f32.mrb[61].mxu0  ;;  %v3489_v55 = vrot.slane %v6988_v6, 1 }
 0x20a   : > { %v3485_v42 = vrot.slane %v3323_v37, 1  ;;  %v6989_v54 = vpop.f32.mrb[62].mxu0 }
 0x20b   : > { %v3491_v14 = vrot.slane %v6989_v54, 1  ;;  %v3326_v34 = vpop.f32.mrb[63].mxu0 }
 0x20c   : > { %v3486_v28 = vsel %vm2157_vm0, %v3483_v58, %v3485_v42  ;;  %v3487_v17 = vrot.slane %v3326_v34, 1 }
 0x20d   : > { %v3492_v29 = vsel %vm2157_vm0, %v3489_v55, %v3491_v14  ;;  %v9261_v56 = vadd.f32 %v9086_v7, %v3486_v28 }
 0x20e   : > { %v3488_v21 = vsel %vm2157_vm0, %v3485_v42, %v3487_v17  ;;  %v3490_v15 = vsel %vm2157_vm0, %v3487_v17, %v3489_v55  ;;  %v9266_v41 = vadd.f32 %v9092_v27, %v3492_v29 }
 0x20f   : > { %v9269_v50 = vadd.f32 %v9099_v62, %v3488_v21  ;;  %v9272_v35 = vadd.f32 %v9102_v13, %v3490_v15 }
 0x210   : > { %v6992_v16 = vpop.f32.mrb[64].mxu0 }
 0x211   : > { %v3339_v61 = vpop.f32.mrb[65].mxu0  ;;  %v3497_v31 = vrot.slane %v6992_v16, 1 }
 0x212   : > { %v3493_v12 = vrot.slane %v3339_v61, 1  ;;  %v6993_v51 = vpop.f32.mrb[66].mxu0 }
 0x213   : > { %v3499_v7 = vrot.slane %v6993_v51, 1  ;;  %v3342_v58 = vpop.f32.mrb[67].mxu0 }
 0x214   : > { %v3494_v45 = vsel %vm2157_vm0, %v3491_v14, %v3493_v12  ;;  %v3495_v57 = vrot.slane %v3342_v58, 1 }
 0x215   : > { %v3500_v38 = vsel %vm2157_vm0, %v3497_v31, %v3499_v7  ;;  %v9277_v27 = vadd.f32 %v9106_v26, %v3494_v45 }
 0x216   : > { %v3496_v62 = vsel %vm2157_vm0, %v3493_v12, %v3495_v57  ;;  %v3498_v13 = vsel %vm2157_vm0, %v3495_v57, %v3497_v31  ;;  %v9282_v43 = vadd.f32 %v9112_v0, %v3500_v38 }
 0x217   : > { %v9285_v9 = vadd.f32 %v9119_v60, %v3496_v62  ;;  %v9288_v19 = vadd.f32 %v9122_v10, %v3498_v13 }
 0x218   : > { %v6996_v6 = vpop.f32.mrb[68].mxu0 }
 0x219   : > { %v3355_v37 = vpop.f32.mrb[69].mxu0  ;;  %v3505_v55 = vrot.slane %v6996_v6, 1 }
 0x21a   : > { %v3501_v42 = vrot.slane %v3355_v37, 1  ;;  %v6997_v54 = vpop.f32.mrb[70].mxu0 }
 0x21b   : > { %v3507_v26 = vrot.slane %v6997_v54, 1  ;;  %v3358_v14 = vpop.f32.mrb[71].mxu0 }
 0x21c   : > { %v3502_v34 = vsel %vm2157_vm0, %v3499_v7, %v3501_v42  ;;  %v3503_v28 = vrot.slane %v3358_v14, 1 }
 0x21d   : > { %v3508_v17 = vsel %vm2157_vm0, %v3505_v55, %v3507_v26  ;;  %v9293_v0 = vadd.f32 %v9126_v1, %v3502_v34 }
 0x21e   : > { %v3504_v60 = vsel %vm2157_vm0, %v3501_v42, %v3503_v28  ;;  %v3506_v10 = vsel %vm2157_vm0, %v3503_v28, %v3505_v55  ;;  %v9298_v29 = vadd.f32 %v9132_v4, %v3508_v17 }
 0x21f   : > { %v9301_v21 = vadd.f32 %v9139_v47, %v3504_v60  ;;  %v9304_v15 = vadd.f32 %v9142_v30, %v3506_v10 }
 0x220   : > { %v7000_v16 = vpop.f32.mrb[72].mxu0 }
 0x221   : > { %v3371_v61 = vpop.f32.mrb[73].mxu0  ;;  %v3513_v31 = vrot.slane %v7000_v16, 1 }
 0x222   : > { %v3509_v12 = vrot.slane %v3371_v61, 1  ;;  %v7001_v51 = vpop.f32.mrb[74].mxu0 }
 0x223   : > { %v3515_v1 = vrot.slane %v7001_v51, 1  ;;  %v3374_v7 = vpop.f32.mrb[75].mxu0 }
 0x224   : > { %v3510_v58 = vsel %vm2157_vm0, %v3507_v26, %v3509_v12  ;;  %v3511_v45 = vrot.slane %v3374_v7, 1 }
 0x225   : > { %v3516_v57 = vsel %vm2157_vm0, %v3513_v31, %v3515_v1  ;;  %v9309_v4 = vadd.f32 %v9146_v20, %v3510_v58 }
 0x226   : > { %v3512_v47 = vsel %vm2157_vm0, %v3509_v12, %v3511_v45  ;;  %v3514_v30 = vsel %vm2157_vm0, %v3511_v45, %v3513_v31  ;;  %v9314_v38 = vadd.f32 %v9152_v22, %v3516_v57 }
 0x227   : > { %v9317_v62 = vadd.f32 %v9159_v63, %v3512_v47  ;;  %v9320_v13 = vadd.f32 %v9162_v53, %v3514_v30 }
 0x228   : > { %v7004_v6 = vpop.f32.mrb[76].mxu0 }
 0x229   : > { %v3387_v37 = vpop.f32.mrb[77].mxu0  ;;  %v3521_v55 = vrot.slane %v7004_v6, 1 }
 0x22a   : > { %v3517_v42 = vrot.slane %v3387_v37, 1  ;;  %v7005_v54 = vpop.f32.mrb[78].mxu0 }
 0x22b   : > { %v3523_v20 = vrot.slane %v7005_v54, 1  ;;  %v3390_v26 = vpop.f32.mrb[79].mxu0 }
 0x22c   : > { %v3518_v14 = vsel %vm2157_vm0, %v3515_v1, %v3517_v42  ;;  %v3519_v34 = vrot.slane %v3390_v26, 1 }
 0x22d   : > { %v3524_v28 = vsel %vm2157_vm0, %v3521_v55, %v3523_v20  ;;  %v9325_v22 = vadd.f32 %v9166_v23, %v3518_v14 }
 0x22e   : > { %v3520_v63 = vsel %vm2157_vm0, %v3517_v42, %v3519_v34  ;;  %v3522_v53 = vsel %vm2157_vm0, %v3519_v34, %v3521_v55  ;;  %v9330_v17 = vadd.f32 %v9172_v33, %v3524_v28 }
 0x22f   : > { %v9333_v60 = vadd.f32 %v9179_v44, %v3520_v63  ;;  %v9336_v10 = vadd.f32 %v9182_v25, %v3522_v53 }
 0x230   : > { %v7008_v16 = vpop.f32.mrb[80].mxu0 }
 0x231   : > { %v3403_v61 = vpop.f32.mrb[81].mxu0  ;;  %v3529_v31 = vrot.slane %v7008_v16, 1 }
 0x232   : > { %v3525_v12 = vrot.slane %v3403_v61, 1  ;;  %v7009_v51 = vpop.f32.mrb[82].mxu0 }
 0x233   : > { %v3531_v23 = vrot.slane %v7009_v51, 1  ;;  %v3406_v1 = vpop.f32.mrb[83].mxu0 }
 0x234   : > { %v3526_v7 = vsel %vm2157_vm0, %v3523_v20, %v3525_v12  ;;  %v3527_v58 = vrot.slane %v3406_v1, 1 }
 0x235   : > { %v3532_v45 = vsel %vm2157_vm0, %v3529_v31, %v3531_v23  ;;  %v9341_v33 = vadd.f32 %v9186_v59, %v3526_v7 }
 0x236   : > { %v3528_v44 = vsel %vm2157_vm0, %v3525_v12, %v3527_v58  ;;  %v3530_v25 = vsel %vm2157_vm0, %v3527_v58, %v3529_v31  ;;  %v9346_v57 = vadd.f32 %v9192_v46, %v3532_v45 }
 0x237   : > { %v9349_v47 = vadd.f32 %v9199_v36, %v3528_v44  ;;  %v9352_v30 = vadd.f32 %v9202_v39, %v3530_v25 }
 0x238   : > { %v7012_v6 = vpop.f32.mrb[84].mxu0 }
 0x239   : > { %v3419_v37 = vpop.f32.mrb[85].mxu0  ;;  %v3537_v55 = vrot.slane %v7012_v6, 1 }
 0x23a   : > { %v3533_v42 = vrot.slane %v3419_v37, 1  ;;  %v7013_v54 = vpop.f32.mrb[86].mxu0 }
 0x23b   : > { %v3539_v59 = vrot.slane %v7013_v54, 1  ;;  %v3422_v20 = vpop.f32.mrb[87].mxu0 }
 0x23c   : > { %v3534_v26 = vsel %vm2157_vm0, %v3531_v23, %v3533_v42  ;;  %v3535_v14 = vrot.slane %v3422_v20, 1 }
 0x23d   : > { %v3540_v34 = vsel %vm2157_vm0, %v3537_v55, %v3539_v59  ;;  %v3577_v46 = vsel %vm2157_vm0, %v3539_v59, 0.0  ;;  %v9358_v36 = vadd.f32 %v9209_v3, %v3534_v26 }
 0x23e   : > { %v9361_v39 = vadd.f32 %v9218_v40, %v3577_v46  ;;  %v3536_v28 = vsel %vm2157_vm0, %v3533_v42, %v3535_v14  ;;  %v3538_v63 = vsel %vm2157_vm0, %v3535_v14, %v3537_v55  ;;  %v9366_v53 = vadd.f32 %v9216_v11, %v3540_v34 }
 0x23f   : > { %v9369_v16 = vadd.f32 %v9224_v8, %v3536_v28  ;;  %v9372_v61 = vadd.f32 %v9227_v2, %v3538_v63 }
 0x240   : > { %v7136_v12 = vpop.f32.mrb[88].mxu0 }
 0x241   : > { %v4413_v51 = vpop.f32.mrb[89].mxu0  ;;  %v4595_v31 = vrot.slane %v7136_v12, 1 }
 0x242   : > { %v7137_v3 = vpop.f32.mrb[90].mxu0  ;;  %v4592_v1 = vrot.slane %v4413_v51, 1 }
 0x243   : > { %v4597_v23 = vrot.slane %v7137_v3, 1  ;;  %v4416_v40 = vpop.f32.mrb[91].mxu0 }
 0x244   : > { %v4593_v7 = vrot.slane %v4416_v40, 1 }
 0x245   : > { %v9375_v58 = vsel %vm2157_vm0, %v4595_v31, %v4597_v23 }
 0x246   : > { %v9378_v11 = vsel %vm2157_vm0, %v4592_v1, %v4593_v7  ;;  %v9381_v8 = vsel %vm2157_vm0, %v4593_v7, %v4595_v31 }
 0x248   : > { %v7032_v45 = vpop.f32.mrb[56].mxu1  ;;  %v7140_v2 = vpop.f32.mrb[92].mxu0 }
 0x249   : > { %v3713_v44 = vpop.f32.mrb[57].mxu1  ;;  %v4429_v25 = vpop.f32.mrb[93].mxu0  ;;  %v3895_v54 = vrot.slane %v7032_v45, 2  ;;  %v4603_v55 = vrot.slane %v7140_v2, 1 }
 0x24a   : > { %v4599_v6 = vrot.slane %v4429_v25, 1  ;;  %v7033_v37 = vpop.f32.mrb[58].mxu1  ;;  %v7141_v42 = vpop.f32.mrb[94].mxu0  ;;  %v3892_v34 = vrot.slane %v3713_v44, 2 }
 0x24b   : > { %v3897_v59 = vrot.slane %v7033_v37, 2  ;;  %v4605_v20 = vrot.slane %v7141_v42, 1  ;;  %v3716_v26 = vpop.f32.mrb[59].mxu1  ;;  %v4432_v14 = vpop.f32.mrb[95].mxu0 }
 0x24c   : > { %v3893_v46 = vrot.slane %v3716_v26, 2  ;;  %v4601_v28 = vrot.slane %v4432_v14, 1  ;;  %v9384_v63 = vsel %vm2157_vm0, %v4597_v23, %v4599_v6 }
 0x24d   : > { %v3898_v12 = vsel %vm2769_vm1, %v3895_v54, %v3897_v59  ;;  %v9388_v51 = vsel %vm2157_vm0, %v4603_v55, %v4605_v20 }
 0x24e   : > { %v9391_v3 = vadd.f32 %v9234_v49, %v3898_v12  ;;  %v3894_v31 = vsel %vm2769_vm1, %v3892_v34, %v3893_v46  ;;  %v3896_v40 = vsel %vm2769_vm1, %v3893_v46, %v3895_v54  ;;  %v9396_v1 = vsel %vm2157_vm0, %v4599_v6, %v4601_v28 }
 0x24f   : > { %v9399_v7 = vadd.f32 %v9237_v32, %v3894_v31  ;;  %v9402_v23 = vadd.f32 %v9240_v24, %v3896_v40  ;;  %v9405_v45 = vsel %vm2157_vm0, %v4601_v28, %v4603_v55 }
 0x250   : > { %9946 = vst [vmem:[#allocation8_spill] sm:$0xff] %v9405_v45  ;;  %v7036_v2 = vpop.f32.mrb[60].mxu1  ;;  %v7144_v44 = vpop.f32.mrb[96].mxu0 }
 0x251   : > { %v3729_v49 = vpop.f32.mrb[61].mxu1  ;;  %v4445_v25 = vpop.f32.mrb[97].mxu0  ;;  %v3903_v14 = vrot.slane %v7036_v2, 2  ;;  %v4611_v6 = vrot.slane %v7144_v44, 1 }
 0x252   : > { %v3899_v37 = vrot.slane %v3729_v49, 2  ;;  %v4607_v42 = vrot.slane %v4445_v25, 1  ;;  %v7037_v26 = vpop.f32.mrb[62].mxu1  ;;  %v7145_v54 = vpop.f32.mrb[98].mxu0 }
 0x253   : > { %v3905_v34 = vrot.slane %v7037_v26, 2  ;;  %v4613_v46 = vrot.slane %v7145_v54, 1  ;;  %v3732_v32 = vpop.f32.mrb[63].mxu1  ;;  %v4448_v12 = vpop.f32.mrb[99].mxu0 }
 0x254   : > { %v3901_v31 = vrot.slane %v3732_v32, 2  ;;  %v4609_v24 = vrot.slane %v4448_v12, 1  ;;  %v3900_v40 = vsel %vm2769_vm1, %v3897_v59, %v3899_v37  ;;  %v9409_v55 = vsel %vm2157_vm0, %v4605_v20, %v4607_v42 }
 0x255   : > { %9947 = vst [vmem:[#allocation2_spill] sm:$0xff] %v9409_v55  ;;  %v9412_v28 = vadd.f32 %v9245_v52, %v3900_v40  ;;  %v3906_v49 = vsel %vm2769_vm1, %v3903_v14, %v3905_v34  ;;  %v9416_v25 = vsel %vm2157_vm0, %v4611_v6, %v4613_v46 }
 0x256   : > { %9948 = vst [vmem:[#allocation3_spill] sm:$0xff] %v9416_v25  ;;  %v9419_v2 = vadd.f32 %v9250_v48, %v3906_v49  ;;  %v3902_v44 = vsel %vm2769_vm1, %v3899_v37, %v3901_v31  ;;  %v3904_v26 = vsel %vm2769_vm1, %v3901_v31, %v3903_v14  ;;  %v9424_v59 = vsel %vm2157_vm0, %v4607_v42, %v4609_v24 }
 0x257   : > { %9949 = vst [vmem:[#allocation4_spill] sm:$0xff] %v9424_v59  ;;  %v9427_v20 = vadd.f32 %v9253_v5, %v3902_v44  ;;  %v9430_v52 = vadd.f32 %v9256_v18, %v3904_v26  ;;  %v9433_v54 = vsel %vm2157_vm0, %v4609_v24, %v4611_v6 }
 0x258   : > { %9950 = vst [vmem:[#allocation5_spill] sm:$0xff] %v9433_v54  ;;  %v7040_v32 = vpop.f32.mrb[64].mxu1  ;;  %v7148_v12 = vpop.f32.mrb[100].mxu0 }
 0x259   : > { %v3745_v48 = vpop.f32.mrb[65].mxu1  ;;  %v4461_v40 = vpop.f32.mrb[101].mxu0  ;;  %v3911_v31 = vrot.slane %v7040_v32, 2  ;;  %v4619_v42 = vrot.slane %v7148_v12, 1 }
 0x25a   : > { %v3907_v49 = vrot.slane %v3745_v48, 2  ;;  %v4615_v37 = vrot.slane %v4461_v40, 1  ;;  %v7041_v25 = vpop.f32.mrb[66].mxu1  ;;  %v7149_v14 = vpop.f32.mrb[102].mxu0 }
 0x25b   : > { %v3913_v59 = vrot.slane %v7041_v25, 2  ;;  %v4621_v45 = vrot.slane %v7149_v14, 1  ;;  %v3748_v5 = vpop.f32.mrb[67].mxu1  ;;  %v4464_v44 = vpop.f32.mrb[103].mxu0 }
 0x25c   : > { %v3909_v55 = vrot.slane %v3748_v5, 2  ;;  %v4617_v18 = vrot.slane %v4464_v44, 1  ;;  %v3908_v26 = vsel %vm2769_vm1, %v3905_v34, %v3907_v49  ;;  %v9437_v6 = vsel %vm2157_vm0, %v4613_v46, %v4615_v37 }
 0x25d   : > { %9951 = vst [vmem:[#allocation6_spill] sm:$0xff] %v9437_v6  ;;  %v9440_v24 = vadd.f32 %v9261_v56, %v3908_v26  ;;  %v3914_v48 = vsel %vm2769_vm1, %v3911_v31, %v3913_v59  ;;  %v9444_v40 = vsel %vm2157_vm0, %v4619_v42, %v4621_v45 }
 0x25e   : > { %9952 = vst [vmem:[#allocation7_spill] sm:$0xff] %v9444_v40  ;;  %v9447_v25 = vadd.f32 %v9266_v41, %v3914_v48  ;;  %v3910_v32 = vsel %vm2769_vm1, %v3907_v49, %v3909_v55  ;;  %v3912_v12 = vsel %vm2769_vm1, %v3909_v55, %v3911_v31  ;;  %v9452_v34 = vsel %vm2157_vm0, %v4615_v37, %v4617_v18 }
 0x25f   : > { %9953 = vst [vmem:[#allocation9_spill] sm:$0xff] %v9452_v34  ;;  %v9455_v46 = vadd.f32 %v9269_v50, %v3910_v32  ;;  %v9458_v56 = vadd.f32 %v9272_v35, %v3912_v12  ;;  %v9461_v14 = vsel %vm2157_vm0, %v4617_v18, %v4619_v42 }
 0x260   : > { %9954 = vst [vmem:[#allocation10_spill] sm:$0xff] %v9461_v14  ;;  %v7044_v5 = vpop.f32.mrb[68].mxu1  ;;  %v7152_v44 = vpop.f32.mrb[104].mxu0 }
 0x261   : > { %v3761_v41 = vpop.f32.mrb[69].mxu1  ;;  %v4477_v26 = vpop.f32.mrb[105].mxu0  ;;  %v3919_v31 = vrot.slane %v7044_v5, 2  ;;  %v4627_v37 = vrot.slane %v7152_v44, 1 }
 0x262   : > { %v3915_v48 = vrot.slane %v3761_v41, 2  ;;  %v4623_v49 = vrot.slane %v4477_v26, 1  ;;  %v7045_v40 = vpop.f32.mrb[70].mxu1  ;;  %v7153_v55 = vpop.f32.mrb[106].mxu0 }
 0x263   : > { %v3921_v34 = vrot.slane %v7045_v40, 2  ;;  %v4629_v54 = vrot.slane %v7153_v55, 1  ;;  %v3764_v50 = vpop.f32.mrb[71].mxu1  ;;  %v4480_v32 = vpop.f32.mrb[107].mxu0 }
 0x264   : > { %v3917_v6 = vrot.slane %v3764_v50, 2  ;;  %v4625_v35 = vrot.slane %v4480_v32, 1  ;;  %v3916_v12 = vsel %vm2769_vm1, %v3913_v59, %v3915_v48  ;;  %v9465_v42 = vsel %vm2157_vm0, %v4621_v45, %v4623_v49  ;;  %v9482_v45 = vpop.permute.xlu1 %5381  ;;  %v9484_v55 = vpop.permute.xlu0 %5376 }
 0x265   : > { %9955 = vst [vmem:[#allocation11_spill] sm:$0xff] %v9465_v42  ;;  %v9468_v18 = vadd.f32 %v9277_v27, %v3916_v12  ;;  %v3922_v41 = vsel %vm2769_vm1, %v3919_v31, %v3921_v34  ;;  %v9472_v26 = vsel %vm2157_vm0, %v4627_v37, %v4629_v54 }
 0x266   : > { %9956 = vst [vmem:[#allocation12_spill] sm:$0xff] %v9472_v26  ;;  %v9475_v40 = vadd.f32 %v9282_v43, %v3922_v41  ;;  %v3918_v5 = vsel %vm2769_vm1, %v3915_v48, %v3917_v6  ;;  %v3920_v44 = vsel %vm2769_vm1, %v3917_v6, %v3919_v31  ;;  %v9480_v59 = vsel %vm2157_vm0, %v4623_v49, %v4625_v35 }
 0x267   : > { %9958 = vst [vmem:[#allocation14_spill] sm:$0xff] %v9480_v59  ;;  %v9487_v27 = vadd.f32 %v9285_v9, %v3918_v5  ;;  %v9490_v50 = vadd.f32 %v9288_v19, %v3920_v44  ;;  %v9493_v43 = vsel %vm2157_vm0, %v4625_v35, %v4627_v37 }
 0x268   : > { %9957 = vst [vmem:[#allocation13_spill] sm:$0xff] %v9475_v40  ;;  %9960 = vst [vmem:[#allocation16_spill] sm:$0xff] %v9493_v43  ;;  %v7048_v32 = vpop.f32.mrb[72].mxu1  ;;  %v7156_v48 = vpop.f32.mrb[108].mxu0 }
 0x269   : > { %9959 = vst [vmem:[#allocation15_spill] sm:$0xff] %v9487_v27  ;;  %v3777_v12 = vpop.f32.mrb[73].mxu1  ;;  %v4493_v6 = vpop.f32.mrb[109].mxu0  ;;  %v3927_v26 = vrot.slane %v7048_v32, 2  ;;  %v4635_v14 = vrot.slane %v7156_v48, 1 }
 0x26a   : > { %v3923_v31 = vrot.slane %v3777_v12, 2  ;;  %v4631_v49 = vrot.slane %v4493_v6, 1  ;;  %v7049_v41 = vpop.f32.mrb[74].mxu1  ;;  %v7157_v59 = vpop.f32.mrb[110].mxu0 }
 0x26b   : > { %v3929_v42 = vrot.slane %v7049_v41, 2  ;;  %v4637_v40 = vrot.slane %v7157_v59, 1  ;;  %v3780_v9 = vpop.f32.mrb[75].mxu1  ;;  %v4496_v5 = vpop.f32.mrb[111].mxu0 }
 0x26c   : > { %v3925_v27 = vrot.slane %v3780_v9, 2  ;;  %v4633_v19 = vrot.slane %v4496_v5, 1  ;;  %v3924_v44 = vsel %vm2769_vm1, %v3921_v34, %v3923_v31  ;;  %v9497_v37 = vsel %vm2157_vm0, %v4629_v54, %v4631_v49  ;;  %v9514_v54 = vpop.permute.xlu1 %5391  ;;  %v9516_v41 = vpop.permute.xlu0 %5386 }
 0x26d   : > { %9961 = vst [vmem:[#allocation17_spill] sm:$0xff] %v9497_v37  ;;  %v9500_v35 = vadd.f32 %v9293_v0, %v3924_v44  ;;  %v3930_v12 = vsel %vm2769_vm1, %v3927_v26, %v3929_v42  ;;  %v9504_v6 = vsel %vm2157_vm0, %v4635_v14, %v4637_v40 }
 0x26e   : > { %9962 = vst [vmem:[#allocation18_spill] sm:$0xff] %v9504_v6  ;;  %v9507_v32 = vadd.f32 %v9298_v29, %v3930_v12  ;;  %v3926_v59 = vsel %vm2769_vm1, %v3923_v31, %v3925_v27  ;;  %v3928_v48 = vsel %vm2769_vm1, %v3925_v27, %v3927_v26  ;;  %v9512_v34 = vsel %vm2157_vm0, %v4631_v49, %v4633_v19 }
 0x26f   : > { %9964 = vst [vmem:[#allocation20_spill] sm:$0xff] %v9512_v34  ;;  %v9519_v0 = vadd.f32 %v9301_v21, %v3926_v59  ;;  %v9522_v9 = vadd.f32 %v9304_v15, %v3928_v48  ;;  %v9525_v29 = vsel %vm2157_vm0, %v4633_v19, %v4635_v14 }
 0x270   : > { %9963 = vst [vmem:[#allocation19_spill] sm:$0xff] %v9507_v32  ;;  %9966 = vst [vmem:[#allocation22_spill] sm:$0xff] %v9525_v29  ;;  %v7052_v5 = vpop.f32.mrb[76].mxu1  ;;  %v7160_v31 = vpop.f32.mrb[112].mxu0 }
 0x271   : > { %9965 = vst [vmem:[#allocation21_spill] sm:$0xff] %v9519_v0  ;;  %v3793_v44 = vpop.f32.mrb[77].mxu1  ;;  %v4509_v26 = vpop.f32.mrb[113].mxu0  ;;  %v3935_v6 = vrot.slane %v7052_v5, 2  ;;  %v4643_v43 = vrot.slane %v7160_v31, 1 }
 0x272   : > { %v3931_v27 = vrot.slane %v3793_v44, 2  ;;  %v4639_v49 = vrot.slane %v4509_v26, 1  ;;  %v7053_v12 = vpop.f32.mrb[78].mxu1  ;;  %v7161_v34 = vpop.f32.mrb[114].mxu0 }
 0x273   : > { %v3937_v37 = vrot.slane %v7053_v12, 2  ;;  %v4645_v32 = vrot.slane %v7161_v34, 1  ;;  %v3796_v21 = vpop.f32.mrb[79].mxu1  ;;  %v4512_v59 = vpop.f32.mrb[115].mxu0 }
 0x274   : > { %v3933_v0 = vrot.slane %v3796_v21, 2  ;;  %v4641_v15 = vrot.slane %v4512_v59, 1  ;;  %v3932_v48 = vsel %vm2769_vm1, %v3929_v42, %v3931_v27  ;;  %v9529_v14 = vsel %vm2157_vm0, %v4637_v40, %v4639_v49  ;;  %v9546_v40 = vpop.permute.xlu1 %5401  ;;  %v9548_v12 = vpop.permute.xlu0 %5396 }
 0x275   : > { %9967 = vst [vmem:[#allocation23_spill] sm:$0xff] %v9529_v14  ;;  %v9532_v19 = vadd.f32 %v9309_v4, %v3932_v48  ;;  %v3938_v44 = vsel %vm2769_vm1, %v3935_v6, %v3937_v37  ;;  %v9536_v26 = vsel %vm2157_vm0, %v4643_v43, %v4645_v32 }
 0x276   : > { %9968 = vst [vmem:[#allocation24_spill] sm:$0xff] %v9536_v26  ;;  %v9539_v5 = vadd.f32 %v9314_v38, %v3938_v44  ;;  %v3934_v34 = vsel %vm2769_vm1, %v3931_v27, %v3933_v0  ;;  %v3936_v31 = vsel %vm2769_vm1, %v3933_v0, %v3935_v6  ;;  %v9544_v42 = vsel %vm2157_vm0, %v4639_v49, %v4641_v15 }
 0x277   : > { %9970 = vst [vmem:[#allocation26_spill] sm:$0xff] %v9544_v42  ;;  %v9551_v4 = vadd.f32 %v9317_v62, %v3934_v34  ;;  %v9554_v21 = vadd.f32 %v9320_v13, %v3936_v31  ;;  %v9557_v38 = vsel %vm2157_vm0, %v4641_v15, %v4643_v43 }
 0x278   : > { %9969 = vst [vmem:[#allocation25_spill] sm:$0xff] %v9539_v5  ;;  %9972 = vst [vmem:[#allocation28_spill] sm:$0xff] %v9557_v38  ;;  %v7056_v59 = vpop.f32.mrb[80].mxu1  ;;  %v7164_v27 = vpop.f32.mrb[116].mxu0 }
 0x279   : > { %9971 = vst [vmem:[#allocation27_spill] sm:$0xff] %v9551_v4  ;;  %v3809_v48 = vpop.f32.mrb[81].mxu1  ;;  %v4525_v6 = vpop.f32.mrb[117].mxu0  ;;  %v3943_v26 = vrot.slane %v7056_v59, 2  ;;  %v4651_v29 = vrot.slane %v7164_v27, 1 }
 0x27a   : > { %v3939_v0 = vrot.slane %v3809_v48, 2  ;;  %v4647_v49 = vrot.slane %v4525_v6, 1  ;;  %v7057_v44 = vpop.f32.mrb[82].mxu1  ;;  %v7165_v42 = vpop.f32.mrb[118].mxu0 }
 0x27b   : > { %v3945_v14 = vrot.slane %v7057_v44, 2  ;;  %v4653_v5 = vrot.slane %v7165_v42, 1  ;;  %v3812_v62 = vpop.f32.mrb[83].mxu1  ;;  %v4528_v34 = vpop.f32.mrb[119].mxu0 }
 0x27c   : > { %v3941_v4 = vrot.slane %v3812_v62, 2  ;;  %v4649_v13 = vrot.slane %v4528_v34, 1  ;;  %v3940_v31 = vsel %vm2769_vm1, %v3937_v37, %v3939_v0  ;;  %v9561_v43 = vsel %vm2157_vm0, %v4645_v32, %v4647_v49  ;;  %v9578_v32 = vpop.permute.xlu1 %5411  ;;  %v9580_v44 = vpop.permute.xlu0 %5406 }
 0x27d   : > { %9973 = vst [vmem:[#allocation29_spill] sm:$0xff] %v9561_v43  ;;  %v9564_v15 = vadd.f32 %v9325_v22, %v3940_v31  ;;  %v3946_v48 = vsel %vm2769_vm1, %v3943_v26, %v3945_v14  ;;  %v9568_v6 = vsel %vm2157_vm0, %v4651_v29, %v4653_v5 }
 0x27e   : > { %9974 = vst [vmem:[#allocation30_spill] sm:$0xff] %v9568_v6  ;;  %v9571_v59 = vadd.f32 %v9330_v17, %v3946_v48  ;;  %v3942_v42 = vsel %vm2769_vm1, %v3939_v0, %v3941_v4  ;;  %v3944_v27 = vsel %vm2769_vm1, %v3941_v4, %v3943_v26  ;;  %v9576_v37 = vsel %vm2157_vm0, %v4647_v49, %v4649_v13 }
 0x27f   : > { %9975 = vst [vmem:[#allocation31_spill] sm:$0xff] %v9576_v37  ;;  %v9583_v22 = vadd.f32 %v9333_v60, %v3942_v42  ;;  %v9586_v62 = vadd.f32 %v9336_v10, %v3944_v27  ;;  %v9589_v17 = vsel %vm2157_vm0, %v4649_v13, %v4651_v29 }
 0x280   : > { %9977 = vst [vmem:[#allocation33_spill] sm:$0xff] %v9589_v17  ;;  %v7060_v34 = vpop.f32.mrb[84].mxu1  ;;  %v7168_v0 = vpop.f32.mrb[120].mxu0 }
 0x281   : > { %9976 = vst [vmem:[#allocation32_spill] sm:$0xff] %v9586_v62  ;;  %v3825_v31 = vpop.f32.mrb[85].mxu1  ;;  %v4541_v26 = vpop.f32.mrb[121].mxu0  ;;  %v3951_v6 = vrot.slane %v7060_v34, 2  ;;  %v4659_v38 = vrot.slane %v7168_v0, 1 }
 0x282   : > { %v3947_v4 = vrot.slane %v3825_v31, 2  ;;  %v4655_v49 = vrot.slane %v4541_v26, 1  ;;  %v7061_v48 = vpop.f32.mrb[86].mxu1  ;;  %v9591_v37 = vpop.f32.mrb[122].mxu0 }
 0x283   : > { %9978 = vst [vmem:[#allocation34_spill] sm:$0xff] %v9591_v37  ;;  %v3953_v43 = vrot.slane %v7061_v48, 2  ;;  %v9917_v60 = vrot.slane %v9591_v37, 1  ;;  %v3828_v42 = vpop.f32.mrb[87].mxu1  ;;  %v4544_v10 = vpop.f32.mrb[123].mxu0 }
 0x284   : > { %v3949_v27 = vrot.slane %v3828_v42, 2  ;;  %v4657_v62 = vrot.slane %v4544_v10, 1  ;;  %v3948_v29 = vsel %vm2769_vm1, %v3945_v14, %v3947_v4  ;;  %v9596_v13 = vsel %vm2157_vm0, %v4653_v5, %v4655_v49  ;;  %v9615_v42 = vpop.permute.xlu1 %5421 }
 0x285   : > { %9979 = vst [vmem:[#allocation35_spill] sm:$0xff] %v9596_v13  ;;  %v9599_v31 = vadd.f32 %v9341_v33, %v3948_v29  ;;  %v3954_v26 = vsel %vm2769_vm1, %v3951_v6, %v3953_v43  ;;  %v9605_v34 = vsel %vm2157_vm0, %v4659_v38, %v9917_v60  ;;  %v9617_v33 = vpop.permute.xlu0 %5416 }
 0x286   : > { %9980 = vst [vmem:[#allocation36_spill] sm:$0xff] %v9605_v34  ;;  %v9608_v0 = vadd.f32 %v9346_v57, %v3954_v26  ;;  %v3950_v48 = vsel %vm2769_vm1, %v3947_v4, %v3949_v27  ;;  %v3952_v14 = vsel %vm2769_vm1, %v3949_v27, %v3951_v6  ;;  %v9613_v5 = vsel %vm2157_vm0, %v4655_v49, %v4657_v62 }
 0x287   : > { %9982 = vst [vmem:[#allocation38_spill] sm:$0xff] %v9613_v5  ;;  %v9620_v10 = vadd.f32 %v9349_v47, %v3950_v48  ;;  %v9623_v29 = vadd.f32 %v9352_v30, %v3952_v14  ;;  %v9626_v57 = vsel %vm2157_vm0, %v4657_v62, %v4659_v38 }
 0x288   : > { %9981 = vst [vmem:[#allocation37_spill] sm:$0xff] %v9608_v0  ;;  %9984 = vst [vmem:[#allocation40_spill] sm:$0xff] %v9626_v57  ;;  %v7064_v26 = vpop.f32.mrb[88].mxu1  ;;  %v7188_v4 = vpop.f32.mrb[124].mxu0 }
 0x289   : > { %9983 = vst [vmem:[#allocation39_spill] sm:$0xff] %v9620_v10  ;;  %v3841_v60 = vpop.f32.mrb[89].mxu1  ;;  %v4835_v6 = vpop.f32.mrb[125].mxu0  ;;  %v3959_v34 = vrot.slane %v7064_v26, 2  ;;  %v5017_v17 = vrot.slane %v7188_v4, 2 }
 0x28a   : > { %v3955_v27 = vrot.slane %v3841_v60, 2  ;;  %v7065_v49 = vpop.f32.mrb[90].mxu1  ;;  %v7189_v5 = vpop.f32.mrb[126].mxu0  ;;  %v5014_v48 = vrot.slane %v4835_v6, 2 }
 0x28b   : > { %v3961_v13 = vrot.slane %v7065_v49, 2  ;;  %v5019_v37 = vrot.slane %v7189_v5, 2  ;;  %v3844_v0 = vpop.f32.mrb[91].mxu1  ;;  %v4838_v47 = vpop.f32.mrb[127].mxu0 }
 0x28c   : > { %v3957_v10 = vrot.slane %v3844_v0, 2  ;;  %v5015_v30 = vrot.slane %v4838_v47, 2  ;;  %v3956_v14 = vsel %vm2769_vm1, %v3953_v43, %v3955_v27  ;;  %v9641_v6 = vpop.permute.xlu1 %5431  ;;  %v9643_v43 = vpop.permute.xlu0 %5426 }
 0x28d   : > { %v3999_v38 = vsel %vm2769_vm1, %v3961_v13, 0.0  ;;  %v5020_v62 = vsel %vm2769_vm1, %v5017_v17, %v5019_v37  ;;  %v9632_v57 = vadd.f32 %v9358_v36, %v3956_v14  ;;  %v3962_v60 = vsel %vm2769_vm1, %v3959_v34, %v3961_v13 }
 0x28e   : > { %v5016_v26 = vsel %vm2769_vm1, %v5014_v48, %v5015_v30  ;;  %v5018_v5 = vsel %vm2769_vm1, %v5015_v30, %v5017_v17  ;;  %v9638_v4 = vadd.f32 %v9366_v53, %v3962_v60  ;;  %v3958_v0 = vsel %vm2769_vm1, %v3955_v27, %v3957_v10 }
 0x28f   : > { %v9646_v49 = vadd.f32 %v9369_v16, %v3958_v0  ;;  %v9649_v36 = vadd.f32 %v9361_v39, %v3999_v38  ;;  %v3960_v13 = vsel %vm2769_vm1, %v3957_v10, %v3959_v34 }
 0x290   : > { %9985 = vst [vmem:[#allocation41_spill] sm:$0xff] %v9638_v4  ;;  %v7084_v47 = vpop.f32.mrb[20].mxu1  ;;  %v7192_v48 = vpop.f32.mrb[128].mxu0  ;;  %v9653_v17 = vadd.f32 %v9372_v61, %v3960_v13 }
 0x291   : > { %9986 = vst [vmem:[#allocation42_spill] sm:$0xff] %v9649_v36  ;;  %v7241_v53 = vadd.f32 %v9391_v3, %v7084_v47  ;;  %v4135_v27 = vpop.f32.mrb[21].mxu1  ;;  %v4851_v30 = vpop.f32.mrb[129].mxu0  ;;  %v5025_v39 = vrot.slane %v7192_v48, 2 }
 0x292   : > { %v7245_v14 = vadd.f32 %v9399_v7, %v4135_v27  ;;  %v5021_v60 = vrot.slane %v4851_v30, 2  ;;  %v7085_v4 = vpop.f32.mrb[22].mxu1  ;;  %v7193_v16 = vpop.f32.mrb[130].mxu0 }
 0x293   : > { %v4702_v0 = vadd.f32 %v7241_v53, %v9375_v58  ;;  %v7249_v38 = vadd.f32 %v9412_v28, %v7085_v4  ;;  %v5027_v34 = vrot.slane %v7193_v16, 2  ;;  %v4138_v10 = vpop.f32.mrb[23].mxu1  ;;  %v4854_v36 = vpop.f32.mrb[131].mxu0 }
 0x294   : > { %v4700_v61 = vadd.f32 %v7245_v14, %v9378_v11  ;;  %v5022_v3 = vsel %vm2769_vm1, %v5019_v37, %v5021_v60  ;;  %v7253_v13 = vadd.f32 %v9402_v23, %v4138_v10  ;;  %v5023_v47 = vrot.slane %v4854_v36, 2  ;;  %v9667_v53 = vpop.permute.xlu1 %5441  ;;  %v9669_v11 = vpop.permute.xlu0 %5436 }
 0x295   : > { %v5124_v7 = vadd.f32 %v5020_v62, %v4702_v0  ;;  %v4703_v27 = vadd.f32 %v7249_v38, %v9384_v63  ;;  %v5028_v30 = vsel %vm2769_vm1, %v5025_v39, %v5027_v34 }
 0x296   : > { %v5122_v58 = vadd.f32 %v5016_v26, %v4700_v61  ;;  %v4701_v48 = vadd.f32 %v7253_v13, %v9381_v8  ;;  %v5024_v28 = vsel %vm2769_vm1, %v5021_v60, %v5023_v47  ;;  %v5026_v4 = vsel %vm2769_vm1, %v5023_v47, %v5025_v39 }
 0x297   : > { %v5556_v37 = vmul.f32 %v9516_v41, %v5124_v7  ;;  %v5125_v23 = vadd.f32 %v5022_v3, %v4703_v27 }
 0x298   : > { %v5554_v62 = vmul.f32 %v9484_v55, %v5122_v58  ;;  %v5123_v8 = vadd.f32 %v5018_v5, %v4701_v48  ;;  %v7088_v63 = vpop.f32.mrb[24].mxu1  ;;  %v7196_v26 = vpop.f32.mrb[132].mxu0 }
 0x299   : > { %v5633_v36 = vmul.f32 %v5556_v37, %v5124_v7  ;;  %v6370_v14 = vpack.c.bf16 %v5125_v23, %v5124_v7  ;;  %v7257_v60 = vadd.f32 %v9419_v2, %v7088_v63  ;;  %v4151_v16 = vpop.f32.mrb[25].mxu1  ;;  %v4867_v0 = vpop.f32.mrb[133].mxu0  ;;  %v5557_v39 = vmul.f32 %v9514_v54, %v5125_v23 }
 0x29a   : > { %v5631_v41 = vmul.f32 %v5554_v62, %v5122_v58  ;;  %v6365_v55 = vpack.c.bf16 %v5123_v8, %v5122_v58  ;;  %v5555_v38 = vmul.f32 %v9482_v45, %v5123_v8  ;;  %v7089_v10 = vpop.f32.mrb[26].mxu1  ;;  %v9682_v61 = vpop.f32.mrb[134].mxu0  ;;  %v5033_v3 = vrot.slane %v7196_v26, 2 }
 0x29b   : > { %6503 = vst [vmem:[%s9677_s21 + $0x8] sm:$0xff] %v6370_v14   ;;  %v4706_v5 = vadd.f32 %v7257_v60, %v9388_v51  ;;  %v7261_v13 = vadd.f32 %v9427_v20, %v4151_v16  ;;  %v5029_v47 = vrot.slane %v4867_v0, 2  ;;  %v4154_v2 = vpop.f32.mrb[27].mxu1  ;;  %v4870_v7 = vpop.f32.mrb[135].mxu0  ;;  %v7265_v54 = vadd.f32 %v9440_v24, %v7089_v10  ;;  %v9987_v20 = vld [vmem:[#allocation2_spill] sm:$0xff] }
 0x29c   : > { %6366 = vst [vmem:[%s9677_s21] sm:$0xff] %v6365_v55   ;;  %v5590_v27 = vadd.f32 %v5555_v38, %v5554_v62  ;;  %v5632_v48 = vmul.f32 %v5555_v38, %v5123_v8  ;;  %v5035_v58 = vrot.slane %v9682_v61, 2  ;;  %v7269_v51 = vadd.f32 %v9430_v52, %v4154_v2  ;;  %v9695_v55 = vpop.permute.xlu1 %5451  ;;  %v9697_v62 = vpop.permute.xlu0 %5446 }
 0x29d   : > { %v5128_v45 = vadd.f32 %v5028_v30, %v4706_v5  ;;  %v4704_v63 = vadd.f32 %v7261_v13, %v9396_v1  ;;  %v5030_v14 = vsel %vm2769_vm1, %v5027_v34, %v5029_v47  ;;  %v4707_v16 = vadd.f32 %v7265_v54, %v9987_v20  ;;  %v9988_v30 = vld [vmem:[#allocation8_spill] sm:$0xff] }
 0x29e   : > { %v5591_v26 = vadd.f32 %v5590_v27, %v5556_v37  ;;  %v5667_v60 = vadd.f32 %v5632_v48, %v5631_v41  ;;  %v5036_v0 = vsel %vm2769_vm1, %v5033_v3, %v5035_v58  ;;  %v4705_v38 = vadd.f32 %v7269_v51, %v9988_v30 }
 0x29f   : > { %v5560_v24 = vmul.f32 %v9580_v44, %v5128_v45  ;;  %v5126_v8 = vadd.f32 %v5024_v28, %v4704_v63  ;;  %v5031_v1 = vrot.slane %v4870_v7, 2  ;;  %v5634_v10 = vmul.f32 %v5557_v39, %v5125_v23 }
 0x2a0   : > { %v5668_v34 = vadd.f32 %v5667_v60, %v5633_v36  ;;  %v5592_v61 = vadd.f32 %v5591_v26, %v5557_v39  ;;  %v5129_v52 = vadd.f32 %v5030_v14, %v4707_v16  ;;  %v7092_v37 = vpop.f32.mrb[28].mxu1  ;;  %v7200_v41 = vpop.f32.mrb[136].mxu0  ;;  %v5127_v2 = vadd.f32 %v5026_v4, %v4705_v38  ;;  %v9989_v38 = vld [vmem:[#allocation3_spill] sm:$0xff] }
 0x2a1   : > { %v5637_v5 = vmul.f32 %v5560_v24, %v5128_v45  ;;  %v5558_v13 = vmul.f32 %v9548_v12, %v5126_v8  ;;  %v5032_v27 = vsel %vm2769_vm1, %v5029_v47, %v5031_v1  ;;  %v4167_v48 = vpop.f32.mrb[29].mxu1  ;;  %v4883_v54 = vpop.f32.mrb[137].mxu0  ;;  %v5034_v23 = vsel %vm2769_vm1, %v5031_v1, %v5033_v3 }
 0x2a2   : > { %v5669_v44 = vadd.f32 %v5668_v34, %v5634_v10  ;;  %v6380_v28 = vpack.c.bf16 %v5129_v52, %v5128_v45  ;;  %v5561_v63 = vmul.f32 %v9578_v32, %v5129_v52  ;;  %v7093_v36 = vpop.f32.mrb[30].mxu1  ;;  %v9705_v39 = vpop.f32.mrb[138].mxu0  ;;  %v6375_v51 = vpack.c.bf16 %v5127_v2, %v5126_v8  ;;  %v9990_v10 = vld [vmem:[#allocation4_spill] sm:$0xff] }
 0x2a3   : > { %v5593_v7 = vadd.f32 %v5592_v61, %v5558_v13  ;;  %v5635_v14 = vmul.f32 %v5558_v13, %v5126_v8  ;;  %v5559_v12 = vmul.f32 %v9546_v40, %v5127_v2  ;;  %v4170_v4 = vpop.f32.mrb[31].mxu1  ;;  %v4886_v26 = vpop.f32.mrb[139].mxu0  ;;  %v7273_v60 = vadd.f32 %v9447_v25, %v7092_v37 }
 0x2a4   : > { %6505 = vst [vmem:[%s9677_s21 + $0x18] sm:$0xff] %v6380_v28   ;;  %v5638_v47 = vmul.f32 %v5561_v63, %v5129_v52  ;;  %v5041_v45 = vrot.slane %v7200_v41, 2  ;;  %v7277_v32 = vadd.f32 %v9455_v46, %v4167_v48  ;;  %6504 = vst [vmem:[%s9677_s21 + $0x10] sm:$0xff] %v6375_v51   ;;  %v5037_v30 = vrot.slane %v4883_v54, 2  ;;  %v9716_v61 = vpop.permute.xlu1 %5461  ;;  %v9718_v52 = vpop.permute.xlu0 %5456  ;;  %v9991_v48 = vld [vmem:[#allocation6_spill] sm:$0xff] }
 0x2a5   : > { %v5670_v20 = vadd.f32 %v5669_v44, %v5635_v14  ;;  %v5594_v3 = vadd.f32 %v5593_v7, %v5559_v12  ;;  %v5636_v16 = vmul.f32 %v5559_v12, %v5127_v2  ;;  %v4710_v1 = vadd.f32 %v7273_v60, %v9989_v38  ;;  %v9992_v7 = vld [vmem:[#allocation5_spill] sm:$0xff] }
 0x2a6   : > { %v4708_v8 = vadd.f32 %v7277_v32, %v9990_v10  ;;  %v7281_v40 = vadd.f32 %v9468_v18, %v7093_v36  ;;  %v5043_v34 = vrot.slane %v9705_v39, 2  ;;  %v5038_v46 = vsel %vm2769_vm1, %v5035_v58, %v5037_v30 }
 0x2a7   : > { %v5595_v25 = vadd.f32 %v5594_v3, %v5560_v24  ;;  %v5671_v37 = vadd.f32 %v5670_v20, %v5636_v16  ;;  %v7285_v41 = vadd.f32 %v9458_v56, %v4170_v4  ;;  %v5132_v13 = vadd.f32 %v5036_v0, %v4710_v1 }
 0x2a8   : > { %v5130_v2 = vadd.f32 %v5032_v27, %v4708_v8  ;;  %v4711_v54 = vadd.f32 %v7281_v40, %v9991_v48  ;;  %v5044_v44 = vsel %vm2769_vm1, %v5041_v45, %v5043_v34  ;;  %v7096_v28 = vpop.f32.mrb[32].mxu1  ;;  %v9724_v18 = vpop.f32.mrb[140].mxu0  ;;  %v5039_v51 = vrot.slane %v4886_v26, 2  ;;  %v9993_v27 = vld [vmem:[#allocation13_spill] sm:$0xff] }
 0x2a9   : > { %v5672_v36 = vadd.f32 %v5671_v37, %v5637_v5  ;;  %v5596_v39 = vadd.f32 %v5595_v25, %v5561_v63  ;;  %v4709_v14 = vadd.f32 %v7285_v41, %v9992_v7  ;;  %v4183_v24 = vpop.f32.mrb[33].mxu1  ;;  %v4899_v12 = vpop.f32.mrb[141].mxu0  ;;  %v5564_v58 = vmul.f32 %v9643_v43, %v5132_v13  ;;  %v9994_v25 = vld [vmem:[#allocation7_spill] sm:$0xff] }
 0x2aa   : > { %v5562_v56 = vmul.f32 %v9617_v33, %v5130_v2  ;;  %v5133_v0 = vadd.f32 %v5038_v46, %v4711_v54  ;;  %v7289_v4 = vadd.f32 %v9993_v27, %v7096_v28  ;;  %v7097_v60 = vpop.f32.mrb[34].mxu1  ;;  %v9730_v32 = vpop.f32.mrb[142].mxu0  ;;  %v5040_v5 = vsel %vm2769_vm1, %v5037_v30, %v5039_v51  ;;  %v9995_v30 = vld [vmem:[#allocation15_spill] sm:$0xff]  ;;  %v9996_v28 = vld [vmem:[#allocation9_spill] sm:$0xff] }
 0x2ab   : > { %v5673_v20 = vadd.f32 %v5672_v36, %v5638_v47  ;;  %v5131_v3 = vadd.f32 %v5034_v23, %v4709_v14  ;;  %v5042_v63 = vsel %vm2769_vm1, %v5039_v51, %v5041_v45  ;;  %v4186_v26 = vpop.f32.mrb[35].mxu1  ;;  %v4902_v16 = vpop.f32.mrb[143].mxu0  ;;  %v5641_v38 = vmul.f32 %v5564_v58, %v5132_v13 }
 0x2ac   : > { %v5597_v43 = vadd.f32 %v5596_v39, %v5562_v56  ;;  %v5639_v1 = vmul.f32 %v5562_v56, %v5130_v2  ;;  %v6390_v33 = vpack.c.bf16 %v5133_v0, %v5132_v13  ;;  %v5565_v10 = vmul.f32 %v9641_v6, %v5133_v0  ;;  %v9740_v41 = vpop.permute.xlu1 %5471  ;;  %v9742_v48 = vpop.permute.xlu0 %5466 }
 0x2ad   : > { %v6385_v8 = vpack.c.bf16 %v5131_v3, %v5130_v2  ;;  %v5563_v40 = vmul.f32 %v9615_v42, %v5131_v3  ;;  %v4714_v37 = vadd.f32 %v7289_v4, %v9994_v25  ;;  %v5049_v23 = vrot.slane %v9724_v18, 2  ;;  %v9997_v4 = vld [vmem:[#allocation11_spill] sm:$0xff] }
 0x2ae   : > { %v5674_v47 = vadd.f32 %v5673_v20, %v5639_v1  ;;  %6507 = vst [vmem:[%s9677_s21 + $0x28] sm:$0xff] %v6390_v33   ;;  %v7293_v45 = vadd.f32 %v9995_v30, %v4183_v24  ;;  %v5045_v46 = vrot.slane %v4899_v12, 2  ;;  %v5642_v54 = vmul.f32 %v5565_v10, %v5133_v0  ;;  %v9998_v1 = vld [vmem:[#allocation10_spill] sm:$0xff] }
 0x2af   : > { %6506 = vst [vmem:[%s9677_s21 + $0x20] sm:$0xff] %v6385_v8   ;;  %v5598_v13 = vadd.f32 %v5597_v43, %v5563_v40  ;;  %v5640_v6 = vmul.f32 %v5563_v40, %v5131_v3  ;;  %v5136_v2 = vadd.f32 %v5044_v44, %v4714_v37  ;;  %v7297_v39 = vadd.f32 %v9500_v35, %v7097_v60  ;;  %v9999_v37 = vld [vmem:[#allocation19_spill] sm:$0xff] }
 0x2b0   : > { %v4712_v42 = vadd.f32 %v7293_v45, %v9996_v28  ;;  %v5046_v36 = vsel %vm2769_vm1, %v5043_v34, %v5045_v46  ;;  %v5051_v18 = vrot.slane %v9730_v32, 2  ;;  %v7100_v7 = vpop.f32.mrb[36].mxu1  ;;  %v9749_v14 = vpop.f32.mrb[144].mxu0  ;;  %v7301_v56 = vadd.f32 %v9490_v50, %v4186_v26  ;;  %v10000_v28 = vld [vmem:[#allocation12_spill] sm:$0xff] }
 0x2b1   : > { %v5599_v51 = vadd.f32 %v5598_v13, %v5564_v58  ;;  %v5675_v24 = vadd.f32 %v5674_v47, %v5640_v6  ;;  %v5568_v12 = vmul.f32 %v9697_v62, %v5136_v2  ;;  %v4199_v0 = vpop.f32.mrb[37].mxu1  ;;  %v9753_v27 = vpop.f32.mrb[145].mxu0  ;;  %v4715_v20 = vadd.f32 %v7297_v39, %v9997_v4 }
 0x2b2   : > { %v5134_v44 = vadd.f32 %v5040_v5, %v4712_v42  ;;  %v5052_v34 = vsel %vm2769_vm1, %v5049_v23, %v5051_v18  ;;  %v5047_v35 = vrot.slane %v4902_v16, 2  ;;  %v7101_v60 = vpop.f32.mrb[38].mxu1  ;;  %v9757_v32 = vpop.f32.mrb[146].mxu0  ;;  %v4713_v33 = vadd.f32 %v7301_v56, %v9998_v1 }
 0x2b3   : > { %v5676_v3 = vadd.f32 %v5675_v24, %v5641_v38  ;;  %v5645_v43 = vmul.f32 %v5568_v12, %v5136_v2  ;;  %v5600_v58 = vadd.f32 %v5599_v51, %v5565_v10  ;;  %v4202_v62 = vpop.f32.mrb[39].mxu1  ;;  %v9760_v8 = vpop.f32.mrb[147].mxu0  ;;  %v5137_v26 = vadd.f32 %v5046_v36, %v4715_v20 }
 0x2b4   : > { %v5566_v50 = vmul.f32 %v9669_v11, %v5134_v44  ;;  %v5048_v5 = vsel %vm2769_vm1, %v5045_v46, %v5047_v35  ;;  %v5050_v40 = vsel %vm2769_vm1, %v5047_v35, %v5049_v23  ;;  %v5135_v25 = vadd.f32 %v5042_v63, %v4713_v33  ;;  %v9768_v6 = vpop.permute.xlu1 %5481  ;;  %v9770_v11 = vpop.permute.xlu0 %5476  ;;  %v10001_v63 = vld [vmem:[#allocation21_spill] sm:$0xff] }
 0x2b5   : > { %v5677_v16 = vadd.f32 %v5676_v3, %v5642_v54  ;;  %v7305_v47 = vadd.f32 %v9999_v37, %v7100_v7  ;;  %v5057_v38 = vrot.slane %v9749_v14, 2  ;;  %v6400_v45 = vpack.c.bf16 %v5137_v26, %v5136_v2  ;;  %v10003_v35 = vld [vmem:[#allocation17_spill] sm:$0xff]  ;;  %v10004_v37 = vld [vmem:[#allocation16_spill] sm:$0xff] }
 0x2b6   : > { %v5601_v10 = vadd.f32 %v5600_v58, %v5566_v50  ;;  %v5643_v30 = vmul.f32 %v5566_v50, %v5134_v44  ;;  %v5569_v13 = vmul.f32 %v9695_v55, %v5137_v26  ;;  %v6395_v46 = vpack.c.bf16 %v5135_v25, %v5134_v44  ;;  %v10002_v44 = vld [vmem:[#allocation14_spill] sm:$0xff] }
 0x2b7   : > { %v5567_v23 = vmul.f32 %v9667_v53, %v5135_v25  ;;  %v4718_v54 = vadd.f32 %v7305_v47, %v10000_v28  ;;  %v7309_v42 = vadd.f32 %v10001_v63, %v4199_v0  ;;  %6509 = vst [vmem:[%s9677_s21 + $0x38] sm:$0xff] %v6400_v45   ;;  %v5053_v7 = vrot.slane %v9753_v27, 2 }
 0x2b8   : > { %v5678_v36 = vadd.f32 %v5677_v16, %v5643_v30  ;;  %v5646_v39 = vmul.f32 %v5569_v13, %v5137_v26  ;;  %v7313_v2 = vadd.f32 %v9532_v19, %v7101_v60  ;;  %v7104_v14 = vpop.f32.mrb[40].mxu1  ;;  %v9778_v55 = vpop.f32.mrb[148].mxu0  ;;  %6508 = vst [vmem:[%s9677_s21 + $0x30] sm:$0xff] %v6395_v46   ;;  %v5059_v27 = vrot.slane %v9757_v32, 2 }
 0x2b9   : > { %v5602_v51 = vadd.f32 %v5601_v10, %v5567_v23  ;;  %v5644_v24 = vmul.f32 %v5567_v23, %v5135_v25  ;;  %v5140_v56 = vadd.f32 %v5052_v34, %v4718_v54  ;;  %v4716_v53 = vadd.f32 %v7309_v42, %v10002_v44  ;;  %v4215_v4 = vpop.f32.mrb[41].mxu1  ;;  %v9782_v20 = vpop.f32.mrb[149].mxu0 }
 0x2ba   : > { %v5054_v0 = vsel %vm2769_vm1, %v5051_v18, %v5053_v7  ;;  %v4719_v3 = vadd.f32 %v7313_v2, %v10003_v35  ;;  %v7317_v19 = vadd.f32 %v9522_v9, %v4202_v62  ;;  %v7105_v60 = vpop.f32.mrb[42].mxu1  ;;  %v9788_v58 = vpop.f32.mrb[150].mxu0  ;;  %v5060_v18 = vsel %vm2769_vm1, %v5057_v38, %v5059_v27 }
 0x2bb   : > { %v5603_v1 = vadd.f32 %v5602_v51, %v5568_v12  ;;  %v5679_v33 = vadd.f32 %v5678_v36, %v5644_v24  ;;  %v5572_v34 = vmul.f32 %v9742_v48, %v5140_v56  ;;  %v5138_v50 = vadd.f32 %v5048_v5, %v4716_v53  ;;  %v4218_v26 = vpop.f32.mrb[43].mxu1  ;;  %v9791_v16 = vpop.f32.mrb[151].mxu0  ;;  %v10006_v51 = vld [vmem:[#allocation27_spill] sm:$0xff] }
 0x2bc   : > { %v5141_v25 = vadd.f32 %v5054_v0, %v4719_v3  ;;  %v4717_v47 = vadd.f32 %v7317_v19, %v10004_v37  ;;  %v5055_v32 = vrot.slane %v9760_v8, 2  ;;  %v5492_v46 = vpop.permute.xlu1 %5491  ;;  %v5487_v23 = vpop.permute.xlu0 %5486  ;;  %v7325_v24 = vadd.f32 %v10006_v51, %v4215_v4  ;;  %v10007_v0 = vld [vmem:[#allocation18_spill] sm:$0xff]  ;;  %v10008_v19 = vld [vmem:[#allocation20_spill] sm:$0xff] }
 0x2bd   : > { %v5680_v9 = vadd.f32 %v5679_v33, %v5645_v43  ;;  %v5649_v62 = vmul.f32 %v5572_v34, %v5140_v56  ;;  %v5570_v10 = vmul.f32 %v9718_v52, %v5138_v50  ;;  %v5604_v12 = vadd.f32 %v5603_v1, %v5569_v13  ;;  %v10005_v13 = vld [vmem:[#allocation25_spill] sm:$0xff] }
 0x2be   : > { %v6410_v30 = vpack.c.bf16 %v5141_v25, %v5140_v56  ;;  %v5573_v48 = vmul.f32 %v9740_v41, %v5141_v25  ;;  %v5139_v5 = vadd.f32 %v5050_v40, %v4717_v47  ;;  %v5056_v45 = vsel %vm2769_vm1, %v5053_v7, %v5055_v32 }
 0x2bf   : > { %v5605_v28 = vadd.f32 %v5604_v12, %v5570_v10  ;;  %v5647_v54 = vmul.f32 %v5570_v10, %v5138_v50  ;;  %v5681_v63 = vadd.f32 %v5680_v9, %v5646_v39  ;;  %v5058_v42 = vsel %vm2769_vm1, %v5055_v32, %v5057_v38  ;;  %v10009_v32 = vld [vmem:[#allocation23_spill] sm:$0xff]  ;;  %v10010_v10 = vld [vmem:[#allocation22_spill] sm:$0xff] }
 0x2c0   : > { %6511 = vst [vmem:[%s9677_s21 + $0x48] sm:$0xff] %v6410_v30   ;;  %v5650_v43 = vmul.f32 %v5573_v48, %v5141_v25  ;;  %v6405_v8 = vpack.c.bf16 %v5139_v5, %v5138_v50  ;;  %v5571_v52 = vmul.f32 %v9716_v61, %v5139_v5  ;;  %v7321_v36 = vadd.f32 %v10005_v13, %v7104_v14  ;;  %v7108_v2 = vpop.f32.mrb[44].mxu1  ;;  %v9803_v41 = vpop.f32.mrb[152].mxu0 }
 0x2c1   : > { %v5682_v40 = vadd.f32 %v5681_v63, %v5647_v54  ;;  %v5065_v7 = vrot.slane %v9778_v55, 2  ;;  %v5061_v56 = vrot.slane %v9782_v20, 2  ;;  %v4231_v39 = vpop.f32.mrb[45].mxu1  ;;  %v9808_v44 = vpop.f32.mrb[153].mxu0  ;;  %v7329_v14 = vadd.f32 %v9564_v15, %v7105_v60 }
 0x2c2   : > { %6510 = vst [vmem:[%s9677_s21 + $0x40] sm:$0xff] %v6405_v8   ;;  %v5606_v38 = vadd.f32 %v5605_v28, %v5571_v52  ;;  %v5648_v53 = vmul.f32 %v5571_v52, %v5139_v5  ;;  %v4722_v61 = vadd.f32 %v7321_v36, %v10007_v0  ;;  %v7109_v35 = vpop.f32.mrb[46].mxu1  ;;  %v9813_v3 = vpop.f32.mrb[154].mxu0  ;;  %v4720_v1 = vadd.f32 %v7325_v24, %v10008_v19  ;;  %v10011_v19 = vld [vmem:[#allocation24_spill] sm:$0xff] }
 0x2c3   : > { %v5062_v55 = vsel %vm2769_vm1, %v5059_v27, %v5061_v56  ;;  %v5067_v4 = vrot.slane %v9788_v58, 2  ;;  %v7333_v20 = vadd.f32 %v9554_v21, %v4218_v26  ;;  %v4234_v33 = vpop.f32.mrb[47].mxu1  ;;  %v9819_v50 = vpop.f32.mrb[155].mxu0  ;;  %v4723_v9 = vadd.f32 %v7329_v14, %v10009_v32 }
 0x2c4   : > { %v5607_v25 = vadd.f32 %v5606_v38, %v5572_v34  ;;  %v5683_v37 = vadd.f32 %v5682_v40, %v5648_v53  ;;  %v5144_v47 = vadd.f32 %v5060_v18, %v4722_v61  ;;  %v5142_v15 = vadd.f32 %v5056_v45, %v4720_v1  ;;  %v9825_v21 = vpop.permute.xlu1 %5501  ;;  %v5497_v26 = vpop.permute.xlu0 %5496 }
 0x2c5   : > { %v5068_v60 = vsel %vm2769_vm1, %v5065_v7, %v5067_v4  ;;  %v4721_v12 = vadd.f32 %v7333_v20, %v10010_v10  ;;  %v5063_v30 = vrot.slane %v9791_v16, 2  ;;  %v5145_v28 = vadd.f32 %v5062_v55, %v4723_v9  ;;  %v10012_v55 = vld [vmem:[#allocation26_spill] sm:$0xff]  ;;  %v10014_v9 = vld [vmem:[#allocation29_spill] sm:$0xff] }
 0x2c6   : > { %v5684_v27 = vadd.f32 %v5683_v37, %v5649_v62  ;;  %v5576_v5 = vmul.f32 %v5487_v23, %v5144_v47  ;;  %v5608_v58 = vadd.f32 %v5607_v25, %v5573_v48  ;;  %v5574_v34 = vmul.f32 %v9770_v11, %v5142_v15  ;;  %v10013_v37 = vld [vmem:[#allocation32_spill] sm:$0xff] }
 0x2c7   : > { %v5143_v18 = vadd.f32 %v5058_v42, %v4721_v12  ;;  %v5064_v54 = vsel %vm2769_vm1, %v5061_v56, %v5063_v30  ;;  %v5066_v45 = vsel %vm2769_vm1, %v5063_v30, %v5065_v7  ;;  %v6420_v52 = vpack.c.bf16 %v5145_v28, %v5144_v47 }
 0x2c8   : > { %v5653_v63 = vmul.f32 %v5576_v5, %v5144_v47  ;;  %v5685_v8 = vadd.f32 %v5684_v27, %v5650_v43  ;;  %v5577_v13 = vmul.f32 %v5492_v46, %v5145_v28  ;;  %v7112_v16 = vpop.f32.mrb[48].mxu1  ;;  %v9830_v62 = vpop.f32.mrb[156].mxu0  ;;  %v5609_v48 = vadd.f32 %v5608_v58, %v5574_v34  ;;  %v10015_v58 = vld [vmem:[#allocation28_spill] sm:$0xff] }
 0x2c9   : > { %v5651_v23 = vmul.f32 %v5574_v34, %v5142_v15  ;;  %v6415_v36 = vpack.c.bf16 %v5143_v18, %v5142_v15  ;;  %v5575_v40 = vmul.f32 %v9768_v6, %v5143_v18  ;;  %v4247_v11 = vpop.f32.mrb[49].mxu1  ;;  %v9833_v51 = vpop.f32.mrb[157].mxu0  ;;  %6513 = vst [vmem:[%s9677_s21 + $0x58] sm:$0xff] %v6420_v52   ;;  %v7337_v7 = vadd.f32 %v9571_v59, %v7108_v2 }
 0x2ca   : > { %v5654_v42 = vmul.f32 %v5577_v13, %v5145_v28  ;;  %v5073_v43 = vrot.slane %v9803_v41, 2  ;;  %v7341_v46 = vadd.f32 %v9583_v22, %v4231_v39  ;;  %v7113_v24 = vpop.f32.mrb[50].mxu1  ;;  %v9839_v56 = vpop.f32.mrb[158].mxu0  ;;  %v5069_v6 = vrot.slane %v9808_v44, 2  ;;  %v10016_v28 = vld [vmem:[#allocation37_spill] sm:$0xff] }
 0x2cb   : > { %v5686_v38 = vadd.f32 %v5685_v8, %v5651_v23  ;;  %6512 = vst [vmem:[%s9677_s21 + $0x50] sm:$0xff] %v6415_v36   ;;  %v5610_v53 = vadd.f32 %v5609_v48, %v5575_v40  ;;  %v5652_v0 = vmul.f32 %v5575_v40, %v5143_v18  ;;  %v4250_v61 = vpop.f32.mrb[51].mxu1  ;;  %v9843_v14 = vpop.f32.mrb[159].mxu0  ;;  %v4726_v1 = vadd.f32 %v7337_v7, %v10011_v19 }
 0x2cc   : > { %v4724_v59 = vadd.f32 %v7341_v46, %v10012_v55  ;;  %v7345_v2 = vadd.f32 %v9599_v31, %v7109_v35  ;;  %v5075_v22 = vrot.slane %v9813_v3, 2  ;;  %v5507_v41 = vpop.permute.xlu0 %5506  ;;  %v5070_v25 = vsel %vm2769_vm1, %v5067_v4, %v5069_v6  ;;  %v5512_v12 = vpop.permute.xlu1 %5511  ;;  %v10018_v46 = vld [vmem:[#allocation39_spill] sm:$0xff] }
 0x2cd   : > { %v5611_v39 = vadd.f32 %v5610_v53, %v5576_v5  ;;  %v5687_v20 = vadd.f32 %v5686_v38, %v5652_v0  ;;  %v7349_v47 = vadd.f32 %v10013_v37, %v4234_v33  ;;  %v5148_v32 = vadd.f32 %v5068_v60, %v4726_v1  ;;  %v10019_v55 = vld [vmem:[#allocation31_spill] sm:$0xff] }
 0x2ce   : > { %v5146_v44 = vadd.f32 %v5064_v54, %v4724_v59  ;;  %v4727_v15 = vadd.f32 %v7345_v2, %v10014_v9  ;;  %v5076_v10 = vsel %vm2769_vm1, %v5073_v43, %v5075_v22  ;;  %v5071_v35 = vrot.slane %v9819_v50, 2  ;;  %v10022_v9 = vld [vmem:[#allocation35_spill] sm:$0xff] }
 0x2cf   : > { %v5688_v30 = vadd.f32 %v5687_v20, %v5653_v63  ;;  %v5612_v27 = vadd.f32 %v5611_v39, %v5577_v13  ;;  %v4725_v31 = vadd.f32 %v7349_v47, %v10015_v58  ;;  %v7353_v34 = vadd.f32 %v10016_v28, %v7112_v16  ;;  %v10017_v16 = vld [vmem:[#allocation30_spill] sm:$0xff] }
 0x2d0   : > { %v5578_v3 = vmul.f32 %v5497_v26, %v5146_v44  ;;  %v5149_v5 = vadd.f32 %v5070_v25, %v4727_v15  ;;  %v7116_v4 = vpop.f32.mrb[52].mxu1  ;;  %v5072_v60 = vsel %vm2769_vm1, %v5069_v6, %v5071_v35  ;;  %v5074_v54 = vsel %vm2769_vm1, %v5071_v35, %v5073_v43  ;;  %v5517_v23 = vpop.permute.xlu0 %5516  ;;  %v10020_v25 = vld [vmem:[#allocation34_spill] sm:$0xff] }
 0x2d1   : > { %v5689_v18 = vadd.f32 %v5688_v30, %v5654_v42  ;;  %v5147_v33 = vadd.f32 %v5066_v45, %v4725_v31  ;;  %v4263_v8 = vpop.f32.mrb[53].mxu1  ;;  %v5580_v50 = vmul.f32 %v5507_v41, %v5148_v32  ;;  %v4730_v40 = vadd.f32 %v7353_v34, %v10017_v16  ;;  %v5522_v53 = vpop.permute.xlu1 %5521  ;;  %v10025_v28 = vld [vmem:[#allocation42_spill] sm:$0xff] }
 0x2d2   : > { %v5613_v52 = vadd.f32 %v5612_v27, %v5578_v3  ;;  %v5655_v63 = vmul.f32 %v5578_v3, %v5146_v44  ;;  %v6430_v13 = vpack.c.bf16 %v5149_v5, %v5148_v32  ;;  %v7117_v48 = vpop.f32.mrb[54].mxu1  ;;  %v5581_v45 = vmul.f32 %v5512_v12, %v5149_v5 }
 0x2d3   : > { %v6425_v26 = vpack.c.bf16 %v5147_v33, %v5146_v44  ;;  %v5579_v36 = vmul.f32 %v9825_v21, %v5147_v33  ;;  %v4266_v42 = vpop.f32.mrb[55].mxu1  ;;  %v7357_v38 = vadd.f32 %v10018_v46, %v4247_v11  ;;  %v5077_v43 = vrot.slane %v9833_v51, 2 }
 0x2d4   : > { %v5690_v7 = vadd.f32 %v5689_v18, %v5655_v63  ;;  %6515 = vst [vmem:[%s9677_s21 + $0x68] sm:$0xff] %v6430_v13   ;;  %v5152_v19 = vadd.f32 %v5076_v10, %v4730_v40  ;;  %v5081_v1 = vrot.slane %v9830_v62, 2  ;;  %v7361_v2 = vadd.f32 %v9632_v57, %v7113_v24  ;;  %v5527_v10 = vpop.permute.xlu0 %5526  ;;  %v10023_v24 = vld [vmem:[#allocation33_spill] sm:$0xff] }
 0x2d5   : > { %6514 = vst [vmem:[%s9677_s21 + $0x60] sm:$0xff] %v6425_v26   ;;  %v5614_v0 = vadd.f32 %v5613_v52, %v5579_v36  ;;  %v5656_v6 = vmul.f32 %v5579_v36, %v5147_v33  ;;  %v4728_v59 = vadd.f32 %v7357_v38, %v10019_v55  ;;  %v5078_v21 = vsel %vm2769_vm1, %v5075_v22, %v5077_v43  ;;  %v5532_v58 = vpop.permute.xlu1 %5531  ;;  %v10027_v26 = vld [vmem:[#allocation38_spill] sm:$0xff] }
 0x2d6   : > { %v5083_v41 = vrot.slane %v9839_v56, 2  ;;  %v5657_v39 = vmul.f32 %v5580_v50, %v5148_v32  ;;  %v7365_v51 = vadd.f32 %v9623_v29, %v4250_v61  ;;  %v10021_v37 = vrot.slane %v10020_v25, 1  ;;  %v10024_v29 = vld [vmem:[#allocation41_spill] sm:$0xff] }
 0x2d7   : > { %v5615_v20 = vadd.f32 %v5614_v0, %v5580_v50  ;;  %v5691_v11 = vadd.f32 %v5690_v7, %v5656_v6  ;;  %v5150_v44 = vadd.f32 %v5072_v60, %v4728_v59  ;;  %v4731_v62 = vadd.f32 %v7361_v2, %v10022_v9  ;;  %v10026_v50 = vld [vmem:[#allocation36_spill] sm:$0xff] }
 0x2d8   : > { %v4699_v47 = vsel %vm2157_vm0, %v10021_v37, 0.0  ;;  %v5084_v15 = vsel %vm2769_vm1, %v5081_v1, %v5083_v41  ;;  %v5658_v22 = vmul.f32 %v5581_v45, %v5149_v5  ;;  %v4729_v56 = vadd.f32 %v7365_v51, %v10023_v24 }
 0x2d9   : > { %v5692_v12 = vadd.f32 %v5691_v11, %v5657_v39  ;;  %v5616_v57 = vadd.f32 %v5615_v20, %v5581_v45  ;;  %v5582_v32 = vmul.f32 %v5517_v23, %v5150_v44  ;;  %v5153_v30 = vadd.f32 %v5078_v21, %v4731_v62 }
 0x2da   : > { %v5079_v27 = vrot.slane %v9843_v14, 2  ;;  %v7369_v61 = vadd.f32 %v10024_v29, %v7116_v4  ;;  %v5151_v35 = vadd.f32 %v5074_v54, %v4729_v56  ;;  %v7373_v3 = vadd.f32 %v9646_v49, %v4263_v8  ;;  %v5537_v8 = vpop.permute.xlu0 %5536 }
 0x2db   : > { %v5693_v31 = vadd.f32 %v5692_v12, %v5658_v22  ;;  %v7377_v34 = vadd.f32 %v10025_v28, %v7117_v48  ;;  %v5584_v5 = vmul.f32 %v5527_v10, %v5152_v19  ;;  %v5617_v18 = vadd.f32 %v5616_v57, %v5582_v32 }
 0x2dc   : > { %v5659_v33 = vmul.f32 %v5582_v32, %v5150_v44  ;;  %v6440_v60 = vpack.c.bf16 %v5153_v30, %v5152_v19  ;;  %v6435_v52 = vpack.c.bf16 %v5151_v35, %v5150_v44  ;;  %v5583_v63 = vmul.f32 %v5522_v53, %v5151_v35 }
 0x2dd   : > { %v5080_v13 = vsel %vm2769_vm1, %v5077_v43, %v5079_v27  ;;  %v5082_v14 = vsel %vm2769_vm1, %v5079_v27, %v5081_v1  ;;  %v5585_v4 = vmul.f32 %v5532_v58, %v5153_v30  ;;  %v4734_v54 = vadd.f32 %v7369_v61, %v10026_v50  ;;  %v5542_v43 = vpop.permute.xlu1 %5541  ;;  %v10028_v1 = vld [vmem:[#allocation40_spill] sm:$0xff] }
 0x2de   : > { %v5694_v23 = vadd.f32 %v5693_v31, %v5659_v33  ;;  %6517 = vst [vmem:[%s9677_s21 + $0x78] sm:$0xff] %v6440_v60   ;;  %v4732_v49 = vadd.f32 %v7373_v3, %v10027_v26  ;;  %6516 = vst [vmem:[%s9677_s21 + $0x70] sm:$0xff] %v6435_v52   ;;  %v5618_v48 = vadd.f32 %v5617_v18, %v5583_v63  ;;  %v5121_v45 = vsel %vm2769_vm1, %v5083_v41, 0.0 }
 0x2df   : > { %v5660_v36 = vmul.f32 %v5583_v63, %v5151_v35  ;;  %v4735_v16 = vadd.f32 %v7377_v34, %v4699_v47  ;;  %v7381_v40 = vadd.f32 %v9653_v17, %v4266_v42  ;;  %v5661_v7 = vmul.f32 %v5584_v5, %v5152_v19  ;;  %v5547_v42 = vpop.permute.xlu0 %5546 }
 0x2e0   : > { %v5156_v46 = vadd.f32 %v5084_v15, %v4734_v54  ;;  %v5154_v38 = vadd.f32 %v5080_v13, %v4732_v49  ;;  %v5619_v53 = vadd.f32 %v5618_v48, %v5584_v5  ;;  %v5662_v21 = vmul.f32 %v5585_v4, %v5153_v30 }
 0x2e1   : > { %v5695_v0 = vadd.f32 %v5694_v23, %v5660_v36  ;;  %v5157_v6 = vadd.f32 %v5121_v45, %v4735_v16  ;;  %v4733_v55 = vadd.f32 %v7381_v40, %v10028_v1  ;;  %v5552_v47 = vpop.permute.xlu1 %5551 }
 0x2e2   : > { %v5586_v59 = vmul.f32 %v5537_v8, %v5154_v38  ;;  %v5620_v39 = vadd.f32 %v5619_v53, %v5585_v4  ;;  %v5588_v51 = vmul.f32 %v5547_v42, %v5156_v46 }
 0x2e3   : > { %v5696_v2 = vadd.f32 %v5695_v0, %v5661_v7  ;;  %v6450_v20 = vpack.c.bf16 %v5157_v6, %v5156_v46  ;;  %v5155_v17 = vadd.f32 %v5082_v14, %v4733_v55  ;;  %v5589_v9 = vmul.f32 %v5552_v47, %v5157_v6 }
 0x2e4   : > { %v5663_v11 = vmul.f32 %v5586_v59, %v5154_v38  ;;  %v5621_v19 = vadd.f32 %v5620_v39, %v5586_v59  ;;  %v5665_v10 = vmul.f32 %v5588_v51, %v5156_v46 }
 0x2e5   : > { %v5697_v41 = vadd.f32 %v5696_v2, %v5662_v21  ;;  %6519 = vst [vmem:[%s9677_s21 + $0x88] sm:$0xff] %v6450_v20   ;;  %v6445_v25 = vpack.c.bf16 %v5155_v17, %v5154_v38  ;;  %v5587_v37 = vmul.f32 %v5542_v43, %v5155_v17  ;;  %v5666_v57 = vmul.f32 %v5589_v9, %v5157_v6 }
 0x2e7   : > { %v5698_v44 = vadd.f32 %v5697_v41, %v5663_v11  ;;  %6518 = vst [vmem:[%s9677_s21 + $0x80] sm:$0xff] %v6445_v25   ;;  %v5622_v62 = vadd.f32 %v5621_v19, %v5587_v37  ;;  %v5664_v15 = vmul.f32 %v5587_v37, %v5155_v17 }
 0x2e9   : > { %v5623_v22 = vadd.f32 %v5622_v62, %v5588_v51  ;;  %v5699_v12 = vadd.f32 %v5698_v44, %v5664_v15 }
 0x2eb   : > { %v5624_v24 = vadd.f32 %v5623_v22, %v5589_v9  ;;  %v5700_v56 = vadd.f32 %v5699_v12, %v5665_v10 }
 0x2ed   : > { %v5625_v32 = vrot.slane %v5624_v24, 4  ;;  %v5701_v30 = vadd.f32 %v5700_v56, %v5666_v57 }
 0x2ef   : > { %v5626_v27 = vadd.f32 %v5625_v32, %v5624_v24  ;;  %v5702_v29 = vrot.slane %v5701_v30, 4 }
 0x2f1   : > { %v5627_v61 = vrot.slane %v5626_v27, 2  ;;  %v5703_v58 = vadd.f32 %v5702_v29, %v5701_v30 }
 0x2f3   : > { %v5628_v31 = vadd.f32 %v5627_v61, %v5626_v27  ;;  %v5704_v35 = vrot.slane %v5703_v58, 2 }
 0x2f5   : > { %v5629_v3 = vrot.slane %v5628_v31, 1  ;;  %v5705_v28 = vadd.f32 %v5704_v35, %v5703_v58 }
 0x2f7   : > { %v5706_v34 = vrot.slane %v5705_v28, 1  ;;  %v5630_v5 = vadd.f32 %v5629_v3, %v5628_v31 }
 0x2f9   : > { %v5707_v18 = vadd.f32 %v5706_v34, %v5705_v28 }
 0x2fb   : > { %v5709_v33 = vsel %vm5708_vm2, %v5630_v5, %v5707_v18 }
 0x2fc   : > { %5710 = vst [vmem:[%s497_s25] sm:$0x3] %v5709_v33 }
 0x2fd PF: > { %s22_s17 = sadd.s32 1, %s7549_s17  }
 0x2fe   : > { %p19_p4 = scmp.ge.s32.totalorder %s22_s17, 4  }
 0x300   :  { %21 = sbr.rel (!%p19_p4) target bundleno = 1 (0x1), region = 125 }

// kernel: cnn_part_forward.5
= control target key start
LH: loop header
LB: loop body
LE: loop exit
PB: predicated region body
PF: predicated region fallthrough
CT: control target
= control target key end

     0   :  { %s7209_s13 = smov 0   ;;  %s9486_s0 = inlined_call_operand.vmem [shape: bf16[2,288,128], index: 0, kind: input, shape index: {}]   ;;  %s9487_s1 = inlined_call_operand.vmem [shape: bf16[2,288,128], index: 1, kind: input, shape index: {}]   ;;  %s9488_s2 = inlined_call_operand.vmem [shape: bf16[2,288,128], index: 2, kind: input, shape index: {}]   ;;  %s9489_s3 = inlined_call_operand.vmem [shape: f32[2,288,1], index: 3, kind: input, shape index: {}]   ;;  %s9490_s4 = inlined_call_operand.vmem [shape: f32[2,288,1], index: 4, kind: input, shape index: {}]   ;;  %s9491_s5 = inlined_call_operand.vmem [shape: f32[2,288,1], index: 5, kind: input, shape index: {}]   ;;  %s9492_s6 = inlined_call_operand.vmem [shape: f32[1,128], index: 6, kind: input, shape index: {}]   ;;  %s9493_s7 = inlined_call_operand.vmem [shape: f32[1,128], index: 7, kind: input, shape index: {}]   ;;  %s9494_s8 = inlined_call_operand.vmem [shape: bf16[9,128,128], index: 8, kind: input, shape index: {}]   ;;  %s9495_s9 = inlined_call_operand.vmem [shape: f32[1,128], index: 9, kind: input, shape index: {}]   ;;  %s9496_s10 = inlined_call_operand.vmem [shape: f32[2,288,128], index: 10, kind: output, shape index: {}]  }
   0x1 LB: > { %s5494_s14 = sadd.s32 4294967295, %s7151_s13   ;;  %p5498_p0 = scmp.ge.s32.totalorder %s7151_s13, 1  ;;  %s7151_s13 = sphi %s7209_s13, %s20_s13  }
   0x2   : > { %p362_p1 = scmp.lt.s32.totalorder %s7151_s13, 3 }
   0x4   : > { %p363_p2 = pnand %p5498_p0, %p362_p1 }
   0x6   : > { %366 = sbr.rel (%p363_p2) target bundleno = 786 (0x312), region = 60 }
   0xd   : > { %p425_p3 = scmp.lt.s32.totalorder %s5494_s14, 1  ;;  %v7153_v0 = vmov 0   ;;  %v6925_v1 = vld [vmem:[%s9494_s8 + $0x40] sm:$0xff]   ;;  %v6926_v2 = vld [vmem:[%s9494_s8 + $0x48] sm:$0xff]   ;;  %v6927_v3 = vld [vmem:[%s9494_s8 + $0x50] sm:$0xff]   ;;  %vm2119_vm0 = vcmask 1046528  }
   0xe   : > { %6924 = vset.pattern.permute.xlu1 %v7153_v0  ;;  %6923 = vset.pattern.permute.xlu0 %v7153_v0  ;;  %v6928_v8 = vld [vmem:[%s9494_s8 + $0x58] sm:$0xff]   ;;  %v6929_v11 = vld [vmem:[%s9494_s8 + $0x60] sm:$0xff]   ;;  %v6930_v14 = vld [vmem:[%s9494_s8 + $0x68] sm:$0xff]   ;;  %vm2731_vm1 = vcmask 1045504  }
   0xf   : > { %s9584_s14 = smov (!%p425_p3, %s5494_s14), 1  ;;  %6680 = vmatprep.subr.bf16.mxu1 %v6925_v1  ;;  %6212 = vmatprep.subr.bf16.mxu0 %v6925_v1  ;;  %v6931_v21 = vld [vmem:[%s9494_s8 + $0x70] sm:$0xff]   ;;  %v6932_v22 = vld [vmem:[%s9494_s8 + $0x78] sm:$0xff]   ;;  %v7277_v31 = vld [vmem:[%s9494_s8] sm:$0xff]  }
  0x10   : > { %s7226_s19 = smul.u32 288, %s9584_s14  ;;  %6688 = vmatpush3.bf16.msra.mxu1 %v6925_v1  ;;  %6213 = vmatpush3.bf16.msra.mxu0 %v6925_v1  ;;  %v7287_v36 = vld [vmem:[%s9494_s8 + $0x80] sm:$0xff]  }
  0x11   : > { %6681 = vmatprep.subr.bf16.mxu1 %v6926_v2  ;;  %6214 = vmatprep.subr.bf16.mxu0 %v6926_v2 }
  0x12   : > { %s7232_s22 = scalar_lea.vmem %s9489_s3, %s7226_s19  ;;  %s7304_s25 = scalar_lea.vmem %s9490_s4, %s7226_s19 }
  0x13   : > { %v673_v4 = vld [vmem:[%s7232_s22 + $0x90] sm:$0xff]  ;;  %v671_v5 = vld [vmem:[%s7232_s22 + $0x80] sm:$0xff]  ;;  %v674_v6 = vld [vmem:[%s7232_s22 + $0x98] sm:$0xff]  ;;  %s7406_s18 = scalar_lea.vmem %s9491_s5, %s7226_s19 }
  0x14   : > { %783 = vperm.xlu1 %6924, %v673_v4   ;;  %773 = vperm.xlu0 %6923, %v671_v5   ;;  %v672_v7 = vld [vmem:[%s7232_s22 + $0x88] sm:$0xff]  ;;  %v675_v10 = vld [vmem:[%s7232_s22 + $0xa0] sm:$0xff]  ;;  %v678_v15 = vld [vmem:[%s7232_s22 + $0xb8] sm:$0xff] }
  0x15   : > { %6689 = vmatpush3.bf16.msra.mxu1 %v6926_v2  ;;  %6215 = vmatpush3.bf16.msra.mxu0 %v6926_v2  ;;  %v676_v9 = vld [vmem:[%s7232_s22 + $0xa8] sm:$0xff]  ;;  %v655_v13 = vld [vmem:[%s7232_s22] sm:$0xff]  ;;  %v677_v16 = vld [vmem:[%s7232_s22 + $0xb0] sm:$0xff] }
  0x16   : > { %6682 = vmatprep.subr.bf16.mxu1 %v6927_v3  ;;  %6216 = vmatprep.subr.bf16.mxu0 %v6927_v3  ;;  %v656_v12 = vld [vmem:[%s7232_s22 + $0x8] sm:$0xff]  ;;  %v658_v17 = vld [vmem:[%s7232_s22 + $0x18] sm:$0xff]  ;;  %v657_v18 = vld [vmem:[%s7232_s22 + $0x10] sm:$0xff] }
  0x17   : > { %v680_v19 = vld [vmem:[%s7232_s22 + $0xc8] sm:$0xff]  ;;  %v679_v20 = vld [vmem:[%s7232_s22 + $0xc0] sm:$0xff]  ;;  %v682_v25 = vld [vmem:[%s7232_s22 + $0xd8] sm:$0xff] }
  0x18   : > { %788 = vperm.xlu1 %6924, %v674_v6   ;;  %778 = vperm.xlu0 %6923, %v672_v7   ;;  %v660_v23 = vld [vmem:[%s7232_s22 + $0x28] sm:$0xff]  ;;  %v659_v24 = vld [vmem:[%s7232_s22 + $0x20] sm:$0xff]  ;;  %v681_v26 = vld [vmem:[%s7232_s22 + $0xd0] sm:$0xff] }
  0x19   : > { %6690 = vmatpush3.bf16.msra.mxu1 %v6927_v3  ;;  %6217 = vmatpush3.bf16.msra.mxu0 %v6927_v3  ;;  %v662_v27 = vld [vmem:[%s7232_s22 + $0x38] sm:$0xff]  ;;  %v661_v28 = vld [vmem:[%s7232_s22 + $0x30] sm:$0xff]  ;;  %v684_v29 = vld [vmem:[%s7232_s22 + $0xe8] sm:$0xff] }
  0x1a   : > { %6683 = vmatprep.subr.bf16.mxu1 %v6928_v8  ;;  %6218 = vmatprep.subr.bf16.mxu0 %v6928_v8  ;;  %v683_v30 = vld [vmem:[%s7232_s22 + $0xe0] sm:$0xff]  ;;  %v664_v32 = vld [vmem:[%s7232_s22 + $0x48] sm:$0xff]  ;;  %v686_v34 = vld [vmem:[%s7232_s22 + $0xf8] sm:$0xff] }
  0x1b   : > { %v663_v33 = vld [vmem:[%s7232_s22 + $0x40] sm:$0xff]  ;;  %v685_v35 = vld [vmem:[%s7232_s22 + $0xf0] sm:$0xff]  ;;  %v666_v37 = vld [vmem:[%s7232_s22 + $0x58] sm:$0xff] }
  0x1c   : > { %798 = vperm.xlu1 %6924, %v676_v9   ;;  %793 = vperm.xlu0 %6923, %v675_v10   ;;  %v665_v38 = vld [vmem:[%s7232_s22 + $0x50] sm:$0xff]  ;;  %v688_v39 = vld [vmem:[%s7232_s22 + $0x108] sm:$0xff]  ;;  %v687_v40 = vld [vmem:[%s7232_s22 + $0x100] sm:$0xff] }
  0x1d   : > { %6691 = vmatpush3.bf16.msra.mxu1 %v6928_v8  ;;  %6219 = vmatpush3.bf16.msra.mxu0 %v6928_v8  ;;  %v668_v41 = vld [vmem:[%s7232_s22 + $0x68] sm:$0xff]  ;;  %v667_v42 = vld [vmem:[%s7232_s22 + $0x60] sm:$0xff]  ;;  %v690_v43 = vld [vmem:[%s7232_s22 + $0x118] sm:$0xff] }
  0x1e   : > { %6684 = vmatprep.subr.bf16.mxu1 %v6929_v11  ;;  %6220 = vmatprep.subr.bf16.mxu0 %v6929_v11  ;;  %v689_v44 = vld [vmem:[%s7232_s22 + $0x110] sm:$0xff]  ;;  %v670_v45 = vld [vmem:[%s7232_s22 + $0x78] sm:$0xff]  ;;  %v1106_v47 = vld [vmem:[%s7304_s25 + $0x8] sm:$0xff] }
  0x1f   : > { %v669_v46 = vld [vmem:[%s7232_s22 + $0x70] sm:$0xff]  ;;  %v1105_v48 = vld [vmem:[%s7304_s25] sm:$0xff]  ;;  %v1108_v49 = vld [vmem:[%s7304_s25 + $0x18] sm:$0xff]  ;;  %s7327_s22 = smul.u32 144, %s9584_s14 }
  0x20   : > { %698 = vperm.xlu1 %6924, %v656_v12   ;;  %693 = vperm.xlu0 %6923, %v655_v13   ;;  %v1107_v50 = vld [vmem:[%s7304_s25 + $0x10] sm:$0xff]  ;;  %v1110_v51 = vld [vmem:[%s7304_s25 + $0x28] sm:$0xff]  ;;  %v1109_v52 = vld [vmem:[%s7304_s25 + $0x20] sm:$0xff] }
  0x21   : > { %6692 = vmatpush3.bf16.msra.mxu1 %v6929_v11  ;;  %6221 = vmatpush3.bf16.msra.mxu0 %v6929_v11  ;;  %v1112_v53 = vld [vmem:[%s7304_s25 + $0x38] sm:$0xff]  ;;  %v1111_v54 = vld [vmem:[%s7304_s25 + $0x30] sm:$0xff]  ;;  %v1114_v55 = vld [vmem:[%s7304_s25 + $0x48] sm:$0xff]  ;;  %s7335_s28 = scalar_lea.vmem %s9486_s0, %s7327_s22  ;;  %s7719_s17 = scalar_lea.vmem %s9487_s1, %s7327_s22 }
  0x22   : > { %6685 = vmatprep.subr.bf16.mxu1 %v6930_v14  ;;  %6222 = vmatprep.subr.bf16.mxu0 %v6930_v14  ;;  %v1113_v56 = vld [vmem:[%s7304_s25 + $0x40] sm:$0xff]  ;;  %v1116_v57 = vld [vmem:[%s7304_s25 + $0x58] sm:$0xff]  ;;  %v1115_v58 = vld [vmem:[%s7304_s25 + $0x50] sm:$0xff]  ;;  %s8012_s27 = scalar_lea.vmem %s9488_s2, %s7327_s22 }
  0x23   : > { %v1118_v59 = vld [vmem:[%s7304_s25 + $0x68] sm:$0xff]  ;;  %v1117_v60 = vld [vmem:[%s7304_s25 + $0x60] sm:$0xff]  ;;  %v1120_v61 = vld [vmem:[%s7304_s25 + $0x78] sm:$0xff] }
  0x24   : > { %808 = vperm.xlu1 %6924, %v678_v15   ;;  %803 = vperm.xlu0 %6923, %v677_v16   ;;  %v1119_v62 = vld [vmem:[%s7304_s25 + $0x70] sm:$0xff]  ;;  %v1122_v63 = vld [vmem:[%s7304_s25 + $0x88] sm:$0xff]  ;;  %v1121_v0 = vld [vmem:[%s7304_s25 + $0x80] sm:$0xff] }
  0x25   : > { %6693 = vmatpush3.bf16.msra.mxu1 %v6930_v14  ;;  %6223 = vmatpush3.bf16.msra.mxu0 %v6930_v14  ;;  %v1124_v1 = vld [vmem:[%s7304_s25 + $0x98] sm:$0xff]  ;;  %v1123_v2 = vld [vmem:[%s7304_s25 + $0x90] sm:$0xff]  ;;  %v1126_v3 = vld [vmem:[%s7304_s25 + $0xa8] sm:$0xff] }
  0x26   : > { %6686 = vmatprep.subr.bf16.mxu1 %v6931_v21  ;;  %6224 = vmatprep.subr.bf16.mxu0 %v6931_v21  ;;  %v1125_v4 = vld [vmem:[%s7304_s25 + $0xa0] sm:$0xff]  ;;  %v5935_v5 = vld [vmem:[%s7335_s28 + $0x48] sm:$0xff]   ;;  %v1128_v7 = vld [vmem:[%s7304_s25 + $0xb8] sm:$0xff] }
  0x27   : > { %v5934_v6 = vld [vmem:[%s7335_s28 + $0x40] sm:$0xff]   ;;  %v1127_v8 = vld [vmem:[%s7304_s25 + $0xb0] sm:$0xff]  ;;  %v5749_v9 = vunpack.c.l.bf16 %v5935_v5  ;;  %v5750_v12 = vunpack.c.h.bf16 %v5935_v5  ;;  %v1130_v15 = vld [vmem:[%s7304_s25 + $0xc8] sm:$0xff] }
  0x28   : > { %708 = vperm.xlu1 %6924, %v658_v17   ;;  %703 = vperm.xlu0 %6923, %v657_v18   ;;  %v5745_v10 = vunpack.c.l.bf16 %v5934_v6  ;;  %v7344_v11 = vld [vmem:[%s9492_s6] ss:$0 sm:$0xff]  ;;  %v5746_v13 = vunpack.c.h.bf16 %v5934_v6  ;;  %v5936_v14 = vld [vmem:[%s7335_s28 + $0x50] sm:$0xff]   ;;  %v1138_v6 = vld [vmem:[%s7304_s25 + $0x108] sm:$0xff] }
  0x29   : > { %6694 = vmatpush3.bf16.msra.mxu1 %v6931_v21  ;;  %6225 = vmatpush3.bf16.msra.mxu0 %v6931_v21  ;;  %v1129_v16 = vld [vmem:[%s7304_s25 + $0xc0] sm:$0xff]  ;;  %v559_v17 = vmul.f32 %v5749_v9, %v7344_v11 }
  0x2a   : > { %6687 = vmatprep.subr.bf16.mxu1 %v6932_v22  ;;  %6226 = vmatprep.subr.bf16.mxu0 %v6932_v22  ;;  %v557_v18 = vmul.f32 %v5745_v10, %v7344_v11  ;;  %v7355_v21 = vld [vmem:[%s9493_s7] ss:$0 sm:$0xff] }
  0x2b   : > { %v5938_v5 = vld [vmem:[%s7335_s28 + $0x60] sm:$0xff]  }
  0x2c   : > { %818 = vperm.xlu1 %6924, %v680_v19   ;;  %813 = vperm.xlu0 %6923, %v679_v20   ;;  %v5754_v19 = vunpack.c.h.bf16 %v5936_v14  ;;  %v5712_v20 = vld [vmem:[%s7335_s28] sm:$0xff]  }
  0x2d   : > { %6695 = vmatpush3.bf16.msra.mxu1 %v6932_v22  ;;  %6227 = vmatpush3.bf16.msra.mxu0 %v6932_v22  ;;  %v560_v22 = vmul.f32 %v5750_v12, %v7344_v11 }
  0x2e   : > { %6264 = vmatprep.subr.bf16.mxu1 %v7277_v31  ;;  %6316 = vmatprep.subr.bf16.mxu0 %v7287_v36 }
  0x30   : > { %718 = vperm.xlu1 %6924, %v660_v23   ;;  %713 = vperm.xlu0 %6923, %v659_v24   ;;  %v558_v23 = vmul.f32 %v5746_v13, %v7344_v11  ;;  %v5753_v24 = vunpack.c.l.bf16 %v5936_v14 }
  0x34   : > { %828 = vperm.xlu1 %6924, %v682_v25   ;;  %823 = vperm.xlu0 %6923, %v681_v26   ;;  %v1132_v25 = vld [vmem:[%s7304_s25 + $0xd8] sm:$0xff]  ;;  %v1131_v26 = vld [vmem:[%s7304_s25 + $0xd0] sm:$0xff] }
  0x38   : > { %728 = vperm.xlu1 %6924, %v662_v27   ;;  %723 = vperm.xlu0 %6923, %v661_v28   ;;  %v5714_v27 = vunpack.c.h.bf16 %v5712_v20  ;;  %v601_v28 = vadd.f32 %v7355_v21, %v559_v17 }
  0x3c   : > { %838 = vperm.xlu1 %6924, %v684_v29   ;;  %833 = vperm.xlu0 %6923, %v683_v30   ;;  %v599_v29 = vadd.f32 %v7355_v21, %v557_v18  ;;  %v562_v30 = vmul.f32 %v5754_v19, %v7344_v11  ;;  %v5762_v18 = vunpack.c.h.bf16 %v5938_v5  ;;  %v5928_v19 = vld [vmem:[%s7335_s28 + $0x10] sm:$0xff]  }
  0x40   : > { %738 = vperm.xlu1 %6924, %v664_v32   ;;  %733 = vperm.xlu0 %6923, %v663_v33   ;;  %v5713_v32 = vunpack.c.l.bf16 %v5712_v20  ;;  %v5937_v33 = vld [vmem:[%s7335_s28 + $0x58] sm:$0xff]  }
  0x44   : > { %848 = vperm.xlu1 %6924, %v686_v34   ;;  %843 = vperm.xlu0 %6923, %v685_v35   ;;  %v602_v34 = vadd.f32 %v7355_v21, %v560_v22  ;;  %v600_v35 = vadd.f32 %v7355_v21, %v558_v23 }
  0x48   : > { %748 = vperm.xlu1 %6924, %v666_v37   ;;  %743 = vperm.xlu0 %6923, %v665_v38   ;;  %v561_v37 = vmul.f32 %v5753_v24, %v7344_v11  ;;  %v1134_v38 = vld [vmem:[%s7304_s25 + $0xe8] sm:$0xff]  ;;  %v5761_v24 = vunpack.c.l.bf16 %v5938_v5 }
  0x4c   : > { %858 = vperm.xlu1 %6924, %v688_v39   ;;  %853 = vperm.xlu0 %6923, %v687_v40   ;;  %v1133_v39 = vld [vmem:[%s7304_s25 + $0xe0] sm:$0xff]  ;;  %v542_v40 = vmul.f32 %v5714_v27, %v7344_v11  ;;  %v6934_v27 = vld [vmem:[%s9494_s8 + $0x8] sm:$0xff]  }
  0x50   : > { %758 = vperm.xlu1 %6924, %v668_v41   ;;  %753 = vperm.xlu0 %6923, %v667_v42   ;;  %v5758_v41 = vunpack.c.h.bf16 %v5937_v33 }
  0x54   : > { %868 = vperm.xlu1 %6924, %v690_v43   ;;  %863 = vperm.xlu0 %6923, %v689_v44   ;;  %v637_v43 = vmax.f32 %v601_v28, 0.0 }
  0x58   : > { %768 = vperm.xlu1 %6924, %v670_v45   ;;  %763 = vperm.xlu0 %6923, %v669_v46   ;;  %v604_v45 = vadd.f32 %v7355_v21, %v562_v30  ;;  %v541_v46 = vmul.f32 %v5713_v32, %v7344_v11  ;;  %v5722_v30 = vunpack.c.h.bf16 %v5928_v19 }
  0x5c   : > { %1148 = vperm.xlu1 %6924, %v1106_v47   ;;  %1143 = vperm.xlu0 %6923, %v1105_v48   ;;  %v5757_v47 = vunpack.c.l.bf16 %v5937_v33  ;;  %v5927_v48 = vld [vmem:[%s7335_s28 + $0x8] sm:$0xff]  }
  0x60   : > { %1158 = vperm.xlu1 %6924, %v1108_v49   ;;  %1153 = vperm.xlu0 %6923, %v1107_v50   ;;  %v635_v49 = vmax.f32 %v599_v29, 0.0  ;;  %v638_v50 = vmax.f32 %v602_v34, 0.0 }
  0x64   : > { %1168 = vperm.xlu1 %6924, %v1110_v51   ;;  %1163 = vperm.xlu0 %6923, %v1109_v52   ;;  %v636_v51 = vmax.f32 %v600_v35, 0.0  ;;  %v603_v52 = vadd.f32 %v7355_v21, %v561_v37  ;;  %v566_v37 = vmul.f32 %v5762_v18, %v7344_v11  ;;  %v6940_v18 = vld [vmem:[%s9494_s8 + $0x20] sm:$0xff]  }
  0x68   : > { %1178 = vperm.xlu1 %6924, %v1112_v53   ;;  %1173 = vperm.xlu0 %6923, %v1111_v54   ;;  %v1136_v53 = vld [vmem:[%s7304_s25 + $0xf8] sm:$0xff]  ;;  %v1135_v54 = vld [vmem:[%s7304_s25 + $0xf0] sm:$0xff] }
  0x6c   : > { %1188 = vperm.xlu1 %6924, %v1114_v55   ;;  %1183 = vperm.xlu0 %6923, %v1113_v56   ;;  %v584_v55 = vadd.f32 %v7355_v21, %v542_v40  ;;  %v564_v56 = vmul.f32 %v5758_v41, %v7344_v11 }
  0x6e   : > { %v606_v17 = vadd.f32 %v7355_v21, %v564_v56 }
  0x70   : > { %1198 = vperm.xlu1 %6924, %v1116_v57   ;;  %1193 = vperm.xlu0 %6923, %v1115_v58   ;;  %v5718_v57 = vunpack.c.h.bf16 %v5927_v48  ;;  %v5717_v58 = vunpack.c.l.bf16 %v5927_v48  ;;  %v642_v34 = vmax.f32 %v606_v17, 0.0  ;;  %v546_v48 = vmul.f32 %v5722_v30, %v7344_v11  ;;  %v1559_v17 = vld [vmem:[%s7406_s18 + $0x20] sm:$0xff] }
  0x71   : > { %v5930_v30 = vld [vmem:[%s7335_s28 + $0x20] sm:$0xff]  }
  0x72   : > { %v544_v10 = vmul.f32 %v5718_v57, %v7344_v11  ;;  %v543_v12 = vmul.f32 %v5717_v58, %v7344_v11 }
  0x74   : > { %1208 = vperm.xlu1 %6924, %v1118_v59   ;;  %1203 = vperm.xlu0 %6923, %v1117_v60   ;;  %v586_v29 = vadd.f32 %v7355_v21, %v544_v10  ;;  %v585_v35 = vadd.f32 %v7355_v21, %v543_v12 }
  0x76   : > { %v621_v58 = vmax.f32 %v585_v35, 0.0 }
  0x78   : > { %1218 = vperm.xlu1 %6924, %v1120_v61   ;;  %1213 = vperm.xlu0 %6923, %v1119_v62   ;;  %v640_v62 = vmax.f32 %v604_v45, 0.0  ;;  %v1555_v45 = vld [vmem:[%s7406_s18] sm:$0xff] }
  0x7c   : > { %1228 = vperm.xlu1 %6924, %v1122_v63   ;;  %1223 = vperm.xlu0 %6923, %v1121_v0   ;;  %v583_v63 = vadd.f32 %v7355_v21, %v541_v46  ;;  %v563_v0 = vmul.f32 %v5757_v47, %v7344_v11  ;;  %v6936_v46 = vld [vmem:[%s9494_s8 + $0x10] sm:$0xff]  }
  0x7e   : > { %v605_v23 = vadd.f32 %v7355_v21, %v563_v0 }
  0x80   : > { %1238 = vperm.xlu1 %6924, %v1124_v1   ;;  %1233 = vperm.xlu0 %6923, %v1123_v2   ;;  %v641_v41 = vmax.f32 %v605_v23, 0.0 }
  0x84   : > { %1248 = vperm.xlu1 %6924, %v1126_v3   ;;  %1243 = vperm.xlu0 %6923, %v1125_v4   ;;  %v639_v4 = vmax.f32 %v603_v52, 0.0 }
  0x88   : > { %1258 = vperm.xlu1 %6924, %v1128_v7   ;;  %1253 = vperm.xlu0 %6923, %v1127_v8   ;;  %v1137_v7 = vld [vmem:[%s7304_s25 + $0x100] sm:$0xff] }
  0x8c   : > { %1268 = vperm.xlu1 %6924, %v1130_v15   ;;  %1263 = vperm.xlu0 %6923, %v1129_v16   ;;  %v620_v15 = vmax.f32 %v584_v55, 0.0  ;;  %v619_v16 = vmax.f32 %v583_v63, 0.0  ;;  %v5929_v55 = vld [vmem:[%s7335_s28 + $0x18] sm:$0xff]  }
  0x8d   : > { %v5726_v0 = vunpack.c.h.bf16 %v5929_v55 }
  0x90   : > { %1278 = vperm.xlu1 %6924, %v1132_v25   ;;  %1273 = vperm.xlu0 %6923, %v1131_v26   ;;  %v1140_v25 = vld [vmem:[%s7304_s25 + $0x118] sm:$0xff]  ;;  %v1139_v26 = vld [vmem:[%s7304_s25 + $0x110] sm:$0xff] }
  0x93   : > { %v784_v42 = vpop.permute.xlu1 %783  ;;  %v774_v44 = vpop.permute.xlu0 %773 }
  0x94   : > { %1288 = vperm.xlu1 %6924, %v1134_v38   ;;  %1283 = vperm.xlu0 %6923, %v1133_v39   ;;  %v889_v59 = vmul.f32 %v784_v42, %v637_v43  ;;  %v887_v1 = vmul.f32 %v774_v44, %v635_v49  ;;  %v5721_v38 = vunpack.c.l.bf16 %v5928_v19  ;;  %v565_v42 = vmul.f32 %v5761_v24, %v7344_v11  ;;  %v5939_v43 = vld [vmem:[%s7335_s28 + $0x68] sm:$0xff]  }
  0x95   : > { %v1556_v44 = vld [vmem:[%s7406_s18 + $0x8] sm:$0xff] }
  0x96   : > { %v545_v52 = vmul.f32 %v5721_v38, %v7344_v11  ;;  %v1562_v38 = vld [vmem:[%s7406_s18 + $0x38] sm:$0xff] }
  0x97   : > { %v789_v60 = vpop.permute.xlu1 %788  ;;  %v779_v61 = vpop.permute.xlu0 %778 }
  0x98   : > { %v890_v2 = vmul.f32 %v789_v60, %v638_v50  ;;  %v888_v3 = vmul.f32 %v779_v61, %v636_v51  ;;  %1298 = vperm.xlu1 %6924, %v1136_v53   ;;  %1293 = vperm.xlu0 %6923, %v1135_v54   ;;  %v608_v51 = vadd.f32 %v7355_v21, %v566_v37  ;;  %v5766_v53 = vunpack.c.h.bf16 %v5939_v43  ;;  %v1558_v60 = vld [vmem:[%s7406_s18 + $0x18] sm:$0xff]  ;;  %v1557_v61 = vld [vmem:[%s7406_s18 + $0x10] sm:$0xff] }
  0x99   : > { %v5765_v54 = vunpack.c.l.bf16 %v5939_v43  ;;  %v587_v5 = vadd.f32 %v7355_v21, %v545_v52  ;;  %v5730_v43 = vunpack.c.h.bf16 %v5930_v30 }
  0x9a   : > { %v7384_v8 = vpack.c.bf16 %v890_v2, %v889_v59  ;;  %v7386_v9 = vpack.c.bf16 %v888_v3, %v887_v1  ;;  %v607_v59 = vadd.f32 %v7355_v21, %v565_v42  ;;  %v5725_v1 = vunpack.c.l.bf16 %v5929_v55  ;;  %v1564_v55 = vld [vmem:[%s7406_s18 + $0x48] sm:$0xff] }
  0x9b   : > { %v799_v13 = vpop.permute.xlu1 %798  ;;  %v794_v14 = vpop.permute.xlu0 %793 }
  0x9c   : > { %v892_v20 = vmul.f32 %v799_v13, %v640_v62  ;;  %v891_v22 = vmul.f32 %v794_v14, %v639_v4  ;;  %1308 = vperm.xlu1 %6924, %v1138_v6   ;;  %1303 = vperm.xlu0 %6923, %v1137_v7   ;;  %v6938_v62 = vld [vmem:[%s9494_s8 + $0x18] sm:$0xff]   ;;  %v588_v4 = vadd.f32 %v7355_v21, %v546_v48  ;;  %v644_v13 = vmax.f32 %v608_v51, 0.0 }
  0x9d   : > { %6244 = vmatprep.mubr.bf16.mxu1 %v7386_v9  ;;  %v568_v6 = vmul.f32 %v5766_v53, %v7344_v11  ;;  %v567_v7 = vmul.f32 %v5765_v54, %v7344_v11  ;;  %v643_v14 = vmax.f32 %v607_v59, 0.0  ;;  %v5941_v54 = vld [vmem:[%s7335_s28 + $0x78] sm:$0xff]  }
  0x9e   : > { %v7399_v28 = vpack.c.bf16 %v892_v20, %v891_v22  ;;  %6245 = vmatmul.mubr.bf16.vlgmr.msra.gmra.mrb[0].mxu1 %v7384_v8  ;;  %v548_v20 = vmul.f32 %v5726_v0, %v7344_v11  ;;  %v547_v22 = vmul.f32 %v5725_v1, %v7344_v11 }
  0x9f   : > { %v699_v32 = vpop.permute.xlu1 %698  ;;  %v694_v33 = vpop.permute.xlu0 %693  ;;  %6265 = vmatpush3.bf16.msra.mxu1 %v7277_v31  ;;  %v622_v31 = vmax.f32 %v586_v29, 0.0  ;;  %v609_v35 = vadd.f32 %v7355_v21, %v567_v7 }
  0xa0   : > { %v872_v39 = vmul.f32 %v699_v32, %v620_v15  ;;  %v871_v40 = vmul.f32 %v694_v33, %v619_v16  ;;  %1318 = vperm.xlu1 %6924, %v1140_v25   ;;  %1313 = vperm.xlu0 %6923, %v1139_v26   ;;  %v5940_v15 = vld [vmem:[%s7335_s28 + $0x70] sm:$0xff]   ;;  %v1560_v16 = vld [vmem:[%s7406_s18 + $0x28] sm:$0xff]  ;;  %v624_v25 = vmax.f32 %v588_v4, 0.0  ;;  %v623_v26 = vmax.f32 %v587_v5, 0.0  ;;  %v6941_v5 = vld [vmem:[%s9494_s8 + $0x98] sm:$0xff]  }
  0xa1   : > { %6248 = vmatprep.mubr.bf16.mxu1 %v7399_v28  ;;  %6266 = vmatprep.subr.bf16.mxu1 %v6934_v27  ;;  %v5770_v29 = vunpack.c.h.bf16 %v5940_v15  ;;  %v6937_v32 = vld [vmem:[%s9494_s8 + $0x88] sm:$0xff]   ;;  %v5769_v37 = vunpack.c.l.bf16 %v5940_v15  ;;  %v7465_v42 = vadd.f32 %v7355_v21, %v548_v20  ;;  %v6947_v15 = vld [vmem:[%s9494_s8 + $0x38] sm:$0xff]  }
  0xa2   : > { %v7420_v47 = vpack.c.bf16 %v872_v39, %v871_v40  ;;  %v1561_v39 = vld [vmem:[%s7406_s18 + $0x30] sm:$0xff]  ;;  %v6942_v40 = vld [vmem:[%s9494_s8 + $0x28] sm:$0xff]  }
  0xa3   : > { %v809_v49 = vpop.permute.xlu1 %808  ;;  %v804_v50 = vpop.permute.xlu0 %803  ;;  %6267 = vmatpush3.bf16.msra.mxu1 %v6934_v27  ;;  %v610_v27 = vadd.f32 %v7355_v21, %v568_v6  ;;  %v570_v48 = vmul.f32 %v5770_v29, %v7344_v11  ;;  %v569_v53 = vmul.f32 %v5769_v37, %v7344_v11  ;;  %v626_v59 = vmax.f32 %v7465_v42, 0.0  ;;  %v5931_v4 = vld [vmem:[%s7335_s28 + $0x28] sm:$0xff]   ;;  %v6943_v29 = vld [vmem:[%s9494_s8 + $0xa0] sm:$0xff]  }
  0xa4   : > { %v894_v56 = vmul.f32 %v809_v49, %v642_v34  ;;  %v893_v57 = vmul.f32 %v804_v50, %v641_v41  ;;  %1598 = vperm.xlu1 %6924, %v1556_v44   ;;  %1593 = vperm.xlu0 %6923, %v1555_v45   ;;  %v5729_v49 = vunpack.c.l.bf16 %v5930_v30  ;;  %v6939_v50 = vld [vmem:[%s9494_s8 + $0x90] sm:$0xff]   ;;  %v1567_v37 = vld [vmem:[%s7406_s18 + $0x60] sm:$0xff] }
  0xa5   : > { %6228 = vmatprep.mubr.bf16.mxu0 %v7420_v47  ;;  %6268 = vmatprep.subr.bf16.mxu1 %v6936_v46  ;;  %v612_v0 = vadd.f32 %v7355_v21, %v570_v48 }
  0xa6   : > { %v7433_v63 = vpack.c.bf16 %v894_v56, %v893_v57  ;;  %v1563_v56 = vld [vmem:[%s7406_s18 + $0x40] sm:$0xff]  ;;  %v6945_v57 = vld [vmem:[%s9494_s8 + $0x30] sm:$0xff]   ;;  %v549_v1 = vmul.f32 %v5729_v49, %v7344_v11  ;;  %v6944_v49 = vld [vmem:[%s9494_s8 + $0xa8] sm:$0xff]  }
  0xa7   : > { %v709_v2 = vpop.permute.xlu1 %708  ;;  %v704_v3 = vpop.permute.xlu0 %703  ;;  %6269 = vmatpush3.bf16.msra.mxu1 %v6936_v46  ;;  %v646_v46 = vmax.f32 %v610_v27, 0.0  ;;  %v5942_v27 = vld [vmem:[%s7335_s28 + $0x80] sm:$0xff]  }
  0xa8   : > { %v874_v10 = vmul.f32 %v709_v2, %v622_v31  ;;  %v873_v12 = vmul.f32 %v704_v3, %v621_v58  ;;  %1608 = vperm.xlu1 %6924, %v1558_v60   ;;  %1603 = vperm.xlu0 %6923, %v1557_v61   ;;  %v589_v31 = vadd.f32 %v7355_v21, %v547_v22  ;;  %v5774_v2 = vunpack.c.h.bf16 %v5941_v54 }
  0xa9   : > { %6249 = vmatmul.mubr.bf16.gmra.mrb[4].mxu1 %v7433_v63  ;;  %6270 = vmatprep.subr.bf16.mxu1 %v6938_v62  ;;  %v550_v60 = vmul.f32 %v5730_v43, %v7344_v11  ;;  %v5773_v3 = vunpack.c.l.bf16 %v5941_v54  ;;  %v5777_v42 = vunpack.c.l.bf16 %v5942_v27  ;;  %v1570_v54 = vld [vmem:[%s7406_s18 + $0x78] sm:$0xff] }
  0xaa   : > { %v7446_v19 = vpack.c.bf16 %v874_v10, %v873_v12  ;;  %v625_v10 = vmax.f32 %v589_v31, 0.0  ;;  %v611_v12 = vadd.f32 %v7355_v21, %v569_v53  ;;  %v5932_v53 = vld [vmem:[%s7335_s28 + $0x30] sm:$0xff]  }
  0xab   : > { %v819_v23 = vpop.permute.xlu1 %818  ;;  %v814_v24 = vpop.permute.xlu0 %813  ;;  %6271 = vmatpush3.bf16.msra.mxu1 %v6938_v62 }
  0xac   : > { %v896_v33 = vmul.f32 %v819_v23, %v644_v13  ;;  %v895_v34 = vmul.f32 %v814_v24, %v643_v14  ;;  %1618 = vperm.xlu1 %6924, %v1560_v16   ;;  %1613 = vperm.xlu0 %6923, %v1559_v17   ;;  %v1566_v13 = vld [vmem:[%s7406_s18 + $0x58] sm:$0xff]  ;;  %v1565_v14 = vld [vmem:[%s7406_s18 + $0x50] sm:$0xff]  ;;  %v592_v17 = vadd.f32 %v7355_v21, %v550_v60 }
  0xad   : > { %6229 = vmatmul.mubr.bf16.vlgmr.msra.gmra.mrb[0].mxu0 %v7446_v19  ;;  %6272 = vmatprep.subr.bf16.mxu1 %v6940_v18  ;;  %v591_v23 = vadd.f32 %v7355_v21, %v549_v1  ;;  %v572_v24 = vmul.f32 %v5774_v2, %v7344_v11  ;;  %v5738_v2 = vunpack.c.h.bf16 %v5932_v53 }
  0xae   : > { %v7462_v41 = vpack.c.bf16 %v896_v33, %v895_v34  ;;  %6317 = vmatpush3.bf16.msra.mxu0 %v7287_v36  ;;  %v645_v36 = vmax.f32 %v609_v35, 0.0  ;;  %v648_v33 = vmax.f32 %v612_v0, 0.0  ;;  %v647_v34 = vmax.f32 %v611_v12, 0.0  ;;  %v1568_v35 = vld [vmem:[%s7406_s18 + $0x68] sm:$0xff] }
  0xaf   : > { %v719_v44 = vpop.permute.xlu1 %718  ;;  %v714_v45 = vpop.permute.xlu0 %713  ;;  %6318 = vmatprep.subr.bf16.mxu0 %v6937_v32  ;;  %6273 = vmatpush3.bf16.msra.mxu1 %v6940_v18  ;;  %v5734_v18 = vunpack.c.h.bf16 %v5931_v4  ;;  %v1572_v12 = vld [vmem:[%s7406_s18 + $0x88] sm:$0xff] }
  0xb0   : > { %v876_v51 = vmul.f32 %v719_v44, %v624_v25  ;;  %v875_v52 = vmul.f32 %v714_v45, %v623_v26  ;;  %1628 = vperm.xlu1 %6924, %v1562_v38   ;;  %1623 = vperm.xlu0 %6923, %v1561_v39   ;;  %v571_v25 = vmul.f32 %v5773_v3, %v7344_v11  ;;  %v5733_v26 = vunpack.c.l.bf16 %v5931_v4  ;;  %v7514_v38 = vld [vmem:[%s9494_s8 + $0xc0] sm:$0xff]   ;;  %v6946_v3 = vld [vmem:[%s9494_s8 + $0xb0] sm:$0xff]  }
  0xb1   : > { %6252 = vmatprep.mubr.bf16.mxu1 %v7462_v41  ;;  %6274 = vmatprep.subr.bf16.mxu1 %v6942_v40  ;;  %v628_v45 = vmax.f32 %v592_v17, 0.0  ;;  %v552_v31 = vmul.f32 %v5734_v18, %v7344_v11 }
  0xb2   : > { %v7481_v58 = vpack.c.bf16 %v876_v51, %v875_v52  ;;  %6319 = vmatpush3.bf16.msra.mxu0 %v6937_v32  ;;  %v551_v48 = vmul.f32 %v5733_v26, %v7344_v11  ;;  %v627_v52 = vmax.f32 %v591_v23, 0.0  ;;  %v554_v23 = vmul.f32 %v5738_v2, %v7344_v11  ;;  %v6948_v26 = vld [vmem:[%s9494_s8 + $0xb8] sm:$0xff]  }
  0xb3   : > { %v829_v61 = vpop.permute.xlu1 %828  ;;  %v824_v62 = vpop.permute.xlu0 %823  ;;  %6320 = vmatprep.subr.bf16.mxu0 %v6939_v50  ;;  %6275 = vmatpush3.bf16.msra.mxu1 %v6942_v40  ;;  %v5778_v40 = vunpack.c.h.bf16 %v5942_v27  ;;  %v594_v0 = vadd.f32 %v7355_v21, %v552_v31 }
  0xb4   : > { %v898_v6 = vmul.f32 %v829_v61, %v646_v46  ;;  %v897_v7 = vmul.f32 %v824_v62, %v645_v36  ;;  %1638 = vperm.xlu1 %6924, %v1564_v55   ;;  %1633 = vperm.xlu0 %6923, %v1563_v56   ;;  %v614_v46 = vadd.f32 %v7355_v21, %v572_v24  ;;  %v1569_v55 = vld [vmem:[%s7406_s18 + $0x70] sm:$0xff] }
  0xb5   : > { %6232 = vmatprep.mubr.bf16.mxu0 %v7481_v58  ;;  %6276 = vmatprep.subr.bf16.mxu1 %v6945_v57  ;;  %v613_v36 = vadd.f32 %v7355_v21, %v571_v25  ;;  %v593_v1 = vadd.f32 %v7355_v21, %v551_v48 }
  0xb6   : > { %v7498_v16 = vpack.c.bf16 %v898_v6, %v897_v7  ;;  %6321 = vmatpush3.bf16.msra.mxu0 %v6939_v50  ;;  %v650_v62 = vmax.f32 %v614_v46, 0.0  ;;  %v5737_v7 = vunpack.c.l.bf16 %v5932_v53  ;;  %v1576_v53 = vld [vmem:[%s7406_s18 + $0xa8] sm:$0xff] }
  0xb7   : > { %v729_v20 = vpop.permute.xlu1 %728  ;;  %v724_v22 = vpop.permute.xlu0 %723  ;;  %6322 = vmatprep.subr.bf16.mxu0 %v6941_v5  ;;  %6277 = vmatpush3.bf16.msra.mxu1 %v6945_v57  ;;  %v574_v57 = vmul.f32 %v5778_v40, %v7344_v11  ;;  %v649_v6 = vmax.f32 %v613_v36, 0.0 }
  0xb8   : > { %v878_v30 = vmul.f32 %v729_v20, %v626_v59  ;;  %v877_v32 = vmul.f32 %v724_v22, %v625_v10  ;;  %1648 = vperm.xlu1 %6924, %v1566_v13   ;;  %1643 = vperm.xlu0 %6923, %v1565_v14   ;;  %v573_v59 = vmul.f32 %v5777_v42, %v7344_v11  ;;  %v5943_v10 = vld [vmem:[%s7335_s28 + $0x88] sm:$0xff]   ;;  %v1571_v13 = vld [vmem:[%s7406_s18 + $0x80] sm:$0xff]  ;;  %v630_v22 = vmax.f32 %v594_v0, 0.0 }
  0xb9   : > { %6253 = vmatmul.mubr.bf16.gmra.mrb[8].mxu1 %v7498_v16  ;;  %6278 = vmatprep.subr.bf16.mxu1 %v6947_v15  ;;  %v5782_v24 = vunpack.c.h.bf16 %v5943_v10  ;;  %v5781_v25 = vunpack.c.l.bf16 %v5943_v10 }
  0xba   : > { %v7516_v39 = vpack.c.bf16 %v878_v30, %v877_v32  ;;  %6323 = vmatpush3.bf16.msra.mxu0 %v6941_v5  ;;  %v615_v17 = vadd.f32 %v7355_v21, %v573_v59  ;;  %v629_v30 = vmax.f32 %v593_v1, 0.0  ;;  %v553_v32 = vmul.f32 %v5737_v7, %v7344_v11 }
  0xbb   : > { %v839_v43 = vpop.permute.xlu1 %838  ;;  %v834_v44 = vpop.permute.xlu0 %833  ;;  %6324 = vmatprep.subr.bf16.mxu0 %v6943_v29  ;;  %6279 = vmatpush3.bf16.msra.mxu1 %v6947_v15  ;;  %v616_v15 = vadd.f32 %v7355_v21, %v574_v57  ;;  %v576_v46 = vmul.f32 %v5782_v24, %v7344_v11  ;;  %v575_v31 = vmul.f32 %v5781_v25, %v7344_v11 }
  0xbc   : > { %v900_v50 = vmul.f32 %v839_v43, %v648_v33  ;;  %v899_v51 = vmul.f32 %v834_v44, %v647_v34  ;;  %1658 = vperm.xlu1 %6924, %v1568_v35   ;;  %1653 = vperm.xlu0 %6923, %v1567_v37   ;;  %v5933_v33 = vld [vmem:[%s7335_s28 + $0x38] sm:$0xff]   ;;  %v1573_v35 = vld [vmem:[%s7406_s18 + $0x90] sm:$0xff]  ;;  %v651_v42 = vmax.f32 %v615_v17, 0.0 }
  0xbd   : > { %6233 = vmatmul.mubr.bf16.gmra.mrb[4].mxu0 %v7516_v39  ;;  %6368 = vmatprep.subr.bf16.mxu1 %v7514_v38  ;;  %v1574_v34 = vld [vmem:[%s7406_s18 + $0x98] sm:$0xff]  ;;  %v652_v40 = vmax.f32 %v616_v15, 0.0  ;;  %v5742_v48 = vunpack.c.h.bf16 %v5933_v33  ;;  %v5741_v36 = vunpack.c.l.bf16 %v5933_v33 }
  0xbe   : > { %v7530_v56 = vpack.c.bf16 %v900_v50, %v899_v51  ;;  %6325 = vmatpush3.bf16.msra.mxu0 %v6943_v29  ;;  %v1582_v33 = vld [vmem:[%s7406_s18 + $0xd8] sm:$0xff] }
  0xbf   : > { %v739_v60 = vpop.permute.xlu1 %738  ;;  %v734_v61 = vpop.permute.xlu0 %733  ;;  %6326 = vmatprep.subr.bf16.mxu0 %v6944_v49  ;;  %v556_v0 = vmul.f32 %v5742_v48, %v7344_v11 }
  0xc0   : > { %v880_v4 = vmul.f32 %v739_v60, %v628_v45  ;;  %v879_v5 = vmul.f32 %v734_v61, %v627_v52  ;;  %1668 = vperm.xlu1 %6924, %v1570_v54   ;;  %1663 = vperm.xlu0 %6923, %v1569_v55   ;;  %v596_v45 = vadd.f32 %v7355_v21, %v554_v23  ;;  %v1575_v54 = vld [vmem:[%s7406_s18 + $0xa0] sm:$0xff] }
  0xc1   : > { %6256 = vmatprep.mubr.bf16.mxu1 %v7530_v56  ;;  %v595_v52 = vadd.f32 %v7355_v21, %v553_v32  ;;  %v618_v61 = vadd.f32 %v7355_v21, %v576_v46  ;;  %v598_v15 = vadd.f32 %v7355_v21, %v556_v0  ;;  %v1579_v23 = vld [vmem:[%s7406_s18 + $0xc0] sm:$0xff]  ;;  %v1589_v0 = vld [vmem:[%s7406_s18 + $0x110] sm:$0xff] }
  0xc2   : > { %v7543_v14 = vpack.c.bf16 %v880_v4, %v879_v5  ;;  %6327 = vmatpush3.bf16.msra.mxu0 %v6944_v49  ;;  %v7564_v49 = vld [vmem:[%s9494_s8 + $0x100] sm:$0xff]   ;;  %v632_v60 = vmax.f32 %v596_v45, 0.0  ;;  %v555_v4 = vmul.f32 %v5741_v36, %v7344_v11  ;;  %v1578_v5 = vld [vmem:[%s7406_s18 + $0xb8] sm:$0xff]  ;;  %v1584_v45 = vld [vmem:[%s7406_s18 + $0xe8] sm:$0xff] }
  0xc3   : > { %v849_v18 = vpop.permute.xlu1 %848  ;;  %v844_v20 = vpop.permute.xlu0 %843  ;;  %6328 = vmatprep.subr.bf16.mxu0 %v6946_v3  ;;  %v1583_v46 = vld [vmem:[%s7406_s18 + $0xe0] sm:$0xff] }
  0xc4   : > { %v902_v27 = vmul.f32 %v849_v18, %v650_v62  ;;  %v901_v29 = vmul.f32 %v844_v20, %v649_v6  ;;  %1678 = vperm.xlu1 %6924, %v1572_v12   ;;  %1673 = vperm.xlu0 %6923, %v1571_v13   ;;  %v617_v62 = vadd.f32 %v7355_v21, %v575_v31  ;;  %v1577_v6 = vld [vmem:[%s7406_s18 + $0xb0] sm:$0xff]  ;;  %v654_v13 = vmax.f32 %v618_v61, 0.0 }
  0xc5   : > { %6236 = vmatprep.mubr.bf16.mxu0 %v7543_v14  ;;  %v597_v11 = vadd.f32 %v7355_v21, %v555_v4  ;;  %v6958_v4 = vld [vmem:[%s9494_s8 + $0x120] sm:$0xff]  }
  0xc6   : > { %v7556_v37 = vpack.c.bf16 %v902_v27, %v901_v29  ;;  %6329 = vmatpush3.bf16.msra.mxu0 %v6946_v3  ;;  %v631_v3 = vmax.f32 %v595_v52, 0.0  ;;  %v653_v20 = vmax.f32 %v617_v62, 0.0  ;;  %v1585_v52 = vld [vmem:[%s7406_s18 + $0xf0] sm:$0xff]  ;;  %v1590_v62 = vld [vmem:[%s7406_s18 + $0x118] sm:$0xff] }
  0xc7   : > { %v749_v43 = vpop.permute.xlu1 %748  ;;  %v744_v44 = vpop.permute.xlu0 %743  ;;  %6330 = vmatprep.subr.bf16.mxu0 %v6948_v26  ;;  %v633_v32 = vmax.f32 %v597_v11, 0.0 }
  0xc8   : > { %v882_v50 = vmul.f32 %v749_v43, %v630_v22  ;;  %v881_v51 = vmul.f32 %v744_v44, %v629_v30  ;;  %1688 = vperm.xlu1 %6924, %v1574_v34   ;;  %1683 = vperm.xlu0 %6923, %v1573_v35   ;;  %v1580_v22 = vld [vmem:[%s7406_s18 + $0xc8] sm:$0xff]  ;;  %v634_v30 = vmax.f32 %v598_v15, 0.0  ;;  %v1581_v34 = vld [vmem:[%s7406_s18 + $0xd0] sm:$0xff] }
  0xc9   : > { %6257 = vmatmul.mubr.bf16.gmra.mrb[12].mxu1 %v7556_v37  ;;  %v6962_v15 = vld [vmem:[%s9494_s8 + $0x130] sm:$0xff]  }
  0xca   : > { %v7570_v55 = vpack.c.bf16 %v882_v50, %v881_v51  ;;  %6331 = vmatpush3.bf16.msra.mxu0 %v6948_v26  ;;  %v1586_v51 = vld [vmem:[%s7406_s18 + $0xf8] sm:$0xff] }
  0xcb   : > { %v859_v57 = vpop.permute.xlu1 %858  ;;  %v854_v59 = vpop.permute.xlu0 %853  ;;  %6420 = vmatprep.subr.bf16.mxu0 %v7564_v49 }
  0xcc   : > { %v904_v1 = vmul.f32 %v859_v57, %v652_v40  ;;  %v903_v2 = vmul.f32 %v854_v59, %v651_v42  ;;  %1698 = vperm.xlu1 %6924, %v1576_v53   ;;  %1693 = vperm.xlu0 %6923, %v1575_v54   ;;  %v6951_v54 = vld [vmem:[%s9494_s8 + $0xc8] sm:$0xff]   ;;  %v1587_v59 = vld [vmem:[%s7406_s18 + $0x100] sm:$0xff] }
  0xcd   : > { %6237 = vmatmul.mubr.bf16.gmra.mrb[8].mxu0 %v7570_v55  ;;  %v1588_v57 = vld [vmem:[%s7406_s18 + $0x108] sm:$0xff] }
  0xce   : > { %v7580_v7 = vpack.c.bf16 %v904_v1, %v903_v2  ;;  %v6953_v1 = vld [vmem:[%s9494_s8 + $0xd0] sm:$0xff]  }
  0xcf   : > { %v759_v10 = vpop.permute.xlu1 %758  ;;  %v754_v12 = vpop.permute.xlu0 %753 }
  0xd0   : > { %v884_v17 = vmul.f32 %v759_v10, %v632_v60  ;;  %v883_v18 = vmul.f32 %v754_v12, %v631_v3  ;;  %1708 = vperm.xlu1 %6924, %v1578_v5   ;;  %1703 = vperm.xlu0 %6923, %v1577_v6   ;;  %v6957_v3 = vld [vmem:[%s9494_s8 + $0xe0] sm:$0xff]   ;;  %v6959_v6 = vld [vmem:[%s9494_s8 + $0xe8] sm:$0xff]  }
  0xd1   : > { %6260 = vmatprep.mubr.bf16.mxu1 %v7580_v7 }
  0xd2   : > { %v7587_v24 = vpack.c.bf16 %v884_v17, %v883_v18  ;;  %v6963_v17 = vld [vmem:[%s9494_s8 + $0xf8] sm:$0xff]  }
  0xd3   : > { %v869_v25 = vpop.permute.xlu1 %868  ;;  %v864_v26 = vpop.permute.xlu0 %863 }
  0xd4   : > { %v906_v27 = vmul.f32 %v869_v25, %v654_v13  ;;  %v905_v29 = vmul.f32 %v864_v26, %v653_v20  ;;  %1718 = vperm.xlu1 %6924, %v1580_v22   ;;  %1713 = vperm.xlu0 %6923, %v1579_v23   ;;  %v7695_v20 = vld [vmem:[%s9494_s8 + $0x140] sm:$0xff]  }
  0xd5   : > { %6240 = vmatprep.mubr.bf16.mxu0 %v7587_v24  ;;  %v7704_v22 = vld [vmem:[%s9494_s8 + $0x1c0] sm:$0xff]  }
  0xd6   : > { %v7592_v35 = vpack.c.bf16 %v906_v27, %v905_v29  ;;  %v5784_v25 = vld [vmem:[%s7719_s17] sm:$0xff]  }
  0xd7   : > { %v769_v40 = vpop.permute.xlu1 %768  ;;  %v764_v42 = vpop.permute.xlu0 %763  ;;  %v5785_v27 = vunpack.c.l.bf16 %v5784_v25 }
  0xd8   : > { %v886_v43 = vmul.f32 %v769_v40, %v634_v30  ;;  %v885_v44 = vmul.f32 %v764_v42, %v633_v32  ;;  %1728 = vperm.xlu1 %6924, %v1582_v33   ;;  %1723 = vperm.xlu0 %6923, %v1581_v34   ;;  %v5944_v30 = vld [vmem:[%s7719_s17 + $0x8] sm:$0xff]   ;;  %v7739_v32 = vld [vmem:[%s9492_s6] ss:$0 sm:$0xff]  ;;  %v5945_v40 = vld [vmem:[%s7719_s17 + $0x10] sm:$0xff]  }
  0xd9   : > { %6261 = vmatmul.mubr.bf16.gmra.mrb[16].mxu1 %v7592_v35  ;;  %v997_v34 = vmul.f32 %v7739_v32, %v5785_v27  ;;  %v5794_v42 = vunpack.c.h.bf16 %v5945_v40 }
  0xda   : > { %v7597_v31 = vpack.c.bf16 %v886_v43, %v885_v44  ;;  %6280 = vmatprep.mubr.bf16.mxu1 %v7420_v47  ;;  %v5793_v43 = vunpack.c.l.bf16 %v5945_v40 }
  0xdb   : > { %v7600_v48 = vpop.permute.xlu1 %1148  ;;  %v7602_v50 = vpop.permute.xlu0 %1143 }
  0xdc   : > { %1738 = vperm.xlu1 %6924, %v1584_v45   ;;  %1733 = vperm.xlu0 %6923, %v1583_v46   ;;  %v1033_v45 = vadd.f32 %v7355_v21, %v997_v34 }
  0xdd   : > { %6241 = vmatmul.mubr.bf16.gmra.mrb[12].mxu0 %v7597_v31 }
  0xde   : > { %6332 = vmatprep.mubr.bf16.mxu0 %v7420_v47  ;;  %v6952_v47 = vld [vmem:[%s9494_s8 + $0x108] sm:$0xff]  }
  0xdf   : > { %v7608_v36 = vpop.permute.xlu1 %1158  ;;  %v7610_v53 = vpop.permute.xlu0 %1153 }
  0xe0   : > { %1748 = vperm.xlu1 %6924, %v1586_v51   ;;  %1743 = vperm.xlu0 %6923, %v1585_v52  }
  0xe1   : > { %6281 = vmatmul.mubr.bf16.vlgmr.msra.gmra.mrb[20].mxu1 %v7446_v19 }
  0xe2   : > { %6284 = vmatprep.mubr.bf16.mxu1 %v7481_v58  ;;  %6369 = vmatpush3.bf16.msra.mxu1 %v7514_v38  ;;  %v6954_v38 = vld [vmem:[%s9494_s8 + $0x110] sm:$0xff]  }
  0xe3   : > { %6370 = vmatprep.subr.bf16.mxu1 %v6951_v54  ;;  %v7623_v60 = vpop.permute.xlu1 %1168  ;;  %v7625_v61 = vpop.permute.xlu0 %1163 }
  0xe4   : > { %1758 = vperm.xlu1 %6924, %v1588_v57   ;;  %1753 = vperm.xlu0 %6923, %v1587_v59   ;;  %v1001_v57 = vmul.f32 %v7739_v32, %v5793_v43  ;;  %v5946_v59 = vld [vmem:[%s7719_s17 + $0x18] sm:$0xff]  }
  0xe5   : > { %6333 = vmatmul.mubr.bf16.vlgmr.msra.gmra.mrb[16].mxu0 %v7446_v19  ;;  %v6955_v19 = vld [vmem:[%s9494_s8 + $0xd8] sm:$0xff]  }
  0xe6   : > { %6421 = vmatpush3.bf16.msra.mxu0 %v7564_v49  ;;  %6336 = vmatprep.mubr.bf16.mxu0 %v7481_v58  ;;  %v6956_v49 = vld [vmem:[%s9494_s8 + $0x118] sm:$0xff]  }
  0xe7   : > { %6371 = vmatpush3.bf16.msra.mxu1 %v6951_v54  ;;  %6422 = vmatprep.subr.bf16.mxu0 %v6952_v47  ;;  %v7642_v2 = vpop.permute.xlu1 %1178  ;;  %v7645_v58 = vpop.permute.xlu0 %1173  ;;  %v1002_v54 = vmul.f32 %v7739_v32, %v5794_v42 }
  0xe8   : > { %1768 = vperm.xlu1 %6924, %v1590_v62   ;;  %1763 = vperm.xlu0 %6923, %v1589_v0   ;;  %v1069_v62 = vmax.f32 %v1033_v45, 0.0 }
  0xe9   : > { %6285 = vmatmul.mubr.bf16.gmra.mrb[24].mxu1 %v7516_v39  ;;  %6372 = vmatprep.subr.bf16.mxu1 %v6953_v1 }
  0xea   : > { %6288 = vmatprep.mubr.bf16.mxu1 %v7543_v14  ;;  %6423 = vmatpush3.bf16.msra.mxu0 %v6952_v47 }
  0xeb   : > { %6373 = vmatpush3.bf16.msra.mxu1 %v6953_v1  ;;  %6424 = vmatprep.subr.bf16.mxu0 %v6954_v38  ;;  %v7658_v5 = vpop.permute.xlu1 %1188  ;;  %v7663_v10 = vpop.permute.xlu0 %1183 }
  0xec   : > { %6374 = vmatprep.subr.bf16.mxu1 %v6955_v19 }
  0xed   : > { %6337 = vmatmul.mubr.bf16.gmra.mrb[20].mxu0 %v7516_v39  ;;  %v6960_v39 = vld [vmem:[%s9494_s8 + $0x128] sm:$0xff]  }
  0xee   : > { %6340 = vmatprep.mubr.bf16.mxu0 %v7543_v14  ;;  %6425 = vmatpush3.bf16.msra.mxu0 %v6954_v38  ;;  %v6961_v14 = vld [vmem:[%s9494_s8 + $0xf0] sm:$0xff]  }
  0xef   : > { %6375 = vmatpush3.bf16.msra.mxu1 %v6955_v19  ;;  %6426 = vmatprep.subr.bf16.mxu0 %v6956_v49  ;;  %v7674_v12 = vpop.permute.xlu1 %1198  ;;  %v7677_v13 = vpop.permute.xlu0 %1193 }
  0xf0   : > { %6376 = vmatprep.subr.bf16.mxu1 %v6957_v3 }
  0xf1   : > { %6289 = vmatmul.mubr.bf16.gmra.mrb[28].mxu1 %v7570_v55 }
  0xf2   : > { %6292 = vmatprep.mubr.bf16.mxu1 %v7587_v24  ;;  %6427 = vmatpush3.bf16.msra.mxu0 %v6956_v49 }
  0xf3   : > { %6377 = vmatpush3.bf16.msra.mxu1 %v6957_v3  ;;  %6428 = vmatprep.subr.bf16.mxu0 %v6958_v4  ;;  %v7690_v18 = vpop.permute.xlu1 %1208  ;;  %v7697_v11 = vpop.permute.xlu0 %1203  ;;  %v5797_v3 = vunpack.c.l.bf16 %v5946_v59 }
  0xf4   : > { %6378 = vmatprep.subr.bf16.mxu1 %v6959_v6 }
  0xf5   : > { %6341 = vmatmul.mubr.bf16.gmra.mrb[24].mxu0 %v7570_v55  ;;  %v6964_v55 = vld [vmem:[%s9494_s8 + $0x138] sm:$0xff]   ;;  %v1003_v27 = vmul.f32 %v7739_v32, %v5797_v3 }
  0xf6   : > { %6344 = vmatprep.mubr.bf16.mxu0 %v7587_v24  ;;  %6429 = vmatpush3.bf16.msra.mxu0 %v6958_v4 }
  0xf7   : > { %6379 = vmatpush3.bf16.msra.mxu1 %v6959_v6  ;;  %6430 = vmatprep.subr.bf16.mxu0 %v6960_v39  ;;  %v7708_v23 = vpop.permute.xlu1 %1218  ;;  %v7711_v24 = vpop.permute.xlu0 %1213 }
  0xf8   : > { %6380 = vmatprep.subr.bf16.mxu1 %v6961_v14 }
  0xf9   : > { %6293 = vmatmul.mubr.bf16.gmra.mrb[32].mxu1 %v7597_v31 }
  0xfa   : > { %6296 = vmatprep.mubr.bf16.mxu1 %v7386_v9  ;;  %6431 = vmatpush3.bf16.msra.mxu0 %v6960_v39  ;;  %v1321_v39 = vmul.f32 %v7602_v50, %v1069_v62 }
  0xfb   : > { %6381 = vmatpush3.bf16.msra.mxu1 %v6961_v14  ;;  %6432 = vmatprep.subr.bf16.mxu0 %v6962_v15  ;;  %v7725_v26 = vpop.permute.xlu0 %1223 }
  0xfc   : > { %6382 = vmatprep.subr.bf16.mxu1 %v6963_v17 }
  0xfd   : > { %6345 = vmatmul.mubr.bf16.gmra.mrb[28].mxu0 %v7597_v31 }
  0xfe   : > { %6348 = vmatprep.mubr.bf16.mxu0 %v7386_v9  ;;  %6433 = vmatpush3.bf16.msra.mxu0 %v6962_v15  ;;  %v7722_v9 = vpop.permute.xlu1 %1228 }
  0xff   : > { %6383 = vmatpush3.bf16.msra.mxu1 %v6963_v17  ;;  %6434 = vmatprep.subr.bf16.mxu0 %v6964_v55 }
 0x100   : > { %6472 = vmatprep.subr.bf16.mxu1 %v7695_v20 }
 0x101   : > { %6297 = vmatmul.mubr.bf16.gmra.mrb[36].mxu1 %v7384_v8 }
 0x102   : > { %6300 = vmatprep.mubr.bf16.mxu1 %v7399_v28  ;;  %6435 = vmatpush3.bf16.msra.mxu0 %v6964_v55  ;;  %v7730_v29 = vpop.permute.xlu1 %1238 }
 0x103   : > { %6576 = vmatprep.subr.bf16.mxu0 %v7704_v22 }
 0x105   : > { %6349 = vmatmul.mubr.bf16.gmra.mrb[32].mxu0 %v7384_v8  ;;  %v5786_v8 = vunpack.c.h.bf16 %v5784_v25 }
 0x106   : > { %6352 = vmatprep.mubr.bf16.mxu0 %v7399_v28  ;;  %v7734_v28 = vpop.permute.xlu0 %1233  ;;  %v7748_v46 = vpop.permute.xlu1 %1248 }
 0x107   : > { %v998_v33 = vmul.f32 %v7739_v32, %v5786_v8 }
 0x109   : > { %6301 = vmatmul.mubr.bf16.gmra.mrb[40].mxu1 %v7433_v63  ;;  %v1034_v44 = vadd.f32 %v7355_v21, %v998_v33  ;;  %v5947_v21 = vld [vmem:[%s7719_s17 + $0x20] sm:$0xff]   ;;  %v5949_v33 = vld [vmem:[%s7719_s17 + $0x30] sm:$0xff]  }
 0x10a   : > { %6304 = vmatprep.mubr.bf16.mxu1 %v7462_v41  ;;  %v7750_v31 = vpop.permute.xlu0 %1243  ;;  %v7767_v1 = vpop.permute.xlu1 %1258  ;;  %v5802_v14 = vunpack.c.h.bf16 %v5947_v21  ;;  %v5801_v15 = vunpack.c.l.bf16 %v5947_v21  ;;  %v5810_v43 = vunpack.c.h.bf16 %v5949_v33 }
 0x10b   : > { %v1070_v47 = vmax.f32 %v1034_v44, 0.0 }
 0x10c   : > { %v1006_v50 = vmul.f32 %v7739_v32, %v5802_v14  ;;  %v1005_v40 = vmul.f32 %v7739_v32, %v5801_v15 }
 0x10d   : > { %6353 = vmatmul.mubr.bf16.gmra.mrb[36].mxu0 %v7433_v63  ;;  %v5790_v63 = vunpack.c.h.bf16 %v5944_v30  ;;  %v1322_v6 = vmul.f32 %v7600_v48, %v1070_v47 }
 0x10e   : > { %6356 = vmatprep.mubr.bf16.mxu0 %v7462_v41  ;;  %v5789_v41 = vunpack.c.l.bf16 %v5944_v30  ;;  %v7773_v4 = vpop.permute.xlu0 %1253  ;;  %v5948_v30 = vld [vmem:[%s7719_s17 + $0x28] sm:$0xff]  }
 0x10f   : > { %v1000_v51 = vmul.f32 %v7739_v32, %v5790_v63  ;;  %v7783_v34 = vpack.c.bf16 %v1322_v6, %v1321_v39  ;;  %v7787_v63 = vpop.permute.xlu1 %1268  ;;  %v5805_v42 = vunpack.c.l.bf16 %v5948_v30  ;;  %v5951_v39 = vld [vmem:[%s7719_s17 + $0x40] sm:$0xff]  }
 0x110   : > { %v999_v52 = vmul.f32 %v7739_v32, %v5789_v41  ;;  %v5806_v41 = vunpack.c.h.bf16 %v5948_v30 }
 0x111   : > { %6305 = vmatmul.mubr.bf16.gmra.mrb[44].mxu1 %v7498_v16 }
 0x112   : > { %6308 = vmatprep.mubr.bf16.mxu1 %v7530_v56  ;;  %v1008_v62 = vmul.f32 %v7739_v32, %v5806_v41 }
 0x113   : > { %v7805_v21 = vpop.permute.xlu1 %1278 }
 0x115   : > { %6357 = vmatmul.mubr.bf16.gmra.mrb[40].mxu0 %v7498_v16  ;;  %v7764_v16 = vld [vmem:[%s9493_s7] ss:$0 sm:$0xff] }
 0x116   : > { %6360 = vmatprep.mubr.bf16.mxu0 %v7530_v56  ;;  %v1036_v0 = vadd.f32 %v7764_v16, %v1000_v51  ;;  %v5798_v56 = vunpack.c.h.bf16 %v5946_v59  ;;  %v1035_v38 = vadd.f32 %v7764_v16, %v999_v52  ;;  %v1038_v19 = vadd.f32 %v7764_v16, %v1002_v54 }
 0x117   : > { %v1037_v49 = vadd.f32 %v7764_v16, %v1001_v57  ;;  %v1039_v51 = vadd.f32 %v7764_v16, %v1003_v27  ;;  %v5809_v52 = vunpack.c.l.bf16 %v5949_v33  ;;  %v1042_v59 = vadd.f32 %v7764_v16, %v1006_v50  ;;  %v6968_v33 = vld [vmem:[%s9494_s8 + $0x1c8] sm:$0xff]  }
 0x118   : > { %v1004_v17 = vmul.f32 %v7739_v32, %v5798_v56  ;;  %v1072_v55 = vmax.f32 %v1036_v0, 0.0  ;;  %v1071_v25 = vmax.f32 %v1035_v38, 0.0  ;;  %v1074_v8 = vmax.f32 %v1038_v19, 0.0  ;;  %v5950_v38 = vld [vmem:[%s7719_s17 + $0x38] sm:$0xff]  }
 0x119   : > { %6309 = vmatmul.mubr.bf16.gmra.mrb[48].mxu1 %v7556_v37  ;;  %v1073_v48 = vmax.f32 %v1037_v49, 0.0  ;;  %v1041_v47 = vadd.f32 %v7764_v16, %v1005_v40  ;;  %v1075_v0 = vmax.f32 %v1039_v51, 0.0  ;;  %v1009_v56 = vmul.f32 %v7739_v32, %v5809_v52  ;;  %v5953_v51 = vld [vmem:[%s7719_s17 + $0x50] sm:$0xff]  }
 0x11a   : > { %6312 = vmatprep.mubr.bf16.mxu1 %v7580_v7  ;;  %v1324_v44 = vmul.f32 %v7608_v36, %v1072_v55  ;;  %v1323_v45 = vmul.f32 %v7610_v53, %v1071_v25  ;;  %v1326_v54 = vmul.f32 %v7623_v60, %v1074_v8  ;;  %v1007_v36 = vmul.f32 %v7739_v32, %v5805_v42  ;;  %v6970_v52 = vld [vmem:[%s9494_s8 + $0x1d0] sm:$0xff]  }
 0x11b   : > { %v1325_v57 = vmul.f32 %v7625_v61, %v1073_v48  ;;  %v1010_v53 = vmul.f32 %v7739_v32, %v5810_v43  ;;  %v1078_v3 = vmax.f32 %v1042_v59, 0.0  ;;  %v1077_v6 = vmax.f32 %v1041_v47, 0.0  ;;  %v6971_v47 = vld [vmem:[%s9494_s8 + $0x158] sm:$0xff]  }
 0x11c   : > { %v7808_v60 = vpack.c.bf16 %v1324_v44, %v1323_v45  ;;  %v1044_v14 = vadd.f32 %v7764_v16, %v1008_v62  ;;  %v1043_v15 = vadd.f32 %v7764_v16, %v1007_v36  ;;  %v5814_v55 = vunpack.c.h.bf16 %v5950_v38  ;;  %v5952_v45 = vld [vmem:[%s7719_s17 + $0x48] sm:$0xff]  }
 0x11d   : > { %6361 = vmatmul.mubr.bf16.gmra.mrb[44].mxu0 %v7556_v37  ;;  %v7789_v37 = vpop.permute.xlu0 %1263  ;;  %v7817_v49 = vpack.c.bf16 %v1326_v54, %v1325_v57  ;;  %v1327_v8 = vmul.f32 %v7645_v58, %v1075_v0  ;;  %v1045_v27 = vadd.f32 %v7764_v16, %v1009_v56  ;;  %v5813_v30 = vunpack.c.l.bf16 %v5950_v38 }
 0x11e   : > { %6364 = vmatprep.mubr.bf16.mxu0 %v7580_v7  ;;  %v1040_v7 = vadd.f32 %v7764_v16, %v1004_v17  ;;  %v1046_v17 = vadd.f32 %v7764_v16, %v1010_v53  ;;  %v1330_v48 = vmul.f32 %v7658_v5, %v1078_v3  ;;  %v1329_v50 = vmul.f32 %v7663_v10, %v1077_v6 }
 0x11f   : > { %v5818_v40 = vunpack.c.h.bf16 %v5951_v39  ;;  %v1080_v41 = vmax.f32 %v1044_v14, 0.0  ;;  %v1012_v42 = vmul.f32 %v7739_v32, %v5814_v55  ;;  %v1079_v10 = vmax.f32 %v1043_v15, 0.0 }
 0x120   : > { %v1076_v61 = vmax.f32 %v1040_v7, 0.0  ;;  %v7834_v7 = vpop.permute.xlu1 %1288  ;;  %v1082_v43 = vmax.f32 %v1046_v17, 0.0  ;;  %v1011_v44 = vmul.f32 %v7739_v32, %v5813_v30  ;;  %v7853_v54 = vpack.c.bf16 %v1330_v48, %v1329_v50  ;;  %v6973_v17 = vld [vmem:[%s9494_s8 + $0x160] sm:$0xff]  }
 0x121   : > { %6313 = vmatmul.mubr.bf16.gmra.mrb[52].mxu1 %v7592_v35  ;;  %v7812_v19 = vpop.permute.xlu0 %1273  ;;  %v1081_v57 = vmax.f32 %v1045_v27, 0.0  ;;  %v1048_v62 = vadd.f32 %v7764_v16, %v1012_v42  ;;  %v5822_v36 = vunpack.c.h.bf16 %v5952_v45  ;;  %v5821_v53 = vunpack.c.l.bf16 %v5952_v45  ;;  %v6974_v48 = vld [vmem:[%s9494_s8 + $0x1e0] sm:$0xff]  }
 0x122   : > { %6384 = vmatprep.mubr.bf16.mxu1 %v7783_v34  ;;  %v1328_v25 = vmul.f32 %v7642_v2, %v1076_v61  ;;  %v6969_v2 = vld [vmem:[%s9494_s8 + $0x150] sm:$0xff]   ;;  %v5826_v61 = vunpack.c.h.bf16 %v5953_v51  ;;  %v1332_v56 = vmul.f32 %v7674_v12, %v1080_v41  ;;  %v1331_v38 = vmul.f32 %v7677_v13, %v1079_v10  ;;  %v6975_v41 = vld [vmem:[%s9494_s8 + $0x168] sm:$0xff]   ;;  %v5955_v42 = vld [vmem:[%s7719_s17 + $0x60] sm:$0xff]  }
 0x123   : > { %v5825_v3 = vunpack.c.l.bf16 %v5953_v51  ;;  %v1334_v14 = vmul.f32 %v7690_v18, %v1082_v43  ;;  %v1333_v15 = vmul.f32 %v7697_v11, %v1081_v57  ;;  %v1016_v55 = vmul.f32 %v7739_v32, %v5822_v36 }
 0x124   : > { %v7845_v5 = vpack.c.bf16 %v1328_v25, %v1327_v8  ;;  %v7862_v0 = vpop.permute.xlu1 %1298  ;;  %v1015_v25 = vmul.f32 %v7739_v32, %v5821_v53  ;;  %v1018_v18 = vmul.f32 %v7739_v32, %v5826_v61  ;;  %v7885_v11 = vpack.c.bf16 %v1332_v56, %v1331_v38  ;;  %v5956_v38 = vld [vmem:[%s7719_s17 + $0x68] sm:$0xff]  }
 0x125   : > { %6365 = vmatmul.mubr.bf16.gmra.mrb[48].mxu0 %v7592_v35  ;;  %v6967_v35 = vld [vmem:[%s9494_s8 + $0x148] sm:$0xff]   ;;  %v7839_v58 = vpop.permute.xlu0 %1283  ;;  %v1084_v8 = vmax.f32 %v1048_v62, 0.0  ;;  %v1017_v30 = vmul.f32 %v7739_v32, %v5825_v3  ;;  %v7892_v50 = vpack.c.bf16 %v1334_v14, %v1333_v15  ;;  %v1052_v43 = vadd.f32 %v7764_v16, %v1016_v55  ;;  %v5957_v14 = vld [vmem:[%s7719_s17 + $0x70] sm:$0xff]  }
 0x126   : > { %6436 = vmatprep.mubr.bf16.mxu0 %v7783_v34  ;;  %v1054_v45 = vadd.f32 %v7764_v16, %v1018_v18  ;;  %v5834_v53 = vunpack.c.h.bf16 %v5955_v42  ;;  %v5833_v61 = vunpack.c.l.bf16 %v5955_v42  ;;  %v6979_v18 = vld [vmem:[%s9494_s8 + $0x178] sm:$0xff]  }
 0x127   : > { %v6980_v42 = vld [vmem:[%s9494_s8 + $0x1f8] sm:$0xff]  }
 0x128   : > { %v1090_v3 = vmax.f32 %v1054_v45, 0.0  ;;  %v1022_v55 = vmul.f32 %v7739_v32, %v5834_v53 }
 0x129   : > { %6385 = vmatmul.mubr.bf16.vlgmr.msra.gmra.mrb[20].mxu1 %v7808_v60  ;;  %v7868_v6 = vpop.permute.xlu0 %1293 }
 0x12a   : > { %6388 = vmatprep.mubr.bf16.mxu1 %v7817_v49  ;;  %6473 = vmatpush3.bf16.msra.mxu1 %v7695_v20  ;;  %v5817_v20 = vunpack.c.l.bf16 %v5951_v39  ;;  %v6972_v39 = vld [vmem:[%s9494_s8 + $0x1d8] sm:$0xff]   ;;  %v1058_v45 = vadd.f32 %v7764_v16, %v1022_v55 }
 0x12b   : > { %6474 = vmatprep.subr.bf16.mxu1 %v6967_v35 }
 0x12c   : > { %v1013_v59 = vmul.f32 %v7739_v32, %v5817_v20 }
 0x12d   : > { %6437 = vmatmul.mubr.bf16.vlgmr.msra.gmra.mrb[52].mxu0 %v7808_v60  ;;  %v7900_v10 = vpop.permute.xlu0 %1303 }
 0x12e   : > { %6577 = vmatpush3.bf16.msra.mxu0 %v7704_v22  ;;  %6440 = vmatprep.mubr.bf16.mxu0 %v7817_v49  ;;  %v1014_v22 = vmul.f32 %v7739_v32, %v5818_v40  ;;  %v1049_v13 = vadd.f32 %v7764_v16, %v1013_v59 }
 0x12f   : > { %6475 = vmatpush3.bf16.msra.mxu1 %v6967_v35  ;;  %6578 = vmatprep.subr.bf16.mxu0 %v6968_v33  ;;  %v1047_v35 = vadd.f32 %v7764_v16, %v1011_v44  ;;  %v1051_v44 = vadd.f32 %v7764_v16, %v1015_v25  ;;  %v1021_v25 = vmul.f32 %v7739_v32, %v5833_v61  ;;  %v1094_v61 = vmax.f32 %v1058_v45, 0.0 }
 0x130   : > { %6476 = vmatprep.subr.bf16.mxu1 %v6969_v2  ;;  %v1050_v12 = vadd.f32 %v7764_v16, %v1014_v22  ;;  %v1085_v20 = vmax.f32 %v1049_v13, 0.0  ;;  %v1053_v22 = vadd.f32 %v7764_v16, %v1017_v30  ;;  %v5837_v30 = vunpack.c.l.bf16 %v5956_v38 }
 0x131   : > { %6389 = vmatmul.mubr.bf16.gmra.mrb[24].mxu1 %v7845_v5  ;;  %v1083_v27 = vmax.f32 %v1047_v35, 0.0  ;;  %v7928_v15 = vpop.permute.xlu0 %1313 }
 0x132   : > { %6392 = vmatprep.mubr.bf16.mxu1 %v7853_v54  ;;  %6579 = vmatpush3.bf16.msra.mxu0 %v6968_v33  ;;  %v5954_v33 = vld [vmem:[%s7719_s17 + $0x58] sm:$0xff]   ;;  %v1086_v40 = vmax.f32 %v1050_v12, 0.0  ;;  %v1337_v36 = vmul.f32 %v7725_v26, %v1085_v20  ;;  %v1087_v26 = vmax.f32 %v1051_v44, 0.0  ;;  %v6978_v12 = vld [vmem:[%s9494_s8 + $0x1f0] sm:$0xff]  }
 0x133   : > { %6477 = vmatpush3.bf16.msra.mxu1 %v6969_v2  ;;  %6580 = vmatprep.subr.bf16.mxu0 %v6970_v52  ;;  %v7894_v2 = vpop.permute.xlu1 %1308  ;;  %v5830_v51 = vunpack.c.h.bf16 %v5954_v33  ;;  %v1335_v57 = vmul.f32 %v7711_v24, %v1083_v27  ;;  %v5829_v59 = vunpack.c.l.bf16 %v5954_v33  ;;  %v1088_v24 = vmax.f32 %v1052_v43, 0.0 }
 0x134   : > { %6478 = vmatprep.subr.bf16.mxu1 %v6971_v47  ;;  %v1338_v62 = vmul.f32 %v7722_v9, %v1086_v40  ;;  %v5842_v33 = vunpack.c.h.bf16 %v5957_v14  ;;  %v1339_v20 = vmul.f32 %v7734_v28, %v1087_v26  ;;  %v1342_v43 = vmul.f32 %v7748_v46, %v1090_v3 }
 0x135   : > { %6441 = vmatmul.mubr.bf16.gmra.mrb[56].mxu0 %v7845_v5  ;;  %v1020_v56 = vmul.f32 %v7739_v32, %v5830_v51  ;;  %v1340_v40 = vmul.f32 %v7730_v29, %v1088_v24  ;;  %v1057_v51 = vadd.f32 %v7764_v16, %v1021_v25  ;;  %v7958_v29 = vld [vmem:[%s9494_s8 + $0x180] sm:$0xff]   ;;  %v1023_v46 = vmul.f32 %v7739_v32, %v5837_v30  ;;  %v5958_v24 = vld [vmem:[%s7719_s17 + $0x78] sm:$0xff]  }
 0x136   : > { %6444 = vmatprep.mubr.bf16.mxu0 %v7853_v54  ;;  %6581 = vmatpush3.bf16.msra.mxu0 %v6970_v52  ;;  %v1336_v52 = vmul.f32 %v7708_v23, %v1084_v8  ;;  %v6977_v23 = vld [vmem:[%s9494_s8 + $0x170] sm:$0xff]   ;;  %v7933_v13 = vpack.c.bf16 %v1338_v62, %v1337_v36  ;;  %v5838_v8 = vunpack.c.h.bf16 %v5956_v38  ;;  %v7973_v36 = vld [vmem:[%s9494_s8 + $0x200] sm:$0xff]   ;;  %v5846_v55 = vunpack.c.h.bf16 %v5958_v24 }
 0x137   : > { %6479 = vmatpush3.bf16.msra.mxu1 %v6971_v47  ;;  %6582 = vmatprep.subr.bf16.mxu0 %v6972_v39  ;;  %v6976_v47 = vld [vmem:[%s9494_s8 + $0x1e8] sm:$0xff]   ;;  %v7921_v35 = vpop.permute.xlu1 %1318  ;;  %v1056_v27 = vadd.f32 %v7764_v16, %v1020_v56  ;;  %v5959_v38 = vld [vmem:[%s7719_s17 + $0x80] sm:$0xff]   ;;  %v1059_v26 = vadd.f32 %v7764_v16, %v1023_v46  ;;  %v5845_v25 = vunpack.c.l.bf16 %v5958_v24 }
 0x138   : > { %6480 = vmatprep.subr.bf16.mxu1 %v6973_v17  ;;  %v7924_v9 = vpack.c.bf16 %v1336_v52, %v1335_v57  ;;  %v1024_v28 = vmul.f32 %v7739_v32, %v5838_v8  ;;  %v7961_v57 = vpop.permute.xlu0 %1593  ;;  %v1346_v8 = vmul.f32 %v7787_v63, %v1094_v61  ;;  %v5850_v30 = vunpack.c.h.bf16 %v5959_v38 }
 0x139   : > { %6393 = vmatmul.mubr.bf16.gmra.mrb[28].mxu1 %v7885_v11 }
 0x13a   : > { %6396 = vmatprep.mubr.bf16.mxu1 %v7892_v50  ;;  %6583 = vmatpush3.bf16.msra.mxu0 %v6972_v39  ;;  %v1019_v39 = vmul.f32 %v7739_v32, %v5829_v59  ;;  %v7968_v59 = vpack.c.bf16 %v1340_v40, %v1339_v20  ;;  %v1060_v56 = vadd.f32 %v7764_v16, %v1024_v28 }
 0x13b   : > { %6481 = vmatpush3.bf16.msra.mxu1 %v6973_v17  ;;  %6584 = vmatprep.subr.bf16.mxu0 %v6974_v48  ;;  %v1089_v17 = vmax.f32 %v1053_v22, 0.0  ;;  %v7953_v52 = vpop.permute.xlu1 %1598  ;;  %v1028_v20 = vmul.f32 %v7739_v32, %v5846_v55 }
 0x13c   : > { %6482 = vmatprep.subr.bf16.mxu1 %v6975_v41 }
 0x13d   : > { %6445 = vmatmul.mubr.bf16.gmra.mrb[60].mxu0 %v7885_v11  ;;  %v1341_v44 = vmul.f32 %v7750_v31, %v1089_v17  ;;  %v1026_v31 = vmul.f32 %v7739_v32, %v5842_v33  ;;  %v5849_v33 = vunpack.c.l.bf16 %v5959_v38  ;;  %v5856_v38 = vld [vmem:[%s8012_s27] sm:$0xff]  }
 0x13e   : > { %6448 = vmatprep.mubr.bf16.mxu0 %v7892_v50  ;;  %6585 = vmatpush3.bf16.msra.mxu0 %v6974_v48  ;;  %v5841_v48 = vunpack.c.l.bf16 %v5957_v14 }
 0x13f   : > { %6483 = vmatpush3.bf16.msra.mxu1 %v6975_v41  ;;  %6586 = vmatprep.subr.bf16.mxu0 %v6976_v47  ;;  %v1055_v41 = vadd.f32 %v7764_v16, %v1019_v39  ;;  %v7975_v53 = vpack.c.bf16 %v1342_v43, %v1341_v44  ;;  %v1062_v3 = vadd.f32 %v7764_v16, %v1026_v31  ;;  %v7985_v14 = vpop.permute.xlu1 %1608 }
 0x140   : > { %6484 = vmatprep.subr.bf16.mxu1 %v6977_v23  ;;  %v1025_v22 = vmul.f32 %v7739_v32, %v5841_v48  ;;  %v1096_v48 = vmax.f32 %v1060_v56, 0.0  ;;  %v1030_v43 = vmul.f32 %v7739_v32, %v5850_v30  ;;  %v1029_v44 = vmul.f32 %v7739_v32, %v5849_v33 }
 0x141   : > { %6397 = vmatmul.mubr.bf16.gmra.mrb[32].mxu1 %v7924_v9  ;;  %v1091_v62 = vmax.f32 %v1055_v41, 0.0  ;;  %v1098_v40 = vmax.f32 %v1062_v3, 0.0  ;;  %v1027_v41 = vmul.f32 %v7739_v32, %v5845_v25 }
 0x142   : > { %6400 = vmatprep.mubr.bf16.mxu1 %v7933_v13  ;;  %6587 = vmatpush3.bf16.msra.mxu0 %v6976_v47  ;;  %v1092_v47 = vmax.f32 %v1056_v27, 0.0  ;;  %v1061_v39 = vadd.f32 %v7764_v16, %v1025_v22  ;;  %v1348_v31 = vmul.f32 %v7805_v21, %v1096_v48  ;;  %v1066_v24 = vadd.f32 %v7764_v16, %v1030_v43  ;;  %v5962_v43 = vld [vmem:[%s8012_s27 + $0x10] sm:$0xff]  }
 0x143   : > { %6485 = vmatpush3.bf16.msra.mxu1 %v6977_v23  ;;  %6588 = vmatprep.subr.bf16.mxu0 %v6978_v12  ;;  %v1093_v23 = vmax.f32 %v1057_v51, 0.0  ;;  %v1343_v17 = vmul.f32 %v7773_v4, %v1091_v62  ;;  %v8006_v45 = vpop.permute.xlu1 %1618  ;;  %v1063_v62 = vadd.f32 %v7764_v16, %v1027_v41  ;;  %v1350_v61 = vmul.f32 %v7834_v7, %v1098_v40 }
 0x144   : > { %6486 = vmatprep.subr.bf16.mxu1 %v6979_v18  ;;  %v1065_v56 = vadd.f32 %v7764_v16, %v1029_v44  ;;  %v1102_v55 = vmax.f32 %v1066_v24, 0.0 }
 0x145   : > { %6449 = vmatmul.mubr.bf16.gmra.mrb[64].mxu0 %v7924_v9  ;;  %v1345_v27 = vmul.f32 %v7789_v37, %v1093_v23  ;;  %v1097_v37 = vmax.f32 %v1061_v39, 0.0  ;;  %v1099_v39 = vmax.f32 %v1063_v62, 0.0  ;;  %v5865_v62 = vunpack.c.l.bf16 %v5962_v43 }
 0x146   : > { %6452 = vmatprep.mubr.bf16.mxu0 %v7933_v13  ;;  %6589 = vmatpush3.bf16.msra.mxu0 %v6978_v12  ;;  %v1344_v12 = vmul.f32 %v7767_v1, %v1092_v47  ;;  %v1095_v1 = vmax.f32 %v1059_v26, 0.0  ;;  %v1064_v47 = vadd.f32 %v7764_v16, %v1028_v20  ;;  %v1101_v25 = vmax.f32 %v1065_v56, 0.0 }
 0x147   : > { %6487 = vmatpush3.bf16.msra.mxu1 %v6979_v18  ;;  %6590 = vmatprep.subr.bf16.mxu0 %v6980_v42  ;;  %v7990_v18 = vpop.permute.xlu0 %1603  ;;  %v8002_v63 = vpack.c.bf16 %v1346_v8, %v1345_v27  ;;  %v1349_v23 = vmul.f32 %v7839_v58, %v1097_v37  ;;  %v5858_v58 = vunpack.c.h.bf16 %v5856_v38  ;;  %v5857_v8 = vunpack.c.l.bf16 %v5856_v38 }
 0x148   : > { %6524 = vmatprep.subr.bf16.mxu1 %v7958_v29  ;;  %v7997_v4 = vpack.c.bf16 %v1344_v12, %v1343_v17  ;;  %v1347_v22 = vmul.f32 %v7812_v19, %v1095_v1  ;;  %v8030_v19 = vpop.permute.xlu1 %1628  ;;  %v1100_v7 = vmax.f32 %v1064_v47, 0.0  ;;  %v1351_v48 = vmul.f32 %v7868_v6, %v1099_v39 }
 0x149   : > { %6401 = vmatmul.mubr.bf16.gmra.mrb[36].mxu1 %v7968_v59  ;;  %v8037_v17 = vpack.c.bf16 %v1350_v61, %v1349_v23  ;;  %v1448_v1 = vmul.f32 %v7739_v32, %v5858_v58  ;;  %v1354_v40 = vmul.f32 %v7894_v2, %v1102_v55  ;;  %v1353_v20 = vmul.f32 %v7900_v10, %v1101_v25  ;;  %v5963_v61 = vld [vmem:[%s8012_s27 + $0x18] sm:$0xff]   ;;  %v5964_v23 = vld [vmem:[%s8012_s27 + $0x20] sm:$0xff]  }
 0x14a   : > { %6404 = vmatprep.mubr.bf16.mxu1 %v7975_v53  ;;  %6591 = vmatpush3.bf16.msra.mxu0 %v6980_v42  ;;  %v5960_v42 = vld [vmem:[%s7719_s17 + $0x88] sm:$0xff]   ;;  %v8033_v3 = vpack.c.bf16 %v1348_v31, %v1347_v22  ;;  %v1352_v33 = vmul.f32 %v7862_v0, %v1100_v7  ;;  %v1447_v41 = vmul.f32 %v7739_v32, %v5857_v8  ;;  %v5866_v47 = vunpack.c.h.bf16 %v5962_v43  ;;  %s9238_s17 = scalar_lea.vmem %s9496_s10, %s7226_s19 }
 0x14b   : > { %6628 = vmatprep.subr.bf16.mxu0 %v7973_v36  ;;  %v8014_v51 = vpop.permute.xlu0 %1613  ;;  %v5854_v28 = vunpack.c.h.bf16 %v5960_v42  ;;  %v5853_v46 = vunpack.c.l.bf16 %v5960_v42  ;;  %v5961_v42 = vld [vmem:[%s8012_s27 + $0x8] sm:$0xff]   ;;  %v1484_v2 = vadd.f32 %v7764_v16, %v1448_v1  ;;  %v8060_v31 = vpack.c.bf16 %v1354_v40, %v1353_v20 }
 0x14c   : > { %v8050_v37 = vpop.permute.xlu1 %1638  ;;  %v5862_v10 = vunpack.c.h.bf16 %v5961_v42  ;;  %v1483_v22 = vadd.f32 %v7764_v16, %v1447_v41  ;;  %v1452_v55 = vmul.f32 %v7739_v32, %v5866_v47  ;;  %v1451_v25 = vmul.f32 %v7739_v32, %v5865_v62  ;;  %v5965_v1 = vld [vmem:[%s8012_s27 + $0x28] sm:$0xff]  }
 0x14d   : > { %6453 = vmatmul.mubr.bf16.gmra.mrb[68].mxu0 %v7968_v59  ;;  %v1032_v26 = vmul.f32 %v7739_v32, %v5854_v28  ;;  %v1031_v21 = vmul.f32 %v7739_v32, %v5853_v46  ;;  %v8057_v28 = vpack.c.bf16 %v1352_v33, %v1351_v48  ;;  %v5861_v46 = vunpack.c.l.bf16 %v5961_v42 }
 0x14e   : > { %6456 = vmatprep.mubr.bf16.mxu0 %v7975_v53  ;;  %v1520_v39 = vmax.f32 %v1484_v2, 0.0  ;;  %v1519_v58 = vmax.f32 %v1483_v22, 0.0  ;;  %v5870_v8 = vunpack.c.h.bf16 %v5963_v61  ;;  %v1488_v41 = vadd.f32 %v7764_v16, %v1452_v55 }
 0x14f   : > { %v8035_v12 = vpop.permute.xlu0 %1623  ;;  %v1068_v27 = vadd.f32 %v7764_v16, %v1032_v26  ;;  %v1067_v30 = vadd.f32 %v7764_v16, %v1031_v21  ;;  %v1450_v26 = vmul.f32 %v7739_v32, %v5862_v10  ;;  %v1449_v21 = vmul.f32 %v7739_v32, %v5861_v46 }
 0x150   : > { %v8066_v24 = vpop.permute.xlu1 %1648  ;;  %v1772_v40 = vmul.f32 %v7953_v52, %v1520_v39  ;;  %v1771_v20 = vmul.f32 %v7961_v57, %v1519_v58  ;;  %v1487_v42 = vadd.f32 %v7764_v16, %v1451_v25  ;;  %v5878_v57 = vunpack.c.h.bf16 %v5965_v1 }
 0x151   : > { %6405 = vmatmul.mubr.bf16.gmra.mrb[40].mxu1 %v7997_v4  ;;  %v1104_v0 = vmax.f32 %v1068_v27, 0.0  ;;  %v1103_v6 = vmax.f32 %v1067_v30, 0.0  ;;  %v5869_v27 = vunpack.c.l.bf16 %v5963_v61  ;;  %v5874_v30 = vunpack.c.h.bf16 %v5964_v23 }
 0x152   : > { %6408 = vmatprep.mubr.bf16.mxu1 %v8002_v63  ;;  %v1486_v33 = vadd.f32 %v7764_v16, %v1450_v26  ;;  %v1485_v48 = vadd.f32 %v7764_v16, %v1449_v21  ;;  %v5877_v22 = vunpack.c.l.bf16 %v5965_v1  ;;  %v5967_v26 = vld [vmem:[%s8012_s27 + $0x38] sm:$0xff]   ;;  %v1458_v55 = vmul.f32 %v7739_v32, %v5878_v57 }
 0x153   : > { %v8053_v44 = vpop.permute.xlu0 %1633  ;;  %v1356_v56 = vmul.f32 %v7921_v35, %v1104_v0  ;;  %v1355_v38 = vmul.f32 %v7928_v15, %v1103_v6  ;;  %v5873_v35 = vunpack.c.l.bf16 %v5964_v23  ;;  %v5966_v0 = vld [vmem:[%s8012_s27 + $0x30] sm:$0xff]   ;;  %v1454_v6 = vmul.f32 %v7739_v32, %v5870_v8 }
 0x154   : > { %v8088_v43 = vpop.permute.xlu1 %1658  ;;  %v1453_v2 = vmul.f32 %v7739_v32, %v5869_v27  ;;  %v1456_v10 = vmul.f32 %v7739_v32, %v5874_v30  ;;  %v1522_v47 = vmax.f32 %v1486_v33, 0.0  ;;  %v1521_v62 = vmax.f32 %v1485_v48, 0.0  ;;  %v8116_v30 = vld [vmem:[%s8012_s27 + $0x40] sm:$0xff]  }
 0x155   : > { %6457 = vmatmul.mubr.bf16.gmra.mrb[72].mxu0 %v7997_v4  ;;  %v8079_v15 = vpack.c.bf16 %v1356_v56, %v1355_v38  ;;  %v1455_v52 = vmul.f32 %v7739_v32, %v5873_v35  ;;  %v5882_v61 = vunpack.c.h.bf16 %v5966_v0  ;;  %v8099_v23 = vpack.c.bf16 %v1772_v40, %v1771_v20  ;;  %v6983_v20 = vld [vmem:[%s9494_s8 + $0x188] sm:$0xff]  }
 0x156   : > { %6460 = vmatprep.mubr.bf16.mxu0 %v8002_v63  ;;  %v1524_v56 = vmax.f32 %v1488_v41, 0.0  ;;  %v1523_v38 = vmax.f32 %v1487_v42, 0.0  ;;  %v1490_v21 = vadd.f32 %v7764_v16, %v1454_v6  ;;  %v1489_v39 = vadd.f32 %v7764_v16, %v1453_v2 }
 0x157   : > { %v8073_v7 = vpop.permute.xlu0 %1643  ;;  %v8105_v58 = vadd.f32 %v7764_v16, %v1456_v10  ;;  %v1457_v25 = vmul.f32 %v7739_v32, %v5877_v22  ;;  %v5881_v8 = vunpack.c.l.bf16 %v5966_v0  ;;  %v1774_v35 = vmul.f32 %v7985_v14, %v1522_v47 }
 0x158   : > { %v8113_v27 = vpop.permute.xlu1 %1668  ;;  %v1773_v33 = vmul.f32 %v7990_v18, %v1521_v62  ;;  %v1460_v48 = vmul.f32 %v7739_v32, %v5882_v61  ;;  %v5886_v1 = vunpack.c.h.bf16 %v5967_v26  ;;  %v1776_v41 = vmul.f32 %v8006_v45, %v1524_v56  ;;  %v6984_v56 = vld [vmem:[%s9494_s8 + $0x208] sm:$0xff]  }
 0x159   : > { %6409 = vmatmul.mubr.bf16.gmra.mrb[44].mxu1 %v8033_v3  ;;  %v1775_v42 = vmul.f32 %v8014_v51, %v1523_v38  ;;  %v5885_v0 = vunpack.c.l.bf16 %v5967_v26  ;;  %v1526_v6 = vmax.f32 %v1490_v21, 0.0  ;;  %v1525_v2 = vmax.f32 %v1489_v39, 0.0 }
 0x15a   : > { %6412 = vmatprep.mubr.bf16.mxu1 %v8037_v17  ;;  %v1528_v14 = vmax.f32 %v8105_v58, 0.0  ;;  %v5890_v18 = vunpack.c.h.bf16 %v8116_v30  ;;  %v8134_v57 = vadd.f32 %v7764_v16, %v1458_v55  ;;  %v8137_v22 = vadd.f32 %v7764_v16, %v1457_v25  ;;  %v6985_v58 = vld [vmem:[%s9494_s8 + $0x190] sm:$0xff]  }
 0x15b   : > { %v8094_v46 = vpop.permute.xlu0 %1653  ;;  %v1459_v45 = vmul.f32 %v7739_v32, %v5881_v8  ;;  %v8144_v47 = vpack.c.bf16 %v1774_v35, %v1773_v33  ;;  %v1462_v62 = vmul.f32 %v7739_v32, %v5886_v1  ;;  %v8155_v38 = vpack.c.bf16 %v1776_v41, %v1775_v42  ;;  %v8175_v1 = vld [vmem:[%s8012_s27 + $0x48] sm:$0xff]  }
 0x15c   : > { %v5889_v25 = vunpack.c.l.bf16 %v8116_v30  ;;  %v1778_v33 = vmul.f32 %v8030_v19, %v1526_v6  ;;  %v1777_v30 = vmul.f32 %v8035_v12, %v1525_v2 }
 0x15d   : > { %6461 = vmatmul.mubr.bf16.gmra.mrb[76].mxu0 %v8033_v3  ;;  %v8199_v12 = vadd.f32 %v7764_v16, %v1462_v62 }
 0x15e   : > { %6464 = vmatprep.mubr.bf16.mxu0 %v8037_v17 }
 0x15f   : > { %v8122_v40 = vpop.permute.xlu0 %1663 }
 0x161   : > { %6413 = vmatmul.mubr.bf16.gmra.mrb[48].mxu1 %v8057_v28 }
 0x162   : > { %6416 = vmatprep.mubr.bf16.mxu1 %v8060_v31 }
 0x163   : > { %v8165_v55 = vpop.permute.xlu0 %1673 }
 0x165   : > { %6465 = vmatmul.mubr.bf16.gmra.mrb[80].mxu0 %v8057_v28 }
 0x166   : > { %6468 = vmatprep.mubr.bf16.mxu0 %v8060_v31 }
 0x169   : > { %6417 = vmatmul.mubr.bf16.gmra.mrb[52].mxu1 %v8079_v15 }
 0x16a   : > { %6488 = vmatprep.mubr.bf16.mxu1 %v7783_v34  ;;  %v8109_v34 = vadd.f32 %v7764_v16, %v1455_v52 }
 0x16c   : > { %v1527_v52 = vmax.f32 %v8109_v34, 0.0  ;;  %v1464_v34 = vmul.f32 %v7739_v32, %v5890_v18 }
 0x16d   : > { %6469 = vmatmul.mubr.bf16.gmra.mrb[84].mxu0 %v8079_v15 }
 0x16e   : > { %6592 = vmatprep.mubr.bf16.mxu0 %v8099_v23  ;;  %v1779_v6 = vmul.f32 %v8053_v44, %v1527_v52  ;;  %v8208_v18 = vadd.f32 %v7764_v16, %v1464_v34  ;;  %v5894_v44 = vunpack.c.h.bf16 %v8175_v1  ;;  %v1530_v52 = vmax.f32 %v8134_v57, 0.0  ;;  %v6989_v34 = vld [vmem:[%s9494_s8 + $0x1a0] sm:$0xff]  }
 0x171   : > { %v6246_v10 = vpop.f32.mrb[0].mxu1  ;;  %6489 = vmatmul.mubr.bf16.vlgmr.msra.gmra.mrb[56].mxu1 %v7808_v60  ;;  %v8147_v60 = vadd.f32 %v7764_v16, %v1460_v48  ;;  %v8172_v48 = vadd.f32 %v7764_v16, %v1459_v45  ;;  %v1529_v45 = vmax.f32 %v8137_v22, 0.0 }
 0x172   : > { %v8140_v51 = vpop.f32.mrb[1].mxu1  ;;  %6492 = vmatprep.mubr.bf16.mxu1 %v7817_v49  ;;  %6525 = vmatpush3.bf16.msra.mxu1 %v7958_v29  ;;  %v1461_v49 = vmul.f32 %v7739_v32, %v5885_v0  ;;  %v8158_v29 = vpop.permute.xlu1 %1678  ;;  %v2155_v26 = vrot.slane %v6246_v10, 1  ;;  %v6986_v0 = vld [vmem:[%s9494_s8 + $0x210] sm:$0xff]   ;;  %v8216_v10 = vpack.c.bf16 %v1778_v33, %v1777_v30  ;;  %v5893_v33 = vunpack.c.l.bf16 %v8175_v1 }
 0x173   : > { %v8150_v61 = vpop.f32.mrb[2].mxu1  ;;  %6526 = vmatprep.subr.bf16.mxu1 %v6983_v20  ;;  %v9497_v8 = vrot.slane %v8140_v51, 1  ;;  %v1532_v62 = vmax.f32 %v8147_v60, 0.0 }
 0x174   : > { %v9498_v21 = vrot.slane %v8150_v61, 1  ;;  %v2007_v39 = vpop.f32.mrb[3].mxu1  ;;  %v8202_v2 = vadd.f32 %v7764_v16, %v1461_v49  ;;  %v8221_v49 = vpop.permute.xlu0 %1683 }
 0x175   : > { %v2153_v35 = vrot.slane %v2007_v39, 1  ;;  %6593 = vmatmul.mubr.bf16.vlgmr.msra.gmra.mrb[88].mxu0 %v8144_v47  ;;  %v8225_v39 = vld [vmem:[%s8012_s27 + $0x58] sm:$0xff]  }
 0x176   : > { %v8180_v41 = vsel %vm2119_vm0, %v2155_v26, %v9498_v21  ;;  %6629 = vmatpush3.bf16.msra.mxu0 %v7973_v36  ;;  %6596 = vmatprep.mubr.bf16.mxu0 %v8155_v38  ;;  %v1780_v36 = vmul.f32 %v8050_v37, %v1528_v14  ;;  %v1463_v37 = vmul.f32 %v7739_v32, %v5889_v25  ;;  %v8213_v14 = vpop.permute.xlu1 %1688 }
 0x177   : > { %v8188_v19 = vsel %vm2119_vm0, %v9497_v8, %v2153_v35  ;;  %v8191_v42 = vsel %vm2119_vm0, %v2153_v35, %v2155_v26  ;;  %6527 = vmatpush3.bf16.msra.mxu1 %v6983_v20  ;;  %6630 = vmatprep.subr.bf16.mxu0 %v6984_v56  ;;  %v6987_v20 = vld [vmem:[%s9494_s8 + $0x198] sm:$0xff]   ;;  %v5970_v26 = vld [vmem:[%s8012_s27 + $0x50] sm:$0xff]   ;;  %v1466_v35 = vmul.f32 %v7739_v32, %v5894_v44 }
 0x178   : > { %9505 = vst [vmem:[#allocation2_spill] sm:$0xff] %v8191_v42  ;;  %6528 = vmatprep.subr.bf16.mxu1 %v6985_v58  ;;  %v8240_v25 = vadd.f32 %v7764_v16, %v1463_v37  ;;  %v5898_v30 = vunpack.c.h.bf16 %v5970_v26  ;;  %v1782_v37 = vmul.f32 %v8066_v24, %v1530_v52  ;;  %v9506_v24 = vrot.slane %v8150_v61, 1 }
 0x179   : > { %6493 = vmatmul.mubr.bf16.gmra.mrb[60].mxu1 %v7845_v5  ;;  %v6988_v5 = vld [vmem:[%s9494_s8 + $0x218] sm:$0xff]   ;;  %v5901_v61 = vunpack.c.l.bf16 %v8225_v39 }
 0x17a   : > { %6496 = vmatprep.mubr.bf16.mxu1 %v7853_v54  ;;  %6631 = vmatpush3.bf16.msra.mxu0 %v6984_v56  ;;  %v8230_v54 = vpack.c.bf16 %v1780_v36, %v1779_v6  ;;  %v1531_v56 = vmax.f32 %v8172_v48, 0.0  ;;  %v5897_v36 = vunpack.c.l.bf16 %v5970_v26  ;;  %v5902_v6 = vunpack.c.h.bf16 %v8225_v39  ;;  %v6990_v26 = vld [vmem:[%s9494_s8 + $0x220] sm:$0xff]   ;;  %v8257_v42 = vpop.permute.xlu1 %1698 }
 0x17b   : > { %6529 = vmatpush3.bf16.msra.mxu1 %v6985_v58  ;;  %6632 = vmatprep.subr.bf16.mxu0 %v6986_v0  ;;  %v1781_v58 = vmul.f32 %v8073_v7, %v1529_v45  ;;  %v8268_v45 = vadd.f32 %v7764_v16, %v1466_v35  ;;  %v8284_v16 = vld [vmem:[%s9492_s6] ss:$0 sm:$0xff] }
 0x17c   : > { %v6250_v60 = vpop.f32.mrb[4].mxu1  ;;  %6530 = vmatprep.subr.bf16.mxu1 %v6987_v20  ;;  %v1783_v21 = vmul.f32 %v8094_v46, %v1531_v56  ;;  %v8271_v46 = vpop.permute.xlu0 %1693 }
 0x17d   : > { %v2020_v48 = vpop.f32.mrb[5].mxu1  ;;  %6597 = vmatmul.mubr.bf16.gmra.mrb[92].mxu0 %v8216_v10  ;;  %v2163_v44 = vrot.slane %v6250_v60, 1  ;;  %v5972_v60 = vld [vmem:[%s8012_s27 + $0x60] sm:$0xff]  }
 0x17e   : > { %v2159_v8 = vrot.slane %v2020_v48, 1  ;;  %v8246_v22 = vpop.f32.mrb[6].mxu1  ;;  %6600 = vmatprep.mubr.bf16.mxu0 %v8230_v54  ;;  %6633 = vmatpush3.bf16.msra.mxu0 %v6986_v0  ;;  %v1784_v48 = vmul.f32 %v8088_v43, %v1532_v62  ;;  %v1465_v43 = vmul.f32 %v7739_v32, %v5893_v33  ;;  %v1468_v32 = vmul.f32 %v8284_v16, %v5898_v30 }
 0x17f   : > { %v9499_v1 = vrot.slane %v8246_v22, 1  ;;  %v2023_v57 = vpop.f32.mrb[7].mxu1  ;;  %6531 = vmatpush3.bf16.msra.mxu1 %v6987_v20  ;;  %6634 = vmatprep.subr.bf16.mxu0 %v6988_v5  ;;  %v6991_v20 = vld [vmem:[%s9494_s8 + $0x1a8] sm:$0xff]  }
 0x180   : > { %v8262_v7 = vsel %vm2119_vm0, %v9506_v24, %v2159_v8  ;;  %v2161_v0 = vrot.slane %v2023_v57, 1  ;;  %v6230_v52 = vpop.f32.mrb[0].mxu0  ;;  %6532 = vmatprep.subr.bf16.mxu1 %v6989_v34  ;;  %v1535_v57 = vmax.f32 %v8240_v25, 0.0  ;;  %v1467_v25 = vmul.f32 %v8284_v16, %v5897_v36 }
 0x181   : > { %9507 = vst [vmem:[#allocation3_spill] sm:$0xff] %v8262_v7  ;;  %v8277_v62 = vsel %vm2119_vm0, %v2163_v44, %v9499_v1  ;;  %v1940_v56 = vpop.f32.mrb[1].mxu0  ;;  %6497 = vmatmul.mubr.bf16.gmra.mrb[64].mxu1 %v7885_v11  ;;  %v8297_v11 = vpack.c.bf16 %v1782_v37, %v1781_v58  ;;  %v2123_v24 = vrot.slane %v6230_v52, 1  ;;  %v6993_v58 = vld [vmem:[%s9494_s8 + $0x1b0] sm:$0xff]   ;;  %v1469_v36 = vmul.f32 %v8284_v16, %v5901_v61 }
 0x182   : > { %9508 = vst [vmem:[#allocation4_spill] sm:$0xff] %v8277_v62  ;;  %v8289_v39 = vsel %vm2119_vm0, %v2159_v8, %v2161_v0  ;;  %v8292_v35 = vsel %vm2119_vm0, %v2161_v0, %v2163_v44  ;;  %v8294_v33 = vpop.f32.mrb[2].mxu0  ;;  %6500 = vmatprep.mubr.bf16.mxu1 %v7892_v50  ;;  %6635 = vmatpush3.bf16.msra.mxu0 %v6988_v5  ;;  %v6992_v8 = vld [vmem:[%s9494_s8 + $0x228] sm:$0xff]   ;;  %v2120_v50 = vrot.slane %v1940_v56, 1  ;;  %v5906_v37 = vunpack.c.h.bf16 %v5972_v60 }
 0x183   : > { %9509 = vst [vmem:[#allocation5_spill] sm:$0xff] %v8289_v39  ;;  %9510 = vst [vmem:[#allocation6_spill] sm:$0xff] %v8292_v35  ;;  %v9500_v1 = vrot.slane %v8294_v33, 1  ;;  %v1943_v30 = vpop.f32.mrb[3].mxu0  ;;  %6533 = vmatpush3.bf16.msra.mxu1 %v6989_v34  ;;  %6636 = vmatprep.subr.bf16.mxu0 %v6990_v26  ;;  %v8304_v44 = vpack.c.bf16 %v1784_v48, %v1783_v21  ;;  %v1470_v0 = vmul.f32 %v8284_v16, %v5902_v6  ;;  %v8320_v21 = vld [vmem:[%s9493_s7] ss:$0 sm:$0xff]  ;;  %v8323_v48 = vpop.permute.xlu1 %1708 }
 0x184   : > { %v2121_v5 = vrot.slane %v1943_v30, 1  ;;  %6534 = vmatprep.subr.bf16.mxu1 %v6991_v20  ;;  %v5905_v34 = vunpack.c.l.bf16 %v5972_v60  ;;  %v1501_v6 = vadd.f32 %v8320_v21, %v1465_v43  ;;  %v9511_v60 = vmax.f32 %v8199_v12, 0.0  ;;  %v8339_v39 = vpop.permute.xlu0 %1703 }
 0x185   : > { %v8314_v52 = vsel %vm2119_vm0, %v2123_v24, %v9500_v1  ;;  %6601 = vmatmul.mubr.bf16.gmra.mrb[96].mxu0 %v8297_v11  ;;  %v9512_v1 = vmax.f32 %v8202_v2, 0.0  ;;  %v1504_v43 = vadd.f32 %v8320_v21, %v1468_v32  ;;  %v8350_v2 = vadd.f32 %v8320_v21, %v1470_v0  ;;  %v5974_v0 = vld [vmem:[%s8012_s27 + $0x70] sm:$0xff]  }
 0x186   : > { %v8326_v61 = vsel %vm2119_vm0, %v2120_v50, %v2121_v5  ;;  %v8329_v56 = vsel %vm2119_vm0, %v2121_v5, %v2123_v24  ;;  %6604 = vmatprep.mubr.bf16.mxu0 %v8304_v44  ;;  %6637 = vmatpush3.bf16.msra.mxu0 %v6990_v26  ;;  %v1786_v30 = vmul.f32 %v8113_v27, %v9511_v60  ;;  %v6994_v24 = vld [vmem:[%s9494_s8 + $0x230] sm:$0xff]   ;;  %v9513_v26 = vmax.f32 %v8208_v18, 0.0  ;;  %v6996_v50 = vld [vmem:[%s9494_s8 + $0x238] sm:$0xff]  }
 0x187   : > { %v1785_v35 = vmul.f32 %v8122_v40, %v9512_v1  ;;  %6535 = vmatpush3.bf16.msra.mxu1 %v6991_v20  ;;  %6638 = vmatprep.subr.bf16.mxu0 %v6992_v8  ;;  %v1787_v27 = vmul.f32 %v8165_v55, %v1535_v57  ;;  %v1503_v40 = vadd.f32 %v8320_v21, %v1467_v25  ;;  %v6995_v1 = vld [vmem:[%s9494_s8 + $0x1b8] sm:$0xff]   ;;  %v5973_v55 = vld [vmem:[%s8012_s27 + $0x68] sm:$0xff]   ;;  %v1538_v32 = vmax.f32 %v8268_v45, 0.0 }
 0x188   : > { %v1788_v12 = vmul.f32 %v8158_v29, %v9513_v26  ;;  %6536 = vmatprep.subr.bf16.mxu1 %v6993_v58  ;;  %v8356_v20 = vadd.f32 %v8320_v21, %v1469_v36  ;;  %v1472_v18 = vmul.f32 %v8284_v16, %v5906_v37  ;;  %v1471_v29 = vmul.f32 %v8284_v16, %v5905_v34 }
 0x189   : > { %6501 = vmatmul.mubr.bf16.gmra.mrb[68].mxu1 %v7924_v9  ;;  %v8363_v57 = vpack.c.bf16 %v1786_v30, %v1785_v35  ;;  %v1537_v25 = vmax.f32 %v1501_v6, 0.0  ;;  %v1540_v36 = vmax.f32 %v1504_v43, 0.0  ;;  %v1539_v9 = vmax.f32 %v1503_v40, 0.0 }
 0x18a   : > { %6504 = vmatprep.mubr.bf16.mxu1 %v7933_v13  ;;  %6639 = vmatpush3.bf16.msra.mxu0 %v6992_v8  ;;  %v8370_v5 = vpack.c.bf16 %v1788_v12, %v1787_v27  ;;  %v8373_v13 = vpop.permute.xlu1 %1718  ;;  %v1541_v45 = vmax.f32 %v8356_v20, 0.0  ;;  %v8377_v8 = vadd.f32 %v8320_v21, %v1472_v18  ;;  %v8382_v34 = vadd.f32 %v8320_v21, %v1471_v29 }
 0x18b   : > { %6537 = vmatpush3.bf16.msra.mxu1 %v6993_v58  ;;  %6640 = vmatprep.subr.bf16.mxu0 %v6994_v24  ;;  %v8379_v58 = vpop.permute.xlu0 %1713  ;;  %v5910_v6 = vunpack.c.h.bf16 %v5973_v55  ;;  %v5909_v30 = vunpack.c.l.bf16 %v5973_v55  ;;  %v5914_v43 = vunpack.c.h.bf16 %v5974_v0  ;;  %v5913_v26 = vunpack.c.l.bf16 %v5974_v0 }
 0x18c   : > { %v6254_v35 = vpop.f32.mrb[8].mxu1  ;;  %6538 = vmatprep.subr.bf16.mxu1 %v6995_v1  ;;  %v1790_v40 = vmul.f32 %v8213_v14, %v1538_v32  ;;  %v1789_v20 = vmul.f32 %v8221_v49, %v1537_v25  ;;  %v1792_v55 = vmul.f32 %v8257_v42, %v1540_v36  ;;  %v1791_v0 = vmul.f32 %v8271_v46, %v1539_v9  ;;  %v5975_v36 = vld [vmem:[%s8012_s27 + $0x78] sm:$0xff]   ;;  %v5976_v9 = vld [vmem:[%s8012_s27 + $0x80] sm:$0xff]  }
 0x18d   : > { %v2036_v60 = vpop.f32.mrb[9].mxu1  ;;  %6605 = vmatmul.mubr.bf16.gmra.mrb[100].mxu0 %v8363_v57  ;;  %v2171_v18 = vrot.slane %v6254_v35, 1  ;;  %v1544_v49 = vmax.f32 %v8377_v8, 0.0  ;;  %v1543_v25 = vmax.f32 %v8382_v34, 0.0  ;;  %v1474_v35 = vmul.f32 %v8284_v16, %v5910_v6 }
 0x18e   : > { %v2167_v12 = vrot.slane %v2036_v60, 1  ;;  %v8385_v27 = vpop.f32.mrb[10].mxu1  ;;  %6608 = vmatprep.mubr.bf16.mxu0 %v8370_v5  ;;  %6641 = vmatpush3.bf16.msra.mxu0 %v6994_v24  ;;  %v9514_v60 = vrot.slane %v8246_v22, 1  ;;  %v8407_v22 = vpop.permute.xlu1 %1728  ;;  %v1473_v46 = vmul.f32 %v8284_v16, %v5909_v30 }
 0x18f   : > { %v9501_v29 = vrot.slane %v8385_v27, 1  ;;  %v2039_v37 = vpop.f32.mrb[11].mxu1  ;;  %6539 = vmatpush3.bf16.msra.mxu1 %v6995_v1  ;;  %6642 = vmatprep.subr.bf16.mxu0 %v6996_v50 }
 0x190   : > { %v8396_v24 = vsel %vm2119_vm0, %v9514_v60, %v2167_v12  ;;  %v2169_v14 = vrot.slane %v2039_v37, 1  ;;  %v6234_v32 = vpop.f32.mrb[4].mxu0  ;;  %v8421_v60 = vpack.c.bf16 %v1790_v40, %v1789_v20  ;;  %v5917_v40 = vunpack.c.l.bf16 %v5975_v36 }
 0x191   : > { %9515 = vst [vmem:[#allocation7_spill] sm:$0xff] %v8396_v24  ;;  %v8404_v1 = vsel %vm2119_vm0, %v2171_v18, %v9501_v29  ;;  %v1956_v42 = vpop.f32.mrb[5].mxu0  ;;  %6505 = vmatmul.mubr.bf16.gmra.mrb[72].mxu1 %v7968_v59  ;;  %v1724_v59 = vpop.permute.xlu0 %1723  ;;  %v1476_v29 = vmul.f32 %v8284_v16, %v5914_v43  ;;  %v2131_v30 = vrot.slane %v6234_v32, 1  ;;  %v5922_v20 = vunpack.c.h.bf16 %v5976_v9 }
 0x192   : > { %9516 = vst [vmem:[#allocation8_spill] sm:$0xff] %v8404_v1  ;;  %v8413_v37 = vsel %vm2119_vm0, %v2167_v12, %v2169_v14  ;;  %v8416_v8 = vsel %vm2119_vm0, %v2169_v14, %v2171_v18  ;;  %v2127_v34 = vrot.slane %v1956_v42, 1  ;;  %v8418_v6 = vpop.f32.mrb[6].mxu0  ;;  %6508 = vmatprep.mubr.bf16.mxu1 %v7975_v53  ;;  %6643 = vmatpush3.bf16.msra.mxu0 %v6996_v50  ;;  %v9519_v14 = vrot.slane %v8294_v33, 1 }
 0x193   : > { %9517 = vst [vmem:[#allocation9_spill] sm:$0xff] %v8413_v37  ;;  %9518 = vst [vmem:[#allocation10_spill] sm:$0xff] %v8416_v8  ;;  %v9502_v1 = vrot.slane %v8418_v6, 1  ;;  %v1959_v24 = vpop.f32.mrb[7].mxu0  ;;  %v8425_v12 = vpack.c.bf16 %v1792_v55, %v1791_v0  ;;  %v1475_v18 = vmul.f32 %v8284_v16, %v5913_v26  ;;  %v5918_v50 = vunpack.c.h.bf16 %v5975_v36 }
 0x194   : > { %v8431_v42 = vsel %vm2119_vm0, %v9519_v14, %v2127_v34  ;;  %v2129_v53 = vrot.slane %v1959_v24, 1  ;;  %v5921_v55 = vunpack.c.l.bf16 %v5976_v9  ;;  %v9520_v26 = vmax.f32 %v8350_v2, 0.0 }
 0x195   : > { %v8436_v43 = vsel %vm2119_vm0, %v2131_v30, %v9502_v1  ;;  %6609 = vmatmul.mubr.bf16.gmra.mrb[104].mxu0 %v8421_v60  ;;  %v1793_v32 = vmul.f32 %v8339_v39, %v1541_v45  ;;  %v1510_v36 = vadd.f32 %v8320_v21, %v1474_v35  ;;  %v1509_v14 = vadd.f32 %v8320_v21, %v1473_v46  ;;  %v1739_v1 = vpop.permute.xlu1 %1738  ;;  %v1734_v8 = vpop.permute.xlu0 %1733 }
 0x196   : > { %v8440_v0 = vsel %vm2119_vm0, %v2127_v34, %v2129_v53  ;;  %v8443_v33 = vsel %vm2119_vm0, %v2129_v53, %v2131_v30  ;;  %6612 = vmatprep.mubr.bf16.mxu0 %v8425_v12  ;;  %v1794_v24 = vmul.f32 %v8323_v48, %v9520_v26  ;;  %v1796_v9 = vmul.f32 %v8373_v13, %v1544_v49 }
 0x197   : > { %v1795_v34 = vmul.f32 %v8379_v58, %v1543_v25  ;;  %v1512_v30 = vadd.f32 %v8320_v21, %v1476_v29  ;;  %v1511_v53 = vadd.f32 %v8320_v21, %v1475_v18  ;;  %v1478_v2 = vmul.f32 %v8284_v16, %v5918_v50  ;;  %v5977_v29 = vld [vmem:[%s8012_s27 + $0x88] sm:$0xff]  }
 0x198   : > { %v1477_v48 = vmul.f32 %v8284_v16, %v5917_v40  ;;  %v1480_v39 = vmul.f32 %v8284_v16, %v5922_v20  ;;  %v1479_v45 = vmul.f32 %v8284_v16, %v5921_v55  ;;  %v8462_v13 = vpack.c.bf16 %v1794_v24, %v1793_v32 }
 0x199   : > { %6509 = vmatmul.mubr.bf16.gmra.mrb[76].mxu1 %v7997_v4  ;;  %v1546_v58 = vmax.f32 %v1510_v36, 0.0  ;;  %v1545_v49 = vmax.f32 %v1509_v14, 0.0  ;;  %v8465_v25 = vpack.c.bf16 %v1796_v9, %v1795_v34  ;;  %v1548_v35 = vmax.f32 %v1512_v30, 0.0  ;;  %v1744_v34 = vpop.permute.xlu0 %1743 }
 0x19a   : > { %6512 = vmatprep.mubr.bf16.mxu1 %v8002_v63  ;;  %v1547_v46 = vmax.f32 %v1511_v53, 0.0  ;;  %v1514_v50 = vadd.f32 %v8320_v21, %v1478_v2  ;;  %v1513_v40 = vadd.f32 %v8320_v21, %v1477_v48  ;;  %v1516_v4 = vadd.f32 %v8320_v21, %v1480_v39  ;;  %v1749_v63 = vpop.permute.xlu1 %1748 }
 0x19b   : > { %9521 = vst [vmem:[#allocation11_spill] sm:$0xff] %v8465_v25  ;;  %v1515_v55 = vadd.f32 %v8320_v21, %v1479_v45  ;;  %v5926_v26 = vunpack.c.h.bf16 %v5977_v29  ;;  %v5925_v24 = vunpack.c.l.bf16 %v5977_v29  ;;  %v1798_v14 = vmul.f32 %v8407_v22, %v1546_v58 }
 0x19c   : > { %v6258_v18 = vpop.f32.mrb[12].mxu1  ;;  %v1797_v9 = vmul.f32 %v1724_v59, %v1545_v49  ;;  %v1800_v48 = vmul.f32 %v1739_v1, %v1548_v35  ;;  %v1799_v39 = vmul.f32 %v1734_v8, %v1547_v46  ;;  %v9522_v37 = vrot.slane %v8385_v27, 1 }
 0x19d   : > { %v2052_v20 = vpop.f32.mrb[13].mxu1  ;;  %6613 = vmatmul.mubr.bf16.gmra.mrb[108].mxu0 %v8462_v13  ;;  %v2179_v30 = vrot.slane %v6258_v18, 1  ;;  %v1550_v62 = vmax.f32 %v1514_v50, 0.0  ;;  %v1549_v7 = vmax.f32 %v1513_v40, 0.0  ;;  %v1482_v58 = vmul.f32 %v8284_v16, %v5926_v26 }
 0x19e   : > { %v2175_v32 = vrot.slane %v2052_v20, 1  ;;  %v8472_v36 = vpop.f32.mrb[14].mxu1  ;;  %6616 = vmatprep.mubr.bf16.mxu0 %v8465_v25  ;;  %v1552_v25 = vmax.f32 %v1516_v4, 0.0  ;;  %v8494_v49 = vpack.c.bf16 %v1798_v14, %v1797_v9  ;;  %v1481_v35 = vmul.f32 %v8284_v16, %v5925_v24 }
 0x19f   : > { %v2181_v53 = vrot.slane %v8472_v36, 1  ;;  %v2055_v2 = vpop.f32.mrb[15].mxu1  ;;  %v1551_v40 = vmax.f32 %v1515_v55, 0.0  ;;  %v9523_v4 = vrot.slane %v8418_v6, 1  ;;  %v1759_v36 = vpop.permute.xlu1 %1758  ;;  %v1802_v6 = vmul.f32 %v1749_v63, %v1550_v62 }
 0x1a0   : > { %v8480_v45 = vsel %vm2119_vm0, %v9522_v37, %v2175_v32  ;;  %v2177_v29 = vrot.slane %v2055_v2, 1  ;;  %v6238_v20 = vpop.f32.mrb[8].mxu0  ;;  %v1801_v55 = vmul.f32 %v1744_v34, %v1549_v7  ;;  %v1518_v14 = vadd.f32 %v8320_v21, %v1482_v58 }
 0x1a1   : > { %v8483_v22 = vsel %vm2119_vm0, %v2179_v30, %v2181_v53  ;;  %v1972_v59 = vpop.f32.mrb[9].mxu0  ;;  %6513 = vmatmul.mubr.bf16.gmra.mrb[80].mxu1 %v8033_v3  ;;  %v2139_v46 = vrot.slane %v6238_v20, 1  ;;  %v8497_v3 = vpack.c.bf16 %v1800_v48, %v1799_v39  ;;  %v1517_v9 = vadd.f32 %v8320_v21, %v1481_v35 }
 0x1a2   : > { %v8488_v1 = vsel %vm2119_vm0, %v2175_v32, %v2177_v29  ;;  %v8491_v27 = vsel %vm2119_vm0, %v2177_v29, %v2179_v30  ;;  %v2135_v37 = vrot.slane %v1972_v59, 1  ;;  %v6239_v8 = vpop.f32.mrb[10].mxu0  ;;  %6516 = vmatprep.mubr.bf16.mxu1 %v8037_v17  ;;  %v1754_v30 = vpop.permute.xlu0 %1753  ;;  %v1804_v2 = vmul.f32 %v1759_v36, %v1552_v25 }
 0x1a3   : > { %v2141_v18 = vrot.slane %v6239_v8, 1  ;;  %v1975_v50 = vpop.f32.mrb[11].mxu0  ;;  %v1803_v48 = vmul.f32 %v1754_v30, %v1551_v40  ;;  %v8519_v39 = vpack.c.bf16 %v1802_v6, %v1801_v55  ;;  %v1769_v29 = vpop.permute.xlu1 %1768  ;;  %v1554_v20 = vmax.f32 %v1518_v14, 0.0 }
 0x1a4   : > { %v8502_v26 = vsel %vm2119_vm0, %v9523_v4, %v2135_v37  ;;  %v2137_v32 = vrot.slane %v1975_v50, 1  ;;  %v1553_v59 = vmax.f32 %v1517_v9, 0.0 }
 0x1a5   : > { %v8505_v17 = vsel %vm2119_vm0, %v2139_v46, %v2141_v18  ;;  %6617 = vmatmul.mubr.bf16.gmra.mrb[112].mxu0 %v8494_v49 }
 0x1a6   : > { %v8509_v16 = vsel %vm2119_vm0, %v2135_v37, %v2137_v32  ;;  %v8512_v24 = vsel %vm2119_vm0, %v2137_v32, %v2139_v46  ;;  %6620 = vmatprep.mubr.bf16.mxu0 %v8497_v3  ;;  %v8521_v37 = vpack.c.bf16 %v1804_v2, %v1803_v48  ;;  %v1764_v8 = vpop.permute.xlu0 %1763 }
 0x1a7   : > { %v1805_v25 = vmul.f32 %v1764_v8, %v1553_v59 }
 0x1a9   : > { %6517 = vmatmul.mubr.bf16.gmra.mrb[84].mxu1 %v8057_v28  ;;  %v1806_v28 = vmul.f32 %v1769_v29, %v1554_v20  ;;  %v9524_v29 = vrot.slane %v8140_v51, 1 }
 0x1aa   : > { %6520 = vmatprep.mubr.bf16.mxu1 %v8060_v31 }
 0x1ac   : > { %v6262_v62 = vpop.f32.mrb[16].mxu1 }
 0x1ad   : > { %v2068_v7 = vpop.f32.mrb[17].mxu1  ;;  %6621 = vmatmul.mubr.bf16.gmra.mrb[116].mxu0 %v8519_v39  ;;  %v2187_v31 = vrot.slane %v6262_v62, 1 }
 0x1ae   : > { %v2183_v63 = vrot.slane %v2068_v7, 1  ;;  %v8524_v21 = vpop.f32.mrb[18].mxu1  ;;  %6624 = vmatprep.mubr.bf16.mxu0 %v8521_v37 }
 0x1af   : > { %v2189_v34 = vrot.slane %v8524_v21, 1  ;;  %v2071_v58 = vpop.f32.mrb[19].mxu1 }
 0x1b0   : > { %v8529_v35 = vsel %vm2119_vm0, %v2181_v53, %v2183_v63  ;;  %v2185_v46 = vrot.slane %v2071_v58, 1  ;;  %v6242_v50 = vpop.f32.mrb[12].mxu0  ;;  %v8544_v53 = vpack.c.bf16 %v1806_v28, %v1805_v25 }
 0x1b1   : > { %v8534_v40 = vsel %vm2119_vm0, %v2187_v31, %v2189_v34  ;;  %v1988_v4 = vpop.f32.mrb[13].mxu0  ;;  %6521 = vmatmul.mubr.bf16.gmra.mrb[88].mxu1 %v8079_v15  ;;  %v2147_v55 = vrot.slane %v6242_v50, 1 }
 0x1b2   : > { %v8538_v32 = vsel %vm2119_vm0, %v2183_v63, %v2185_v46  ;;  %v8541_v36 = vsel %vm2119_vm0, %v2185_v46, %v2187_v31  ;;  %v2143_v30 = vrot.slane %v1988_v4, 1  ;;  %v6243_v6 = vpop.f32.mrb[14].mxu0  ;;  %6540 = vmatprep.mubr.bf16.mxu1 %v8099_v23 }
 0x1b3   : > { %v2149_v14 = vrot.slane %v6243_v6, 1  ;;  %v1991_v9 = vpop.f32.mrb[15].mxu0 }
 0x1b4   : > { %v8547_v2 = vsel %vm2119_vm0, %v2141_v18, %v2143_v30  ;;  %v2145_v48 = vrot.slane %v1991_v9, 1 }
 0x1b5   : > { %v8550_v15 = vsel %vm2119_vm0, %v2147_v55, %v2149_v14  ;;  %v8555_v20 = vsel %vm2119_vm0, %v2149_v14, %v9524_v29  ;;  %6625 = vmatmul.mubr.bf16.gmra.mrb[120].mxu0 %v8544_v53 }
 0x1b6   : > { %v8559_v59 = vsel %vm2119_vm0, %v2143_v30, %v2145_v48  ;;  %v8562_v8 = vsel %vm2119_vm0, %v2145_v48, %v2147_v55  ;;  %6644 = vmatprep.mubr.bf16.mxu0 %v8099_v23 }
 0x1b8   : > { %v6334_v18 = vpop.f32.mrb[16].mxu0 }
 0x1b9   : > { %v2552_v62 = vpop.f32.mrb[17].mxu0  ;;  %6541 = vmatmul.mubr.bf16.vlgmr.msra.gmra.mrb[20].mxu1 %v8144_v47  ;;  %v2735_v51 = vrot.slane %v6334_v18, 2 }
 0x1ba   : > { %v6335_v7 = vpop.f32.mrb[18].mxu0  ;;  %6544 = vmatprep.mubr.bf16.mxu1 %v8155_v38  ;;  %v2732_v25 = vrot.slane %v2552_v62, 2 }
 0x1bb   : > { %v2737_v63 = vrot.slane %v6335_v7, 2  ;;  %v2555_v28 = vpop.f32.mrb[19].mxu0 }
 0x1bc   : > { %v2733_v31 = vrot.slane %v2555_v28, 2 }
 0x1bd   : > { %v2738_v58 = vsel %vm2731_vm1, %v2735_v51, %v2737_v63  ;;  %6645 = vmatmul.mubr.bf16.vlgmr.msra.gmra.mrb[124].mxu0 %v8144_v47 }
 0x1be   : > { %v8570_v46 = vadd.f32 %v2738_v58, %v8314_v52  ;;  %v2734_v23 = vsel %vm2731_vm1, %v2732_v25, %v2733_v31  ;;  %v2736_v50 = vsel %vm2731_vm1, %v2733_v31, %v2735_v51  ;;  %6648 = vmatprep.mubr.bf16.mxu0 %v8155_v38 }
 0x1bf   : > { %v8576_v4 = vadd.f32 %v2734_v23, %v8326_v61  ;;  %v8579_v30 = vadd.f32 %v2736_v50, %v8329_v56 }
 0x1c0   : > { %v6338_v6 = vpop.f32.mrb[20].mxu0 }
 0x1c1   : > { %v2568_v55 = vpop.f32.mrb[21].mxu0  ;;  %6545 = vmatmul.mubr.bf16.gmra.mrb[24].mxu1 %v8216_v10  ;;  %v2743_v52 = vrot.slane %v6338_v6, 2 }
 0x1c2   : > { %v2739_v47 = vrot.slane %v2568_v55, 2  ;;  %v6339_v14 = vpop.f32.mrb[22].mxu0  ;;  %6548 = vmatprep.mubr.bf16.mxu1 %v8230_v54 }
 0x1c3   : > { %v2745_v9 = vrot.slane %v6339_v14, 2  ;;  %v2571_v48 = vpop.f32.mrb[23].mxu0 }
 0x1c4   : > { %v2740_v29 = vsel %vm2731_vm1, %v2737_v63, %v2739_v47  ;;  %v2741_v38 = vrot.slane %v2571_v48, 2 }
 0x1c5   : > { %v8585_v61 = vadd.f32 %v2740_v29, %v8431_v42  ;;  %v2746_v56 = vsel %vm2731_vm1, %v2743_v52, %v2745_v9  ;;  %6649 = vmatmul.mubr.bf16.gmra.mrb[128].mxu0 %v8216_v10 }
 0x1c6   : > { %v8590_v18 = vadd.f32 %v2746_v56, %v8436_v43  ;;  %v2742_v62 = vsel %vm2731_vm1, %v2739_v47, %v2741_v38  ;;  %v2744_v7 = vsel %vm2731_vm1, %v2741_v38, %v2743_v52  ;;  %6652 = vmatprep.mubr.bf16.mxu0 %v8230_v54 }
 0x1c7   : > { %v8596_v51 = vadd.f32 %v2742_v62, %v8440_v0  ;;  %v8599_v63 = vadd.f32 %v2744_v7, %v8443_v33 }
 0x1c8   : > { %v6342_v42 = vpop.f32.mrb[24].mxu0 }
 0x1c9   : > { %v2584_v28 = vpop.f32.mrb[25].mxu0  ;;  %6549 = vmatmul.mubr.bf16.gmra.mrb[28].mxu1 %v8297_v11  ;;  %v2751_v43 = vrot.slane %v6342_v42, 2 }
 0x1ca   : > { %v2747_v10 = vrot.slane %v2584_v28, 2  ;;  %v6343_v25 = vpop.f32.mrb[26].mxu0  ;;  %6552 = vmatprep.mubr.bf16.mxu1 %v8304_v44 }
 0x1cb   : > { %v2753_v31 = vrot.slane %v6343_v25, 2  ;;  %v2587_v58 = vpop.f32.mrb[27].mxu0 }
 0x1cc   : > { %v2748_v23 = vsel %vm2731_vm1, %v2745_v9, %v2747_v10  ;;  %v2749_v54 = vrot.slane %v2587_v58, 2 }
 0x1cd   : > { %v8605_v0 = vadd.f32 %v2748_v23, %v8502_v26  ;;  %v2754_v33 = vsel %vm2731_vm1, %v2751_v43, %v2753_v31  ;;  %6653 = vmatmul.mubr.bf16.gmra.mrb[132].mxu0 %v8297_v11 }
 0x1ce   : > { %v8610_v50 = vadd.f32 %v2754_v33, %v8505_v17  ;;  %v2750_v6 = vsel %vm2731_vm1, %v2747_v10, %v2749_v54  ;;  %v2752_v55 = vsel %vm2731_vm1, %v2749_v54, %v2751_v43  ;;  %6656 = vmatprep.mubr.bf16.mxu0 %v8304_v44 }
 0x1cf   : > { %v8616_v47 = vadd.f32 %v2750_v6, %v8509_v16  ;;  %v8619_v14 = vadd.f32 %v2752_v55, %v8512_v24  ;;  %v9525_v55 = vld [vmem:[#allocation2_spill] sm:$0xff] }
 0x1d0   : > { %v6346_v26 = vpop.f32.mrb[28].mxu0 }
 0x1d1   : > { %v2600_v52 = vpop.f32.mrb[29].mxu0  ;;  %6553 = vmatmul.mubr.bf16.gmra.mrb[32].mxu1 %v8363_v57  ;;  %v2759_v17 = vrot.slane %v6346_v26, 2 }
 0x1d2   : > { %v2755_v11 = vrot.slane %v2600_v52, 2  ;;  %v6347_v9 = vpop.f32.mrb[30].mxu0  ;;  %6556 = vmatprep.mubr.bf16.mxu1 %v8370_v5 }
 0x1d3   : > { %v2761_v48 = vrot.slane %v6347_v9, 2  ;;  %v2603_v29 = vpop.f32.mrb[31].mxu0 }
 0x1d4   : > { %v2756_v38 = vsel %vm2731_vm1, %v2753_v31, %v2755_v11  ;;  %v2757_v44 = vrot.slane %v2603_v29, 2 }
 0x1d5   : > { %v8625_v16 = vadd.f32 %v2756_v38, %v8547_v2  ;;  %v2762_v24 = vsel %vm2731_vm1, %v2759_v17, %v2761_v48  ;;  %6657 = vmatmul.mubr.bf16.gmra.mrb[136].mxu0 %v8363_v57  ;;  %v9527_v38 = vld [vmem:[#allocation3_spill] sm:$0xff] }
 0x1d6   : > { %v8630_v56 = vadd.f32 %v2762_v24, %v8550_v15  ;;  %v2758_v62 = vsel %vm2731_vm1, %v2755_v11, %v2757_v44  ;;  %v2760_v7 = vsel %vm2731_vm1, %v2757_v44, %v2759_v17  ;;  %6660 = vmatprep.mubr.bf16.mxu0 %v8370_v5  ;;  %v9528_v24 = vld [vmem:[#allocation4_spill] sm:$0xff] }
 0x1d7   : > { %v8636_v42 = vadd.f32 %v2758_v62, %v8559_v59  ;;  %v8639_v28 = vadd.f32 %v2760_v7, %v8562_v8 }
 0x1d8   : > { %v6350_v2 = vpop.f32.mrb[32].mxu0 }
 0x1d9   : > { %v2616_v10 = vpop.f32.mrb[33].mxu0  ;;  %6557 = vmatmul.mubr.bf16.gmra.mrb[36].mxu1 %v8421_v60  ;;  %v2767_v15 = vrot.slane %v6350_v2, 2 }
 0x1da   : > { %v2763_v57 = vrot.slane %v2616_v10, 2  ;;  %v6351_v25 = vpop.f32.mrb[34].mxu0  ;;  %6560 = vmatprep.mubr.bf16.mxu1 %v8425_v12  ;;  %v9529_v10 = vld [vmem:[#allocation5_spill] sm:$0xff] }
 0x1db   : > { %v2769_v43 = vrot.slane %v6351_v25, 2  ;;  %v2619_v31 = vpop.f32.mrb[35].mxu0  ;;  %v9530_v25 = vld [vmem:[#allocation6_spill] sm:$0xff] }
 0x1dc   : > { %v2764_v58 = vsel %vm2731_vm1, %v2761_v48, %v2763_v57  ;;  %v2765_v5 = vrot.slane %v2619_v31, 2 }
 0x1dd   : > { %v8645_v59 = vadd.f32 %v2764_v58, %v8555_v20  ;;  %v2770_v8 = vsel %vm2731_vm1, %v2767_v15, %v2769_v43  ;;  %6661 = vmatmul.mubr.bf16.gmra.mrb[140].mxu0 %v8421_v60 }
 0x1de   : > { %v8650_v23 = vadd.f32 %v2770_v8, %v8180_v41  ;;  %v2766_v54 = vsel %vm2731_vm1, %v2763_v57, %v2765_v5  ;;  %v2768_v33 = vsel %vm2731_vm1, %v2765_v5, %v2767_v15  ;;  %6664 = vmatprep.mubr.bf16.mxu0 %v8425_v12  ;;  %v9526_v41 = vld [vmem:[#allocation11_spill] sm:$0xff] }
 0x1df   : > { %v8656_v6 = vadd.f32 %v2766_v54, %v8188_v19  ;;  %v8659_v26 = vadd.f32 %v2768_v33, %v9525_v55 }
 0x1e0   : > { %v6354_v20 = vpop.f32.mrb[36].mxu0 }
 0x1e1   : > { %v2632_v52 = vpop.f32.mrb[37].mxu0  ;;  %6561 = vmatmul.mubr.bf16.gmra.mrb[40].mxu1 %v8462_v13  ;;  %v2775_v9 = vrot.slane %v6354_v20, 2  ;;  %v9531_v20 = vld [vmem:[#allocation7_spill] sm:$0xff] }
 0x1e2   : > { %v2771_v60 = vrot.slane %v2632_v52, 2  ;;  %v6355_v11 = vpop.f32.mrb[38].mxu0  ;;  %6564 = vmatprep.mubr.bf16.mxu1 %v9526_v41 }
 0x1e3   : > { %v2777_v17 = vrot.slane %v6355_v11, 2  ;;  %v2635_v48 = vpop.f32.mrb[39].mxu0  ;;  %v9532_v11 = vld [vmem:[#allocation8_spill] sm:$0xff] }
 0x1e4   : > { %v2772_v29 = vsel %vm2731_vm1, %v2769_v43, %v2771_v60  ;;  %v2773_v12 = vrot.slane %v2635_v48, 2 }
 0x1e5   : > { %v8665_v19 = vadd.f32 %v2772_v29, %v9527_v38  ;;  %v2778_v44 = vsel %vm2731_vm1, %v2775_v9, %v2777_v17  ;;  %6665 = vmatmul.mubr.bf16.gmra.mrb[144].mxu0 %v8462_v13  ;;  %v9533_v29 = vld [vmem:[#allocation9_spill] sm:$0xff] }
 0x1e6   : > { %v8670_v62 = vadd.f32 %v2778_v44, %v9528_v24  ;;  %v2774_v7 = vsel %vm2731_vm1, %v2771_v60, %v2773_v12  ;;  %v2776_v2 = vsel %vm2731_vm1, %v2773_v12, %v2775_v9  ;;  %6668 = vmatprep.mubr.bf16.mxu0 %v9526_v41 }
 0x1e7   : > { %v8676_v57 = vadd.f32 %v2774_v7, %v9529_v10  ;;  %v8679_v15 = vadd.f32 %v2776_v2, %v9530_v25 }
 0x1e8   : > { %v6358_v43 = vpop.f32.mrb[40].mxu0 }
 0x1e9   : > { %v2648_v31 = vpop.f32.mrb[41].mxu0  ;;  %6565 = vmatmul.mubr.bf16.gmra.mrb[44].mxu1 %v8494_v49  ;;  %v2783_v5 = vrot.slane %v6358_v43, 2 }
 0x1ea   : > { %v2779_v13 = vrot.slane %v2648_v31, 2  ;;  %v6359_v58 = vpop.f32.mrb[42].mxu0  ;;  %6568 = vmatprep.mubr.bf16.mxu1 %v8497_v3 }
 0x1eb   : > { %v2785_v8 = vrot.slane %v6359_v58, 2  ;;  %v2651_v54 = vpop.f32.mrb[43].mxu0 }
 0x1ec   : > { %v2780_v33 = vsel %vm2731_vm1, %v2777_v17, %v2779_v13  ;;  %v2781_v55 = vrot.slane %v2651_v54, 2  ;;  %v9534_v17 = vld [vmem:[#allocation10_spill] sm:$0xff] }
 0x1ed   : > { %v8685_v52 = vadd.f32 %v2780_v33, %v9531_v20  ;;  %v2786_v60 = vsel %vm2731_vm1, %v2783_v5, %v2785_v8  ;;  %6669 = vmatmul.mubr.bf16.gmra.mrb[148].mxu0 %v8494_v49 }
 0x1ee   : > { %v8690_v41 = vadd.f32 %v2786_v60, %v9532_v11  ;;  %v2782_v9 = vsel %vm2731_vm1, %v2779_v13, %v2781_v55  ;;  %v2784_v48 = vsel %vm2731_vm1, %v2781_v55, %v2783_v5  ;;  %6672 = vmatprep.mubr.bf16.mxu0 %v8497_v3 }
 0x1ef   : > { %v8696_v12 = vadd.f32 %v2782_v9, %v9533_v29  ;;  %v8699_v38 = vadd.f32 %v2784_v48, %v9534_v17 }
 0x1f0   : > { %v6362_v44 = vpop.f32.mrb[44].mxu0 }
 0x1f1   : > { %v2664_v24 = vpop.f32.mrb[45].mxu0  ;;  %6569 = vmatmul.mubr.bf16.gmra.mrb[48].mxu1 %v8519_v39  ;;  %v2791_v2 = vrot.slane %v6362_v44, 2 }
 0x1f2   : > { %v2787_v49 = vrot.slane %v2664_v24, 2  ;;  %v6363_v7 = vpop.f32.mrb[46].mxu0  ;;  %6572 = vmatprep.mubr.bf16.mxu1 %v8521_v37 }
 0x1f3   : > { %v2793_v10 = vrot.slane %v6363_v7, 2  ;;  %v2667_v25 = vpop.f32.mrb[47].mxu0 }
 0x1f4   : > { %v2788_v43 = vsel %vm2731_vm1, %v2785_v8, %v2787_v49  ;;  %v2789_v3 = vrot.slane %v2667_v25, 2 }
 0x1f5   : > { %v8705_v31 = vadd.f32 %v2788_v43, %v8480_v45  ;;  %v2794_v13 = vsel %vm2731_vm1, %v2791_v2, %v2793_v10  ;;  %6673 = vmatmul.mubr.bf16.gmra.mrb[152].mxu0 %v8519_v39 }
 0x1f6   : > { %v8710_v58 = vadd.f32 %v2794_v13, %v8483_v22  ;;  %v2790_v5 = vsel %vm2731_vm1, %v2787_v49, %v2789_v3  ;;  %v2792_v54 = vsel %vm2731_vm1, %v2789_v3, %v2791_v2  ;;  %6676 = vmatprep.mubr.bf16.mxu0 %v8521_v37 }
 0x1f7   : > { %v8716_v33 = vadd.f32 %v2790_v5, %v8488_v1  ;;  %v8719_v8 = vadd.f32 %v2792_v54, %v8491_v27  ;;  %v2227_v1 = vsel %vm2119_vm0, %v2189_v34, 0.0 }
 0x1f8   : > { %v6366_v45 = vpop.f32.mrb[48].mxu0 }
 0x1f9   : > { %v2680_v55 = vpop.f32.mrb[49].mxu0  ;;  %6573 = vmatmul.mubr.bf16.gmra.mrb[52].mxu1 %v8544_v53  ;;  %v2799_v22 = vrot.slane %v6366_v45, 2 }
 0x1fa   : > { %v2795_v39 = vrot.slane %v2680_v55, 2  ;;  %v6367_v20 = vpop.f32.mrb[50].mxu0 }
 0x1fb   : > { %v2801_v60 = vrot.slane %v6367_v20, 2  ;;  %v2683_v11 = vpop.f32.mrb[51].mxu0 }
 0x1fc   : > { %v2796_v9 = vsel %vm2731_vm1, %v2793_v10, %v2795_v39  ;;  %v2797_v48 = vrot.slane %v2683_v11, 2 }
 0x1fd   : > { %v8727_v37 = vadd.f32 %v2796_v9, %v8529_v35  ;;  %v2802_v27 = vsel %vm2731_vm1, %v2799_v22, %v2801_v60  ;;  %v2839_v29 = vsel %vm2731_vm1, %v2801_v60, 0.0  ;;  %6677 = vmatmul.mubr.bf16.gmra.mrb[156].mxu0 %v8544_v53 }
 0x1fe   : > { %v8733_v17 = vadd.f32 %v2802_v27, %v8534_v40  ;;  %v8735_v44 = vadd.f32 %v2839_v29, %v2227_v1  ;;  %v2798_v24 = vsel %vm2731_vm1, %v2795_v39, %v2797_v48  ;;  %v2800_v21 = vsel %vm2731_vm1, %v2797_v48, %v2799_v22 }
 0x1ff   : > { %v8740_v34 = vadd.f32 %v2798_v24, %v8538_v32  ;;  %v8743_v35 = vadd.f32 %v2800_v21, %v8541_v36 }
 0x200   : > { %v6438_v49 = vpop.f32.mrb[52].mxu0 }
 0x201   : > { %v3253_v7 = vpop.f32.mrb[53].mxu0  ;;  %v3435_v10 = vrot.slane %v6438_v49, 1 }
 0x202   : > { %v6439_v2 = vpop.f32.mrb[54].mxu0  ;;  %v3432_v40 = vrot.slane %v3253_v7, 1 }
 0x203   : > { %v3437_v53 = vrot.slane %v6439_v2, 1  ;;  %v3256_v25 = vpop.f32.mrb[55].mxu0 }
 0x204   : > { %v3433_v43 = vrot.slane %v3256_v25, 1 }
 0x205   : > { %v3438_v3 = vsel %vm2119_vm0, %v3435_v10, %v3437_v53 }
 0x206   : > { %v3434_v13 = vsel %vm2119_vm0, %v3432_v40, %v3433_v43  ;;  %v3436_v5 = vsel %vm2119_vm0, %v3433_v43, %v3435_v10  ;;  %v8749_v32 = vadd.f32 %v8570_v46, %v3438_v3 }
 0x207   : > { %v8752_v36 = vadd.f32 %v8576_v4, %v3434_v13  ;;  %v8755_v54 = vadd.f32 %v8579_v30, %v3436_v5 }
 0x208   : > { %v6442_v45 = vpop.f32.mrb[56].mxu0 }
 0x209   : > { %v3269_v55 = vpop.f32.mrb[57].mxu0  ;;  %v3443_v22 = vrot.slane %v6442_v45, 1 }
 0x20a   : > { %v3439_v39 = vrot.slane %v3269_v55, 1  ;;  %v6443_v20 = vpop.f32.mrb[58].mxu0 }
 0x20b   : > { %v3445_v60 = vrot.slane %v6443_v20, 1  ;;  %v3272_v11 = vpop.f32.mrb[59].mxu0 }
 0x20c   : > { %v3440_v9 = vsel %vm2119_vm0, %v3437_v53, %v3439_v39  ;;  %v3441_v48 = vrot.slane %v3272_v11, 1 }
 0x20d   : > { %v3446_v1 = vsel %vm2119_vm0, %v3443_v22, %v3445_v60  ;;  %v8760_v46 = vadd.f32 %v8585_v61, %v3440_v9 }
 0x20e   : > { %v3442_v4 = vsel %vm2119_vm0, %v3439_v39, %v3441_v48  ;;  %v3444_v30 = vsel %vm2119_vm0, %v3441_v48, %v3443_v22  ;;  %v8765_v27 = vadd.f32 %v8590_v18, %v3446_v1 }
 0x20f   : > { %v8768_v29 = vadd.f32 %v8596_v51, %v3442_v4  ;;  %v8771_v24 = vadd.f32 %v8599_v63, %v3444_v30 }
 0x210   : > { %v6446_v21 = vpop.f32.mrb[60].mxu0 }
 0x211   : > { %v3285_v49 = vpop.f32.mrb[61].mxu0  ;;  %v3451_v10 = vrot.slane %v6446_v21, 1 }
 0x212   : > { %v3447_v7 = vrot.slane %v3285_v49, 1  ;;  %v6447_v2 = vpop.f32.mrb[62].mxu0 }
 0x213   : > { %v3453_v61 = vrot.slane %v6447_v2, 1  ;;  %v3288_v53 = vpop.f32.mrb[63].mxu0 }
 0x214   : > { %v3448_v25 = vsel %vm2119_vm0, %v3445_v60, %v3447_v7  ;;  %v3449_v40 = vrot.slane %v3288_v53, 1 }
 0x215   : > { %v3454_v43 = vsel %vm2119_vm0, %v3451_v10, %v3453_v61  ;;  %v8776_v18 = vadd.f32 %v8605_v0, %v3448_v25 }
 0x216   : > { %v3450_v51 = vsel %vm2119_vm0, %v3447_v7, %v3449_v40  ;;  %v3452_v63 = vsel %vm2119_vm0, %v3449_v40, %v3451_v10  ;;  %v8781_v3 = vadd.f32 %v8610_v50, %v3454_v43 }
 0x217   : > { %v8784_v13 = vadd.f32 %v8616_v47, %v3450_v51  ;;  %v8787_v5 = vadd.f32 %v8619_v14, %v3452_v63 }
 0x218   : > { %v6450_v45 = vpop.f32.mrb[64].mxu0 }
 0x219   : > { %v3301_v55 = vpop.f32.mrb[65].mxu0  ;;  %v3459_v22 = vrot.slane %v6450_v45, 1 }
 0x21a   : > { %v3455_v39 = vrot.slane %v3301_v55, 1  ;;  %v6451_v20 = vpop.f32.mrb[66].mxu0 }
 0x21b   : > { %v3461_v0 = vrot.slane %v6451_v20, 1  ;;  %v3304_v60 = vpop.f32.mrb[67].mxu0 }
 0x21c   : > { %v3456_v11 = vsel %vm2119_vm0, %v3453_v61, %v3455_v39  ;;  %v3457_v9 = vrot.slane %v3304_v60, 1 }
 0x21d   : > { %v3462_v48 = vsel %vm2119_vm0, %v3459_v22, %v3461_v0  ;;  %v8792_v50 = vadd.f32 %v8625_v16, %v3456_v11 }
 0x21e   : > { %v3458_v47 = vsel %vm2119_vm0, %v3455_v39, %v3457_v9  ;;  %v3460_v14 = vsel %vm2119_vm0, %v3457_v9, %v3459_v22  ;;  %v8797_v1 = vadd.f32 %v8630_v56, %v3462_v48 }
 0x21f   : > { %v8800_v4 = vadd.f32 %v8636_v42, %v3458_v47  ;;  %v8803_v30 = vadd.f32 %v8639_v28, %v3460_v14 }
 0x220   : > { %v6454_v21 = vpop.f32.mrb[68].mxu0 }
 0x221   : > { %v3317_v49 = vpop.f32.mrb[69].mxu0  ;;  %v3467_v10 = vrot.slane %v6454_v21, 1 }
 0x222   : > { %v3463_v7 = vrot.slane %v3317_v49, 1  ;;  %v6455_v2 = vpop.f32.mrb[70].mxu0 }
 0x223   : > { %v3469_v16 = vrot.slane %v6455_v2, 1  ;;  %v3320_v61 = vpop.f32.mrb[71].mxu0 }
 0x224   : > { %v3464_v53 = vsel %vm2119_vm0, %v3461_v0, %v3463_v7  ;;  %v3465_v25 = vrot.slane %v3320_v61, 1 }
 0x225   : > { %v3470_v40 = vsel %vm2119_vm0, %v3467_v10, %v3469_v16  ;;  %v8808_v56 = vadd.f32 %v8645_v59, %v3464_v53 }
 0x226   : > { %v3466_v42 = vsel %vm2119_vm0, %v3463_v7, %v3465_v25  ;;  %v3468_v28 = vsel %vm2119_vm0, %v3465_v25, %v3467_v10  ;;  %v8813_v43 = vadd.f32 %v8650_v23, %v3470_v40 }
 0x227   : > { %v8816_v51 = vadd.f32 %v8656_v6, %v3466_v42  ;;  %v8819_v63 = vadd.f32 %v8659_v26, %v3468_v28 }
 0x228   : > { %v6458_v45 = vpop.f32.mrb[72].mxu0 }
 0x229   : > { %v3333_v55 = vpop.f32.mrb[73].mxu0  ;;  %v3475_v22 = vrot.slane %v6458_v45, 1 }
 0x22a   : > { %v3471_v39 = vrot.slane %v3333_v55, 1  ;;  %v6459_v20 = vpop.f32.mrb[74].mxu0 }
 0x22b   : > { %v3477_v59 = vrot.slane %v6459_v20, 1  ;;  %v3336_v0 = vpop.f32.mrb[75].mxu0 }
 0x22c   : > { %v3472_v60 = vsel %vm2119_vm0, %v3469_v16, %v3471_v39  ;;  %v3473_v11 = vrot.slane %v3336_v0, 1 }
 0x22d   : > { %v3478_v9 = vsel %vm2119_vm0, %v3475_v22, %v3477_v59  ;;  %v8824_v23 = vadd.f32 %v8665_v19, %v3472_v60 }
 0x22e   : > { %v3474_v6 = vsel %vm2119_vm0, %v3471_v39, %v3473_v11  ;;  %v3476_v26 = vsel %vm2119_vm0, %v3473_v11, %v3475_v22  ;;  %v8829_v48 = vadd.f32 %v8670_v62, %v3478_v9 }
 0x22f   : > { %v8832_v47 = vadd.f32 %v8676_v57, %v3474_v6  ;;  %v8835_v14 = vadd.f32 %v8679_v15, %v3476_v26 }
 0x230   : > { %v6462_v21 = vpop.f32.mrb[76].mxu0 }
 0x231   : > { %v3349_v49 = vpop.f32.mrb[77].mxu0  ;;  %v3483_v10 = vrot.slane %v6462_v21, 1 }
 0x232   : > { %v3479_v7 = vrot.slane %v3349_v49, 1  ;;  %v6463_v2 = vpop.f32.mrb[78].mxu0 }
 0x233   : > { %v3485_v19 = vrot.slane %v6463_v2, 1  ;;  %v3352_v16 = vpop.f32.mrb[79].mxu0 }
 0x234   : > { %v3480_v61 = vsel %vm2119_vm0, %v3477_v59, %v3479_v7  ;;  %v3481_v53 = vrot.slane %v3352_v16, 1 }
 0x235   : > { %v3486_v25 = vsel %vm2119_vm0, %v3483_v10, %v3485_v19  ;;  %v8840_v62 = vadd.f32 %v8685_v52, %v3480_v61 }
 0x236   : > { %v3482_v57 = vsel %vm2119_vm0, %v3479_v7, %v3481_v53  ;;  %v3484_v15 = vsel %vm2119_vm0, %v3481_v53, %v3483_v10  ;;  %v8845_v40 = vadd.f32 %v8690_v41, %v3486_v25 }
 0x237   : > { %v8848_v42 = vadd.f32 %v8696_v12, %v3482_v57  ;;  %v8851_v28 = vadd.f32 %v8699_v38, %v3484_v15 }
 0x238   : > { %v6466_v45 = vpop.f32.mrb[80].mxu0 }
 0x239   : > { %v3365_v55 = vpop.f32.mrb[81].mxu0  ;;  %v3491_v22 = vrot.slane %v6466_v45, 1 }
 0x23a   : > { %v3487_v39 = vrot.slane %v3365_v55, 1  ;;  %v6467_v20 = vpop.f32.mrb[82].mxu0 }
 0x23b   : > { %v3493_v52 = vrot.slane %v6467_v20, 1  ;;  %v3368_v59 = vpop.f32.mrb[83].mxu0 }
 0x23c   : > { %v3488_v0 = vsel %vm2119_vm0, %v3485_v19, %v3487_v39  ;;  %v3489_v60 = vrot.slane %v3368_v59, 1 }
 0x23d   : > { %v3494_v11 = vsel %vm2119_vm0, %v3491_v22, %v3493_v52  ;;  %v8856_v41 = vadd.f32 %v8705_v31, %v3488_v0 }
 0x23e   : > { %v3490_v12 = vsel %vm2119_vm0, %v3487_v39, %v3489_v60  ;;  %v3492_v38 = vsel %vm2119_vm0, %v3489_v60, %v3491_v22  ;;  %v8861_v9 = vadd.f32 %v8710_v58, %v3494_v11 }
 0x23f   : > { %v8864_v6 = vadd.f32 %v8716_v33, %v3490_v12  ;;  %v8867_v26 = vadd.f32 %v8719_v8, %v3492_v38 }
 0x240   : > { %v6470_v21 = vpop.f32.mrb[84].mxu0 }
 0x241   : > { %v3381_v49 = vpop.f32.mrb[85].mxu0  ;;  %v3499_v10 = vrot.slane %v6470_v21, 1 }
 0x242   : > { %v3495_v7 = vrot.slane %v3381_v49, 1  ;;  %v6471_v2 = vpop.f32.mrb[86].mxu0 }
 0x243   : > { %v3501_v31 = vrot.slane %v6471_v2, 1  ;;  %v3384_v19 = vpop.f32.mrb[87].mxu0 }
 0x244   : > { %v3496_v16 = vsel %vm2119_vm0, %v3493_v52, %v3495_v7  ;;  %v3497_v61 = vrot.slane %v3384_v19, 1  ;;  %v6490_v53 = vpop.f32.mrb[56].mxu1 }
 0x245   : > { %v3502_v58 = vsel %vm2119_vm0, %v3499_v10, %v3501_v31  ;;  %v3539_v25 = vsel %vm2119_vm0, %v3501_v31, 0.0  ;;  %v3675_v33 = vpop.f32.mrb[57].mxu1  ;;  %v8873_v57 = vadd.f32 %v8727_v37, %v3496_v16  ;;  %v3857_v55 = vrot.slane %v6490_v53, 2 }
 0x246   : > { %v8876_v8 = vadd.f32 %v8735_v44, %v3539_v25  ;;  %v3498_v15 = vsel %vm2119_vm0, %v3495_v7, %v3497_v61  ;;  %v3500_v45 = vsel %vm2119_vm0, %v3497_v61, %v3499_v10  ;;  %v6491_v39 = vpop.f32.mrb[58].mxu1  ;;  %v8881_v52 = vadd.f32 %v8733_v17, %v3502_v58 }
 0x247   : > { %v3859_v20 = vrot.slane %v6491_v39, 2  ;;  %v3678_v22 = vpop.f32.mrb[59].mxu1  ;;  %v8884_v59 = vadd.f32 %v8740_v34, %v3498_v15  ;;  %v8887_v37 = vadd.f32 %v8743_v35, %v3500_v45  ;;  %v3854_v0 = vrot.slane %v3675_v33, 2 }
 0x248   : > { %v3855_v44 = vrot.slane %v3678_v22, 2  ;;  %v6594_v60 = vpop.f32.mrb[88].mxu0 }
 0x249   : > { %v4375_v11 = vpop.f32.mrb[89].mxu0  ;;  %v3860_v12 = vsel %vm2731_vm1, %v3857_v55, %v3859_v20  ;;  %v4557_v7 = vrot.slane %v6594_v60, 1 }
 0x24a   : > { %v6595_v38 = vpop.f32.mrb[90].mxu0  ;;  %v8891_v21 = vadd.f32 %v8749_v32, %v3860_v12  ;;  %v3856_v49 = vsel %vm2731_vm1, %v3854_v0, %v3855_v44  ;;  %v3858_v17 = vsel %vm2731_vm1, %v3855_v44, %v3857_v55  ;;  %v4554_v31 = vrot.slane %v4375_v11, 1 }
 0x24b   : > { %v4559_v34 = vrot.slane %v6595_v38, 1  ;;  %v4378_v2 = vpop.f32.mrb[91].mxu0  ;;  %v8896_v35 = vadd.f32 %v8752_v36, %v3856_v49  ;;  %v8899_v10 = vadd.f32 %v8755_v54, %v3858_v17 }
 0x24c   : > { %v4555_v19 = vrot.slane %v4378_v2, 1  ;;  %v6494_v16 = vpop.f32.mrb[60].mxu1 }
 0x24d   : > { %v3691_v61 = vpop.f32.mrb[61].mxu1  ;;  %v8902_v32 = vsel %vm2119_vm0, %v4557_v7, %v4559_v34  ;;  %v3865_v36 = vrot.slane %v6494_v16, 2 }
 0x24e   : > { %v3861_v53 = vrot.slane %v3691_v61, 2  ;;  %v6495_v58 = vpop.f32.mrb[62].mxu1  ;;  %v8905_v25 = vsel %vm2119_vm0, %v4554_v31, %v4555_v19  ;;  %v8908_v33 = vsel %vm2119_vm0, %v4555_v19, %v4557_v7 }
 0x24f   : > { %v3867_v15 = vrot.slane %v6495_v58, 2  ;;  %v3694_v45 = vpop.f32.mrb[63].mxu1 }
 0x250   : > { %v3863_v54 = vrot.slane %v3694_v45, 2  ;;  %v6598_v55 = vpop.f32.mrb[92].mxu0  ;;  %v3862_v39 = vsel %vm2731_vm1, %v3859_v20, %v3861_v53 }
 0x251   : > { %v4391_v22 = vpop.f32.mrb[93].mxu0  ;;  %v8912_v0 = vadd.f32 %v8760_v46, %v3862_v39  ;;  %v3868_v44 = vsel %vm2731_vm1, %v3865_v36, %v3867_v15  ;;  %v4565_v17 = vrot.slane %v6598_v55, 1 }
 0x252   : > { %v4561_v60 = vrot.slane %v4391_v22, 1  ;;  %v6599_v11 = vpop.f32.mrb[94].mxu0  ;;  %v8916_v12 = vadd.f32 %v8765_v27, %v3868_v44  ;;  %v3864_v38 = vsel %vm2731_vm1, %v3861_v53, %v3863_v54  ;;  %v3866_v49 = vsel %vm2731_vm1, %v3863_v54, %v3865_v36 }
 0x253   : > { %v4567_v7 = vrot.slane %v6599_v11, 1  ;;  %v4394_v2 = vpop.f32.mrb[95].mxu0  ;;  %v8921_v20 = vadd.f32 %v8768_v29, %v3864_v38  ;;  %v8924_v46 = vadd.f32 %v8771_v24, %v3866_v49 }
 0x254   : > { %v4563_v31 = vrot.slane %v4394_v2, 1  ;;  %v6498_v19 = vpop.f32.mrb[64].mxu1  ;;  %v8927_v16 = vsel %vm2119_vm0, %v4559_v34, %v4561_v60 }
 0x255   : > { %v3707_v27 = vpop.f32.mrb[65].mxu1  ;;  %v8930_v61 = vsel %vm2119_vm0, %v4565_v17, %v4567_v7  ;;  %v3873_v45 = vrot.slane %v6498_v19, 2 }
 0x256   : > { %v3869_v53 = vrot.slane %v3707_v27, 2  ;;  %v6499_v58 = vpop.f32.mrb[66].mxu1  ;;  %v8933_v36 = vsel %vm2119_vm0, %v4561_v60, %v4563_v31  ;;  %v8936_v29 = vsel %vm2119_vm0, %v4563_v31, %v4565_v17 }
 0x257   : > { %v3875_v24 = vrot.slane %v6499_v58, 2  ;;  %v3710_v54 = vpop.f32.mrb[67].mxu1 }
 0x258   : > { %v3871_v55 = vrot.slane %v3710_v54, 2  ;;  %v6602_v39 = vpop.f32.mrb[96].mxu0  ;;  %v3870_v34 = vsel %vm2731_vm1, %v3867_v15, %v3869_v53 }
 0x259   : > { %v4407_v22 = vpop.f32.mrb[97].mxu0  ;;  %v8940_v44 = vadd.f32 %v8776_v18, %v3870_v34  ;;  %v3876_v11 = vsel %vm2731_vm1, %v3873_v45, %v3875_v24  ;;  %v4573_v31 = vrot.slane %v6602_v39, 1 }
 0x25a   : > { %v4569_v38 = vrot.slane %v4407_v22, 1  ;;  %v6603_v49 = vpop.f32.mrb[98].mxu0  ;;  %v8944_v60 = vadd.f32 %v8781_v3, %v3876_v11  ;;  %v3872_v17 = vsel %vm2731_vm1, %v3869_v53, %v3871_v55  ;;  %v3874_v2 = vsel %vm2731_vm1, %v3871_v55, %v3873_v45 }
 0x25b   : > { %v4575_v19 = vrot.slane %v6603_v49, 1  ;;  %v4410_v27 = vpop.f32.mrb[99].mxu0  ;;  %v8949_v15 = vadd.f32 %v8784_v13, %v3872_v17  ;;  %v8952_v18 = vadd.f32 %v8787_v5, %v3874_v2 }
 0x25c   : > { %v4571_v58 = vrot.slane %v4410_v27, 1  ;;  %v6502_v54 = vpop.f32.mrb[68].mxu1  ;;  %v8955_v34 = vsel %vm2119_vm0, %v4567_v7, %v4569_v38 }
 0x25d   : > { %9535 = vst [vmem:[#allocation2_spill] sm:$0xff] %v8952_v18  ;;  %v3723_v3 = vpop.f32.mrb[69].mxu1  ;;  %v8958_v22 = vsel %vm2119_vm0, %v4573_v31, %v4575_v19  ;;  %v3881_v39 = vrot.slane %v6502_v54, 2 }
 0x25e   : > { %9536 = vst [vmem:[#allocation11_spill] sm:$0xff] %v8958_v22  ;;  %v3877_v53 = vrot.slane %v3723_v3, 2  ;;  %v6503_v45 = vpop.f32.mrb[70].mxu1  ;;  %v8961_v55 = vsel %vm2119_vm0, %v4569_v38, %v4571_v58  ;;  %v8964_v13 = vsel %vm2119_vm0, %v4571_v58, %v4573_v31 }
 0x25f   : > { %9537 = vst [vmem:[#allocation3_spill] sm:$0xff] %v8964_v13  ;;  %v3883_v5 = vrot.slane %v6503_v45, 2  ;;  %v3726_v11 = vpop.f32.mrb[71].mxu1 }
 0x260   : > { %v3879_v49 = vrot.slane %v3726_v11, 2  ;;  %v6606_v17 = vpop.f32.mrb[100].mxu0  ;;  %v3878_v7 = vsel %vm2731_vm1, %v3875_v24, %v3877_v53 }
 0x261   : > { %v4423_v2 = vpop.f32.mrb[101].mxu0  ;;  %v8968_v27 = vadd.f32 %v8792_v50, %v3878_v7  ;;  %v3884_v3 = vsel %vm2731_vm1, %v3881_v39, %v3883_v5  ;;  %v4581_v54 = vrot.slane %v6606_v17, 1 }
 0x262   : > { %v4577_v18 = vrot.slane %v4423_v2, 1  ;;  %v6607_v22 = vpop.f32.mrb[102].mxu0  ;;  %v8972_v38 = vadd.f32 %v8797_v1, %v3884_v3  ;;  %v3880_v31 = vsel %vm2731_vm1, %v3877_v53, %v3879_v49  ;;  %v3882_v58 = vsel %vm2731_vm1, %v3879_v49, %v3881_v39 }
 0x263   : > { %v4583_v45 = vrot.slane %v6607_v22, 1  ;;  %v4426_v11 = vpop.f32.mrb[103].mxu0  ;;  %v8977_v24 = vadd.f32 %v8800_v4, %v3880_v31  ;;  %v8980_v50 = vadd.f32 %v8803_v30, %v3882_v58 }
 0x264   : > { %v4579_v7 = vrot.slane %v4426_v11, 1  ;;  %v6506_v13 = vpop.f32.mrb[72].mxu1  ;;  %v8983_v2 = vsel %vm2119_vm0, %v4575_v19, %v4577_v18 }
 0x265   : > { %9538 = vst [vmem:[#allocation4_spill] sm:$0xff] %v8977_v24  ;;  %9539 = vst [vmem:[#allocation5_spill] sm:$0xff] %v8980_v50  ;;  %v3739_v1 = vpop.f32.mrb[73].mxu1  ;;  %v8986_v3 = vsel %vm2119_vm0, %v4581_v54, %v4583_v45  ;;  %v3889_v49 = vrot.slane %v6506_v13, 2 }
 0x266   : > { %9540 = vst [vmem:[#allocation6_spill] sm:$0xff] %v8986_v3  ;;  %v3885_v53 = vrot.slane %v3739_v1, 2  ;;  %v6507_v39 = vpop.f32.mrb[74].mxu1  ;;  %v8989_v22 = vsel %vm2119_vm0, %v4577_v18, %v4579_v7  ;;  %v8992_v4 = vsel %vm2119_vm0, %v4579_v7, %v4581_v54 }
 0x267   : > { %9541 = vst [vmem:[#allocation7_spill] sm:$0xff] %v8992_v4  ;;  %v3891_v30 = vrot.slane %v6507_v39, 2  ;;  %v3742_v17 = vpop.f32.mrb[75].mxu1 }
 0x268   : > { %v3887_v31 = vrot.slane %v3742_v17, 2  ;;  %v6610_v58 = vpop.f32.mrb[104].mxu0  ;;  %v3886_v19 = vsel %vm2731_vm1, %v3883_v5, %v3885_v53 }
 0x269   : > { %v4439_v11 = vpop.f32.mrb[105].mxu0  ;;  %v8996_v50 = vadd.f32 %v8808_v56, %v3886_v19  ;;  %v3892_v1 = vsel %vm2731_vm1, %v3889_v49, %v3891_v30  ;;  %v4589_v7 = vrot.slane %v6610_v58, 1 }
 0x26a   : > { %v4585_v3 = vrot.slane %v4439_v11, 1  ;;  %v6611_v24 = vpop.f32.mrb[106].mxu0  ;;  %v9000_v18 = vadd.f32 %v8813_v43, %v3892_v1  ;;  %v3888_v54 = vsel %vm2731_vm1, %v3885_v53, %v3887_v31  ;;  %v3890_v13 = vsel %vm2731_vm1, %v3887_v31, %v3889_v49 }
 0x26b   : > { %v4591_v39 = vrot.slane %v6611_v24, 1  ;;  %v4442_v17 = vpop.f32.mrb[107].mxu0  ;;  %v9005_v5 = vadd.f32 %v8816_v51, %v3888_v54  ;;  %v9008_v56 = vadd.f32 %v8819_v63, %v3890_v13 }
 0x26c   : > { %v4587_v19 = vrot.slane %v4442_v17, 1  ;;  %v6510_v4 = vpop.f32.mrb[76].mxu1  ;;  %v9011_v11 = vsel %vm2119_vm0, %v4583_v45, %v4585_v3 }
 0x26d   : > { %9542 = vst [vmem:[#allocation8_spill] sm:$0xff] %v9005_v5  ;;  %9543 = vst [vmem:[#allocation9_spill] sm:$0xff] %v9008_v56  ;;  %v3755_v43 = vpop.f32.mrb[77].mxu1  ;;  %v9014_v1 = vsel %vm2119_vm0, %v4589_v7, %v4591_v39  ;;  %v3897_v31 = vrot.slane %v6510_v4, 2 }
 0x26e   : > { %9544 = vst [vmem:[#allocation10_spill] sm:$0xff] %v9014_v1  ;;  %v3893_v53 = vrot.slane %v3755_v43, 2  ;;  %v6511_v49 = vpop.f32.mrb[78].mxu1  ;;  %v9017_v24 = vsel %vm2119_vm0, %v4585_v3, %v4587_v19  ;;  %v9020_v51 = vsel %vm2119_vm0, %v4587_v19, %v4589_v7 }
 0x26f   : > { %9545 = vst [vmem:[#allocation12_spill] sm:$0xff] %v9020_v51  ;;  %v3899_v63 = vrot.slane %v6511_v49, 2  ;;  %v3758_v58 = vpop.f32.mrb[79].mxu1 }
 0x270   : > { %v3895_v54 = vrot.slane %v3758_v58, 2  ;;  %v6614_v13 = vpop.f32.mrb[108].mxu0  ;;  %v3894_v45 = vsel %vm2731_vm1, %v3891_v30, %v3893_v53 }
 0x271   : > { %v4455_v17 = vpop.f32.mrb[109].mxu0  ;;  %v9024_v56 = vadd.f32 %v8824_v23, %v3894_v45  ;;  %v3900_v43 = vsel %vm2731_vm1, %v3897_v31, %v3899_v63  ;;  %v4597_v19 = vrot.slane %v6614_v13, 1 }
 0x272   : > { %v4593_v1 = vrot.slane %v4455_v17, 1  ;;  %v6615_v5 = vpop.f32.mrb[110].mxu0  ;;  %v9028_v3 = vadd.f32 %v8829_v48, %v3900_v43  ;;  %v3896_v7 = vsel %vm2731_vm1, %v3893_v53, %v3895_v54  ;;  %v3898_v4 = vsel %vm2731_vm1, %v3895_v54, %v3897_v31 }
 0x273   : > { %v4599_v49 = vrot.slane %v6615_v5, 1  ;;  %v4458_v58 = vpop.f32.mrb[111].mxu0  ;;  %v9033_v30 = vadd.f32 %v8832_v47, %v3896_v7  ;;  %v9036_v23 = vadd.f32 %v8835_v14, %v3898_v4 }
 0x274   : > { %v4595_v45 = vrot.slane %v4458_v58, 1  ;;  %v6514_v51 = vpop.f32.mrb[80].mxu1  ;;  %v9039_v17 = vsel %vm2119_vm0, %v4591_v39, %v4593_v1 }
 0x275   : > { %9546 = vst [vmem:[#allocation13_spill] sm:$0xff] %v9033_v30  ;;  %9547 = vst [vmem:[#allocation14_spill] sm:$0xff] %v9036_v23  ;;  %v3771_v48 = vpop.f32.mrb[81].mxu1  ;;  %v9042_v43 = vsel %vm2119_vm0, %v4597_v19, %v4599_v49  ;;  %v3905_v54 = vrot.slane %v6514_v51, 2 }
 0x276   : > { %9548 = vst [vmem:[#allocation15_spill] sm:$0xff] %v9042_v43  ;;  %v3901_v53 = vrot.slane %v3771_v48, 2  ;;  %v6515_v31 = vpop.f32.mrb[82].mxu1  ;;  %v9045_v5 = vsel %vm2119_vm0, %v4593_v1, %v4595_v45  ;;  %v9048_v47 = vsel %vm2119_vm0, %v4595_v45, %v4597_v19 }
 0x277   : > { %9549 = vst [vmem:[#allocation16_spill] sm:$0xff] %v9048_v47  ;;  %v3907_v14 = vrot.slane %v6515_v31, 2  ;;  %v3774_v13 = vpop.f32.mrb[83].mxu1 }
 0x278   : > { %v3903_v7 = vrot.slane %v3774_v13, 2  ;;  %v6618_v4 = vpop.f32.mrb[112].mxu0  ;;  %v3902_v39 = vsel %vm2731_vm1, %v3899_v63, %v3901_v53 }
 0x279   : > { %v4471_v58 = vpop.f32.mrb[113].mxu0  ;;  %v9052_v23 = vadd.f32 %v8840_v62, %v3902_v39  ;;  %v3908_v48 = vsel %vm2731_vm1, %v3905_v54, %v3907_v14  ;;  %v4605_v45 = vrot.slane %v6618_v4, 1 }
 0x27a   : > { %v4601_v43 = vrot.slane %v4471_v58, 1  ;;  %v6619_v30 = vpop.f32.mrb[114].mxu0  ;;  %v9056_v1 = vadd.f32 %v8845_v40, %v3908_v48  ;;  %v3904_v19 = vsel %vm2731_vm1, %v3901_v53, %v3903_v7  ;;  %v3906_v51 = vsel %vm2731_vm1, %v3903_v7, %v3905_v54 }
 0x27b   : > { %v4607_v31 = vrot.slane %v6619_v30, 1  ;;  %v4474_v13 = vpop.f32.mrb[115].mxu0  ;;  %v9061_v63 = vadd.f32 %v8848_v42, %v3904_v19  ;;  %v9064_v62 = vadd.f32 %v8851_v28, %v3906_v51 }
 0x27c   : > { %v4603_v39 = vrot.slane %v4474_v13, 1  ;;  %v6518_v47 = vpop.f32.mrb[84].mxu1  ;;  %v9067_v58 = vsel %vm2119_vm0, %v4599_v49, %v4601_v43 }
 0x27d   : > { %9550 = vst [vmem:[#allocation17_spill] sm:$0xff] %v9061_v63  ;;  %9551 = vst [vmem:[#allocation18_spill] sm:$0xff] %v9064_v62  ;;  %v3787_v40 = vpop.f32.mrb[85].mxu1  ;;  %v9070_v48 = vsel %vm2119_vm0, %v4605_v45, %v4607_v31  ;;  %v3913_v7 = vrot.slane %v6518_v47, 2 }
 0x27e   : > { %9552 = vst [vmem:[#allocation19_spill] sm:$0xff] %v9070_v48  ;;  %v3909_v53 = vrot.slane %v3787_v40, 2  ;;  %v6519_v54 = vpop.f32.mrb[86].mxu1  ;;  %v9073_v30 = vsel %vm2119_vm0, %v4601_v43, %v4603_v39  ;;  %v9076_v42 = vsel %vm2119_vm0, %v4603_v39, %v4605_v45 }
 0x27f   : > { %9553 = vst [vmem:[#allocation20_spill] sm:$0xff] %v9076_v42  ;;  %v3915_v28 = vrot.slane %v6519_v54, 2  ;;  %v3790_v4 = vpop.f32.mrb[87].mxu1 }
 0x280   : > { %v3911_v19 = vrot.slane %v3790_v4, 2  ;;  %v6622_v51 = vpop.f32.mrb[116].mxu0  ;;  %v3910_v49 = vsel %vm2731_vm1, %v3907_v14, %v3909_v53 }
 0x281   : > { %v4487_v13 = vpop.f32.mrb[117].mxu0  ;;  %v9080_v62 = vadd.f32 %v8856_v41, %v3910_v49  ;;  %v3916_v40 = vsel %vm2731_vm1, %v3913_v7, %v3915_v28  ;;  %v4613_v39 = vrot.slane %v6622_v51, 1 }
 0x282   : > { %v4609_v48 = vrot.slane %v4487_v13, 1  ;;  %v6623_v63 = vpop.f32.mrb[118].mxu0  ;;  %v9084_v43 = vadd.f32 %v8861_v9, %v3916_v40  ;;  %v3912_v45 = vsel %vm2731_vm1, %v3909_v53, %v3911_v19  ;;  %v3914_v47 = vsel %vm2731_vm1, %v3911_v19, %v3913_v7 }
 0x283   : > { %v4615_v54 = vrot.slane %v6623_v63, 1  ;;  %v4490_v4 = vpop.f32.mrb[119].mxu0  ;;  %v9089_v14 = vadd.f32 %v8864_v6, %v3912_v45  ;;  %v9092_v41 = vadd.f32 %v8867_v26, %v3914_v47 }
 0x284   : > { %v4611_v49 = vrot.slane %v4490_v4, 1  ;;  %v6522_v42 = vpop.f32.mrb[88].mxu1  ;;  %v9095_v13 = vsel %vm2119_vm0, %v4607_v31, %v4609_v48 }
 0x285   : > { %9554 = vst [vmem:[#allocation21_spill] sm:$0xff] %v9092_v41  ;;  %v3803_v9 = vpop.f32.mrb[89].mxu1  ;;  %v9098_v40 = vsel %vm2119_vm0, %v4613_v39, %v4615_v54  ;;  %v3921_v19 = vrot.slane %v6522_v42, 2 }
 0x286   : > { %9555 = vst [vmem:[#allocation22_spill] sm:$0xff] %v9098_v40  ;;  %v3917_v53 = vrot.slane %v3803_v9, 2  ;;  %v6523_v7 = vpop.f32.mrb[90].mxu1  ;;  %v9101_v63 = vsel %vm2119_vm0, %v4609_v48, %v4611_v49  ;;  %v9104_v6 = vsel %vm2119_vm0, %v4611_v49, %v4613_v39 }
 0x287   : > { %9556 = vst [vmem:[#allocation23_spill] sm:$0xff] %v9101_v63  ;;  %9557 = vst [vmem:[#allocation24_spill] sm:$0xff] %v9104_v6  ;;  %v3923_v26 = vrot.slane %v6523_v7, 2  ;;  %v3806_v51 = vpop.f32.mrb[91].mxu1 }
 0x288   : > { %v3919_v45 = vrot.slane %v3806_v51, 2  ;;  %v6626_v47 = vpop.f32.mrb[120].mxu0  ;;  %v3918_v31 = vsel %vm2731_vm1, %v3915_v28, %v3917_v53 }
 0x289   : > { %v3961_v4 = vsel %vm2731_vm1, %v3923_v26, 0.0  ;;  %v4503_v41 = vpop.f32.mrb[121].mxu0  ;;  %v9109_v40 = vadd.f32 %v8873_v57, %v3918_v31  ;;  %v3924_v9 = vsel %vm2731_vm1, %v3921_v19, %v3923_v26  ;;  %v4621_v28 = vrot.slane %v6626_v47, 1 }
 0x28a   : > { %v4617_v48 = vrot.slane %v4503_v41, 1  ;;  %v9112_v63 = vpop.f32.mrb[122].mxu0  ;;  %v9115_v39 = vadd.f32 %v8881_v52, %v3924_v9  ;;  %v3920_v42 = vsel %vm2731_vm1, %v3917_v53, %v3919_v45  ;;  %v9119_v49 = vadd.f32 %v8876_v8, %v3961_v4 }
 0x28b   : > { %v4623_v7 = vrot.slane %v9112_v63, 1  ;;  %v4506_v51 = vpop.f32.mrb[123].mxu0  ;;  %v9123_v57 = vadd.f32 %v8884_v59, %v3920_v42  ;;  %v3922_v26 = vsel %vm2731_vm1, %v3919_v45, %v3921_v19 }
 0x28c   : > { %v4619_v41 = vrot.slane %v4506_v51, 1  ;;  %v6542_v31 = vpop.f32.mrb[20].mxu1  ;;  %v9127_v6 = vsel %vm2119_vm0, %v4615_v54, %v4617_v48  ;;  %v9130_v52 = vadd.f32 %v8887_v37, %v3922_v26 }
 0x28d   : > { %v6699_v8 = vadd.f32 %v8891_v21, %v6542_v31  ;;  %v4097_v53 = vpop.f32.mrb[21].mxu1  ;;  %v9134_v47 = vsel %vm2119_vm0, %v4621_v28, %v4623_v7 }
 0x28e   : > { %v6703_v63 = vadd.f32 %v8896_v35, %v4097_v53  ;;  %v6543_v59 = vpop.f32.mrb[22].mxu1  ;;  %v9138_v4 = vsel %vm2119_vm0, %v4617_v48, %v4619_v41  ;;  %v9141_v19 = vsel %vm2119_vm0, %v4619_v41, %v4621_v28 }
 0x28f   : > { %9558 = vst [vmem:[#allocation25_spill] sm:$0xff] %v9141_v19  ;;  %v4664_v54 = vadd.f32 %v6699_v8, %v8902_v32  ;;  %v6707_v37 = vadd.f32 %v8912_v0, %v6543_v59  ;;  %v4100_v45 = vpop.f32.mrb[23].mxu1 }
 0x290   : > { %v4662_v21 = vadd.f32 %v6703_v63, %v8905_v25  ;;  %v6711_v9 = vadd.f32 %v8899_v10, %v4100_v45  ;;  %v6646_v42 = vpop.f32.mrb[124].mxu0  ;;  %v9153_v25 = vld [vmem:[%s9495_s9] ss:$0 sm:$0xff] }
 0x291   : > { %v4665_v51 = vadd.f32 %v6707_v37, %v8927_v16  ;;  %v4797_v35 = vpop.f32.mrb[125].mxu0  ;;  %v4979_v31 = vrot.slane %v6646_v42, 2 }
 0x292   : > { %v4663_v26 = vadd.f32 %v6711_v9, %v8908_v33  ;;  %v6647_v48 = vpop.f32.mrb[126].mxu0  ;;  %v4976_v41 = vrot.slane %v4797_v35, 2 }
 0x293   : > { %v4981_v53 = vrot.slane %v6647_v48, 2  ;;  %v4800_v28 = vpop.f32.mrb[127].mxu0 }
 0x294   : > { %v4977_v19 = vrot.slane %v4800_v28, 2  ;;  %v6546_v32 = vpop.f32.mrb[24].mxu1 }
 0x295   : > { %v4982_v0 = vsel %vm2731_vm1, %v4979_v31, %v4981_v53  ;;  %v6715_v10 = vadd.f32 %v8916_v12, %v6546_v32  ;;  %v4113_v16 = vpop.f32.mrb[25].mxu1 }
 0x296   : > { %v5086_v8 = vadd.f32 %v4982_v0, %v4664_v54  ;;  %v4978_v33 = vsel %vm2731_vm1, %v4976_v41, %v4977_v19  ;;  %v4980_v63 = vsel %vm2731_vm1, %v4977_v19, %v4979_v31  ;;  %v6719_v59 = vadd.f32 %v8921_v20, %v4113_v16  ;;  %v6547_v37 = vpop.f32.mrb[26].mxu1 }
 0x297   : > { %v5084_v45 = vadd.f32 %v4978_v33, %v4662_v21  ;;  %v5085_v9 = vadd.f32 %v4980_v63, %v4663_v26  ;;  %v4668_v42 = vadd.f32 %v6715_v10, %v8930_v61  ;;  %v6723_v35 = vadd.f32 %v8940_v44, %v6547_v37  ;;  %v4116_v48 = vpop.f32.mrb[27].mxu1 }
 0x298   : > { %v5129_v28 = vadd.f32 %v9153_v25, %v5086_v8  ;;  %v4666_v12 = vadd.f32 %v6719_v59, %v8933_v36  ;;  %v6727_v54 = vadd.f32 %v8924_v46, %v4116_v48  ;;  %v6650_v32 = vpop.f32.mrb[128].mxu0  ;;  %v9171_v46 = vsel %vm2119_vm0, %v4623_v7, 0.0 }
 0x299   : > { %v5127_v41 = vadd.f32 %v9153_v25, %v5084_v45  ;;  %v5128_v19 = vadd.f32 %v9153_v25, %v5085_v9  ;;  %v9167_v20 = vadd.f32 %v6723_v35, %v8955_v34  ;;  %v4813_v21 = vpop.f32.mrb[129].mxu0  ;;  %v4987_v16 = vrot.slane %v6650_v32, 2 }
 0x29a   : > { %v5165_v26 = vsub.f32 0.0, %v5129_v28  ;;  %v4667_v61 = vadd.f32 %v6727_v54, %v8936_v29  ;;  %v4983_v44 = vrot.slane %v4813_v21, 2  ;;  %v6651_v31 = vpop.f32.mrb[130].mxu0 }
 0x29b   : > { %v5163_v0 = vsub.f32 0.0, %v5127_v41  ;;  %v5164_v10 = vsub.f32 0.0, %v5128_v19  ;;  %v4989_v36 = vrot.slane %v6651_v31, 2  ;;  %v4816_v8 = vpop.f32.mrb[131].mxu0 }
 0x29c   : > { %v5203_v33 = vmul.f32 1.442695, %v5165_v26  ;;  %v4984_v63 = vsel %vm2731_vm1, %v4981_v53, %v4983_v44  ;;  %v4985_v59 = vrot.slane %v4816_v8, 2  ;;  %v6550_v34 = vpop.f32.mrb[28].mxu1 }
 0x29d   : > { %v5199_v37 = vmul.f32 1.442695, %v5163_v0  ;;  %v5201_v45 = vmul.f32 1.442695, %v5164_v10  ;;  %v5087_v9 = vadd.f32 %v4984_v63, %v4665_v51  ;;  %v4990_v29 = vsel %vm2731_vm1, %v4987_v16, %v4989_v36  ;;  %v4129_v35 = vpop.f32.mrb[29].mxu1  ;;  %v9560_v63 = vld [vmem:[#allocation2_spill] sm:$0xff] }
 0x29e   : > { %6997 = vpow2.f32 %v5203_v33  ;;  %v5090_v48 = vadd.f32 %v4990_v29, %v4668_v42  ;;  %v4986_v28 = vsel %vm2731_vm1, %v4983_v44, %v4985_v59  ;;  %v4988_v54 = vsel %vm2731_vm1, %v4985_v59, %v4987_v16  ;;  %v6551_v32 = vpop.f32.mrb[30].mxu1 }
 0x29f   : > { %6999 = vpow2.f32 %v5199_v37  ;;  %v5130_v7 = vadd.f32 %v9153_v25, %v5087_v9  ;;  %v5088_v41 = vadd.f32 %v4986_v28, %v4666_v12  ;;  %v5089_v53 = vadd.f32 %v4988_v54, %v4667_v61  ;;  %v4132_v19 = vpop.f32.mrb[31].mxu1  ;;  %v9559_v12 = vld [vmem:[#allocation11_spill] sm:$0xff] }
 0x2a0   : > { %7001 = vpow2.f32 %v5201_v45  ;;  %v5133_v21 = vadd.f32 %v9153_v25, %v5090_v48  ;;  %v6731_v51 = vadd.f32 %v8944_v60, %v6550_v34  ;;  %v6735_v26 = vadd.f32 %v8949_v15, %v4129_v35  ;;  %v6654_v31 = vpop.f32.mrb[132].mxu0  ;;  %v9561_v35 = vld [vmem:[#allocation3_spill] sm:$0xff] }
 0x2a1   : > { %v5166_v42 = vsub.f32 0.0, %v5130_v7  ;;  %v5131_v44 = vadd.f32 %v9153_v25, %v5088_v41  ;;  %v5132_v0 = vadd.f32 %v9153_v25, %v5089_v53  ;;  %v6739_v10 = vadd.f32 %v8968_v27, %v6551_v32  ;;  %v4829_v16 = vpop.f32.mrb[133].mxu0 }
 0x2a2   : > { %v5169_v8 = vsub.f32 0.0, %v5133_v21  ;;  %v4672_v61 = vadd.f32 %v6731_v51, %v9559_v12  ;;  %v4670_v33 = vadd.f32 %v6735_v26, %v8961_v55  ;;  %v6743_v59 = vadd.f32 %v9560_v63, %v4132_v19  ;;  %v9187_v37 = vpop.f32.mrb[134].mxu0 }
 0x2a3   : > { %v5205_v60 = vmul.f32 1.442695, %v5166_v42  ;;  %v5167_v15 = vsub.f32 0.0, %v5131_v44  ;;  %v5168_v34 = vsub.f32 0.0, %v5132_v0  ;;  %v9190_v45 = vadd.f32 %v6739_v10, %v8983_v2  ;;  %v4832_v9 = vpop.f32.mrb[135].mxu0 }
 0x2a4   : > { %v5211_v29 = vmul.f32 1.442695, %v5169_v8  ;;  %v4671_v27 = vadd.f32 %v6743_v59, %v9561_v35  ;;  %v4995_v48 = vrot.slane %v6654_v31, 2  ;;  %v4991_v28 = vrot.slane %v4829_v16, 2  ;;  %v6554_v54 = vpop.f32.mrb[32].mxu1  ;;  %v9562_v31 = vld [vmem:[#allocation4_spill] sm:$0xff] }
 0x2a5   : > { %7003 = vpow2.f32 %v5205_v60  ;;  %v5207_v32 = vmul.f32 1.442695, %v5167_v15  ;;  %v5209_v55 = vmul.f32 1.442695, %v5168_v34  ;;  %v4997_v7 = vrot.slane %v9187_v37, 2  ;;  %v4145_v41 = vpop.f32.mrb[33].mxu1 }
 0x2a6   : > { %7005 = vpow2.f32 %v5211_v29  ;;  %v4992_v53 = vsel %vm2731_vm1, %v4989_v36, %v4991_v28  ;;  %v4993_v19 = vrot.slane %v4832_v9, 2  ;;  %v6747_v2 = vadd.f32 %v8972_v38, %v6554_v54  ;;  %v6555_v21 = vpop.f32.mrb[34].mxu1  ;;  %v9563_v29 = vld [vmem:[#allocation6_spill] sm:$0xff] }
 0x2a7   : > { %7007 = vpow2.f32 %v5207_v32  ;;  %v5091_v51 = vadd.f32 %v4992_v53, %v9167_v20  ;;  %v4998_v26 = vsel %vm2731_vm1, %v4995_v48, %v4997_v7  ;;  %v6751_v42 = vadd.f32 %v9562_v31, %v4145_v41  ;;  %v4148_v44 = vpop.f32.mrb[35].mxu1 }
 0x2a8   : > { %v6998_v0 = vpop.eup %6997  ;;  %7009 = vpow2.f32 %v5209_v55  ;;  %v5094_v10 = vadd.f32 %v4998_v26, %v4672_v61  ;;  %v4994_v16 = vsel %vm2731_vm1, %v4991_v28, %v4993_v19  ;;  %v4996_v36 = vsel %vm2731_vm1, %v4993_v19, %v4995_v48  ;;  %v9203_v8 = vpop.f32.mrb[136].mxu0 }
 0x2a9   : > { %v7000_v38 = vpop.eup %6999  ;;  %v5273_v12 = vadd.f32 1.0, %v6998_v0  ;;  %v5134_v20 = vadd.f32 %v9153_v25, %v5091_v51  ;;  %v5092_v63 = vadd.f32 %v4994_v16, %v4670_v33  ;;  %v5093_v59 = vadd.f32 %v4996_v36, %v4671_v27  ;;  %v4845_v60 = vpop.f32.mrb[137].mxu0  ;;  %v9564_v51 = vld [vmem:[#allocation5_spill] sm:$0xff] }
 0x2aa   : > { %v7002_v15 = vpop.eup %7001  ;;  %v5271_v34 = vadd.f32 1.0, %v7000_v38  ;;  %v5137_v9 = vadd.f32 %v9153_v25, %v5094_v10  ;;  %v4676_v35 = vadd.f32 %v6747_v2, %v9563_v29  ;;  %v4674_v61 = vadd.f32 %v6751_v42, %v8989_v22  ;;  %v9209_v28 = vpop.f32.mrb[138].mxu0 }
 0x2ab   : > { %7011 = vrcp.f32 %v5273_v12  ;;  %v5272_v48 = vadd.f32 1.0, %v7002_v15  ;;  %v5170_v54 = vsub.f32 0.0, %v5134_v20  ;;  %v5135_v32 = vadd.f32 %v9153_v25, %v5092_v63  ;;  %v4848_v55 = vpop.f32.mrb[139].mxu0  ;;  %v9565_v12 = vld [vmem:[#allocation7_spill] sm:$0xff] }
 0x2ac   : > { %7013 = vrcp.f32 %v5271_v34  ;;  %v5173_v33 = vsub.f32 0.0, %v5137_v9  ;;  %v5136_v27 = vadd.f32 %v9153_v25, %v5093_v59  ;;  %v6755_v41 = vadd.f32 %v8996_v50, %v6555_v21  ;;  %v6558_v53 = vpop.f32.mrb[36].mxu1 }
 0x2ad   : > { %7015 = vrcp.f32 %v5272_v48  ;;  %v5213_v19 = vmul.f32 1.442695, %v5170_v54  ;;  %v5171_v2 = vsub.f32 0.0, %v5135_v32  ;;  %v6759_v22 = vadd.f32 %v9564_v51, %v4148_v44  ;;  %v4161_v26 = vpop.f32.mrb[37].mxu1 }
 0x2ae   : > { %v5219_v31 = vmul.f32 1.442695, %v5173_v33  ;;  %v5172_v42 = vsub.f32 0.0, %v5136_v27  ;;  %v9216_v0 = vadd.f32 %v6755_v41, %v9011_v11  ;;  %v5003_v10 = vrot.slane %v9203_v8, 2  ;;  %v6559_v16 = vpop.f32.mrb[38].mxu1 }
 0x2af   : > { %v7004_v36 = vpop.eup %7003  ;;  %7017 = vpow2.f32 %v5213_v19  ;;  %v5215_v38 = vmul.f32 1.442695, %v5171_v2  ;;  %v4675_v50 = vadd.f32 %v6759_v22, %v9565_v12  ;;  %v4999_v21 = vrot.slane %v4845_v60, 2  ;;  %v4164_v20 = vpop.f32.mrb[39].mxu1 }
 0x2b0   : > { %v7006_v63 = vpop.eup %7005  ;;  %v5274_v59 = vadd.f32 1.0, %v7004_v36  ;;  %7019 = vpow2.f32 %v5219_v31  ;;  %v5217_v44 = vmul.f32 1.442695, %v5172_v42  ;;  %v5005_v15 = vrot.slane %v9209_v28, 2  ;;  %v9221_v34 = vpop.f32.mrb[140].mxu0 }
 0x2b1   : > { %v7008_v11 = vpop.eup %7007  ;;  %v5277_v9 = vadd.f32 1.0, %v7006_v63  ;;  %7021 = vpow2.f32 %v5215_v38  ;;  %v5000_v8 = vsel %vm2731_vm1, %v4997_v7, %v4999_v21  ;;  %v5001_v29 = vrot.slane %v4848_v55, 2  ;;  %v9226_v48 = vpop.f32.mrb[141].mxu0  ;;  %v9566_v63 = vld [vmem:[#allocation8_spill] sm:$0xff] }
 0x2b2   : > { %v7010_v60 = vpop.eup %7009  ;;  %7023 = vrcp.f32 %v5274_v59  ;;  %v5275_v54 = vadd.f32 1.0, %v7008_v11  ;;  %v5095_v32 = vadd.f32 %v5000_v8, %v9190_v45  ;;  %v5006_v33 = vsel %vm2731_vm1, %v5003_v10, %v5005_v15  ;;  %v9232_v27 = vpop.f32.mrb[142].mxu0 }
 0x2b3   : > { %7025 = vrcp.f32 %v5277_v9  ;;  %v5276_v37 = vadd.f32 1.0, %v7010_v60  ;;  %v5098_v7 = vadd.f32 %v5006_v33, %v4676_v35  ;;  %v5002_v55 = vsel %vm2731_vm1, %v4999_v21, %v5001_v29  ;;  %v9241_v41 = vpop.f32.mrb[143].mxu0 }
 0x2b4   : > { %7027 = vrcp.f32 %v5275_v54  ;;  %v5138_v45 = vadd.f32 %v9153_v25, %v5095_v32  ;;  %v5004_v19 = vsel %vm2731_vm1, %v5001_v29, %v5003_v10  ;;  %v5096_v2 = vadd.f32 %v5002_v55, %v4674_v61  ;;  %v6562_v51 = vpop.f32.mrb[40].mxu1  ;;  %v9568_v54 = vld [vmem:[#allocation9_spill] sm:$0xff] }
 0x2b5   : > { %v7012_v22 = vpop.eup %7011  ;;  %7029 = vrcp.f32 %v5276_v37  ;;  %v5141_v31 = vadd.f32 %v9153_v25, %v5098_v7  ;;  %v5097_v42 = vadd.f32 %v5004_v19, %v4675_v50  ;;  %v6763_v36 = vadd.f32 %v9000_v18, %v6558_v53  ;;  %v4177_v35 = vpop.f32.mrb[41].mxu1  ;;  %v9567_v50 = vld [vmem:[#allocation10_spill] sm:$0xff] }
 0x2b6   : > { %v7014_v38 = vpop.eup %7013  ;;  %5345 = vst [vmem:[%s9238_s17 + $0x10] sm:$0xff] %v7012_v22  ;;  %7031 = vpow2.f32 %v5217_v44  ;;  %v5174_v12 = vsub.f32 0.0, %v5138_v45  ;;  %v5139_v21 = vadd.f32 %v9153_v25, %v5096_v2  ;;  %v6767_v10 = vadd.f32 %v9566_v63, %v4161_v26  ;;  %v9250_v61 = vpop.f32.mrb[42].mxu1  ;;  %v9569_v22 = vld [vmem:[#allocation12_spill] sm:$0xff] }
 0x2b7   : > { %v7016_v59 = vpop.eup %7015  ;;  %5343 = vst [vmem:[%s9238_s17] sm:$0xff] %v7014_v38  ;;  %v5177_v11 = vsub.f32 0.0, %v5141_v31  ;;  %v5140_v9 = vadd.f32 %v9153_v25, %v5097_v42  ;;  %v4680_v8 = vadd.f32 %v6763_v36, %v9567_v50  ;;  %v6771_v18 = vadd.f32 %v9024_v56, %v6559_v16  ;;  %v9256_v53 = vpop.f32.mrb[43].mxu1 }
 0x2b8   : > { %5344 = vst [vmem:[%s9238_s17 + $0x8] sm:$0xff] %v7016_v59  ;;  %v5221_v44 = vmul.f32 1.442695, %v5174_v12  ;;  %v5175_v29 = vsub.f32 0.0, %v5139_v21  ;;  %v4678_v60 = vadd.f32 %v6767_v10, %v9017_v24  ;;  %v6775_v26 = vadd.f32 %v9568_v54, %v4164_v20  ;;  %v9261_v32 = vpop.f32.mrb[144].mxu0 }
 0x2b9   : > { %v7018_v33 = vpop.eup %7017  ;;  %v5227_v37 = vmul.f32 1.442695, %v5177_v11  ;;  %v5176_v7 = vsub.f32 0.0, %v5140_v9  ;;  %v9264_v55 = vadd.f32 %v6771_v18, %v9039_v17  ;;  %v5011_v45 = vrot.slane %v9221_v34, 2  ;;  %v9267_v56 = vpop.f32.mrb[145].mxu0  ;;  %v9570_v9 = vld [vmem:[#allocation13_spill] sm:$0xff] }
 0x2ba   : > { %v7020_v16 = vpop.eup %7019  ;;  %v5278_v19 = vadd.f32 1.0, %v7018_v33  ;;  %7033 = vpow2.f32 %v5221_v44  ;;  %v5223_v2 = vmul.f32 1.442695, %v5175_v29  ;;  %v4679_v24 = vadd.f32 %v6775_v26, %v9569_v22  ;;  %v9270_v20 = vpop.f32.mrb[146].mxu0 }
 0x2bb   : > { %v7022_v31 = vpop.eup %7021  ;;  %v5281_v42 = vadd.f32 1.0, %v7020_v16  ;;  %7035 = vpow2.f32 %v5227_v37  ;;  %v5225_v36 = vmul.f32 1.442695, %v5176_v7  ;;  %v5007_v17 = vrot.slane %v9226_v48, 2  ;;  %v9273_v38 = vpop.f32.mrb[147].mxu0  ;;  %v9571_v7 = vld [vmem:[#allocation15_spill] sm:$0xff] }
 0x2bc   : > { %v7024_v34 = vpop.eup %7023  ;;  %7037 = vrcp.f32 %v5278_v19  ;;  %v5279_v12 = vadd.f32 1.0, %v7022_v31  ;;  %v5013_v21 = vrot.slane %v9232_v27, 2  ;;  %v5009_v63 = vrot.slane %v9241_v41, 2  ;;  %v9277_v10 = vpop.f32.mrb[44].mxu1  ;;  %v9574_v27 = vld [vmem:[#allocation17_spill] sm:$0xff] }
 0x2bd   : > { %v7026_v59 = vpop.eup %7025  ;;  %5346 = vst [vmem:[%s9238_s17 + $0x18] sm:$0xff] %v7024_v34  ;;  %7039 = vrcp.f32 %v5281_v42  ;;  %v5008_v48 = vsel %vm2731_vm1, %v5005_v15, %v5007_v17  ;;  %v6779_v11 = vadd.f32 %v9028_v3, %v6562_v51  ;;  %v6783_v50 = vadd.f32 %v9570_v9, %v4177_v35  ;;  %v9285_v18 = vpop.f32.mrb[45].mxu1 }
 0x2be   : > { %v7028_v44 = vpop.eup %7027  ;;  %5349 = vst [vmem:[%s9238_s17 + $0x30] sm:$0xff] %v7026_v59  ;;  %7041 = vrcp.f32 %v5279_v12  ;;  %v5099_v41 = vadd.f32 %v5008_v48, %v9216_v0  ;;  %v5014_v29 = vsel %vm2731_vm1, %v5011_v45, %v5013_v21  ;;  %v5010_v28 = vsel %vm2731_vm1, %v5007_v17, %v5009_v63  ;;  %v9293_v54 = vpop.f32.mrb[46].mxu1 }
 0x2bf   : > { %v7030_v15 = vpop.eup %7029  ;;  %5347 = vst [vmem:[%s9238_s17 + $0x20] sm:$0xff] %v7028_v44  ;;  %7043 = vpow2.f32 %v5223_v2  ;;  %v5102_v3 = vadd.f32 %v5014_v29, %v4680_v8  ;;  %v5012_v51 = vsel %vm2731_vm1, %v5009_v63, %v5011_v45  ;;  %v5100_v35 = vadd.f32 %v5010_v28, %v4678_v60  ;;  %v9297_v26 = vpop.f32.mrb[47].mxu1 }
 0x2c0   : > { %v7032_v33 = vpop.eup %7031  ;;  %5348 = vst [vmem:[%s9238_s17 + $0x28] sm:$0xff] %v7030_v15  ;;  %7045 = vpow2.f32 %v5225_v36  ;;  %v5142_v0 = vadd.f32 %v9153_v25, %v5099_v41  ;;  %v5101_v37 = vadd.f32 %v5012_v51, %v4679_v24  ;;  %v4684_v16 = vadd.f32 %v6779_v11, %v9571_v7  ;;  %v9302_v19 = vpop.f32.mrb[148].mxu0  ;;  %v9572_v24 = vld [vmem:[#allocation14_spill] sm:$0xff] }
 0x2c1   : > { %v5280_v22 = vadd.f32 1.0, %v7032_v33  ;;  %v5145_v31 = vadd.f32 %v9153_v25, %v5102_v3  ;;  %v5143_v8 = vadd.f32 %v9153_v25, %v5100_v35  ;;  %v4682_v45 = vadd.f32 %v6783_v50, %v9045_v5  ;;  %v9307_v60 = vpop.f32.mrb[149].mxu0 }
 0x2c2   : > { %v5178_v2 = vsub.f32 0.0, %v5142_v0  ;;  %v5144_v42 = vadd.f32 %v9153_v25, %v5101_v37  ;;  %v6787_v36 = vadd.f32 %v9052_v23, %v9250_v61  ;;  %v6791_v17 = vadd.f32 %v9572_v24, %v9256_v53  ;;  %v9314_v34 = vpop.f32.mrb[150].mxu0  ;;  %v9573_v23 = vld [vmem:[#allocation16_spill] sm:$0xff] }
 0x2c3   : > { %7047 = vrcp.f32 %v5280_v22  ;;  %v5181_v12 = vsub.f32 0.0, %v5145_v31  ;;  %v5179_v63 = vsub.f32 0.0, %v5143_v8  ;;  %v5019_v59 = vrot.slane %v9261_v32, 2  ;;  %v9317_v48 = vpop.f32.mrb[151].mxu0 }
 0x2c4   : > { %v7034_v5 = vpop.eup %7033  ;;  %v5229_v11 = vmul.f32 1.442695, %v5178_v2  ;;  %v5180_v9 = vsub.f32 0.0, %v5144_v42  ;;  %v9320_v50 = vadd.f32 %v6787_v36, %v9067_v58  ;;  %v4683_v61 = vadd.f32 %v6791_v17, %v9573_v23  ;;  %v9323_v44 = vpop.f32.mrb[48].mxu1 }
 0x2c5   : > { %v7036_v53 = vpop.eup %7035  ;;  %v5282_v41 = vadd.f32 1.0, %v7034_v5  ;;  %v5235_v29 = vmul.f32 1.442695, %v5181_v12  ;;  %v5231_v28 = vmul.f32 1.442695, %v5179_v63  ;;  %v5015_v32 = vrot.slane %v9267_v56, 2 }
 0x2c6   : > { %v7038_v15 = vpop.eup %7037  ;;  %v5285_v3 = vadd.f32 1.0, %v7036_v53  ;;  %7049 = vpow2.f32 %v5229_v11  ;;  %v5233_v51 = vmul.f32 1.442695, %v5180_v9  ;;  %v5021_v35 = vrot.slane %v9270_v20, 2  ;;  %v9327_v33 = vpop.f32.mrb[49].mxu1  ;;  %v9575_v53 = vld [vmem:[#allocation19_spill] sm:$0xff] }
 0x2c7   : > { %v7040_v58 = vpop.eup %7039  ;;  %5350 = vst [vmem:[%s9238_s17 + $0x38] sm:$0xff] %v7038_v15  ;;  %7051 = vrcp.f32 %v5282_v41  ;;  %v5016_v0 = vsel %vm2731_vm1, %v5013_v21, %v5015_v32  ;;  %v5017_v37 = vrot.slane %v9273_v38, 2  ;;  %v6795_v56 = vadd.f32 %v9056_v1, %v9277_v10  ;;  %v9336_v7 = vpop.f32.mrb[50].mxu1 }
 0x2c8   : > { %v7042_v22 = vpop.eup %7041  ;;  %5353 = vst [vmem:[%s9238_s17 + $0x50] sm:$0xff] %v7040_v58  ;;  %7053 = vrcp.f32 %v5285_v3  ;;  %v5103_v31 = vadd.f32 %v5016_v0, %v9264_v55  ;;  %v5022_v8 = vsel %vm2731_vm1, %v5019_v59, %v5021_v35  ;;  %v6799_v2 = vadd.f32 %v9574_v27, %v9285_v18  ;;  %v9345_v21 = vpop.f32.mrb[51].mxu1  ;;  %v9576_v0 = vld [vmem:[#allocation18_spill] sm:$0xff] }
 0x2c9   : > { %v9347_v38 = vpop.f32.mrb[152].mxu0  ;;  %v7044_v42 = vpop.eup %7043  ;;  %5351 = vst [vmem:[%s9238_s17 + $0x40] sm:$0xff] %v7042_v22  ;;  %7055 = vpow2.f32 %v5235_v29  ;;  %v5106_v1 = vadd.f32 %v5022_v8, %v4684_v16  ;;  %v5018_v10 = vsel %vm2731_vm1, %v5015_v32, %v5017_v37  ;;  %v5020_v36 = vsel %vm2731_vm1, %v5017_v37, %v5019_v59 }
 0x2ca   : > { %v9352_v55 = vpop.f32.mrb[153].mxu0  ;;  %v7046_v24 = vpop.eup %7045  ;;  %v5283_v17 = vadd.f32 1.0, %v7044_v42  ;;  %7057 = vpow2.f32 %v5231_v28  ;;  %v5146_v12 = vadd.f32 %v9153_v25, %v5103_v31  ;;  %v5104_v18 = vadd.f32 %v5018_v10, %v4682_v45 }
 0x2cb   : > { %v9355_v63 = vpop.f32.mrb[154].mxu0  ;;  %v5284_v5 = vadd.f32 1.0, %v7046_v24  ;;  %7059 = vpow2.f32 %v5233_v51  ;;  %v5149_v11 = vadd.f32 %v9153_v25, %v5106_v1  ;;  %v5105_v16 = vadd.f32 %v5020_v36, %v4683_v61 }
 0x2cc   : > { %v9358_v9 = vpop.f32.mrb[155].mxu0  ;;  %7061 = vrcp.f32 %v5283_v17  ;;  %v5182_v59 = vsub.f32 0.0, %v5146_v12  ;;  %v5147_v23 = vadd.f32 %v9153_v25, %v5104_v18  ;;  %v4688_v41 = vadd.f32 %v6795_v56, %v9575_v53  ;;  %v9362_v29 = vpop.f32.mrb[52].mxu1 }
 0x2cd   : > { %v7048_v28 = vpop.eup %7047  ;;  %7063 = vrcp.f32 %v5284_v5  ;;  %v5185_v45 = vsub.f32 0.0, %v5149_v11  ;;  %v5148_v32 = vadd.f32 %v9153_v25, %v5105_v16  ;;  %v4686_v15 = vadd.f32 %v6799_v2, %v9073_v30  ;;  %v9366_v3 = vpop.f32.mrb[53].mxu1 }
 0x2ce   : > { %5352 = vst [vmem:[%s9238_s17 + $0x48] sm:$0xff] %v7048_v28  ;;  %v5237_v61 = vmul.f32 1.442695, %v5182_v59  ;;  %v5183_v51 = vsub.f32 0.0, %v5147_v23  ;;  %v6803_v58 = vadd.f32 %v9080_v62, %v9293_v54  ;;  %v6807_v37 = vadd.f32 %v9576_v0, %v9297_v26  ;;  %v9373_v56 = vpop.f32.mrb[54].mxu1  ;;  %v9577_v62 = vld [vmem:[#allocation20_spill] sm:$0xff] }
 0x2cf   : > { %v5243_v22 = vmul.f32 1.442695, %v5185_v45  ;;  %v5184_v31 = vsub.f32 0.0, %v5148_v32  ;;  %v5027_v8 = vrot.slane %v9302_v19, 2  ;;  %v5023_v30 = vrot.slane %v9307_v60, 2  ;;  %v9377_v27 = vpop.f32.mrb[55].mxu1 }
 0x2d0   : > { %v7050_v2 = vpop.eup %7049  ;;  %7065 = vpow2.f32 %v5237_v61  ;;  %v5239_v42 = vmul.f32 1.442695, %v5183_v51  ;;  %v9380_v1 = vadd.f32 %v6803_v58, %v9095_v13  ;;  %v4687_v54 = vadd.f32 %v6807_v37, %v9577_v62  ;;  %v9383_v26 = vpop.f32.mrb[156].mxu0  ;;  %v9578_v58 = vld [vmem:[#allocation22_spill] sm:$0xff] }
 0x2d1   : > { %v7052_v10 = vpop.eup %7051  ;;  %v5286_v36 = vadd.f32 1.0, %v7050_v2  ;;  %7067 = vpow2.f32 %v5243_v22  ;;  %v5241_v19 = vmul.f32 1.442695, %v5184_v31  ;;  %v5024_v60 = vsel %vm2731_vm1, %v5021_v35, %v5023_v30  ;;  %v9388_v24 = vpop.f32.mrb[157].mxu0  ;;  %v9579_v22 = vld [vmem:[#allocation23_spill] sm:$0xff]  ;;  %v9580_v2 = vld [vmem:[#allocation21_spill] sm:$0xff] }
 0x2d2   : > { %v7054_v17 = vpop.eup %7053  ;;  %5354 = vst [vmem:[%s9238_s17 + $0x58] sm:$0xff] %v7052_v10  ;;  %7069 = vpow2.f32 %v5239_v42  ;;  %v5107_v13 = vadd.f32 %v5024_v60, %v9320_v50  ;;  %v5029_v12 = vrot.slane %v9314_v34, 2  ;;  %v5025_v18 = vrot.slane %v9317_v48, 2  ;;  %v9394_v5 = vpop.f32.mrb[158].mxu0 }
 0x2d3   : > { %v7056_v11 = vpop.eup %7055  ;;  %5357 = vst [vmem:[%s9238_s17 + $0x70] sm:$0xff] %v7054_v17  ;;  %7071 = vrcp.f32 %v5286_v36  ;;  %v6811_v20 = vadd.f32 %v9084_v43, %v9323_v44  ;;  %v6815_v35 = vadd.f32 %v9089_v14, %v9327_v33  ;;  %v6819_v16 = vadd.f32 %v9109_v40, %v9336_v7  ;;  %v9403_v59 = vpop.f32.mrb[159].mxu0 }
 0x2d4   : > { %v7058_v50 = vpop.eup %7057  ;;  %v5289_v34 = vadd.f32 1.0, %v7056_v11  ;;  %7073 = vpow2.f32 %v5241_v19  ;;  %v5150_v48 = vadd.f32 %v9153_v25, %v5107_v13  ;;  %v5030_v23 = vsel %vm2731_vm1, %v5027_v8, %v5029_v12 }
 0x2d5   : > { %v7060_v53 = vpop.eup %7059  ;;  %v5287_v28 = vadd.f32 1.0, %v7058_v50  ;;  %v5110_v43 = vadd.f32 %v5030_v23, %v4688_v41  ;;  %v5026_v44 = vsel %vm2731_vm1, %v5023_v30, %v5025_v18  ;;  %v5028_v14 = vsel %vm2731_vm1, %v5025_v18, %v5027_v8  ;;  %v9581_v18 = vld [vmem:[#allocation24_spill] sm:$0xff] }
 0x2d6   : > { %v7062_v33 = vpop.eup %7061  ;;  %7075 = vrcp.f32 %v5289_v34  ;;  %v5288_v40 = vadd.f32 1.0, %v7060_v53  ;;  %v5186_v7 = vsub.f32 0.0, %v5150_v48  ;;  %v5108_v45 = vadd.f32 %v5026_v44, %v4686_v15 }
 0x2d7   : > { %v7064_v32 = vpop.eup %7063  ;;  %5355 = vst [vmem:[%s9238_s17 + $0x60] sm:$0xff] %v7062_v33  ;;  %7077 = vrcp.f32 %v5287_v28  ;;  %v5153_v61 = vadd.f32 %v9153_v25, %v5110_v43  ;;  %v5109_v51 = vadd.f32 %v5028_v14, %v4687_v54  ;;  %v4692_v0 = vadd.f32 %v6811_v20, %v9578_v58 }
 0x2d8   : > { %5356 = vst [vmem:[%s9238_s17 + $0x68] sm:$0xff] %v7064_v32  ;;  %7079 = vrcp.f32 %v5288_v40  ;;  %v5245_v41 = vmul.f32 1.442695, %v5186_v7  ;;  %v5151_v37 = vadd.f32 %v9153_v25, %v5108_v45  ;;  %v4690_v31 = vadd.f32 %v6815_v35, %v9579_v22 }
 0x2d9   : > { %v5189_v8 = vsub.f32 0.0, %v5153_v61  ;;  %v5152_v30 = vadd.f32 %v9153_v25, %v5109_v51  ;;  %v9417_v15 = vadd.f32 %v6819_v16, %v9127_v6  ;;  %v6823_v42 = vadd.f32 %v9580_v2, %v9345_v21 }
 0x2da   : > { %v7066_v62 = vpop.eup %7065  ;;  %7081 = vpow2.f32 %v5245_v41  ;;  %v5187_v54 = vsub.f32 0.0, %v5151_v37  ;;  %v5035_v10 = vrot.slane %v9347_v38, 2  ;;  %v5031_v36 = vrot.slane %v9352_v55, 2 }
 0x2db   : > { %v7068_v19 = vpop.eup %7067  ;;  %v5290_v60 = vadd.f32 1.0, %v7066_v62  ;;  %v5251_v17 = vmul.f32 1.442695, %v5189_v8  ;;  %v5188_v13 = vsub.f32 0.0, %v5152_v30  ;;  %v4691_v11 = vadd.f32 %v6823_v42, %v9581_v18  ;;  %v9582_v8 = vld [vmem:[#allocation25_spill] sm:$0xff] }
 0x2dc   : > { %v7070_v20 = vpop.eup %7069  ;;  %v5293_v6 = vadd.f32 1.0, %v7068_v19  ;;  %v5247_v35 = vmul.f32 1.442695, %v5187_v54  ;;  %v5032_v16 = vsel %vm2731_vm1, %v5029_v12, %v5031_v36  ;;  %v5037_v21 = vrot.slane %v9355_v63, 2 }
 0x2dd   : > { %v7072_v50 = vpop.eup %7071  ;;  %7083 = vrcp.f32 %v5290_v60  ;;  %v5291_v34 = vadd.f32 1.0, %v7070_v20  ;;  %v5249_v38 = vmul.f32 1.442695, %v5188_v13  ;;  %v5111_v55 = vadd.f32 %v5032_v16, %v9380_v1 }
 0x2de   : > { %v7074_v48 = vpop.eup %7073  ;;  %5358 = vst [vmem:[%s9238_s17 + $0x78] sm:$0xff] %v7072_v50  ;;  %7085 = vrcp.f32 %v5293_v6  ;;  %v5038_v23 = vsel %vm2731_vm1, %v5035_v10, %v5037_v21  ;;  %v5033_v53 = vrot.slane %v9358_v9, 2  ;;  %v6827_v28 = vadd.f32 %v9115_v39, %v9362_v29 }
 0x2df   : > { %v5292_v12 = vadd.f32 1.0, %v7074_v48  ;;  %7087 = vrcp.f32 %v5291_v34  ;;  %v5154_v63 = vadd.f32 %v9153_v25, %v5111_v55  ;;  %v5114_v43 = vadd.f32 %v5038_v23, %v4692_v0 }
 0x2e0   : > { %v7076_v44 = vpop.eup %7075  ;;  %7089 = vpow2.f32 %v5251_v17  ;;  %v5034_v1 = vsel %vm2731_vm1, %v5031_v36, %v5033_v53  ;;  %v5036_v14 = vsel %vm2731_vm1, %v5033_v53, %v5035_v10  ;;  %v4696_v33 = vadd.f32 %v6827_v28, %v9134_v47 }
 0x2e1   : > { %v7078_v40 = vpop.eup %7077  ;;  %5361 = vst [vmem:[%s9238_s17 + $0x90] sm:$0xff] %v7076_v44  ;;  %7091 = vrcp.f32 %v5292_v12  ;;  %v5190_v9 = vsub.f32 0.0, %v5154_v63  ;;  %v5157_v39 = vadd.f32 %v9153_v25, %v5114_v43  ;;  %v5112_v29 = vadd.f32 %v5034_v1, %v4690_v31 }
 0x2e2   : > { %v7080_v7 = vpop.eup %7079  ;;  %5359 = vst [vmem:[%s9238_s17 + $0x80] sm:$0xff] %v7078_v40  ;;  %7093 = vpow2.f32 %v5247_v35  ;;  %v5113_v45 = vadd.f32 %v5036_v14, %v4691_v11  ;;  %v6831_v32 = vadd.f32 %v9123_v57, %v9366_v3  ;;  %v6835_v61 = vadd.f32 %v9119_v49, %v9373_v56 }
 0x2e3   : > { %5360 = vst [vmem:[%s9238_s17 + $0x88] sm:$0xff] %v7080_v7  ;;  %7095 = vpow2.f32 %v5249_v38  ;;  %v5253_v47 = vmul.f32 1.442695, %v5190_v9  ;;  %v5193_v51 = vsub.f32 0.0, %v5157_v39  ;;  %v5155_v58 = vadd.f32 %v9153_v25, %v5112_v29 }
 0x2e4   : > { %v7082_v0 = vpop.eup %7081  ;;  %v5156_v41 = vadd.f32 %v9153_v25, %v5113_v45  ;;  %v4694_v37 = vadd.f32 %v6831_v32, %v9138_v4  ;;  %v4697_v22 = vadd.f32 %v6835_v61, %v9171_v46  ;;  %v6839_v57 = vadd.f32 %v9130_v52, %v9377_v27 }
 0x2e5   : > { %v5294_v3 = vadd.f32 1.0, %v7082_v0  ;;  %7097 = vpow2.f32 %v5253_v47  ;;  %v5259_v49 = vmul.f32 1.442695, %v5193_v51  ;;  %v5191_v56 = vsub.f32 0.0, %v5155_v58 }
 0x2e6   : > { %v5192_v31 = vsub.f32 0.0, %v5156_v41  ;;  %v4695_v30 = vadd.f32 %v6839_v57, %v9582_v8  ;;  %v5043_v2 = vrot.slane %v9383_v26, 2  ;;  %v5039_v42 = vrot.slane %v9388_v24, 2 }
 0x2e7   : > { %v7084_v62 = vpop.eup %7083  ;;  %7099 = vrcp.f32 %v5294_v3  ;;  %v5255_v4 = vmul.f32 1.442695, %v5191_v56  ;;  %v5045_v46 = vrot.slane %v9394_v5, 2  ;;  %v5041_v52 = vrot.slane %v9403_v59, 2 }
 0x2e8   : > { %v7086_v27 = vpop.eup %7085  ;;  %5362 = vst [vmem:[%s9238_s17 + $0x98] sm:$0xff] %v7084_v62  ;;  %7101 = vpow2.f32 %v5259_v49  ;;  %v5257_v54 = vmul.f32 1.442695, %v5192_v31  ;;  %v5040_v10 = vsel %vm2731_vm1, %v5037_v21, %v5039_v42 }
 0x2e9   : > { %v7088_v36 = vpop.eup %7087  ;;  %5365 = vst [vmem:[%s9238_s17 + $0xb0] sm:$0xff] %v7086_v27  ;;  %7103 = vpow2.f32 %v5255_v4  ;;  %v5115_v26 = vadd.f32 %v5040_v10, %v9417_v15  ;;  %v5046_v24 = vsel %vm2731_vm1, %v5043_v2, %v5045_v46  ;;  %v5083_v19 = vsel %vm2731_vm1, %v5045_v46, 0.0 }
 0x2ea   : > { %v7090_v60 = vpop.eup %7089  ;;  %5363 = vst [vmem:[%s9238_s17 + $0xa0] sm:$0xff] %v7088_v36  ;;  %7105 = vpow2.f32 %v5257_v54  ;;  %v5118_v5 = vadd.f32 %v5046_v24, %v4696_v33  ;;  %v5119_v59 = vadd.f32 %v5083_v19, %v4697_v22  ;;  %v5042_v17 = vsel %vm2731_vm1, %v5039_v42, %v5041_v52 }
 0x2eb   : > { %v7092_v13 = vpop.eup %7091  ;;  %v5297_v18 = vadd.f32 1.0, %v7090_v60  ;;  %v5158_v11 = vadd.f32 %v9153_v25, %v5115_v26  ;;  %v5044_v20 = vsel %vm2731_vm1, %v5041_v52, %v5043_v2  ;;  %v5116_v6 = vadd.f32 %v5042_v17, %v4694_v37 }
 0x2ec   : > { %v7094_v35 = vpop.eup %7093  ;;  %5364 = vst [vmem:[%s9238_s17 + $0xa8] sm:$0xff] %v7092_v13  ;;  %v5161_v15 = vadd.f32 %v9153_v25, %v5118_v5  ;;  %v5162_v16 = vadd.f32 %v9153_v25, %v5119_v59  ;;  %v5117_v21 = vadd.f32 %v5044_v20, %v4695_v30 }
 0x2ed   : > { %v7096_v50 = vpop.eup %7095  ;;  %7107 = vrcp.f32 %v5297_v18  ;;  %v5295_v34 = vadd.f32 1.0, %v7094_v35  ;;  %v5194_v38 = vsub.f32 0.0, %v5158_v11  ;;  %v5159_v55 = vadd.f32 %v9153_v25, %v5116_v6 }
 0x2ee   : > { %v5296_v48 = vadd.f32 1.0, %v7096_v50  ;;  %v5197_v23 = vsub.f32 0.0, %v5161_v15  ;;  %v5198_v53 = vsub.f32 0.0, %v5162_v16  ;;  %v5160_v28 = vadd.f32 %v9153_v25, %v5117_v21 }
 0x2ef   : > { %v7098_v12 = vpop.eup %7097  ;;  %7109 = vrcp.f32 %v5295_v34  ;;  %v5261_v63 = vmul.f32 1.442695, %v5194_v38  ;;  %v5195_v43 = vsub.f32 0.0, %v5159_v55 }
 0x2f0   : > { %7111 = vrcp.f32 %v5296_v48  ;;  %v5298_v44 = vadd.f32 1.0, %v7098_v12  ;;  %v5267_v1 = vmul.f32 1.442695, %v5197_v23  ;;  %v5269_v14 = vmul.f32 1.442695, %v5198_v53 }
 0x2f1   : > { %v7100_v33 = vpop.eup %7099  ;;  %7113 = vpow2.f32 %v5261_v63  ;;  %v5196_v40 = vsub.f32 0.0, %v5160_v28  ;;  %v5263_v45 = vmul.f32 1.442695, %v5195_v43 }
 0x2f2   : > { %v7102_v9 = vpop.eup %7101  ;;  %5366 = vst [vmem:[%s9238_s17 + $0xb8] sm:$0xff] %v7100_v33  ;;  %7115 = vrcp.f32 %v5298_v44 }
 0x2f3   : > { %v7104_v39 = vpop.eup %7103  ;;  %v5301_v29 = vadd.f32 1.0, %v7102_v9  ;;  %7117 = vpow2.f32 %v5267_v1  ;;  %v5265_v61 = vmul.f32 1.442695, %v5196_v40 }
 0x2f4   : > { %v7106_v25 = vpop.eup %7105  ;;  %v5299_v7 = vadd.f32 1.0, %v7104_v39  ;;  %7119 = vpow2.f32 %v5269_v14 }
 0x2f5   : > { %7121 = vrcp.f32 %v5301_v29  ;;  %v5300_v32 = vadd.f32 1.0, %v7106_v25 }
 0x2f6   : > { %7123 = vrcp.f32 %v5299_v7 }
 0x2f7   : > { %v7108_v47 = vpop.eup %7107  ;;  %7125 = vrcp.f32 %v5300_v32 }
 0x2f8   : > { %5369 = vst [vmem:[%s9238_s17 + $0xd0] sm:$0xff] %v7108_v47  ;;  %7127 = vpow2.f32 %v5263_v45 }
 0x2f9   : > { %v7110_v51 = vpop.eup %7109  ;;  %7129 = vpow2.f32 %v5265_v61 }
 0x2fa   : > { %v7112_v58 = vpop.eup %7111  ;;  %5367 = vst [vmem:[%s9238_s17 + $0xc0] sm:$0xff] %v7110_v51 }
 0x2fb   : > { %v7114_v0 = vpop.eup %7113  ;;  %5368 = vst [vmem:[%s9238_s17 + $0xc8] sm:$0xff] %v7112_v58 }
 0x2fc   : > { %v7116_v41 = vpop.eup %7115  ;;  %v5302_v37 = vadd.f32 1.0, %v7114_v0 }
 0x2fd   : > { %v7118_v22 = vpop.eup %7117  ;;  %5370 = vst [vmem:[%s9238_s17 + $0xd8] sm:$0xff] %v7116_v41 }
 0x2fe   : > { %v7120_v57 = vpop.eup %7119  ;;  %7131 = vrcp.f32 %v5302_v37  ;;  %v5305_v3 = vadd.f32 1.0, %v7118_v22 }
 0x2ff   : > { %v7122_v49 = vpop.eup %7121  ;;  %v5306_v56 = vadd.f32 1.0, %v7120_v57 }
 0x300   : > { %v7124_v31 = vpop.eup %7123  ;;  %5373 = vst [vmem:[%s9238_s17 + $0xf0] sm:$0xff] %v7122_v49  ;;  %7133 = vrcp.f32 %v5305_v3 }
 0x301   : > { %v7126_v8 = vpop.eup %7125  ;;  %5371 = vst [vmem:[%s9238_s17 + $0xe0] sm:$0xff] %v7124_v31  ;;  %7135 = vrcp.f32 %v5306_v56 }
 0x302   : > { %v7128_v30 = vpop.eup %7127  ;;  %5372 = vst [vmem:[%s9238_s17 + $0xe8] sm:$0xff] %v7126_v8 }
 0x303   : > { %v7130_v2 = vpop.eup %7129  ;;  %v5303_v42 = vadd.f32 1.0, %v7128_v30 }
 0x304   : > { %v5304_v62 = vadd.f32 1.0, %v7130_v2 }
 0x305   : > { %7137 = vrcp.f32 %v5303_v42 }
 0x306   : > { %7139 = vrcp.f32 %v5304_v62 }
 0x308   : > { %v7132_v4 = vpop.eup %7131 }
 0x309   : > { %5374 = vst [vmem:[%s9238_s17 + $0xf8] sm:$0xff] %v7132_v4 }
 0x30a   : > { %v7134_v46 = vpop.eup %7133 }
 0x30b   : > { %v7136_v52 = vpop.eup %7135  ;;  %5377 = vst [vmem:[%s9238_s17 + $0x110] sm:$0xff] %v7134_v46 }
 0x30c   : > { %5378 = vst [vmem:[%s9238_s17 + $0x118] sm:$0xff] %v7136_v52 }
 0x30f   : > { %v7138_v27 = vpop.eup %7137 }
 0x310   : > { %v7140_v54 = vpop.eup %7139  ;;  %5375 = vst [vmem:[%s9238_s17 + $0x100] sm:$0xff] %v7138_v27 }
 0x311   : > { %5376 = vst [vmem:[%s9238_s17 + $0x108] sm:$0xff] %v7140_v54 }
 0x312 PF: > { %s20_s13 = sadd.s32 1, %s7151_s13  }
 0x313   : > { %p17_p4 = scmp.ge.s32.totalorder %s20_s13, 4  }
 0x315   :  { %19 = sbr.rel (!%p17_p4) target bundleno = 1 (0x1), region = 113 }

</bundles_post_ra>
